<compile_context>
chip_gen: v5e
topology: v5e:2x2
jax: 0.10.0
libtpu: 0.0.40
codegen_flags: <defaults>
</compile_context>

<pallas_src>
import functools
import math

import jax
import jax.numpy as jnp
from jax.experimental import pallas as pl
from jax.experimental.pallas import tpu as pltpu


# ----------------------------------------------------------------------------- config
def _ffn_hidden(dim, multiple_of, ffn_dim_multiplier=None):
    hidden = 4 * dim
    hidden = int(2 * hidden / 3)
    if ffn_dim_multiplier is not None:
        hidden = int(ffn_dim_multiplier * hidden)
    return multiple_of * ((hidden + multiple_of - 1) // multiple_of)


CFG = dict(
    patch_size=2,
    in_channels=4,
    dim=32,
    n_heads=2,
    n_kv_heads=1,          # GQA, n_rep = 2
    cap_feat_dim=32,
    multiple_of=32,
    norm_eps=1e-5,
    qk_norm_eps=1e-6,
    n_refiner_layers=1,
    axes_dims=(8, 4, 4),   # sums to head_dim = 16
    axes_lens=(128, 64, 64),
    rope_theta=10000.0,
    t_freq_size=256,
)
CFG["head_dim"] = CFG["dim"] // CFG["n_heads"]
CFG["ffn_hidden"] = _ffn_hidden(CFG["dim"], CFG["multiple_of"])
CFG["t_hidden"] = min(CFG["dim"], 1024)


# ----------------------------------------------------------------------------- in-kernel helpers
def _silu(v):
    return v * (1.0 / (1.0 + jnp.exp(-v)))


def _rms(v, w, eps):
    ms = jnp.mean(v * v, axis=-1, keepdims=True)
    return v * jax.lax.rsqrt(ms + eps) * w


def _bf16(v):
    return v.astype(jnp.bfloat16)


# ----------------------------------------------------------------------------- Pallas kernels
def _t_embedder_kernel(f_ref, w0_ref, b0_ref, w2_ref, b2_ref, o_ref):
    h = jnp.dot(_bf16(f_ref[...]), w0_ref[...],
                preferred_element_type=jnp.float32) + b0_ref[...]
    h = _silu(h)
    o_ref[...] = (jnp.dot(_bf16(h), w2_ref[...], preferred_element_type=jnp.float32)
                  + b2_ref[...]).astype(o_ref.dtype)


def _block_kernel(*refs, H, Hkv, hd, dim, hidden, eps, qk_eps, scale, modulated, embed):
    """Whole JointTransformerBlock (optionally with the token embedder fused in front) for
    one batch element, fully resident in VMEM.  Matmuls: bf16 operands, f32 accumulation."""
    refs = list(refs)
    o_ref = refs.pop()
    it = iter(refs)
    xin_ref, bias_ref, cs_ref = next(it), next(it), next(it)
    temb_ref = next(it) if modulated else None
    if embed == "linear":
        pw_ref, pb_ref = next(it), next(it)
    elif embed == "rmsnorm_linear":
        pnw_ref, pw_ref, pb_ref = next(it), next(it), next(it)
    wqkv_ref, wo_ref, qkn_ref, norms_ref, w13_ref, w2_ref = (
        next(it), next(it), next(it), next(it), next(it), next(it))
    if modulated:
        adaw_ref, adab_ref = next(it), next(it)

    hd2 = hd // 2
    xin = xin_ref[0].astype(jnp.float32)        # (S, Din)
    bias = bias_ref[0].astype(jnp.float32)      # (1, S)   additive attention mask
    cs = cs_ref[0].astype(jnp.float32)          # (S, hd)  packed [cos | sin]
    cos, sin = cs[:, :hd2], cs[:, hd2:]

    an1, an2, fn1, fn2 = norms_ref[0], norms_ref[1], norms_ref[2], norms_ref[3]   # (1, dim)
    qn1, qn2, kn1, kn2 = qkn_ref[0], qkn_ref[1], qkn_ref[2], qkn_ref[3]           # (1, hd//2)

    # ---------------- optional fused token embedder ----------------
    if embed == "linear":            # x_embedder: Linear + bias
        x = jnp.dot(_bf16(xin), pw_ref[...], preferred_element_type=jnp.float32) + pb_ref[...]
    elif embed == "rmsnorm_linear":  # cap_embedder: RMSNorm(norm_eps) + Linear + bias
        xe = _rms(xin, pnw_ref[...], eps)
        x = jnp.dot(_bf16(xe), pw_ref[...], preferred_element_type=jnp.float32) + pb_ref[...]
    else:
        x = xin

    # ---------------- adaLN modulation: single (1,th)@(th,4*dim) push ----------------
    if modulated:
        ts = _silu(temb_ref[0].astype(jnp.float32))                                 # (1, th)
        mod = jnp.dot(_bf16(ts), adaw_ref[...],
                      preferred_element_type=jnp.float32) + adab_ref[...]           # (1, 4*dim)
        scale_msa = mod[:, 0 * dim:1 * dim]
        gate_msa = mod[:, 1 * dim:2 * dim]
        scale_mlp = mod[:, 2 * dim:3 * dim]
        gate_mlp = mod[:, 3 * dim:4 * dim]

    # ---------------- attention ----------------
    xn = _rms(x, an1, eps)
    if modulated:
        xn = xn * (1.0 + scale_msa)

    # One fused q1|q2|k1|k2|v projection (single wide MXU push instead of 2H+3Hkv tiny ones).
    proj = jnp.dot(_bf16(xn), wqkv_ref[...], preferred_element_type=jnp.float32)
    off_q1, off_q2 = 0, H * hd2
    off_k1, off_k2 = 2 * H * hd2, 2 * H * hd2 + Hkv * hd2
    off_v = 2 * H * hd2 + 2 * Hkv * hd2

    n_rep = H // Hkv
    kv = []
    for g in range(Hkv):                                   # GQA: shared KV head, no repeat
        k1 = proj[:, off_k1 + g * hd2: off_k1 + (g + 1) * hd2]
        k2 = proj[:, off_k2 + g * hd2: off_k2 + (g + 1) * hd2]
        inv = jax.lax.rsqrt((jnp.sum(k1 * k1, -1, keepdims=True)
                             + jnp.sum(k2 * k2, -1, keepdims=True)) / hd + qk_eps)
        k1n, k2n = k1 * inv * kn1, k2 * inv * kn2
        kr1 = _bf16(k1n * cos - k2n * sin)                 # RoPE (split-half layout)
        kr2 = _bf16(k1n * sin + k2n * cos)
        vg = _bf16(proj[:, off_v + g * hd: off_v + (g + 1) * hd])
        kv.append((kr1, kr2, vg))

    dn = (((1,), (1,)), ((), ()))                          # contract last dims: A @ B^T
    # NOTE: static loop is right at H=2; at production H batch heads into the fused matmuls
    # or use lax.fori_loop(..., unroll=True) + scratch to bound vreg live ranges.
    oh_parts = []
    for h in range(H):
        q1 = proj[:, off_q1 + h * hd2: off_q1 + (h + 1) * hd2]
        q2 = proj[:, off_q2 + h * hd2: off_q2 + (h + 1) * hd2]
        inv = jax.lax.rsqrt((jnp.sum(q1 * q1, -1, keepdims=True)
                             + jnp.sum(q2 * q2, -1, keepdims=True)) / hd + qk_eps)
        q1n, q2n = q1 * inv * qn1, q2 * inv * qn2
        qr1 = _bf16(q1n * cos - q2n * sin)
        qr2 = _bf16(q1n * sin + q2n * cos)
        kr1, kr2, vg = kv[h // n_rep]
        s = (jax.lax.dot_general(qr1, kr1, dn, preferred_element_type=jnp.float32)
             + jax.lax.dot_general(qr2, kr2, dn, preferred_element_type=jnp.float32)) * scale
        s = s + bias                                       # (S,S) + (1,S)
        s = s - jnp.max(s, axis=-1, keepdims=True)
        p = jnp.exp(s)
        p = p * pl.reciprocal(jnp.sum(p, axis=-1, keepdims=True), approx=True)
        oh_parts.append(jnp.dot(_bf16(p), vg, preferred_element_type=jnp.float32))  # (S, hd)

    # Fused out-projection: one (S, H*hd) @ (H*hd, dim) push instead of H tiny ones + adds.
    attn_all = _bf16(jnp.concatenate(oh_parts, axis=-1))
    attn = jnp.dot(attn_all, wo_ref[...], preferred_element_type=jnp.float32)        # (S, dim)

    attn_n = _rms(attn, an2, eps)
    x = x + (jnp.tanh(gate_msa) * attn_n if modulated else attn_n)

    # ---------------- SwiGLU FFN (fused w1||w3 up-projection) ----------------
    xn2 = _rms(x, fn1, eps)
    if modulated:
        xn2 = xn2 * (1.0 + scale_mlp)
    h13 = jnp.dot(_bf16(xn2), w13_ref[...], preferred_element_type=jnp.float32)      # (S, 2*hidden)
    h1, h3 = h13[:, :hidden], h13[:, hidden:]
    ff = jnp.dot(_bf16(_silu(h1) * h3), w2_ref[...], preferred_element_type=jnp.float32)
    ff_n = _rms(ff, fn2, eps)
    x = x + (jnp.tanh(gate_mlp) * ff_n if modulated else ff_n)

    o_ref[0] = x.astype(o_ref.dtype)


# ----------------------------------------------------------------------------- Pallas wrappers
def _const_spec(a):
    """Full-array block, constant across the batch grid (weights).
    TODO(synk): at real Lumina-2 dims add pipeline_mode=pl.Buffered(1) here to single-buffer
    the grid-invariant weights and re-tile K/KV with accumulators; at this config all block
    weights total ~40 KB so double-buffering costs nothing."""
    nd = a.ndim
    return pl.BlockSpec(a.shape, lambda *args, _nd=nd: (0,) * _nd)


def pallas_t_embedder(p, t_freq):
    B = t_freq.shape[0]
    th = p["w0"].shape[1]
    arrs = [t_freq, p["w0"], p["b0"], p["w2"], p["b2"]]
    return pl.pallas_call(
        _t_embedder_kernel,
        grid=(1,),
        in_specs=[_const_spec(a) for a in arrs],
        out_specs=pl.BlockSpec((B, th), lambda i: (0, 0)),
        out_shape=jax.ShapeDtypeStruct((B, th), jnp.float32),
    )(*arrs)


def fused_transformer_block(kp, xin, bias, cs, cfg, t_emb=None, embed="none", embed_params=None):
    """One pallas_call for an entire JointTransformerBlock (optionally with the token
    embedder fused in front), gridded over batch (parallel across cores)."""
    B, S, Din = xin.shape
    dim = cfg["dim"]
    H, Hkv, hd = cfg["n_heads"], cfg["n_kv_heads"], cfg["head_dim"]
    th = cfg["t_hidden"]
    hidden = cfg["ffn_hidden"]
    modulated = t_emb is not None

    in_arrays = [xin, bias, cs]
    in_specs = [
        pl.BlockSpec((1, S, Din), lambda b: (b, 0, 0)),
        pl.BlockSpec((1, 1, S), lambda b: (b, 0, 0)),
        pl.BlockSpec((1, S, hd), lambda b: (b, 0, 0)),   # packed [cos | sin]
    ]
    if modulated:
        in_arrays.append(t_emb.reshape(B, 1, th))
        in_specs.append(pl.BlockSpec((1, 1, th), lambda b: (b, 0, 0)))

    if embed == "linear":
        emb_arrs = [embed_params["w"], embed_params["b"]]
    elif embed == "rmsnorm_linear":
        emb_arrs = [embed_params["norm_w"], embed_params["w"], embed_params["b"]]
    else:
        emb_arrs = []
    w_names = ["wqkv", "wo", "qkn", "norms", "w13", "w2"] + (["adaw", "adab"] if modulated else [])
    for a in emb_arrs + [kp[n] for n in w_names]:
        in_arrays.append(a)
        in_specs.append(_const_spec(a))

    kernel = functools.partial(
        _block_kernel, H=H, Hkv=Hkv, hd=hd, dim=dim, hidden=hidden,
        eps=cfg["norm_eps"], qk_eps=cfg["qk_norm_eps"], scale=math.sqrt(1.0 / hd),
        modulated=modulated, embed=embed)

    # TODO(synk): for v7x with B==1/odd, add a second "parallel" grid axis (heads or S tiles).
    return pl.pallas_call(
        kernel,
        grid=(B,),
        in_specs=in_specs,
        out_specs=pl.BlockSpec((1, S, dim), lambda b: (b, 0, 0)),
        out_shape=jax.ShapeDtypeStruct((B, S, dim), jnp.float32),
        compiler_params=pltpu.CompilerParams(
            dimension_semantics=("parallel",),
            vmem_limit_bytes=32 << 20),
    )(*in_arrays)


# ----------------------------------------------------------------------------- glue (index bookkeeping)
def timestep_embedding(t, dim, max_period=10000.0):
    half = dim // 2
    freqs = jnp.exp(-math.log(max_period) * jnp.arange(half, dtype=jnp.float32) / half)
    args = t[:, None].astype(jnp.float32) * freqs[None, :]
    return jnp.concatenate([jnp.cos(args), jnp.sin(args)], axis=-1)


def rope_embedder(position_ids, cfg):
    """position_ids: (B, S, 3) int32 -> (cos, sin) each (B, S, head_dim//2)."""
    cos_parts, sin_parts = [], []
    for a, (d_a, len_a) in enumerate(zip(cfg["axes_dims"], cfg["axes_lens"])):
        inv = 1.0 / (cfg["rope_theta"] ** (
            jnp.arange(0, d_a, 2, dtype=jnp.float32)[: d_a // 2] / d_a))
        table = jnp.arange(len_a, dtype=jnp.float32)[:, None] * inv[None, :]   # (len_a, d_a//2)
        ids = jnp.clip(position_ids[..., a], 0, len_a - 1)                     # safe gather
        ang = table[ids]                                                        # (B, S, d_a//2)
        cos_parts.append(jnp.cos(ang))
        sin_parts.append(jnp.sin(ang))
    return jnp.concatenate(cos_parts, -1), jnp.concatenate(sin_parts, -1)


# ----------------------------------------------------------------------------- full InitialLayer forward
def initial_layer_forward(kp, x, t, cap_feats, cap_mask, *, cfg):
    # TODO(synk): requires_grad_ / autograd setup has no inference-side equivalent; skipped.
    B, C, H, W = x.shape
    pH = pW = cfg["patch_size"]
    Ht, Wt = H // pH, W // pW
    img_len = Ht * Wt
    Lc = cap_feats.shape[1]
    max_seq_len = img_len + Lc

    # --- t_embedder (one fused kernel: Linear -> SiLU -> Linear) ----------------
    t_freq = timestep_embedding(t, cfg["t_freq_size"])
    adaln_input = pallas_t_embedder(kp["t_embedder"], t_freq)

    # --- caption lengths / position ids / RoPE tables ----------------------------
    cap_len = jnp.sum(cap_mask.astype(jnp.int32), axis=1)                   # (B,)
    cl = cap_len[:, None]

    pos = jnp.broadcast_to(jnp.arange(max_seq_len, dtype=jnp.int32)[None, :],
                           (B, max_seq_len))
    is_cap = pos < cl
    is_img = (pos >= cl) & (pos < cl + img_len)
    rel = jnp.clip(pos - cl, 0, img_len - 1)
    ax0 = jnp.where(is_cap, pos, jnp.where(is_img, cl, 0))
    ax1 = jnp.where(is_img, rel // Wt, 0)
    ax2 = jnp.where(is_img, rel % Wt, 0)
    position_ids = jnp.stack([ax0, ax1, ax2], axis=-1).astype(jnp.int32)

    cos, sin = rope_embedder(position_ids, cfg)                              # (B, S, hd//2)

    cap_valid = (jnp.arange(Lc, dtype=jnp.int32)[None, :] < cl)[..., None]
    cap_cos = jnp.where(cap_valid, cos[:, :Lc], 0.0)
    cap_sin = jnp.where(cap_valid, sin[:, :Lc], 0.0)
    img_idx = cl + jnp.arange(img_len, dtype=jnp.int32)[None, :]
    img_cos = jnp.take_along_axis(cos, img_idx[..., None], axis=1)
    img_sin = jnp.take_along_axis(sin, img_idx[..., None], axis=1)
    cap_cs = jnp.concatenate([cap_cos, cap_sin], axis=-1)                    # (B, Lc, hd)
    img_cs = jnp.concatenate([img_cos, img_sin], axis=-1)                    # (B, img_len, hd)

    # --- context refiner (cap_embedder fused into the first block) ---------------
    cap_bias = jnp.where(cap_mask, 0.0, -1e30).astype(jnp.float32).reshape(B, 1, Lc)
    cap = cap_feats
    for li, blk in enumerate(kp["context_refiner"]):
        cap = fused_transformer_block(
            blk, cap, cap_bias, cap_cs, cfg,
            embed="rmsnorm_linear" if li == 0 else "none",
            embed_params=kp["cap_embedder"] if li == 0 else None)

    # --- patchify + noise refiner (x_embedder fused into the first block) --------
    x_tok = x.reshape(B, C, Ht, pH, Wt, pW).transpose(0, 2, 4, 3, 5, 1)
    x_tok = x_tok.reshape(B, img_len, pH * pW * C)
    img_bias = jnp.zeros((B, 1, img_len), jnp.float32)    # all images same size -> mask all-true
    img = x_tok
    for li, blk in enumerate(kp["noise_refiner"]):
        img = fused_transformer_block(
            blk, img, img_bias, img_cs, cfg, t_emb=adaln_input,
            embed="linear" if li == 0 else "none",
            embed_params=kp["x_embedder"] if li == 0 else None)

    # --- assemble padded_full_embed / mask ----------------------------------------
    cap_idx = jnp.clip(pos, 0, Lc - 1)
    rel_img = jnp.clip(pos - cl, 0, img_len - 1)
    cap_g = jnp.take_along_axis(cap, cap_idx[..., None], axis=1)
    img_g = jnp.take_along_axis(img, rel_img[..., None], axis=1)
    padded_full_embed = jnp.where(is_cap[..., None], cap_g,
                                  jnp.where(is_img[..., None], img_g, 0.0))
    mask = pos < (cl + img_len)

    img_size = jnp.broadcast_to(jnp.array([[H, W]], dtype=jnp.int32), (B, 2))
    cap_size = cap_len
    # TODO(synk): torch returns complex freqs_cis; represented here as (..., (cos, sin)).
    freqs_cis = jnp.stack([cos, sin], axis=-1)

    return padded_full_embed, mask, freqs_cis, adaln_input, img_size, cap_size


# ----------------------------------------------------------------------------- deterministic param init
def _init_linear(key, out_d, in_d, bias=True):
    kw, kb = jax.random.split(key)
    p = {"w": 0.02 * jax.random.normal(kw, (out_d, in_d), jnp.float32)}
    p["b"] = 0.02 * jax.random.normal(kb, (out_d,), jnp.float32) if bias else None
    return p


def _init_norm(key, d):
    return 1.0 + 0.01 * jax.random.normal(key, (d,), jnp.float32)


def _init_block(key, cfg, modulation):
    dim, H, Hkv, hd = cfg["dim"], cfg["n_heads"], cfg["n_kv_heads"], cfg["head_dim"]
    hidden = cfg["ffn_hidden"]
    ks = list(jax.random.split(key, 12))
    p = {
        "qkv": _init_linear(ks[0], (H + 2 * Hkv) * hd, dim, bias=False),
        "out": _init_linear(ks[1], dim, H * hd, bias=False),
        "q_norm": _init_norm(ks[2], hd),
        "k_norm": _init_norm(ks[3], hd),
        "w1": _init_linear(ks[4], hidden, dim, bias=False),
        "w2": _init_linear(ks[5], dim, hidden, bias=False),
        "w3": _init_linear(ks[6], hidden, dim, bias=False),
        "attention_norm1": _init_norm(ks[7], dim),
        "attention_norm2": _init_norm(ks[8], dim),
        "ffn_norm1": _init_norm(ks[9], dim),
        "ffn_norm2": _init_norm(ks[10], dim),
    }
    if modulation:
        p["adaLN"] = _init_linear(ks[11], 4 * dim, cfg["t_hidden"], bias=True)
    return p


def init_params(key, cfg):
    ks = list(jax.random.split(key, 8))
    dim = cfg["dim"]
    return {
        "t_embedder": {
            "mlp0": _init_linear(ks[0], cfg["t_hidden"], cfg["t_freq_size"]),
            "mlp2": _init_linear(ks[1], cfg["t_hidden"], cfg["t_hidden"]),
        },
        "cap_embedder": {
            "norm_w": _init_norm(ks[2], cfg["cap_feat_dim"]),
            "linear": _init_linear(ks[3], dim, cfg["cap_feat_dim"]),
        },
        "x_embedder": _init_linear(ks[4], dim, cfg["in_channels"] * cfg["patch_size"] ** 2),
        "context_refiner": [_init_block(k, cfg, False)
                            for k in jax.random.split(ks[5], cfg["n_refiner_layers"])],
        "noise_refiner": [_init_block(k, cfg, True)
                          for k in jax.random.split(ks[6], cfg["n_refiner_layers"])],
    }


# ----------------------------------------------------------------------------- one-time weight prep
def _prep_block(p, cfg, modulated):
    """PyTorch (out,in) weights -> pre-transposed, fused, RoPE-permuted bf16 layout."""
    dim, H, Hkv, hd = cfg["dim"], cfg["n_heads"], cfg["n_kv_heads"], cfg["head_dim"]
    hd2 = hd // 2
    wqkv = p["qkv"]["w"]                                      # ((H+2Hkv)*hd, dim)
    wq = wqkv[: H * hd].T.reshape(dim, H, hd)
    wk = wqkv[H * hd: (H + Hkv) * hd].T.reshape(dim, Hkv, hd)
    wv = wqkv[(H + Hkv) * hd:].T.reshape(dim, Hkv, hd)
    # split-half RoPE layout: *_1 columns produce the former even channels, *_2 the odd
    # ones, so in-kernel RoPE is a plain half rotation (scores are invariant to the reorder).
    wqkv_fused = jnp.concatenate([
        wq[:, :, 0::2].reshape(dim, H * hd2),
        wq[:, :, 1::2].reshape(dim, H * hd2),
        wk[:, :, 0::2].reshape(dim, Hkv * hd2),
        wk[:, :, 1::2].reshape(dim, Hkv * hd2),
        wv.reshape(dim, Hkv * hd),
    ], axis=1).astype(jnp.bfloat16)                           # (dim, (H+2Hkv)*hd)
    kp = {
        "wqkv": wqkv_fused,
        "wo": p["out"]["w"].T.astype(jnp.bfloat16),           # (H*hd, dim)
        "qkn": jnp.stack([p["q_norm"][0::2], p["q_norm"][1::2],
                          p["k_norm"][0::2], p["k_norm"][1::2]], 0)[:, None, :],   # (4,1,hd//2)
        "norms": jnp.stack([p["attention_norm1"], p["attention_norm2"],
                            p["ffn_norm1"], p["ffn_norm2"]], 0)[:, None, :],       # (4,1,dim)
        "w13": jnp.concatenate([p["w1"]["w"].T, p["w3"]["w"].T],
                               axis=1).astype(jnp.bfloat16),  # (dim, 2*hidden)
        "w2": p["w2"]["w"].T.astype(jnp.bfloat16),            # (hidden, dim)
    }
    if modulated:
        kp["adaw"] = p["adaLN"]["w"].T.astype(jnp.bfloat16)   # (th, 4*dim)
        kp["adab"] = p["adaLN"]["b"].reshape(1, -1)           # (1, 4*dim), f32
    return kp


def prepare_params(params, cfg):
    return {
        "t_embedder": {
            "w0": params["t_embedder"]["mlp0"]["w"].T.astype(jnp.bfloat16),
            "b0": params["t_embedder"]["mlp0"]["b"].reshape(1, -1),
            "w2": params["t_embedder"]["mlp2"]["w"].T.astype(jnp.bfloat16),
            "b2": params["t_embedder"]["mlp2"]["b"].reshape(1, -1),
        },
        "cap_embedder": {
            "norm_w": params["cap_embedder"]["norm_w"].reshape(1, -1),
            "w": params["cap_embedder"]["linear"]["w"].T.astype(jnp.bfloat16),
            "b": params["cap_embedder"]["linear"]["b"].reshape(1, -1),
        },
        "x_embedder": {
            "w": params["x_embedder"]["w"].T.astype(jnp.bfloat16),
            "b": params["x_embedder"]["b"].reshape(1, -1),
        },
        "context_refiner": [_prep_block(p, cfg, False) for p in params["context_refiner"]],
        "noise_refiner": [_prep_block(p, cfg, True) for p in params["noise_refiner"]],
    }


# ----------------------------------------------------------------------------- main
if __name__ == "__main__":
    key = jax.random.PRNGKey(0)
    kparam, kx, kc, kt = jax.random.split(key, 4)

    params = init_params(kparam, CFG)
    kparams = prepare_params(params, CFG)     # one-time pre-transpose / fuse / bf16 cast

    B, Lc = 2, 8
    x = jax.random.normal(kx, (B, CFG["in_channels"], 16, 16), jnp.float32)
    cap_feats = jax.random.normal(kc, (B, Lc, CFG["cap_feat_dim"]), jnp.float32)
    cap_mask = jnp.arange(Lc)[None, :] < jnp.array([[8], [5]])          # ragged caption lengths
    t = jax.random.uniform(kt, (B,), jnp.float32)

    fwd = jax.jit(functools.partial(initial_layer_forward, cfg=CFG))
    out = fwd(kparams, x, t, cap_feats, cap_mask)
    out = jax.block_until_ready(out)

    full, mask, freqs_cis, adaln, img_size, cap_size = out
    max_seq = (16 // CFG["patch_size"]) ** 2 + Lc
    assert full.shape == (B, max_seq, CFG["dim"])
    assert mask.shape == (B, max_seq) and mask.dtype == jnp.bool_
    assert freqs_cis.shape == (B, max_seq, CFG["head_dim"] // 2, 2)
    assert adaln.shape == (B, CFG["t_hidden"])
    assert img_size.shape == (B, 2) and cap_size.shape == (B,)
    assert bool(jnp.all(jnp.isfinite(full)))

    print("KERNEL_OK")
</pallas_src>

<mosaic_0001>
module attributes {stable_mosaic.version = 11 : i64} {
  func.func @_t_embedder_kernel(%arg0: i32, %arg1: memref<2x256xf32, #tpu.memory_space<vmem>>, %arg2: memref<256x32xbf16, #tpu.memory_space<vmem>>, %arg3: memref<1x32xf32, #tpu.memory_space<vmem>>, %arg4: memref<32x32xbf16, #tpu.memory_space<vmem>>, %arg5: memref<1x32xf32, #tpu.memory_space<vmem>>, %arg6: memref<2x32xf32, #tpu.memory_space<vmem>>) attributes {dimension_semantics = [#tpu.dimension_semantics<arbitrary>], iteration_bounds = array<i64: 1>, scalar_prefetch = 0 : i64, scratch_operands = 0 : i64, tpu.core_type = #tpu.core_type<tc>, window_params = [{pipeline_mode = #tpu.pipeline_mode<synchronous>, transform_indices = @transform_0, window_bounds = array<i64: 2, 256>}, {pipeline_mode = #tpu.pipeline_mode<synchronous>, transform_indices = @transform_1, window_bounds = array<i64: 256, 32>}, {pipeline_mode = #tpu.pipeline_mode<synchronous>, transform_indices = @transform_2, window_bounds = array<i64: 1, 32>}, {pipeline_mode = #tpu.pipeline_mode<synchronous>, transform_indices = @transform_3, window_bounds = array<i64: 32, 32>}, {pipeline_mode = #tpu.pipeline_mode<synchronous>, transform_indices = @transform_4, window_bounds = array<i64: 1, 32>}, {pipeline_mode = #tpu.pipeline_mode<synchronous>, transform_indices = @transform_5, window_bounds = array<i64: 2, 32>}]} {
    %c0 = arith.constant 0 : index
    %c0_0 = arith.constant 0 : index
    %0 = vector.load %arg1[%c0, %c0_0] : memref<2x256xf32, #tpu.memory_space<vmem>>, vector<2x256xf32>
    %1 = arith.truncf %0 : vector<2x256xf32> to vector<2x256xbf16>
    %c0_1 = arith.constant 0 : index
    %c0_2 = arith.constant 0 : index
    %2 = vector.load %arg2[%c0_1, %c0_2] : memref<256x32xbf16, #tpu.memory_space<vmem>>, vector<256x32xbf16>
    %cst = arith.constant dense<0.000000e+00> : vector<2x32xf32>
    %3 = tpu.matmul %1, %2, %cst {dimension_numbers = #tpu.dot_dimension_numbers<[1], [0], [0], [1], [0, 0, 1, 1], [], []>} : vector<2x256xbf16>, vector<256x32xbf16>, vector<2x32xf32> -> vector<2x32xf32>
    %c0_3 = arith.constant 0 : index
    %c0_4 = arith.constant 0 : index
    %4 = vector.load %arg3[%c0_3, %c0_4] : memref<1x32xf32, #tpu.memory_space<vmem>>, vector<1x32xf32>
    %5 = vector.broadcast %4 : vector<1x32xf32> to vector<2x32xf32>
    %6 = arith.addf %3, %5 : vector<2x32xf32>
    %cst_5 = arith.constant 0.000000e+00 : f32
    %7 = vector.broadcast %cst_5 : f32 to vector<2x32xf32>
    %8 = arith.subf %7, %6 : vector<2x32xf32>
    %9 = math.exp %8 : vector<2x32xf32>
    %cst_6 = arith.constant 1.000000e+00 : f32
    %10 = vector.broadcast %cst_6 : f32 to vector<2x32xf32>
    %11 = arith.addf %10, %9 : vector<2x32xf32>
    %cst_7 = arith.constant 1.000000e+00 : f32
    %12 = vector.broadcast %cst_7 : f32 to vector<2x32xf32>
    %13 = arith.divf %12, %11 : vector<2x32xf32>
    %14 = arith.mulf %6, %13 : vector<2x32xf32>
    %15 = arith.truncf %14 : vector<2x32xf32> to vector<2x32xbf16>
    %c0_8 = arith.constant 0 : index
    %c0_9 = arith.constant 0 : index
    %16 = vector.load %arg4[%c0_8, %c0_9] : memref<32x32xbf16, #tpu.memory_space<vmem>>, vector<32x32xbf16>
    %cst_10 = arith.constant dense<0.000000e+00> : vector<2x32xf32>
    %17 = tpu.matmul %15, %16, %cst_10 {dimension_numbers = #tpu.dot_dimension_numbers<[1], [0], [0], [1], [0, 0, 1, 1], [], []>} : vector<2x32xbf16>, vector<32x32xbf16>, vector<2x32xf32> -> vector<2x32xf32>
    %c0_11 = arith.constant 0 : index
    %c0_12 = arith.constant 0 : index
    %18 = vector.load %arg5[%c0_11, %c0_12] : memref<1x32xf32, #tpu.memory_space<vmem>>, vector<1x32xf32>
    %19 = vector.broadcast %18 : vector<1x32xf32> to vector<2x32xf32>
    %20 = arith.addf %17, %19 : vector<2x32xf32>
    %c0_13 = arith.constant 0 : index
    %c0_14 = arith.constant 0 : index
    %21 = vector.load %arg6[%c0_13, %c0_14] : memref<2x32xf32, #tpu.memory_space<vmem>>, vector<2x32xf32>
    tpu.vector_store %arg6[%c0_13, %c0_14], %20 {strides = array<i32>} : memref<2x32xf32, #tpu.memory_space<vmem>>, vector<2x32xf32>,
    return
  }
  func.func @transform_0(%arg0: i32) -> (i32, i32) {
    %c0_i32 = arith.constant 0 : i32
    %c0_i32_0 = arith.constant 0 : i32
    %c0_i32_1 = arith.constant 0 : i32
    return %c0_i32, %c0_i32_0 : i32, i32
  }
  func.func @transform_1(%arg0: i32) -> (i32, i32) {
    %c0_i32 = arith.constant 0 : i32
    %c0_i32_0 = arith.constant 0 : i32
    %c0_i32_1 = arith.constant 0 : i32
    return %c0_i32, %c0_i32_0 : i32, i32
  }
  func.func @transform_2(%arg0: i32) -> (i32, i32) {
    %c0_i32 = arith.constant 0 : i32
    %c0_i32_0 = arith.constant 0 : i32
    %c0_i32_1 = arith.constant 0 : i32
    return %c0_i32, %c0_i32_0 : i32, i32
  }
  func.func @transform_3(%arg0: i32) -> (i32, i32) {
    %c0_i32 = arith.constant 0 : i32
    %c0_i32_0 = arith.constant 0 : i32
    %c0_i32_1 = arith.constant 0 : i32
    return %c0_i32, %c0_i32_0 : i32, i32
  }
  func.func @transform_4(%arg0: i32) -> (i32, i32) {
    %c0_i32 = arith.constant 0 : i32
    %c0_i32_0 = arith.constant 0 : i32
    %c0_i32_1 = arith.constant 0 : i32
    return %c0_i32, %c0_i32_0 : i32, i32
  }
  func.func @transform_5(%arg0: i32) -> (i32, i32) {
    %c0_i32 = arith.constant 0 : i32
    %c0_i32_0 = arith.constant 0 : i32
    %c0_i32_1 = arith.constant 0 : i32
    return %c0_i32, %c0_i32_0 : i32, i32
  }
}

module attributes {stable_mosaic.version = 11 : i64} {
  func.func @_block_kernel(%arg0: i32, %arg1: memref<1x8x32xf32, #tpu.memory_space<vmem>>, %arg2: memref<1x1x8xf32, #tpu.memory_space<vmem>>, %arg3: memref<1x8x16xf32, #tpu.memory_space<vmem>>, %arg4: memref<1x32xf32, #tpu.memory_space<vmem>>, %arg5: memref<32x32xbf16, #tpu.memory_space<vmem>>, %arg6: memref<1x32xf32, #tpu.memory_space<vmem>>, %arg7: memref<32x64xbf16, #tpu.memory_space<vmem>>, %arg8: memref<32x32xbf16, #tpu.memory_space<vmem>>, %arg9: memref<4x1x8xf32, #tpu.memory_space<vmem>>, %arg10: memref<4x1x32xf32, #tpu.memory_space<vmem>>, %arg11: memref<32x192xbf16, #tpu.memory_space<vmem>>, %arg12: memref<96x32xbf16, #tpu.memory_space<vmem>>, %arg13: memref<1x8x32xf32, #tpu.memory_space<vmem>>) attributes {dimension_semantics = [#tpu.dimension_semantics<parallel>], iteration_bounds = array<i64: 2>, scalar_prefetch = 0 : i64, scratch_operands = 0 : i64, tpu.core_type = #tpu.core_type<tc>, window_params = [{transform_indices = @transform_0, window_bounds = array<i64: 1, 8, 32>}, {transform_indices = @transform_1, window_bounds = array<i64: 1, 1, 8>}, {transform_indices = @transform_2, window_bounds = array<i64: 1, 8, 16>}, {pipeline_mode = #tpu.pipeline_mode<synchronous>, transform_indices = @transform_3, window_bounds = array<i64: 1, 32>}, {pipeline_mode = #tpu.pipeline_mode<synchronous>, transform_indices = @transform_4, window_bounds = array<i64: 32, 32>}, {pipeline_mode = #tpu.pipeline_mode<synchronous>, transform_indices = @transform_5, window_bounds = array<i64: 1, 32>}, {pipeline_mode = #tpu.pipeline_mode<synchronous>, transform_indices = @transform_6, window_bounds = array<i64: 32, 64>}, {pipeline_mode = #tpu.pipeline_mode<synchronous>, transform_indices = @transform_7, window_bounds = array<i64: 32, 32>}, {pipeline_mode = #tpu.pipeline_mode<synchronous>, transform_indices = @transform_8, window_bounds = array<i64: 4, 1, 8>}, {pipeline_mode = #tpu.pipeline_mode<synchronous>, transform_indices = @transform_9, window_bounds = array<i64: 4, 1, 32>}, {pipeline_mode = #tpu.pipeline_mode<synchronous>, transform_indices = @transform_10, window_bounds = array<i64: 32, 192>}, {pipeline_mode = #tpu.pipeline_mode<synchronous>, transform_indices = @transform_11, window_bounds = array<i64: 96, 32>}, {transform_indices = @transform_12, window_bounds = array<i64: 1, 8, 32>}]} {
    %c0 = arith.constant 0 : index
    %c0_0 = arith.constant 0 : index
    %c0_1 = arith.constant 0 : index
    %0 = vector.load %arg1[%c0, %c0_0, %c0_1] : memref<1x8x32xf32, #tpu.memory_space<vmem>>, vector<1x8x32xf32>
    %1 = vector.shape_cast %0 : vector<1x8x32xf32> to vector<8x32xf32>
    %c0_2 = arith.constant 0 : index
    %c0_3 = arith.constant 0 : index
    %c0_4 = arith.constant 0 : index
    %2 = vector.load %arg2[%c0_2, %c0_3, %c0_4] : memref<1x1x8xf32, #tpu.memory_space<vmem>>, vector<1x1x8xf32>
    %3 = vector.shape_cast %2 : vector<1x1x8xf32> to vector<1x8xf32>
    %c0_5 = arith.constant 0 : index
    %c0_6 = arith.constant 0 : index
    %c0_7 = arith.constant 0 : index
    %4 = vector.load %arg3[%c0_5, %c0_6, %c0_7] : memref<1x8x16xf32, #tpu.memory_space<vmem>>, vector<1x8x16xf32>
    %5 = vector.shape_cast %4 : vector<1x8x16xf32> to vector<8x16xf32>
    %6 = vector.extract_strided_slice %5 {offsets = [0, 0], sizes = [8, 8], strides = [1, 1]} : vector<8x16xf32> to vector<8x8xf32>
    %7 = vector.extract_strided_slice %5 {offsets = [0, 8], sizes = [8, 8], strides = [1, 1]} : vector<8x16xf32> to vector<8x8xf32>
    %c0_8 = arith.constant 0 : index
    %c0_9 = arith.constant 0 : index
    %c0_10 = arith.constant 0 : index
    %8 = vector.load %arg10[%c0_8, %c0_9, %c0_10] : memref<4x1x32xf32, #tpu.memory_space<vmem>>, vector<1x1x32xf32>
    %9 = vector.shape_cast %8 : vector<1x1x32xf32> to vector<1x32xf32>
    %c1 = arith.constant 1 : index
    %c0_11 = arith.constant 0 : index
    %c0_12 = arith.constant 0 : index
    %10 = vector.load %arg10[%c1, %c0_11, %c0_12] : memref<4x1x32xf32, #tpu.memory_space<vmem>>, vector<1x1x32xf32>
    %11 = vector.shape_cast %10 : vector<1x1x32xf32> to vector<1x32xf32>
    %c2 = arith.constant 2 : index
    %c0_13 = arith.constant 0 : index
    %c0_14 = arith.constant 0 : index
    %12 = vector.load %arg10[%c2, %c0_13, %c0_14] : memref<4x1x32xf32, #tpu.memory_space<vmem>>, vector<1x1x32xf32>
    %13 = vector.shape_cast %12 : vector<1x1x32xf32> to vector<1x32xf32>
    %c3 = arith.constant 3 : index
    %c0_15 = arith.constant 0 : index
    %c0_16 = arith.constant 0 : index
    %14 = vector.load %arg10[%c3, %c0_15, %c0_16] : memref<4x1x32xf32, #tpu.memory_space<vmem>>, vector<1x1x32xf32>
    %15 = vector.shape_cast %14 : vector<1x1x32xf32> to vector<1x32xf32>
    %c0_17 = arith.constant 0 : index
    %c0_18 = arith.constant 0 : index
    %c0_19 = arith.constant 0 : index
    %16 = vector.load %arg9[%c0_17, %c0_18, %c0_19] : memref<4x1x8xf32, #tpu.memory_space<vmem>>, vector<1x1x8xf32>
    %17 = vector.shape_cast %16 : vector<1x1x8xf32> to vector<1x8xf32>
    %c1_20 = arith.constant 1 : index
    %c0_21 = arith.constant 0 : index
    %c0_22 = arith.constant 0 : index
    %18 = vector.load %arg9[%c1_20, %c0_21, %c0_22] : memref<4x1x8xf32, #tpu.memory_space<vmem>>, vector<1x1x8xf32>
    %19 = vector.shape_cast %18 : vector<1x1x8xf32> to vector<1x8xf32>
    %c2_23 = arith.constant 2 : index
    %c0_24 = arith.constant 0 : index
    %c0_25 = arith.constant 0 : index
    %20 = vector.load %arg9[%c2_23, %c0_24, %c0_25] : memref<4x1x8xf32, #tpu.memory_space<vmem>>, vector<1x1x8xf32>
    %21 = vector.shape_cast %20 : vector<1x1x8xf32> to vector<1x8xf32>
    %c3_26 = arith.constant 3 : index
    %c0_27 = arith.constant 0 : index
    %c0_28 = arith.constant 0 : index
    %22 = vector.load %arg9[%c3_26, %c0_27, %c0_28] : memref<4x1x8xf32, #tpu.memory_space<vmem>>, vector<1x1x8xf32>
    %23 = vector.shape_cast %22 : vector<1x1x8xf32> to vector<1x8xf32>
    %c0_29 = arith.constant 0 : index
    %c0_30 = arith.constant 0 : index
    %24 = vector.load %arg4[%c0_29, %c0_30] : memref<1x32xf32, #tpu.memory_space<vmem>>, vector<1x32xf32>
    %25 = arith.mulf %1, %1 : vector<8x32xf32>
    %cst = arith.constant dense<0.000000e+00> : vector<8xf32>
    %26 = vector.multi_reduction <add>, %25, %cst [1] : vector<8x32xf32> to vector<8xf32>
    %27 = vector.shape_cast %26 : vector<8xf32> to vector<8x1xf32>
    %cst_31 = arith.constant 3.200000e+01 : f32
    %28 = vector.broadcast %cst_31 : f32 to vector<8x1xf32>
    %29 = arith.divf %27, %28 : vector<8x1xf32>
    %cst_32 = arith.constant 9.99999974E-6 : f32
    %30 = vector.broadcast %cst_32 : f32 to vector<8x1xf32>
    %31 = arith.addf %29, %30 : vector<8x1xf32>
    %32 = math.rsqrt %31 : vector<8x1xf32>
    %33 = vector.broadcast %32 : vector<8x1xf32> to vector<8x32xf32>
    %34 = arith.mulf %1, %33 : vector<8x32xf32>
    %35 = vector.broadcast %24 : vector<1x32xf32> to vector<8x32xf32>
    %36 = arith.mulf %34, %35 : vector<8x32xf32>
    %37 = arith.truncf %36 : vector<8x32xf32> to vector<8x32xbf16>
    %c0_33 = arith.constant 0 : index
    %c0_34 = arith.constant 0 : index
    %38 = vector.load %arg5[%c0_33, %c0_34] : memref<32x32xbf16, #tpu.memory_space<vmem>>, vector<32x32xbf16>
    %cst_35 = arith.constant dense<0.000000e+00> : vector<8x32xf32>
    %39 = tpu.matmul %37, %38, %cst_35 {dimension_numbers = #tpu.dot_dimension_numbers<[1], [0], [0], [1], [0, 0, 1, 1], [], []>} : vector<8x32xbf16>, vector<32x32xbf16>, vector<8x32xf32> -> vector<8x32xf32>
    %c0_36 = arith.constant 0 : index
    %c0_37 = arith.constant 0 : index
    %40 = vector.load %arg6[%c0_36, %c0_37] : memref<1x32xf32, #tpu.memory_space<vmem>>, vector<1x32xf32>
    %41 = vector.broadcast %40 : vector<1x32xf32> to vector<8x32xf32>
    %42 = arith.addf %39, %41 : vector<8x32xf32>
    %43 = arith.mulf %42, %42 : vector<8x32xf32>
    %cst_38 = arith.constant dense<0.000000e+00> : vector<8xf32>
    %44 = vector.multi_reduction <add>, %43, %cst_38 [1] : vector<8x32xf32> to vector<8xf32>
    %45 = vector.shape_cast %44 : vector<8xf32> to vector<8x1xf32>
    %cst_39 = arith.constant 3.200000e+01 : f32
    %46 = vector.broadcast %cst_39 : f32 to vector<8x1xf32>
    %47 = arith.divf %45, %46 : vector<8x1xf32>
    %cst_40 = arith.constant 9.99999974E-6 : f32
    %48 = vector.broadcast %cst_40 : f32 to vector<8x1xf32>
    %49 = arith.addf %47, %48 : vector<8x1xf32>
    %50 = math.rsqrt %49 : vector<8x1xf32>
    %51 = vector.broadcast %50 : vector<8x1xf32> to vector<8x32xf32>
    %52 = arith.mulf %42, %51 : vector<8x32xf32>
    %53 = vector.broadcast %9 : vector<1x32xf32> to vector<8x32xf32>
    %54 = arith.mulf %52, %53 : vector<8x32xf32>
    %55 = arith.truncf %54 : vector<8x32xf32> to vector<8x32xbf16>
    %c0_41 = arith.constant 0 : index
    %c0_42 = arith.constant 0 : index
    %56 = vector.load %arg7[%c0_41, %c0_42] : memref<32x64xbf16, #tpu.memory_space<vmem>>, vector<32x64xbf16>
    %cst_43 = arith.constant dense<0.000000e+00> : vector<8x64xf32>
    %57 = tpu.matmul %55, %56, %cst_43 {dimension_numbers = #tpu.dot_dimension_numbers<[1], [0], [0], [1], [0, 0, 1, 1], [], []>} : vector<8x32xbf16>, vector<32x64xbf16>, vector<8x64xf32> -> vector<8x64xf32>
    %58 = vector.extract_strided_slice %57 {offsets = [0, 32], sizes = [8, 8], strides = [1, 1]} : vector<8x64xf32> to vector<8x8xf32>
    %59 = vector.extract_strided_slice %57 {offsets = [0, 40], sizes = [8, 8], strides = [1, 1]} : vector<8x64xf32> to vector<8x8xf32>
    %60 = arith.mulf %58, %58 : vector<8x8xf32>
    %cst_44 = arith.constant dense<0.000000e+00> : vector<8xf32>
    %61 = vector.multi_reduction <add>, %60, %cst_44 [1] : vector<8x8xf32> to vector<8xf32>
    %62 = vector.shape_cast %61 : vector<8xf32> to vector<8x1xf32>
    %63 = arith.mulf %59, %59 : vector<8x8xf32>
    %cst_45 = arith.constant dense<0.000000e+00> : vector<8xf32>
    %64 = vector.multi_reduction <add>, %63, %cst_45 [1] : vector<8x8xf32> to vector<8xf32>
    %65 = vector.shape_cast %64 : vector<8xf32> to vector<8x1xf32>
    %66 = arith.addf %62, %65 : vector<8x1xf32>
    %cst_46 = arith.constant 1.600000e+01 : f32
    %67 = vector.broadcast %cst_46 : f32 to vector<8x1xf32>
    %68 = arith.divf %66, %67 : vector<8x1xf32>
    %cst_47 = arith.constant 9.99999997E-7 : f32
    %69 = vector.broadcast %cst_47 : f32 to vector<8x1xf32>
    %70 = arith.addf %68, %69 : vector<8x1xf32>
    %71 = math.rsqrt %70 : vector<8x1xf32>
    %72 = vector.broadcast %71 : vector<8x1xf32> to vector<8x8xf32>
    %73 = arith.mulf %58, %72 : vector<8x8xf32>
    %74 = vector.broadcast %21 : vector<1x8xf32> to vector<8x8xf32>
    %75 = arith.mulf %73, %74 : vector<8x8xf32>
    %76 = vector.broadcast %71 : vector<8x1xf32> to vector<8x8xf32>
    %77 = arith.mulf %59, %76 : vector<8x8xf32>
    %78 = vector.broadcast %23 : vector<1x8xf32> to vector<8x8xf32>
    %79 = arith.mulf %77, %78 : vector<8x8xf32>
    %80 = arith.mulf %75, %6 : vector<8x8xf32>
    %81 = arith.mulf %79, %7 : vector<8x8xf32>
    %82 = arith.subf %80, %81 : vector<8x8xf32>
    %83 = arith.truncf %82 : vector<8x8xf32> to vector<8x8xbf16>
    %84 = arith.mulf %75, %7 : vector<8x8xf32>
    %85 = arith.mulf %79, %6 : vector<8x8xf32>
    %86 = arith.addf %84, %85 : vector<8x8xf32>
    %87 = arith.truncf %86 : vector<8x8xf32> to vector<8x8xbf16>
    %88 = vector.extract_strided_slice %57 {offsets = [0, 48], sizes = [8, 16], strides = [1, 1]} : vector<8x64xf32> to vector<8x16xf32>
    %89 = arith.truncf %88 : vector<8x16xf32> to vector<8x16xbf16>
    %90 = vector.extract_strided_slice %57 {offsets = [0, 0], sizes = [8, 8], strides = [1, 1]} : vector<8x64xf32> to vector<8x8xf32>
    %91 = vector.extract_strided_slice %57 {offsets = [0, 16], sizes = [8, 8], strides = [1, 1]} : vector<8x64xf32> to vector<8x8xf32>
    %92 = arith.mulf %90, %90 : vector<8x8xf32>
    %cst_48 = arith.constant dense<0.000000e+00> : vector<8xf32>
    %93 = vector.multi_reduction <add>, %92, %cst_48 [1] : vector<8x8xf32> to vector<8xf32>
    %94 = vector.shape_cast %93 : vector<8xf32> to vector<8x1xf32>
    %95 = arith.mulf %91, %91 : vector<8x8xf32>
    %cst_49 = arith.constant dense<0.000000e+00> : vector<8xf32>
    %96 = vector.multi_reduction <add>, %95, %cst_49 [1] : vector<8x8xf32> to vector<8xf32>
    %97 = vector.shape_cast %96 : vector<8xf32> to vector<8x1xf32>
    %98 = arith.addf %94, %97 : vector<8x1xf32>
    %cst_50 = arith.constant 1.600000e+01 : f32
    %99 = vector.broadcast %cst_50 : f32 to vector<8x1xf32>
    %100 = arith.divf %98, %99 : vector<8x1xf32>
    %cst_51 = arith.constant 9.99999997E-7 : f32
    %101 = vector.broadcast %cst_51 : f32 to vector<8x1xf32>
    %102 = arith.addf %100, %101 : vector<8x1xf32>
    %103 = math.rsqrt %102 : vector<8x1xf32>
    %104 = vector.broadcast %103 : vector<8x1xf32> to vector<8x8xf32>
    %105 = arith.mulf %90, %104 : vector<8x8xf32>
    %106 = vector.broadcast %17 : vector<1x8xf32> to vector<8x8xf32>
    %107 = arith.mulf %105, %106 : vector<8x8xf32>
    %108 = vector.broadcast %103 : vector<8x1xf32> to vector<8x8xf32>
    %109 = arith.mulf %91, %108 : vector<8x8xf32>
    %110 = vector.broadcast %19 : vector<1x8xf32> to vector<8x8xf32>
    %111 = arith.mulf %109, %110 : vector<8x8xf32>
    %112 = arith.mulf %107, %6 : vector<8x8xf32>
    %113 = arith.mulf %111, %7 : vector<8x8xf32>
    %114 = arith.subf %112, %113 : vector<8x8xf32>
    %115 = arith.truncf %114 : vector<8x8xf32> to vector<8x8xbf16>
    %116 = arith.mulf %107, %7 : vector<8x8xf32>
    %117 = arith.mulf %111, %6 : vector<8x8xf32>
    %118 = arith.addf %116, %117 : vector<8x8xf32>
    %119 = arith.truncf %118 : vector<8x8xf32> to vector<8x8xbf16>
    %cst_52 = arith.constant dense<0.000000e+00> : vector<8x8xf32>
    %120 = tpu.matmul %115, %83, %cst_52 {dimension_numbers = #tpu.dot_dimension_numbers<[1], [1], [0], [0], [0, 0, 1, 0], [], []>} : vector<8x8xbf16>, vector<8x8xbf16>, vector<8x8xf32> -> vector<8x8xf32>
    %cst_53 = arith.constant dense<0.000000e+00> : vector<8x8xf32>
    %121 = tpu.matmul %119, %87, %cst_53 {dimension_numbers = #tpu.dot_dimension_numbers<[1], [1], [0], [0], [0, 0, 1, 0], [], []>} : vector<8x8xbf16>, vector<8x8xbf16>, vector<8x8xf32> -> vector<8x8xf32>
    %122 = arith.addf %120, %121 : vector<8x8xf32>
    %cst_54 = arith.constant 2.500000e-01 : f32
    %123 = vector.broadcast %cst_54 : f32 to vector<8x8xf32>
    %124 = arith.mulf %122, %123 : vector<8x8xf32>
    %125 = vector.broadcast %3 : vector<1x8xf32> to vector<8x8xf32>
    %126 = arith.addf %124, %125 : vector<8x8xf32>
    %cst_55 = arith.constant dense<0xFF800000> : vector<8xf32>
    %127 = vector.multi_reduction <maximumf>, %126, %cst_55 [1] : vector<8x8xf32> to vector<8xf32>
    %128 = vector.shape_cast %127 : vector<8xf32> to vector<8x1xf32>
    %129 = vector.broadcast %128 : vector<8x1xf32> to vector<8x8xf32>
    %130 = arith.subf %126, %129 : vector<8x8xf32>
    %131 = math.exp %130 : vector<8x8xf32>
    %cst_56 = arith.constant dense<0.000000e+00> : vector<8xf32>
    %132 = vector.multi_reduction <add>, %131, %cst_56 [1] : vector<8x8xf32> to vector<8xf32>
    %133 = vector.shape_cast %132 : vector<8xf32> to vector<8x1xf32>
    %134 = tpu.reciprocal %133 {approx = true} : vector<8x1xf32> -> vector<8x1xf32>
    %135 = vector.broadcast %134 : vector<8x1xf32> to vector<8x8xf32>
    %136 = arith.mulf %131, %135 : vector<8x8xf32>
    %137 = arith.truncf %136 : vector<8x8xf32> to vector<8x8xbf16>
    %cst_57 = arith.constant dense<0.000000e+00> : vector<8x16xf32>
    %138 = tpu.matmul %137, %89, %cst_57 {dimension_numbers = #tpu.dot_dimension_numbers<[1], [0], [0], [1], [0, 0, 1, 1], [], []>} : vector<8x8xbf16>, vector<8x16xbf16>, vector<8x16xf32> -> vector<8x16xf32>
    %139 = vector.extract_strided_slice %57 {offsets = [0, 8], sizes = [8, 8], strides = [1, 1]} : vector<8x64xf32> to vector<8x8xf32>
    %140 = vector.extract_strided_slice %57 {offsets = [0, 24], sizes = [8, 8], strides = [1, 1]} : vector<8x64xf32> to vector<8x8xf32>
    %141 = arith.mulf %139, %139 : vector<8x8xf32>
    %cst_58 = arith.constant dense<0.000000e+00> : vector<8xf32>
    %142 = vector.multi_reduction <add>, %141, %cst_58 [1] : vector<8x8xf32> to vector<8xf32>
    %143 = vector.shape_cast %142 : vector<8xf32> to vector<8x1xf32>
    %144 = arith.mulf %140, %140 : vector<8x8xf32>
    %cst_59 = arith.constant dense<0.000000e+00> : vector<8xf32>
    %145 = vector.multi_reduction <add>, %144, %cst_59 [1] : vector<8x8xf32> to vector<8xf32>
    %146 = vector.shape_cast %145 : vector<8xf32> to vector<8x1xf32>
    %147 = arith.addf %143, %146 : vector<8x1xf32>
    %cst_60 = arith.constant 1.600000e+01 : f32
    %148 = vector.broadcast %cst_60 : f32 to vector<8x1xf32>
    %149 = arith.divf %147, %148 : vector<8x1xf32>
    %cst_61 = arith.constant 9.99999997E-7 : f32
    %150 = vector.broadcast %cst_61 : f32 to vector<8x1xf32>
    %151 = arith.addf %149, %150 : vector<8x1xf32>
    %152 = math.rsqrt %151 : vector<8x1xf32>
    %153 = vector.broadcast %152 : vector<8x1xf32> to vector<8x8xf32>
    %154 = arith.mulf %139, %153 : vector<8x8xf32>
    %155 = vector.broadcast %17 : vector<1x8xf32> to vector<8x8xf32>
    %156 = arith.mulf %154, %155 : vector<8x8xf32>
    %157 = vector.broadcast %152 : vector<8x1xf32> to vector<8x8xf32>
    %158 = arith.mulf %140, %157 : vector<8x8xf32>
    %159 = vector.broadcast %19 : vector<1x8xf32> to vector<8x8xf32>
    %160 = arith.mulf %158, %159 : vector<8x8xf32>
    %161 = arith.mulf %156, %6 : vector<8x8xf32>
    %162 = arith.mulf %160, %7 : vector<8x8xf32>
    %163 = arith.subf %161, %162 : vector<8x8xf32>
    %164 = arith.truncf %163 : vector<8x8xf32> to vector<8x8xbf16>
    %165 = arith.mulf %156, %7 : vector<8x8xf32>
    %166 = arith.mulf %160, %6 : vector<8x8xf32>
    %167 = arith.addf %165, %166 : vector<8x8xf32>
    %168 = arith.truncf %167 : vector<8x8xf32> to vector<8x8xbf16>
    %cst_62 = arith.constant dense<0.000000e+00> : vector<8x8xf32>
    %169 = tpu.matmul %164, %83, %cst_62 {dimension_numbers = #tpu.dot_dimension_numbers<[1], [1], [0], [0], [0, 0, 1, 0], [], []>} : vector<8x8xbf16>, vector<8x8xbf16>, vector<8x8xf32> -> vector<8x8xf32>
    %cst_63 = arith.constant dense<0.000000e+00> : vector<8x8xf32>
    %170 = tpu.matmul %168, %87, %cst_63 {dimension_numbers = #tpu.dot_dimension_numbers<[1], [1], [0], [0], [0, 0, 1, 0], [], []>} : vector<8x8xbf16>, vector<8x8xbf16>, vector<8x8xf32> -> vector<8x8xf32>
    %171 = arith.addf %169, %170 : vector<8x8xf32>
    %cst_64 = arith.constant 2.500000e-01 : f32
    %172 = vector.broadcast %cst_64 : f32 to vector<8x8xf32>
    %173 = arith.mulf %171, %172 : vector<8x8xf32>
    %174 = vector.broadcast %3 : vector<1x8xf32> to vector<8x8xf32>
    %175 = arith.addf %173, %174 : vector<8x8xf32>
    %cst_65 = arith.constant dense<0xFF800000> : vector<8xf32>
    %176 = vector.multi_reduction <maximumf>, %175, %cst_65 [1] : vector<8x8xf32> to vector<8xf32>
    %177 = vector.shape_cast %176 : vector<8xf32> to vector<8x1xf32>
    %178 = vector.broadcast %177 : vector<8x1xf32> to vector<8x8xf32>
    %179 = arith.subf %175, %178 : vector<8x8xf32>
    %180 = math.exp %179 : vector<8x8xf32>
    %cst_66 = arith.constant dense<0.000000e+00> : vector<8xf32>
    %181 = vector.multi_reduction <add>, %180, %cst_66 [1] : vector<8x8xf32> to vector<8xf32>
    %182 = vector.shape_cast %181 : vector<8xf32> to vector<8x1xf32>
    %183 = tpu.reciprocal %182 {approx = true} : vector<8x1xf32> -> vector<8x1xf32>
    %184 = vector.broadcast %183 : vector<8x1xf32> to vector<8x8xf32>
    %185 = arith.mulf %180, %184 : vector<8x8xf32>
    %186 = arith.truncf %185 : vector<8x8xf32> to vector<8x8xbf16>
    %cst_67 = arith.constant dense<0.000000e+00> : vector<8x16xf32>
    %187 = tpu.matmul %186, %89, %cst_67 {dimension_numbers = #tpu.dot_dimension_numbers<[1], [0], [0], [1], [0, 0, 1, 1], [], []>} : vector<8x8xbf16>, vector<8x16xbf16>, vector<8x16xf32> -> vector<8x16xf32>
    %188 = tpu.concatenate %138, %187 in 1 : vector<8x16xf32>, vector<8x16xf32> -> vector<8x32xf32>
    %189 = arith.truncf %188 : vector<8x32xf32> to vector<8x32xbf16>
    %c0_68 = arith.constant 0 : index
    %c0_69 = arith.constant 0 : index
    %190 = vector.load %arg8[%c0_68, %c0_69] : memref<32x32xbf16, #tpu.memory_space<vmem>>, vector<32x32xbf16>
    %cst_70 = arith.constant dense<0.000000e+00> : vector<8x32xf32>
    %191 = tpu.matmul %189, %190, %cst_70 {dimension_numbers = #tpu.dot_dimension_numbers<[1], [0], [0], [1], [0, 0, 1, 1], [], []>} : vector<8x32xbf16>, vector<32x32xbf16>, vector<8x32xf32> -> vector<8x32xf32>
    %192 = arith.mulf %191, %191 : vector<8x32xf32>
    %cst_71 = arith.constant dense<0.000000e+00> : vector<8xf32>
    %193 = vector.multi_reduction <add>, %192, %cst_71 [1] : vector<8x32xf32> to vector<8xf32>
    %194 = vector.shape_cast %193 : vector<8xf32> to vector<8x1xf32>
    %cst_72 = arith.constant 3.200000e+01 : f32
    %195 = vector.broadcast %cst_72 : f32 to vector<8x1xf32>
    %196 = arith.divf %194, %195 : vector<8x1xf32>
    %cst_73 = arith.constant 9.99999974E-6 : f32
    %197 = vector.broadcast %cst_73 : f32 to vector<8x1xf32>
    %198 = arith.addf %196, %197 : vector<8x1xf32>
    %199 = math.rsqrt %198 : vector<8x1xf32>
    %200 = vector.broadcast %199 : vector<8x1xf32> to vector<8x32xf32>
    %201 = arith.mulf %191, %200 : vector<8x32xf32>
    %202 = vector.broadcast %11 : vector<1x32xf32> to vector<8x32xf32>
    %203 = arith.mulf %201, %202 : vector<8x32xf32>
    %204 = arith.addf %42, %203 : vector<8x32xf32>
    %205 = arith.mulf %204, %204 : vector<8x32xf32>
    %cst_74 = arith.constant dense<0.000000e+00> : vector<8xf32>
    %206 = vector.multi_reduction <add>, %205, %cst_74 [1] : vector<8x32xf32> to vector<8xf32>
    %207 = vector.shape_cast %206 : vector<8xf32> to vector<8x1xf32>
    %cst_75 = arith.constant 3.200000e+01 : f32
    %208 = vector.broadcast %cst_75 : f32 to vector<8x1xf32>
    %209 = arith.divf %207, %208 : vector<8x1xf32>
    %cst_76 = arith.constant 9.99999974E-6 : f32
    %210 = vector.broadcast %cst_76 : f32 to vector<8x1xf32>
    %211 = arith.addf %209, %210 : vector<8x1xf32>
    %212 = math.rsqrt %211 : vector<8x1xf32>
    %213 = vector.broadcast %212 : vector<8x1xf32> to vector<8x32xf32>
    %214 = arith.mulf %204, %213 : vector<8x32xf32>
    %215 = vector.broadcast %13 : vector<1x32xf32> to vector<8x32xf32>
    %216 = arith.mulf %214, %215 : vector<8x32xf32>
    %217 = arith.truncf %216 : vector<8x32xf32> to vector<8x32xbf16>
    %c0_77 = arith.constant 0 : index
    %c0_78 = arith.constant 0 : index
    %218 = vector.load %arg11[%c0_77, %c0_78] : memref<32x192xbf16, #tpu.memory_space<vmem>>, vector<32x192xbf16>
    %cst_79 = arith.constant dense<0.000000e+00> : vector<8x192xf32>
    %219 = tpu.matmul %217, %218, %cst_79 {dimension_numbers = #tpu.dot_dimension_numbers<[1], [0], [0], [1], [0, 0, 1, 1], [], []>} : vector<8x32xbf16>, vector<32x192xbf16>, vector<8x192xf32> -> vector<8x192xf32>
    %220 = vector.extract_strided_slice %219 {offsets = [0, 0], sizes = [8, 96], strides = [1, 1]} : vector<8x192xf32> to vector<8x96xf32>
    %221 = vector.extract_strided_slice %219 {offsets = [0, 96], sizes = [8, 96], strides = [1, 1]} : vector<8x192xf32> to vector<8x96xf32>
    %cst_80 = arith.constant 0.000000e+00 : f32
    %222 = vector.broadcast %cst_80 : f32 to vector<8x96xf32>
    %223 = arith.subf %222, %220 : vector<8x96xf32>
    %224 = math.exp %223 : vector<8x96xf32>
    %cst_81 = arith.constant 1.000000e+00 : f32
    %225 = vector.broadcast %cst_81 : f32 to vector<8x96xf32>
    %226 = arith.addf %225, %224 : vector<8x96xf32>
    %cst_82 = arith.constant 1.000000e+00 : f32
    %227 = vector.broadcast %cst_82 : f32 to vector<8x96xf32>
    %228 = arith.divf %227, %226 : vector<8x96xf32>
    %229 = arith.mulf %220, %228 : vector<8x96xf32>
    %230 = arith.mulf %229, %221 : vector<8x96xf32>
    %231 = arith.truncf %230 : vector<8x96xf32> to vector<8x96xbf16>
    %c0_83 = arith.constant 0 : index
    %c0_84 = arith.constant 0 : index
    %232 = vector.load %arg12[%c0_83, %c0_84] : memref<96x32xbf16, #tpu.memory_space<vmem>>, vector<96x32xbf16>
    %cst_85 = arith.constant dense<0.000000e+00> : vector<8x32xf32>
    %233 = tpu.matmul %231, %232, %cst_85 {dimension_numbers = #tpu.dot_dimension_numbers<[1], [0], [0], [1], [0, 0, 1, 1], [], []>} : vector<8x96xbf16>, vector<96x32xbf16>, vector<8x32xf32> -> vector<8x32xf32>
    %234 = arith.mulf %233, %233 : vector<8x32xf32>
    %cst_86 = arith.constant dense<0.000000e+00> : vector<8xf32>
    %235 = vector.multi_reduction <add>, %234, %cst_86 [1] : vector<8x32xf32> to vector<8xf32>
    %236 = vector.shape_cast %235 : vector<8xf32> to vector<8x1xf32>
    %cst_87 = arith.constant 3.200000e+01 : f32
    %237 = vector.broadcast %cst_87 : f32 to vector<8x1xf32>
    %238 = arith.divf %236, %237 : vector<8x1xf32>
    %cst_88 = arith.constant 9.99999974E-6 : f32
    %239 = vector.broadcast %cst_88 : f32 to vector<8x1xf32>
    %240 = arith.addf %238, %239 : vector<8x1xf32>
    %241 = math.rsqrt %240 : vector<8x1xf32>
    %242 = vector.broadcast %241 : vector<8x1xf32> to vector<8x32xf32>
    %243 = arith.mulf %233, %242 : vector<8x32xf32>
    %244 = vector.broadcast %15 : vector<1x32xf32> to vector<8x32xf32>
    %245 = arith.mulf %243, %244 : vector<8x32xf32>
    %246 = arith.addf %204, %245 : vector<8x32xf32>
    %c0_89 = arith.constant 0 : index
    %c0_90 = arith.constant 0 : index
    %c0_91 = arith.constant 0 : index
    %247 = vector.load %arg13[%c0_89, %c0_90, %c0_91] : memref<1x8x32xf32, #tpu.memory_space<vmem>>, vector<1x8x32xf32>
    %248 = vector.shape_cast %247 : vector<1x8x32xf32> to vector<8x32xf32>
    %249 = vector.shape_cast %246 : vector<8x32xf32> to vector<1x8x32xf32>
    tpu.vector_store %arg13[%c0_89, %c0_90, %c0_91], %249 {strides = array<i32>} : memref<1x8x32xf32, #tpu.memory_space<vmem>>, vector<1x8x32xf32>,
    return
  }
  func.func @transform_0(%arg0: i32) -> (i32, i32, i32) {
    %c0_i32 = arith.constant 0 : i32
    %c0_i32_0 = arith.constant 0 : i32
    %c0_i32_1 = arith.constant 0 : i32
    return %arg0, %c0_i32, %c0_i32_0 : i32, i32, i32
  }
  func.func @transform_1(%arg0: i32) -> (i32, i32, i32) {
    %c0_i32 = arith.constant 0 : i32
    %c0_i32_0 = arith.constant 0 : i32
    %c0_i32_1 = arith.constant 0 : i32
    return %arg0, %c0_i32, %c0_i32_0 : i32, i32, i32
  }
  func.func @transform_2(%arg0: i32) -> (i32, i32, i32) {
    %c0_i32 = arith.constant 0 : i32
    %c0_i32_0 = arith.constant 0 : i32
    %c0_i32_1 = arith.constant 0 : i32
    return %arg0, %c0_i32, %c0_i32_0 : i32, i32, i32
  }
  func.func @transform_3(%arg0: i32) -> (i32, i32) {
    %c0_i32 = arith.constant 0 : i32
    %c0_i32_0 = arith.constant 0 : i32
    %c0_i32_1 = arith.constant 0 : i32
    return %c0_i32, %c0_i32_0 : i32, i32
  }
  func.func @transform_4(%arg0: i32) -> (i32, i32) {
    %c0_i32 = arith.constant 0 : i32
    %c0_i32_0 = arith.constant 0 : i32
    %c0_i32_1 = arith.constant 0 : i32
    return %c0_i32, %c0_i32_0 : i32, i32
  }
  func.func @transform_5(%arg0: i32) -> (i32, i32) {
    %c0_i32 = arith.constant 0 : i32
    %c0_i32_0 = arith.constant 0 : i32
    %c0_i32_1 = arith.constant 0 : i32
    return %c0_i32, %c0_i32_0 : i32, i32
  }
  func.func @transform_6(%arg0: i32) -> (i32, i32) {
    %c0_i32 = arith.constant 0 : i32
    %c0_i32_0 = arith.constant 0 : i32
    %c0_i32_1 = arith.constant 0 : i32
    return %c0_i32, %c0_i32_0 : i32, i32
  }
  func.func @transform_7(%arg0: i32) -> (i32, i32) {
    %c0_i32 = arith.constant 0 : i32
    %c0_i32_0 = arith.constant 0 : i32
    %c0_i32_1 = arith.constant 0 : i32
    return %c0_i32, %c0_i32_0 : i32, i32
  }
  func.func @transform_8(%arg0: i32) -> (i32, i32, i32) {
    %c0_i32 = arith.constant 0 : i32
    %c0_i32_0 = arith.constant 0 : i32
    %c0_i32_1 = arith.constant 0 : i32
    %c0_i32_2 = arith.constant 0 : i32
    return %c0_i32, %c0_i32_0, %c0_i32_1 : i32, i32, i32
  }
  func.func @transform_9(%arg0: i32) -> (i32, i32, i32) {
    %c0_i32 = arith.constant 0 : i32
    %c0_i32_0 = arith.constant 0 : i32
    %c0_i32_1 = arith.constant 0 : i32
    %c0_i32_2 = arith.constant 0 : i32
    return %c0_i32, %c0_i32_0, %c0_i32_1 : i32, i32, i32
  }
  func.func @transform_10(%arg0: i32) -> (i32, i32) {
    %c0_i32 = arith.constant 0 : i32
    %c0_i32_0 = arith.constant 0 : i32
    %c0_i32_1 = arith.constant 0 : i32
    return %c0_i32, %c0_i32_0 : i32, i32
  }
  func.func @transform_11(%arg0: i32) -> (i32, i32) {
    %c0_i32 = arith.constant 0 : i32
    %c0_i32_0 = arith.constant 0 : i32
    %c0_i32_1 = arith.constant 0 : i32
    return %c0_i32, %c0_i32_0 : i32, i32
  }
  func.func @transform_12(%arg0: i32) -> (i32, i32, i32) {
    %c0_i32 = arith.constant 0 : i32
    %c0_i32_0 = arith.constant 0 : i32
    %c0_i32_1 = arith.constant 0 : i32
    return %arg0, %c0_i32, %c0_i32_0 : i32, i32, i32
  }
}

module attributes {stable_mosaic.version = 11 : i64} {
  func.func @_block_kernel(%arg0: i32, %arg1: memref<1x64x16xf32, #tpu.memory_space<vmem>>, %arg2: memref<1x1x64xf32, #tpu.memory_space<vmem>>, %arg3: memref<1x64x16xf32, #tpu.memory_space<vmem>>, %arg4: memref<1x1x32xf32, #tpu.memory_space<vmem>>, %arg5: memref<16x32xbf16, #tpu.memory_space<vmem>>, %arg6: memref<1x32xf32, #tpu.memory_space<vmem>>, %arg7: memref<32x64xbf16, #tpu.memory_space<vmem>>, %arg8: memref<32x32xbf16, #tpu.memory_space<vmem>>, %arg9: memref<4x1x8xf32, #tpu.memory_space<vmem>>, %arg10: memref<4x1x32xf32, #tpu.memory_space<vmem>>, %arg11: memref<32x192xbf16, #tpu.memory_space<vmem>>, %arg12: memref<96x32xbf16, #tpu.memory_space<vmem>>, %arg13: memref<32x128xbf16, #tpu.memory_space<vmem>>, %arg14: memref<1x128xf32, #tpu.memory_space<vmem>>, %arg15: memref<1x64x32xf32, #tpu.memory_space<vmem>>) attributes {dimension_semantics = [#tpu.dimension_semantics<parallel>], iteration_bounds = array<i64: 2>, scalar_prefetch = 0 : i64, scratch_operands = 0 : i64, tpu.core_type = #tpu.core_type<tc>, window_params = [{transform_indices = @transform_0, window_bounds = array<i64: 1, 64, 16>}, {transform_indices = @transform_1, window_bounds = array<i64: 1, 1, 64>}, {transform_indices = @transform_2, window_bounds = array<i64: 1, 64, 16>}, {transform_indices = @transform_3, window_bounds = array<i64: 1, 1, 32>}, {pipeline_mode = #tpu.pipeline_mode<synchronous>, transform_indices = @transform_4, window_bounds = array<i64: 16, 32>}, {pipeline_mode = #tpu.pipeline_mode<synchronous>, transform_indices = @transform_5, window_bounds = array<i64: 1, 32>}, {pipeline_mode = #tpu.pipeline_mode<synchronous>, transform_indices = @transform_6, window_bounds = array<i64: 32, 64>}, {pipeline_mode = #tpu.pipeline_mode<synchronous>, transform_indices = @transform_7, window_bounds = array<i64: 32, 32>}, {pipeline_mode = #tpu.pipeline_mode<synchronous>, transform_indices = @transform_8, window_bounds = array<i64: 4, 1, 8>}, {pipeline_mode = #tpu.pipeline_mode<synchronous>, transform_indices = @transform_9, window_bounds = array<i64: 4, 1, 32>}, {pipeline_mode = #tpu.pipeline_mode<synchronous>, transform_indices = @transform_10, window_bounds = array<i64: 32, 192>}, {pipeline_mode = #tpu.pipeline_mode<synchronous>, transform_indices = @transform_11, window_bounds = array<i64: 96, 32>}, {pipeline_mode = #tpu.pipeline_mode<synchronous>, transform_indices = @transform_12, window_bounds = array<i64: 32, 128>}, {pipeline_mode = #tpu.pipeline_mode<synchronous>, transform_indices = @transform_13, window_bounds = array<i64: 1, 128>}, {transform_indices = @transform_14, window_bounds = array<i64: 1, 64, 32>}]} {
    %c0 = arith.constant 0 : index
    %c0_0 = arith.constant 0 : index
    %c0_1 = arith.constant 0 : index
    %0 = vector.load %arg1[%c0, %c0_0, %c0_1] : memref<1x64x16xf32, #tpu.memory_space<vmem>>, vector<1x64x16xf32>
    %1 = vector.shape_cast %0 : vector<1x64x16xf32> to vector<64x16xf32>
    %c0_2 = arith.constant 0 : index
    %c0_3 = arith.constant 0 : index
    %c0_4 = arith.constant 0 : index
    %2 = vector.load %arg2[%c0_2, %c0_3, %c0_4] : memref<1x1x64xf32, #tpu.memory_space<vmem>>, vector<1x1x64xf32>
    %3 = vector.shape_cast %2 : vector<1x1x64xf32> to vector<1x64xf32>
    %c0_5 = arith.constant 0 : index
    %c0_6 = arith.constant 0 : index
    %c0_7 = arith.constant 0 : index
    %4 = vector.load %arg3[%c0_5, %c0_6, %c0_7] : memref<1x64x16xf32, #tpu.memory_space<vmem>>, vector<1x64x16xf32>
    %5 = vector.shape_cast %4 : vector<1x64x16xf32> to vector<64x16xf32>
    %6 = vector.extract_strided_slice %5 {offsets = [0, 0], sizes = [64, 8], strides = [1, 1]} : vector<64x16xf32> to vector<64x8xf32>
    %7 = vector.extract_strided_slice %5 {offsets = [0, 8], sizes = [64, 8], strides = [1, 1]} : vector<64x16xf32> to vector<64x8xf32>
    %c0_8 = arith.constant 0 : index
    %c0_9 = arith.constant 0 : index
    %c0_10 = arith.constant 0 : index
    %8 = vector.load %arg10[%c0_8, %c0_9, %c0_10] : memref<4x1x32xf32, #tpu.memory_space<vmem>>, vector<1x1x32xf32>
    %9 = vector.shape_cast %8 : vector<1x1x32xf32> to vector<1x32xf32>
    %c1 = arith.constant 1 : index
    %c0_11 = arith.constant 0 : index
    %c0_12 = arith.constant 0 : index
    %10 = vector.load %arg10[%c1, %c0_11, %c0_12] : memref<4x1x32xf32, #tpu.memory_space<vmem>>, vector<1x1x32xf32>
    %11 = vector.shape_cast %10 : vector<1x1x32xf32> to vector<1x32xf32>
    %c2 = arith.constant 2 : index
    %c0_13 = arith.constant 0 : index
    %c0_14 = arith.constant 0 : index
    %12 = vector.load %arg10[%c2, %c0_13, %c0_14] : memref<4x1x32xf32, #tpu.memory_space<vmem>>, vector<1x1x32xf32>
    %13 = vector.shape_cast %12 : vector<1x1x32xf32> to vector<1x32xf32>
    %c3 = arith.constant 3 : index
    %c0_15 = arith.constant 0 : index
    %c0_16 = arith.constant 0 : index
    %14 = vector.load %arg10[%c3, %c0_15, %c0_16] : memref<4x1x32xf32, #tpu.memory_space<vmem>>, vector<1x1x32xf32>
    %15 = vector.shape_cast %14 : vector<1x1x32xf32> to vector<1x32xf32>
    %c0_17 = arith.constant 0 : index
    %c0_18 = arith.constant 0 : index
    %c0_19 = arith.constant 0 : index
    %16 = vector.load %arg9[%c0_17, %c0_18, %c0_19] : memref<4x1x8xf32, #tpu.memory_space<vmem>>, vector<1x1x8xf32>
    %17 = vector.shape_cast %16 : vector<1x1x8xf32> to vector<1x8xf32>
    %c1_20 = arith.constant 1 : index
    %c0_21 = arith.constant 0 : index
    %c0_22 = arith.constant 0 : index
    %18 = vector.load %arg9[%c1_20, %c0_21, %c0_22] : memref<4x1x8xf32, #tpu.memory_space<vmem>>, vector<1x1x8xf32>
    %19 = vector.shape_cast %18 : vector<1x1x8xf32> to vector<1x8xf32>
    %c2_23 = arith.constant 2 : index
    %c0_24 = arith.constant 0 : index
    %c0_25 = arith.constant 0 : index
    %20 = vector.load %arg9[%c2_23, %c0_24, %c0_25] : memref<4x1x8xf32, #tpu.memory_space<vmem>>, vector<1x1x8xf32>
    %21 = vector.shape_cast %20 : vector<1x1x8xf32> to vector<1x8xf32>
    %c3_26 = arith.constant 3 : index
    %c0_27 = arith.constant 0 : index
    %c0_28 = arith.constant 0 : index
    %22 = vector.load %arg9[%c3_26, %c0_27, %c0_28] : memref<4x1x8xf32, #tpu.memory_space<vmem>>, vector<1x1x8xf32>
    %23 = vector.shape_cast %22 : vector<1x1x8xf32> to vector<1x8xf32>
    %24 = arith.truncf %1 : vector<64x16xf32> to vector<64x16xbf16>
    %c0_29 = arith.constant 0 : index
    %c0_30 = arith.constant 0 : index
    %25 = vector.load %arg5[%c0_29, %c0_30] : memref<16x32xbf16, #tpu.memory_space<vmem>>, vector<16x32xbf16>
    %cst = arith.constant dense<0.000000e+00> : vector<64x32xf32>
    %26 = tpu.matmul %24, %25, %cst {dimension_numbers = #tpu.dot_dimension_numbers<[1], [0], [0], [1], [0, 0, 1, 1], [], []>} : vector<64x16xbf16>, vector<16x32xbf16>, vector<64x32xf32> -> vector<64x32xf32>
    %c0_31 = arith.constant 0 : index
    %c0_32 = arith.constant 0 : index
    %27 = vector.load %arg6[%c0_31, %c0_32] : memref<1x32xf32, #tpu.memory_space<vmem>>, vector<1x32xf32>
    %28 = vector.broadcast %27 : vector<1x32xf32> to vector<64x32xf32>
    %29 = arith.addf %26, %28 : vector<64x32xf32>
    %c0_33 = arith.constant 0 : index
    %c0_34 = arith.constant 0 : index
    %c0_35 = arith.constant 0 : index
    %30 = vector.load %arg4[%c0_33, %c0_34, %c0_35] : memref<1x1x32xf32, #tpu.memory_space<vmem>>, vector<1x1x32xf32>
    %31 = vector.shape_cast %30 : vector<1x1x32xf32> to vector<1x32xf32>
    %cst_36 = arith.constant 0.000000e+00 : f32
    %32 = vector.broadcast %cst_36 : f32 to vector<1x32xf32>
    %33 = arith.subf %32, %31 : vector<1x32xf32>
    %34 = math.exp %33 : vector<1x32xf32>
    %cst_37 = arith.constant 1.000000e+00 : f32
    %35 = vector.broadcast %cst_37 : f32 to vector<1x32xf32>
    %36 = arith.addf %35, %34 : vector<1x32xf32>
    %cst_38 = arith.constant 1.000000e+00 : f32
    %37 = vector.broadcast %cst_38 : f32 to vector<1x32xf32>
    %38 = arith.divf %37, %36 : vector<1x32xf32>
    %39 = arith.mulf %31, %38 : vector<1x32xf32>
    %40 = arith.truncf %39 : vector<1x32xf32> to vector<1x32xbf16>
    %c0_39 = arith.constant 0 : index
    %c0_40 = arith.constant 0 : index
    %41 = vector.load %arg13[%c0_39, %c0_40] : memref<32x128xbf16, #tpu.memory_space<vmem>>, vector<32x128xbf16>
    %cst_41 = arith.constant dense<0.000000e+00> : vector<1x128xf32>
    %42 = tpu.matmul %40, %41, %cst_41 {dimension_numbers = #tpu.dot_dimension_numbers<[1], [0], [0], [1], [0, 0, 1, 1], [], []>} : vector<1x32xbf16>, vector<32x128xbf16>, vector<1x128xf32> -> vector<1x128xf32>
    %c0_42 = arith.constant 0 : index
    %c0_43 = arith.constant 0 : index
    %43 = vector.load %arg14[%c0_42, %c0_43] : memref<1x128xf32, #tpu.memory_space<vmem>>, vector<1x128xf32>
    %44 = arith.addf %42, %43 : vector<1x128xf32>
    %45 = vector.extract_strided_slice %44 {offsets = [0, 0], sizes = [1, 32], strides = [1, 1]} : vector<1x128xf32> to vector<1x32xf32>
    %46 = vector.extract_strided_slice %44 {offsets = [0, 32], sizes = [1, 32], strides = [1, 1]} : vector<1x128xf32> to vector<1x32xf32>
    %47 = vector.extract_strided_slice %44 {offsets = [0, 64], sizes = [1, 32], strides = [1, 1]} : vector<1x128xf32> to vector<1x32xf32>
    %48 = vector.extract_strided_slice %44 {offsets = [0, 96], sizes = [1, 32], strides = [1, 1]} : vector<1x128xf32> to vector<1x32xf32>
    %49 = arith.mulf %29, %29 : vector<64x32xf32>
    %cst_44 = arith.constant dense<0.000000e+00> : vector<64xf32>
    %50 = vector.multi_reduction <add>, %49, %cst_44 [1] : vector<64x32xf32> to vector<64xf32>
    %51 = vector.shape_cast %50 : vector<64xf32> to vector<64x1xf32>
    %cst_45 = arith.constant 3.200000e+01 : f32
    %52 = vector.broadcast %cst_45 : f32 to vector<64x1xf32>
    %53 = arith.divf %51, %52 : vector<64x1xf32>
    %cst_46 = arith.constant 9.99999974E-6 : f32
    %54 = vector.broadcast %cst_46 : f32 to vector<64x1xf32>
    %55 = arith.addf %53, %54 : vector<64x1xf32>
    %56 = math.rsqrt %55 : vector<64x1xf32>
    %57 = vector.broadcast %56 : vector<64x1xf32> to vector<64x32xf32>
    %58 = arith.mulf %29, %57 : vector<64x32xf32>
    %59 = vector.broadcast %9 : vector<1x32xf32> to vector<64x32xf32>
    %60 = arith.mulf %58, %59 : vector<64x32xf32>
    %cst_47 = arith.constant 1.000000e+00 : f32
    %61 = vector.broadcast %cst_47 : f32 to vector<1x32xf32>
    %62 = arith.addf %61, %45 : vector<1x32xf32>
    %63 = vector.broadcast %62 : vector<1x32xf32> to vector<64x32xf32>
    %64 = arith.mulf %60, %63 : vector<64x32xf32>
    %65 = arith.truncf %64 : vector<64x32xf32> to vector<64x32xbf16>
    %c0_48 = arith.constant 0 : index
    %c0_49 = arith.constant 0 : index
    %66 = vector.load %arg7[%c0_48, %c0_49] : memref<32x64xbf16, #tpu.memory_space<vmem>>, vector<32x64xbf16>
    %cst_50 = arith.constant dense<0.000000e+00> : vector<64x64xf32>
    %67 = tpu.matmul %65, %66, %cst_50 {dimension_numbers = #tpu.dot_dimension_numbers<[1], [0], [0], [1], [0, 0, 1, 1], [], []>} : vector<64x32xbf16>, vector<32x64xbf16>, vector<64x64xf32> -> vector<64x64xf32>
    %68 = vector.extract_strided_slice %67 {offsets = [0, 32], sizes = [64, 8], strides = [1, 1]} : vector<64x64xf32> to vector<64x8xf32>
    %69 = vector.extract_strided_slice %67 {offsets = [0, 40], sizes = [64, 8], strides = [1, 1]} : vector<64x64xf32> to vector<64x8xf32>
    %70 = arith.mulf %68, %68 : vector<64x8xf32>
    %cst_51 = arith.constant dense<0.000000e+00> : vector<64xf32>
    %71 = vector.multi_reduction <add>, %70, %cst_51 [1] : vector<64x8xf32> to vector<64xf32>
    %72 = vector.shape_cast %71 : vector<64xf32> to vector<64x1xf32>
    %73 = arith.mulf %69, %69 : vector<64x8xf32>
    %cst_52 = arith.constant dense<0.000000e+00> : vector<64xf32>
    %74 = vector.multi_reduction <add>, %73, %cst_52 [1] : vector<64x8xf32> to vector<64xf32>
    %75 = vector.shape_cast %74 : vector<64xf32> to vector<64x1xf32>
    %76 = arith.addf %72, %75 : vector<64x1xf32>
    %cst_53 = arith.constant 1.600000e+01 : f32
    %77 = vector.broadcast %cst_53 : f32 to vector<64x1xf32>
    %78 = arith.divf %76, %77 : vector<64x1xf32>
    %cst_54 = arith.constant 9.99999997E-7 : f32
    %79 = vector.broadcast %cst_54 : f32 to vector<64x1xf32>
    %80 = arith.addf %78, %79 : vector<64x1xf32>
    %81 = math.rsqrt %80 : vector<64x1xf32>
    %82 = vector.broadcast %81 : vector<64x1xf32> to vector<64x8xf32>
    %83 = arith.mulf %68, %82 : vector<64x8xf32>
    %84 = vector.broadcast %21 : vector<1x8xf32> to vector<64x8xf32>
    %85 = arith.mulf %83, %84 : vector<64x8xf32>
    %86 = vector.broadcast %81 : vector<64x1xf32> to vector<64x8xf32>
    %87 = arith.mulf %69, %86 : vector<64x8xf32>
    %88 = vector.broadcast %23 : vector<1x8xf32> to vector<64x8xf32>
    %89 = arith.mulf %87, %88 : vector<64x8xf32>
    %90 = arith.mulf %85, %6 : vector<64x8xf32>
    %91 = arith.mulf %89, %7 : vector<64x8xf32>
    %92 = arith.subf %90, %91 : vector<64x8xf32>
    %93 = arith.truncf %92 : vector<64x8xf32> to vector<64x8xbf16>
    %94 = arith.mulf %85, %7 : vector<64x8xf32>
    %95 = arith.mulf %89, %6 : vector<64x8xf32>
    %96 = arith.addf %94, %95 : vector<64x8xf32>
    %97 = arith.truncf %96 : vector<64x8xf32> to vector<64x8xbf16>
    %98 = vector.extract_strided_slice %67 {offsets = [0, 48], sizes = [64, 16], strides = [1, 1]} : vector<64x64xf32> to vector<64x16xf32>
    %99 = arith.truncf %98 : vector<64x16xf32> to vector<64x16xbf16>
    %100 = vector.extract_strided_slice %67 {offsets = [0, 0], sizes = [64, 8], strides = [1, 1]} : vector<64x64xf32> to vector<64x8xf32>
    %101 = vector.extract_strided_slice %67 {offsets = [0, 16], sizes = [64, 8], strides = [1, 1]} : vector<64x64xf32> to vector<64x8xf32>
    %102 = arith.mulf %100, %100 : vector<64x8xf32>
    %cst_55 = arith.constant dense<0.000000e+00> : vector<64xf32>
    %103 = vector.multi_reduction <add>, %102, %cst_55 [1] : vector<64x8xf32> to vector<64xf32>
    %104 = vector.shape_cast %103 : vector<64xf32> to vector<64x1xf32>
    %105 = arith.mulf %101, %101 : vector<64x8xf32>
    %cst_56 = arith.constant dense<0.000000e+00> : vector<64xf32>
    %106 = vector.multi_reduction <add>, %105, %cst_56 [1] : vector<64x8xf32> to vector<64xf32>
    %107 = vector.shape_cast %106 : vector<64xf32> to vector<64x1xf32>
    %108 = arith.addf %104, %107 : vector<64x1xf32>
    %cst_57 = arith.constant 1.600000e+01 : f32
    %109 = vector.broadcast %cst_57 : f32 to vector<64x1xf32>
    %110 = arith.divf %108, %109 : vector<64x1xf32>
    %cst_58 = arith.constant 9.99999997E-7 : f32
    %111 = vector.broadcast %cst_58 : f32 to vector<64x1xf32>
    %112 = arith.addf %110, %111 : vector<64x1xf32>
    %113 = math.rsqrt %112 : vector<64x1xf32>
    %114 = vector.broadcast %113 : vector<64x1xf32> to vector<64x8xf32>
    %115 = arith.mulf %100, %114 : vector<64x8xf32>
    %116 = vector.broadcast %17 : vector<1x8xf32> to vector<64x8xf32>
    %117 = arith.mulf %115, %116 : vector<64x8xf32>
    %118 = vector.broadcast %113 : vector<64x1xf32> to vector<64x8xf32>
    %119 = arith.mulf %101, %118 : vector<64x8xf32>
    %120 = vector.broadcast %19 : vector<1x8xf32> to vector<64x8xf32>
    %121 = arith.mulf %119, %120 : vector<64x8xf32>
    %122 = arith.mulf %117, %6 : vector<64x8xf32>
    %123 = arith.mulf %121, %7 : vector<64x8xf32>
    %124 = arith.subf %122, %123 : vector<64x8xf32>
    %125 = arith.truncf %124 : vector<64x8xf32> to vector<64x8xbf16>
    %126 = arith.mulf %117, %7 : vector<64x8xf32>
    %127 = arith.mulf %121, %6 : vector<64x8xf32>
    %128 = arith.addf %126, %127 : vector<64x8xf32>
    %129 = arith.truncf %128 : vector<64x8xf32> to vector<64x8xbf16>
    %cst_59 = arith.constant dense<0.000000e+00> : vector<64x64xf32>
    %130 = tpu.matmul %125, %93, %cst_59 {dimension_numbers = #tpu.dot_dimension_numbers<[1], [1], [0], [0], [0, 0, 1, 0], [], []>} : vector<64x8xbf16>, vector<64x8xbf16>, vector<64x64xf32> -> vector<64x64xf32>
    %cst_60 = arith.constant dense<0.000000e+00> : vector<64x64xf32>
    %131 = tpu.matmul %129, %97, %cst_60 {dimension_numbers = #tpu.dot_dimension_numbers<[1], [1], [0], [0], [0, 0, 1, 0], [], []>} : vector<64x8xbf16>, vector<64x8xbf16>, vector<64x64xf32> -> vector<64x64xf32>
    %132 = arith.addf %130, %131 : vector<64x64xf32>
    %cst_61 = arith.constant 2.500000e-01 : f32
    %133 = vector.broadcast %cst_61 : f32 to vector<64x64xf32>
    %134 = arith.mulf %132, %133 : vector<64x64xf32>
    %135 = vector.broadcast %3 : vector<1x64xf32> to vector<64x64xf32>
    %136 = arith.addf %134, %135 : vector<64x64xf32>
    %cst_62 = arith.constant dense<0xFF800000> : vector<64xf32>
    %137 = vector.multi_reduction <maximumf>, %136, %cst_62 [1] : vector<64x64xf32> to vector<64xf32>
    %138 = vector.shape_cast %137 : vector<64xf32> to vector<64x1xf32>
    %139 = vector.broadcast %138 : vector<64x1xf32> to vector<64x64xf32>
    %140 = arith.subf %136, %139 : vector<64x64xf32>
    %141 = math.exp %140 : vector<64x64xf32>
    %cst_63 = arith.constant dense<0.000000e+00> : vector<64xf32>
    %142 = vector.multi_reduction <add>, %141, %cst_63 [1] : vector<64x64xf32> to vector<64xf32>
    %143 = vector.shape_cast %142 : vector<64xf32> to vector<64x1xf32>
    %144 = tpu.reciprocal %143 {approx = true} : vector<64x1xf32> -> vector<64x1xf32>
    %145 = vector.broadcast %144 : vector<64x1xf32> to vector<64x64xf32>
    %146 = arith.mulf %141, %145 : vector<64x64xf32>
    %147 = arith.truncf %146 : vector<64x64xf32> to vector<64x64xbf16>
    %cst_64 = arith.constant dense<0.000000e+00> : vector<64x16xf32>
    %148 = tpu.matmul %147, %99, %cst_64 {dimension_numbers = #tpu.dot_dimension_numbers<[1], [0], [0], [1], [0, 0, 1, 1], [], []>} : vector<64x64xbf16>, vector<64x16xbf16>, vector<64x16xf32> -> vector<64x16xf32>
    %149 = vector.extract_strided_slice %67 {offsets = [0, 8], sizes = [64, 8], strides = [1, 1]} : vector<64x64xf32> to vector<64x8xf32>
    %150 = vector.extract_strided_slice %67 {offsets = [0, 24], sizes = [64, 8], strides = [1, 1]} : vector<64x64xf32> to vector<64x8xf32>
    %151 = arith.mulf %149, %149 : vector<64x8xf32>
    %cst_65 = arith.constant dense<0.000000e+00> : vector<64xf32>
    %152 = vector.multi_reduction <add>, %151, %cst_65 [1] : vector<64x8xf32> to vector<64xf32>
    %153 = vector.shape_cast %152 : vector<64xf32> to vector<64x1xf32>
    %154 = arith.mulf %150, %150 : vector<64x8xf32>
    %cst_66 = arith.constant dense<0.000000e+00> : vector<64xf32>
    %155 = vector.multi_reduction <add>, %154, %cst_66 [1] : vector<64x8xf32> to vector<64xf32>
    %156 = vector.shape_cast %155 : vector<64xf32> to vector<64x1xf32>
    %157 = arith.addf %153, %156 : vector<64x1xf32>
    %cst_67 = arith.constant 1.600000e+01 : f32
    %158 = vector.broadcast %cst_67 : f32 to vector<64x1xf32>
    %159 = arith.divf %157, %158 : vector<64x1xf32>
    %cst_68 = arith.constant 9.99999997E-7 : f32
    %160 = vector.broadcast %cst_68 : f32 to vector<64x1xf32>
    %161 = arith.addf %159, %160 : vector<64x1xf32>
    %162 = math.rsqrt %161 : vector<64x1xf32>
    %163 = vector.broadcast %162 : vector<64x1xf32> to vector<64x8xf32>
    %164 = arith.mulf %149, %163 : vector<64x8xf32>
    %165 = vector.broadcast %17 : vector<1x8xf32> to vector<64x8xf32>
    %166 = arith.mulf %164, %165 : vector<64x8xf32>
    %167 = vector.broadcast %162 : vector<64x1xf32> to vector<64x8xf32>
    %168 = arith.mulf %150, %167 : vector<64x8xf32>
    %169 = vector.broadcast %19 : vector<1x8xf32> to vector<64x8xf32>
    %170 = arith.mulf %168, %169 : vector<64x8xf32>
    %171 = arith.mulf %166, %6 : vector<64x8xf32>
    %172 = arith.mulf %170, %7 : vector<64x8xf32>
    %173 = arith.subf %171, %172 : vector<64x8xf32>
    %174 = arith.truncf %173 : vector<64x8xf32> to vector<64x8xbf16>
    %175 = arith.mulf %166, %7 : vector<64x8xf32>
    %176 = arith.mulf %170, %6 : vector<64x8xf32>
    %177 = arith.addf %175, %176 : vector<64x8xf32>
    %178 = arith.truncf %177 : vector<64x8xf32> to vector<64x8xbf16>
    %cst_69 = arith.constant dense<0.000000e+00> : vector<64x64xf32>
    %179 = tpu.matmul %174, %93, %cst_69 {dimension_numbers = #tpu.dot_dimension_numbers<[1], [1], [0], [0], [0, 0, 1, 0], [], []>} : vector<64x8xbf16>, vector<64x8xbf16>, vector<64x64xf32> -> vector<64x64xf32>
    %cst_70 = arith.constant dense<0.000000e+00> : vector<64x64xf32>
    %180 = tpu.matmul %178, %97, %cst_70 {dimension_numbers = #tpu.dot_dimension_numbers<[1], [1], [0], [0], [0, 0, 1, 0], [], []>} : vector<64x8xbf16>, vector<64x8xbf16>, vector<64x64xf32> -> vector<64x64xf32>
    %181 = arith.addf %179, %180 : vector<64x64xf32>
    %cst_71 = arith.constant 2.500000e-01 : f32
    %182 = vector.broadcast %cst_71 : f32 to vector<64x64xf32>
    %183 = arith.mulf %181, %182 : vector<64x64xf32>
    %184 = vector.broadcast %3 : vector<1x64xf32> to vector<64x64xf32>
    %185 = arith.addf %183, %184 : vector<64x64xf32>
    %cst_72 = arith.constant dense<0xFF800000> : vector<64xf32>
    %186 = vector.multi_reduction <maximumf>, %185, %cst_72 [1] : vector<64x64xf32> to vector<64xf32>
    %187 = vector.shape_cast %186 : vector<64xf32> to vector<64x1xf32>
    %188 = vector.broadcast %187 : vector<64x1xf32> to vector<64x64xf32>
    %189 = arith.subf %185, %188 : vector<64x64xf32>
    %190 = math.exp %189 : vector<64x64xf32>
    %cst_73 = arith.constant dense<0.000000e+00> : vector<64xf32>
    %191 = vector.multi_reduction <add>, %190, %cst_73 [1] : vector<64x64xf32> to vector<64xf32>
    %192 = vector.shape_cast %191 : vector<64xf32> to vector<64x1xf32>
    %193 = tpu.reciprocal %192 {approx = true} : vector<64x1xf32> -> vector<64x1xf32>
    %194 = vector.broadcast %193 : vector<64x1xf32> to vector<64x64xf32>
    %195 = arith.mulf %190, %194 : vector<64x64xf32>
    %196 = arith.truncf %195 : vector<64x64xf32> to vector<64x64xbf16>
    %cst_74 = arith.constant dense<0.000000e+00> : vector<64x16xf32>
    %197 = tpu.matmul %196, %99, %cst_74 {dimension_numbers = #tpu.dot_dimension_numbers<[1], [0], [0], [1], [0, 0, 1, 1], [], []>} : vector<64x64xbf16>, vector<64x16xbf16>, vector<64x16xf32> -> vector<64x16xf32>
    %198 = tpu.concatenate %148, %197 in 1 : vector<64x16xf32>, vector<64x16xf32> -> vector<64x32xf32>
    %199 = arith.truncf %198 : vector<64x32xf32> to vector<64x32xbf16>
    %c0_75 = arith.constant 0 : index
    %c0_76 = arith.constant 0 : index
    %200 = vector.load %arg8[%c0_75, %c0_76] : memref<32x32xbf16, #tpu.memory_space<vmem>>, vector<32x32xbf16>
    %cst_77 = arith.constant dense<0.000000e+00> : vector<64x32xf32>
    %201 = tpu.matmul %199, %200, %cst_77 {dimension_numbers = #tpu.dot_dimension_numbers<[1], [0], [0], [1], [0, 0, 1, 1], [], []>} : vector<64x32xbf16>, vector<32x32xbf16>, vector<64x32xf32> -> vector<64x32xf32>
    %202 = arith.mulf %201, %201 : vector<64x32xf32>
    %cst_78 = arith.constant dense<0.000000e+00> : vector<64xf32>
    %203 = vector.multi_reduction <add>, %202, %cst_78 [1] : vector<64x32xf32> to vector<64xf32>
    %204 = vector.shape_cast %203 : vector<64xf32> to vector<64x1xf32>
    %cst_79 = arith.constant 3.200000e+01 : f32
    %205 = vector.broadcast %cst_79 : f32 to vector<64x1xf32>
    %206 = arith.divf %204, %205 : vector<64x1xf32>
    %cst_80 = arith.constant 9.99999974E-6 : f32
    %207 = vector.broadcast %cst_80 : f32 to vector<64x1xf32>
    %208 = arith.addf %206, %207 : vector<64x1xf32>
    %209 = math.rsqrt %208 : vector<64x1xf32>
    %210 = vector.broadcast %209 : vector<64x1xf32> to vector<64x32xf32>
    %211 = arith.mulf %201, %210 : vector<64x32xf32>
    %212 = vector.broadcast %11 : vector<1x32xf32> to vector<64x32xf32>
    %213 = arith.mulf %211, %212 : vector<64x32xf32>
    %214 = math.tanh %46 : vector<1x32xf32>
    %215 = vector.broadcast %214 : vector<1x32xf32> to vector<64x32xf32>
    %216 = arith.mulf %215, %213 : vector<64x32xf32>
    %217 = arith.addf %29, %216 : vector<64x32xf32>
    %218 = arith.mulf %217, %217 : vector<64x32xf32>
    %cst_81 = arith.constant dense<0.000000e+00> : vector<64xf32>
    %219 = vector.multi_reduction <add>, %218, %cst_81 [1] : vector<64x32xf32> to vector<64xf32>
    %220 = vector.shape_cast %219 : vector<64xf32> to vector<64x1xf32>
    %cst_82 = arith.constant 3.200000e+01 : f32
    %221 = vector.broadcast %cst_82 : f32 to vector<64x1xf32>
    %222 = arith.divf %220, %221 : vector<64x1xf32>
    %cst_83 = arith.constant 9.99999974E-6 : f32
    %223 = vector.broadcast %cst_83 : f32 to vector<64x1xf32>
    %224 = arith.addf %222, %223 : vector<64x1xf32>
    %225 = math.rsqrt %224 : vector<64x1xf32>
    %226 = vector.broadcast %225 : vector<64x1xf32> to vector<64x32xf32>
    %227 = arith.mulf %217, %226 : vector<64x32xf32>
    %228 = vector.broadcast %13 : vector<1x32xf32> to vector<64x32xf32>
    %229 = arith.mulf %227, %228 : vector<64x32xf32>
    %cst_84 = arith.constant 1.000000e+00 : f32
    %230 = vector.broadcast %cst_84 : f32 to vector<1x32xf32>
    %231 = arith.addf %230, %47 : vector<1x32xf32>
    %232 = vector.broadcast %231 : vector<1x32xf32> to vector<64x32xf32>
    %233 = arith.mulf %229, %232 : vector<64x32xf32>
    %234 = arith.truncf %233 : vector<64x32xf32> to vector<64x32xbf16>
    %c0_85 = arith.constant 0 : index
    %c0_86 = arith.constant 0 : index
    %235 = vector.load %arg11[%c0_85, %c0_86] : memref<32x192xbf16, #tpu.memory_space<vmem>>, vector<32x192xbf16>
    %cst_87 = arith.constant dense<0.000000e+00> : vector<64x192xf32>
    %236 = tpu.matmul %234, %235, %cst_87 {dimension_numbers = #tpu.dot_dimension_numbers<[1], [0], [0], [1], [0, 0, 1, 1], [], []>} : vector<64x32xbf16>, vector<32x192xbf16>, vector<64x192xf32> -> vector<64x192xf32>
    %237 = vector.extract_strided_slice %236 {offsets = [0, 0], sizes = [64, 96], strides = [1, 1]} : vector<64x192xf32> to vector<64x96xf32>
    %238 = vector.extract_strided_slice %236 {offsets = [0, 96], sizes = [64, 96], strides = [1, 1]} : vector<64x192xf32> to vector<64x96xf32>
    %cst_88 = arith.constant 0.000000e+00 : f32
    %239 = vector.broadcast %cst_88 : f32 to vector<64x96xf32>
    %240 = arith.subf %239, %237 : vector<64x96xf32>
    %241 = math.exp %240 : vector<64x96xf32>
    %cst_89 = arith.constant 1.000000e+00 : f32
    %242 = vector.broadcast %cst_89 : f32 to vector<64x96xf32>
    %243 = arith.addf %242, %241 : vector<64x96xf32>
    %cst_90 = arith.constant 1.000000e+00 : f32
    %244 = vector.broadcast %cst_90 : f32 to vector<64x96xf32>
    %245 = arith.divf %244, %243 : vector<64x96xf32>
    %246 = arith.mulf %237, %245 : vector<64x96xf32>
    %247 = arith.mulf %246, %238 : vector<64x96xf32>
    %248 = arith.truncf %247 : vector<64x96xf32> to vector<64x96xbf16>
    %c0_91 = arith.constant 0 : index
    %c0_92 = arith.constant 0 : index
    %249 = vector.load %arg12[%c0_91, %c0_92] : memref<96x32xbf16, #tpu.memory_space<vmem>>, vector<96x32xbf16>
    %cst_93 = arith.constant dense<0.000000e+00> : vector<64x32xf32>
    %250 = tpu.matmul %248, %249, %cst_93 {dimension_numbers = #tpu.dot_dimension_numbers<[1], [0], [0], [1], [0, 0, 1, 1], [], []>} : vector<64x96xbf16>, vector<96x32xbf16>, vector<64x32xf32> -> vector<64x32xf32>
    %251 = arith.mulf %250, %250 : vector<64x32xf32>
    %cst_94 = arith.constant dense<0.000000e+00> : vector<64xf32>
    %252 = vector.multi_reduction <add>, %251, %cst_94 [1] : vector<64x32xf32> to vector<64xf32>
    %253 = vector.shape_cast %252 : vector<64xf32> to vector<64x1xf32>
    %cst_95 = arith.constant 3.200000e+01 : f32
    %254 = vector.broadcast %cst_95 : f32 to vector<64x1xf32>
    %255 = arith.divf %253, %254 : vector<64x1xf32>
    %cst_96 = arith.constant 9.99999974E-6 : f32
    %256 = vector.broadcast %cst_96 : f32 to vector<64x1xf32>
    %257 = arith.addf %255, %256 : vector<64x1xf32>
    %258 = math.rsqrt %257 : vector<64x1xf32>
    %259 = vector.broadcast %258 : vector<64x1xf32> to vector<64x32xf32>
    %260 = arith.mulf %250, %259 : vector<64x32xf32>
    %261 = vector.broadcast %15 : vector<1x32xf32> to vector<64x32xf32>
    %262 = arith.mulf %260, %261 : vector<64x32xf32>
    %263 = math.tanh %48 : vector<1x32xf32>
    %264 = vector.broadcast %263 : vector<1x32xf32> to vector<64x32xf32>
    %265 = arith.mulf %264, %262 : vector<64x32xf32>
    %266 = arith.addf %217, %265 : vector<64x32xf32>
    %c0_97 = arith.constant 0 : index
    %c0_98 = arith.constant 0 : index
    %c0_99 = arith.constant 0 : index
    %267 = vector.load %arg15[%c0_97, %c0_98, %c0_99] : memref<1x64x32xf32, #tpu.memory_space<vmem>>, vector<1x64x32xf32>
    %268 = vector.shape_cast %267 : vector<1x64x32xf32> to vector<64x32xf32>
    %269 = vector.shape_cast %266 : vector<64x32xf32> to vector<1x64x32xf32>
    tpu.vector_store %arg15[%c0_97, %c0_98, %c0_99], %269 {strides = array<i32>} : memref<1x64x32xf32, #tpu.memory_space<vmem>>, vector<1x64x32xf32>,
    return
  }
  func.func @transform_0(%arg0: i32) -> (i32, i32, i32) {
    %c0_i32 = arith.constant 0 : i32
    %c0_i32_0 = arith.constant 0 : i32
    %c0_i32_1 = arith.constant 0 : i32
    return %arg0, %c0_i32, %c0_i32_0 : i32, i32, i32
  }
  func.func @transform_1(%arg0: i32) -> (i32, i32, i32) {
    %c0_i32 = arith.constant 0 : i32
    %c0_i32_0 = arith.constant 0 : i32
    %c0_i32_1 = arith.constant 0 : i32
    return %arg0, %c0_i32, %c0_i32_0 : i32, i32, i32
  }
  func.func @transform_2(%arg0: i32) -> (i32, i32, i32) {
    %c0_i32 = arith.constant 0 : i32
    %c0_i32_0 = arith.constant 0 : i32
    %c0_i32_1 = arith.constant 0 : i32
    return %arg0, %c0_i32, %c0_i32_0 : i32, i32, i32
  }
  func.func @transform_3(%arg0: i32) -> (i32, i32, i32) {
    %c0_i32 = arith.constant 0 : i32
    %c0_i32_0 = arith.constant 0 : i32
    %c0_i32_1 = arith.constant 0 : i32
    return %arg0, %c0_i32, %c0_i32_0 : i32, i32, i32
  }
  func.func @transform_4(%arg0: i32) -> (i32, i32) {
    %c0_i32 = arith.constant 0 : i32
    %c0_i32_0 = arith.constant 0 : i32
    %c0_i32_1 = arith.constant 0 : i32
    return %c0_i32, %c0_i32_0 : i32, i32
  }
  func.func @transform_5(%arg0: i32) -> (i32, i32) {
    %c0_i32 = arith.constant 0 : i32
    %c0_i32_0 = arith.constant 0 : i32
    %c0_i32_1 = arith.constant 0 : i32
    return %c0_i32, %c0_i32_0 : i32, i32
  }
  func.func @transform_6(%arg0: i32) -> (i32, i32) {
    %c0_i32 = arith.constant 0 : i32
    %c0_i32_0 = arith.constant 0 : i32
    %c0_i32_1 = arith.constant 0 : i32
    return %c0_i32, %c0_i32_0 : i32, i32
  }
  func.func @transform_7(%arg0: i32) -> (i32, i32) {
    %c0_i32 = arith.constant 0 : i32
    %c0_i32_0 = arith.constant 0 : i32
    %c0_i32_1 = arith.constant 0 : i32
    return %c0_i32, %c0_i32_0 : i32, i32
  }
  func.func @transform_8(%arg0: i32) -> (i32, i32, i32) {
    %c0_i32 = arith.constant 0 : i32
    %c0_i32_0 = arith.constant 0 : i32
    %c0_i32_1 = arith.constant 0 : i32
    %c0_i32_2 = arith.constant 0 : i32
    return %c0_i32, %c0_i32_0, %c0_i32_1 : i32, i32, i32
  }
  func.func @transform_9(%arg0: i32) -> (i32, i32, i32) {
    %c0_i32 = arith.constant 0 : i32
    %c0_i32_0 = arith.constant 0 : i32
    %c0_i32_1 = arith.constant 0 : i32
    %c0_i32_2 = arith.constant 0 : i32
    return %c0_i32, %c0_i32_0, %c0_i32_1 : i32, i32, i32
  }
  func.func @transform_10(%arg0: i32) -> (i32, i32) {
    %c0_i32 = arith.constant 0 : i32
    %c0_i32_0 = arith.constant 0 : i32
    %c0_i32_1 = arith.constant 0 : i32
    return %c0_i32, %c0_i32_0 : i32, i32
  }
  func.func @transform_11(%arg0: i32) -> (i32, i32) {
    %c0_i32 = arith.constant 0 : i32
    %c0_i32_0 = arith.constant 0 : i32
    %c0_i32_1 = arith.constant 0 : i32
    return %c0_i32, %c0_i32_0 : i32, i32
  }
  func.func @transform_12(%arg0: i32) -> (i32, i32) {
    %c0_i32 = arith.constant 0 : i32
    %c0_i32_0 = arith.constant 0 : i32
    %c0_i32_1 = arith.constant 0 : i32
    return %c0_i32, %c0_i32_0 : i32, i32
  }
  func.func @transform_13(%arg0: i32) -> (i32, i32) {
    %c0_i32 = arith.constant 0 : i32
    %c0_i32_0 = arith.constant 0 : i32
    %c0_i32_1 = arith.constant 0 : i32
    return %c0_i32, %c0_i32_0 : i32, i32
  }
  func.func @transform_14(%arg0: i32) -> (i32, i32, i32) {
    %c0_i32 = arith.constant 0 : i32
    %c0_i32_0 = arith.constant 0 : i32
    %c0_i32_1 = arith.constant 0 : i32
    return %arg0, %c0_i32, %c0_i32_0 : i32, i32, i32
  }
}

</mosaic_0001>

<bundles_post_ra>
// kernel: initial_layer_forward.3
= control target key start
LH: loop header
LB: loop body
LE: loop exit
PB: predicated region body
PF: predicated region fallthrough
CT: control target
= control target key end

     0   :  { %vm229_vm4 = vcmask 261120   ;;  %vm246_vm5 = vcmask 254976   ;;  %s445_s1 = inlined_call_operand.vmem [shape: bf16[256,32], index: 1, kind: input, shape index: {}]   ;;  %s446_s0 = inlined_call_operand.vmem [shape: f32[2,256], index: 0, kind: input, shape index: {}]   ;;  %s447_s2 = inlined_call_operand.vmem [shape: f32[1,32], index: 2, kind: input, shape index: {}]   ;;  %s448_s4 = inlined_call_operand.vmem [shape: f32[1,32], index: 4, kind: input, shape index: {}]   ;;  %s449_s3 = inlined_call_operand.vmem [shape: bf16[32,32], index: 3, kind: input, shape index: {}]   ;;  %s450_s5 = inlined_call_operand.vmem [shape: f32[2,32], index: 5, kind: output, shape index: {}]  }
   0x1   :  { %v332_v0 = vld [vmem:[%s445_s1 + $0x38] sm:$0xff]  ;;  %v331_v2 = vld [vmem:[%s445_s1 + $0x30] sm:$0xff]  ;;  %v21_v4 = vld [vmem:[%s446_s0] sm:$0xf] }
   0x2   :  { %v340_v1 = vld [vmem:[%s445_s1 + $0x78] sm:$0xff]  ;;  %162 = vmatpush.bf16.msra.mxu0 %v332_v0  ;;  %v339_v3 = vld [vmem:[%s445_s1 + $0x70] sm:$0xff]  ;;  %v330_v5 = vld [vmem:[%s445_s1 + $0x28] sm:$0xff]  ;;  %23 = vst [vmem:[#allocation1] ss:$4 sm:$0xff] %v21_v4 }
   0x3   :  { %175 = vmatpush.bf16.msra.mxu1 %v340_v1  ;;  %v338_v6 = vld [vmem:[%s445_s1 + $0x68] sm:$0xff]  ;;  %v329_v7 = vld [vmem:[%s445_s1 + $0x20] sm:$0xff]  ;;  %v328_v9 = vld [vmem:[%s445_s1 + $0x18] sm:$0xff] }
   0x4   :  { %v337_v8 = vld [vmem:[%s445_s1 + $0x60] sm:$0xff]  ;;  %v336_v10 = vld [vmem:[%s445_s1 + $0x58] sm:$0xff]  ;;  %v327_v11 = vld [vmem:[%s445_s1 + $0x10] sm:$0xff] }
   0x5   :  { %v335_v12 = vld [vmem:[%s445_s1 + $0x50] sm:$0xff]  ;;  %v326_v13 = vld [vmem:[%s445_s1 + $0x8] sm:$0xff]  ;;  %v325_v15 = vld [vmem:[%s445_s1] sm:$0xff] }
   0x6   :  { %163 = vmatpush.bf16.msra.mxu0 %v331_v2  ;;  %v334_v14 = vld [vmem:[%s445_s1 + $0x48] sm:$0xff]  ;;  %v333_v16 = vld [vmem:[%s445_s1 + $0x40] sm:$0xff] }
   0x7   :  { %176 = vmatpush.bf16.msra.mxu1 %v339_v3  ;;  %v343_v21 = vld [vmem:[%s447_s2] ss:$0 sm:$0xff]  ;;  %v342_v22 = vld [vmem:[%s449_s3 + $0x8] sm:$0xff] }
   0x8   :  { %239 = vmatpush.bf16.msra.mxu2 %v342_v22  ;;  %v341_v26 = vld [vmem:[%s449_s3] sm:$0xff] }
   0x9   :  { %v24_v17 = vld.sshfl [vmem:[#allocation1] sm:$0xff pattern:$0x73625140]  ;;  %v25_v18 = vld.sshfl [vmem:[#allocation1 + $0x8] sm:$0xff pattern:$0x73625140] }
   0xa   :  { %164 = vmatpush.bf16.msra.mxu0 %v330_v5  ;;  %v28_v19 = vpack.c.bf16 %v24_v17, %v24_v17  ;;  %v29_v20 = vpack.c.bf16 %v25_v18, %v25_v18  ;;  %v344_v46 = vld [vmem:[%s448_s4] ss:$0 sm:$0xff] }
   0xb   :  { %177 = vmatpush.bf16.msra.mxu1 %v338_v6 }
   0xc   :  { %240 = vmatpush.bf16.msra.mxu2 %v341_v26 }
   0xe   :  { %165 = vmatpush.bf16.msra.mxu0 %v329_v7 }
   0xf   :  { %178 = vmatpush.bf16.msra.mxu1 %v337_v8 }
  0x12   :  { %166 = vmatpush.bf16.msra.mxu0 %v328_v9 }
  0x13   :  { %179 = vmatpush.bf16.msra.mxu1 %v336_v10 }
  0x16   :  { %167 = vmatpush.bf16.msra.mxu0 %v327_v11 }
  0x17   :  { %180 = vmatpush.bf16.msra.mxu1 %v335_v12 }
  0x1a   :  { %168 = vmatpush.bf16.msra.mxu0 %v326_v13 }
  0x1b   :  { %181 = vmatpush.bf16.msra.mxu1 %v334_v14 }
  0x1e   :  { %169 = vmatpush.bf16.msra.mxu0 %v325_v15 }
  0x1f   :  { %182 = vmatpush.bf16.msra.mxu1 %v333_v16 }
  0x21   :  { %170 = vmatmul.bf16.vlgmr.msra.gmra.mxu0 %v28_v19 }
  0x22   :  { %183 = vmatmul.bf16.vlgmr.msra.gmra.mxu1 %v29_v20 }
  0x9e   :  { %v171_v23 = vpop.f32.mrf.mxu0 }
  0x9f   :  { %v184_v24 = vpop.f32.mrf.mxu1  ;;  %v172_v25 = vadd.f32 %v343_v21, %v171_v23 }
  0xa1   :  { %v185_v27 = vadd.f32 %v184_v24, %v172_v25 }
  0xa3   :  { %v188_v28 = vsub.f32 0.0, %v185_v27 }
  0xa5   :  { %v189_v29 = vmul.f32 1.442695, %v188_v28 }
  0xa6   :  { %v173_v30 = vpop.f32.mrf.mxu0 }
  0xa7   :  { %v186_v31 = vpop.f32.mrf.mxu1  ;;  %345 = vpow2.f32 %v189_v29 }
  0xad   :  { %v346_v32 = vpop.eup %345 }
  0xae   :  { %v191_v33 = vadd.f32 1.0, %v346_v32 }
  0xb0   :  { %347 = vrcp.f32 %v191_v33  ;;  %v203_v37 = vand.u32 2147483648, %v191_v33  ;;  %v201_v39 = vand.u32 2147483647, %v191_v33  ;;  %vm197_vm1 = vweird.f32 %v191_v33 }
  0xb2   :  { %v204_v41 = vor.u32 1.1754944e-38, %v203_v37  ;;  %vm202_vm3 = vcmp.eq.f32.partialorder %v201_v39, 8.507059e+37 }
  0xb6   :  { %v348_v34 = vpop.eup %347 }
  0xb7   :  { %v193_v35 = vmul.f32 %v348_v34, %v191_v33  ;;  %vm198_vm0 = vweird.f32 %v348_v34 }
  0xb8   :  { %vm199_vm2 = vmor %vm197_vm1, %vm198_vm0 }
  0xb9   :  { %v194_v36 = vsub.f32 1.0, %v193_v35 }
  0xbb   :  { %v195_v38 = vmul.f32 %v348_v34, %v194_v36 }
  0xbd   :  { %v196_v40 = vadd.f32 %v348_v34, %v195_v38 }
  0xbf   :  { %v200_v42 = vsel %vm199_vm2, %v348_v34, %v196_v40 }
  0xc0   :  { %v205_v43 = vsel %vm202_vm3, %v204_v41, %v200_v42 }
  0xc1   :  { %v207_v44 = vmul.f32 %v205_v43, %v185_v27 }
  0xc3   :  { %v208_v45 = vpack.c.bf16 %v207_v44, %v207_v44 }
  0xc5   :  { %324 = vmatmul.msk.bf16.vlgmr.msra.gmra.mxu2 %vm229_vm4, %v208_v45 }
 0x148   :  { %v242_v47 = vpop.f32.mrf.mxu2 }
 0x149   :  { %v243_v48 = vadd.f32 %v344_v46, %v242_v47 }
 0x14b   :  { %247 = vst.msk [vmem:[%s450_s5] sm:$0x3] %vm246_vm5, %v243_v48 }
 0x150   :  { %v244_v49 = vpop.f32.mrf.mxu2 }

// kernel: initial_layer_forward.4
= control target key start
LH: loop header
LB: loop body
LE: loop exit
PB: predicated region body
PF: predicated region fallthrough
CT: control target
= control target key end

     0   :  { %s1500_s21 = smov 0   ;;  %s1711_s0 = inlined_call_operand.vmem [shape: f32[2,8,32], index: 0, kind: input, shape index: {}]   ;;  %s1712_s1 = inlined_call_operand.vmem [shape: f32[2,1,8], index: 1, kind: input, shape index: {}]   ;;  %s1713_s2 = inlined_call_operand.vmem [shape: f32[2,8,16], index: 2, kind: input, shape index: {}]   ;;  %s1714_s3 = inlined_call_operand.vmem [shape: f32[1,32], index: 3, kind: input, shape index: {}]   ;;  %s1715_s4 = inlined_call_operand.vmem [shape: bf16[32,32], index: 4, kind: input, shape index: {}]   ;;  %s1716_s5 = inlined_call_operand.vmem [shape: f32[1,32], index: 5, kind: input, shape index: {}]   ;;  %s1717_s6 = inlined_call_operand.vmem [shape: bf16[32,64], index: 6, kind: input, shape index: {}]   ;;  %s1718_s7 = inlined_call_operand.vmem [shape: bf16[32,32], index: 7, kind: input, shape index: {}]   ;;  %s1719_s8 = inlined_call_operand.vmem [shape: f32[4,1,8], index: 8, kind: input, shape index: {}]   ;;  %s1720_s9 = inlined_call_operand.vmem [shape: f32[4,1,32], index: 9, kind: input, shape index: {}]   ;;  %s1721_s10 = inlined_call_operand.vmem [shape: bf16[32,192], index: 10, kind: input, shape index: {}]   ;;  %s1722_s11 = inlined_call_operand.vmem [shape: bf16[96,32], index: 11, kind: input, shape index: {}]   ;;  %s1723_s12 = inlined_call_operand.vmem [shape: f32[2,8,32], index: 12, kind: output, shape index: {}]  }
   0x1 LB: > { %s1242_s22 = sadd.s32 4294967295, %s1420_s21   ;;  %p1246_p0 = scmp.ge.s32.totalorder %s1420_s21, 1  ;;  %s1420_s21 = sphi %s1500_s21, %s22_s21  }
   0x2   : > { %p378_p1 = scmp.lt.s32.totalorder %s1420_s21, 3 }
   0x4   : > { %p379_p2 = pnand %p1246_p0, %p378_p1 }
   0x5   : > { %p425_p3 = scmp.lt.s32.totalorder (!%p379_p2), %s1242_s22, 1  ;;  %s1424_s27 = smov (!%p379_p2), 96  }
   0x6   : > { %382 = sbr.rel (%p379_p2) target bundleno = 2727 (0xaa7), region = 68  ;;  %s1425_s28 = smov (!%p379_p2), 104  }
   0x7   : > { %s1426_s29 = smov (!%p379_p2), 88   ;;  %s1427_s30 = smov (!%p379_p2), 112  }
   0x8   : > { %s1428_s15 = smov (!%p379_p2), 24   ;;  %s1429_s18 = smov (!%p379_p2), 32  }
   0x9   : > { %s1430_s24 = smov (!%p379_p2), 40   ;;  %s1431_s13 = smov (!%p379_p2), 16  }
   0xa   : > { %s1433_s16 = smov (!%p379_p2), 8  }
   0xb   : > { %s1725_s22 = smov (!%p425_p3, %s1242_s22), 1  ;;  %vm460_vm0 = vcmask 261120   ;;  %v1422_v3 = vmov 32.0   ;;  %v1335_v7 = vld [vmem:[%s1715_s4 + $0x8] sm:$0xff]  ;;  %v1334_v9 = vld [vmem:[%s1715_s4] sm:$0xff]  ;;  %vm584_vm8 = vcmask 64512  }
   0xc   : > { %s1511_s23 = sshll.u32 %s1725_s22, 3  ;;  %1382 = vrcp.f32 %v1422_v3  ;;  %518 = vmatpush.bf16.msra.mxu0 %v1335_v7  ;;  %v1371_v21 = vld [vmem:[%s1714_s3] ss:$0 sm:$0xff]  ;;  %v1337_v32 = vld [vmem:[%s1717_s6 + $0x8] sm:$0xff]  ;;  %v1374_v51 = vld [vmem:[%s1719_s8 + $0x1] ss:$0 sm:$0xff] }
   0xd   : > { %s428_s26 = scalar_lea.vmem %s1711_s0, %s1511_s23  ;;  %v1372_v26 = vld [vmem:[%s1716_s5] ss:$0 sm:$0xff]  ;;  %572 = vmatpush.bf16.msra.mxu1 %v1337_v32  ;;  %v1375_v57 = vld [vmem:[%s1719_s8 + $0x2] ss:$0 sm:$0xff]  ;;  %v1376_v60 = vld [vmem:[%s1719_s8 + $0x3] ss:$0 sm:$0xff] }
   0xe   : > { %v441_v0 = vld [vmem:[%s428_s26] sm:$0xff]  ;;  %s1423_s26 = smov 120  }
   0xf   : > { %v459_v1 = vmul.f32 %v441_v0, %v441_v0  ;;  %v1336_v33 = vld [vmem:[%s1717_s6] sm:$0xff] }
  0x10   : > { %519 = vmatpush.bf16.msra.mxu0 %v1334_v9  ;;  %v1373_v43 = vld [vmem:[%s1720_s9] ss:$0 sm:$0xff] }
  0x11   : > { %v461_v2 = vsel %vm460_vm0, %v459_v1, 0.0  ;;  %573 = vmatpush.bf16.msra.mxu1 %v1336_v33 }
  0x12   : > { %462 = vadd.xlane.f32.xlu0 %v461_v2  ;;  %v1383_v4 = vpop.eup %1382  ;;  %v1432_v2 = vmov 16.0  }
  0x13   : > { %v465_v5 = vmul.f32 32.0, %v1383_v4  ;;  %vm469_vm1 = vweird.f32 %v1383_v4 }
  0x15   : > { %v466_v6 = vsub.f32 1.0, %v465_v5 }
  0x17   : > { %v467_v8 = vmul.f32 %v1383_v4, %v466_v6 }
  0x19   : > { %v468_v10 = vadd.f32 %v1383_v4, %v467_v8 }
  0x1b   : > { %v1524_v11 = vsel %vm469_vm1, %v1383_v4, %v468_v10 }
  0x85   : > { %v463_v12 = vpop.xlane.xlu0 %462 }
  0x86   : > { %v471_v13 = vmul.f32 %v1524_v11, %v463_v12 }
  0x88   : > { %v472_v14 = vadd.f32 1e-05, %v471_v13 }
  0x8a   : > { %1384 = vrsqrt.f32 %v472_v14  ;;  %vm479_vm3 = vweird.f32 %v472_v14 }
  0x90   : > { %v1385_v15 = vpop.eup %1384 }
  0x91   : > { %v474_v16 = vmul.f32 %v1385_v15, %v472_v14  ;;  %vm480_vm2 = vweird.f32 %v1385_v15 }
  0x92   : > { %vm481_vm4 = vmor %vm479_vm3, %vm480_vm2 }
  0x93   : > { %v475_v17 = vmul.f32 %v1385_v15, %v474_v16 }
  0x95   : > { %v476_v18 = vmul.f32 0.5, %v475_v17 }
  0x97   : > { %v477_v19 = vsub.f32 1.5, %v476_v18 }
  0x99   : > { %v478_v20 = vmul.f32 %v1385_v15, %v477_v19 }
  0x9b   : > { %v482_v22 = vsel %vm481_vm4, %v1385_v15, %v478_v20  ;;  %vm779_vm4 = vcmask 1043456  }
  0x9c   : > { %v483_v23 = vmul.f32 %v482_v22, %v441_v0 }
  0x9e   : > { %v487_v24 = vmul.f32 %v1371_v21, %v483_v23 }
  0xa0   : > { %v488_v25 = vpack.c.bf16 %v487_v24, %v487_v24 }
  0xa2   : > { %1264 = vmatmul.msk.bf16.vlgmr.msra.gmra.mxu0 %vm460_vm0, %v488_v25 }
 0x11f   : > { %v521_v27 = vpop.f32.mrf.mxu0 }
 0x120   : > { %v1534_v28 = vadd.f32 %v1372_v26, %v521_v27 }
 0x122   : > { %v525_v29 = vmul.f32 %v1534_v28, %v1534_v28 }
 0x124   : > { %v526_v30 = vsel %vm460_vm0, %v525_v29, 0.0 }
 0x125   : > { %527 = vadd.xlane.f32.xlu0 %v526_v30 }
 0x127   : > { %v523_v31 = vpop.f32.mrf.mxu0 }
 0x198   : > { %v528_v34 = vpop.xlane.xlu0 %527 }
 0x199   : > { %v529_v35 = vmul.f32 %v528_v34, %v1524_v11 }
 0x19b   : > { %v530_v36 = vadd.f32 1e-05, %v529_v35  ;;  %v1377_v35 = vld [vmem:[%s1719_s8] ss:$0 sm:$0xff] }
 0x19d   : > { %1386 = vrsqrt.f32 %v530_v36  ;;  %vm537_vm6 = vweird.f32 %v530_v36 }
 0x19e   : > { %1388 = vrcp.f32 %v1432_v2 }
 0x1a3   : > { %v1387_v37 = vpop.eup %1386 }
 0x1a4   : > { %v532_v38 = vmul.f32 %v1387_v37, %v530_v36  ;;  %vm538_vm5 = vweird.f32 %v1387_v37  ;;  %v1389_v3 = vpop.eup %1388 }
 0x1a5   : > { %vm539_vm7 = vmor %vm537_vm6, %vm538_vm5  ;;  %v596_v4 = vmul.f32 16.0, %v1389_v3  ;;  %vm600_vm9 = vweird.f32 %v1389_v3  ;;  %vm918_vm5 = vcmask 130048  }
 0x1a6   : > { %v533_v39 = vmul.f32 %v1387_v37, %v532_v38 }
 0x1a7   : > { %v597_v5 = vsub.f32 1.0, %v596_v4 }
 0x1a8   : > { %v534_v40 = vmul.f32 0.5, %v533_v39 }
 0x1a9   : > { %v598_v6 = vmul.f32 %v1389_v3, %v597_v5 }
 0x1aa   : > { %v535_v41 = vsub.f32 1.5, %v534_v40 }
 0x1ab   : > { %v599_v7 = vadd.f32 %v1389_v3, %v598_v6 }
 0x1ac   : > { %v536_v42 = vmul.f32 %v1387_v37, %v535_v41 }
 0x1ad   : > { %v601_v9 = vsel %vm600_vm9, %v1389_v3, %v599_v7 }
 0x1ae   : > { %v540_v44 = vsel %vm539_vm7, %v1387_v37, %v536_v42 }
 0x1af   : > { %v541_v45 = vmul.f32 %v540_v44, %v1534_v28 }
 0x1b1   : > { %v545_v46 = vmul.f32 %v1373_v43, %v541_v45 }
 0x1b3   : > { %v546_v47 = vpack.c.bf16 %v545_v46, %v545_v46 }
 0x1b5   : > { %1273 = vmatmul.msk.bf16.vlgmr.msra.gmra.mxu1 %vm460_vm0, %v546_v47 }
 0x232   : > { %v1551_v48 = vpop.f32.mrf.mxu1 }
 0x233   : > { %v579_v49 = vmul.f32 %v1551_v48, %v1551_v48 }
 0x235   : > { %796 = vrot.lane.b32.xlu2 %v579_v49, %s1423_s26  ;;  %581 = vrot.lane.b32.xlu1 %v579_v49, %s1424_s27  ;;  %v654_v1 = vsel %vm584_vm8, %v579_v49, 0.0 }
 0x23a   : > { %v577_v50 = vpop.f32.mrf.mxu1 }
 0x23d   : > { %802 = vrot.lane.b32.xlu2 %v579_v49, %s1425_s28  ;;  %588 = vrot.lane.b32.xlu1 %v579_v49, %s1426_s29  ;;  %s435_s29 = scalar_lea.vmem %s1713_s2, %s1511_s23 }
 0x23e   : > { %v1575_v61 = vld [vmem:[%s435_s29] sm:$0xff] }
 0x245   : > { %657 = vrot.lane.b32.xlu2 %v579_v49, %s1427_s30 }
 0x24d   : > { %826 = vrot.lane.b32.xlu2 %v1374_v51, %s1428_s15 }
 0x28f   : > { %v797_v52 = vpop.permute.xlu2 %796 }
 0x290   : > { %v799_v0 = vsel %vm584_vm8, %v797_v52, 0.0 }
 0x297   : > { %v803_v53 = vpop.permute.xlu2 %802 }
 0x298   : > { %v805_v54 = vsel %vm584_vm8, %v803_v53, 0.0 }
 0x299   : > { %806 = vadd.xlane.f32.xlu2 %v805_v54 }
 0x29f   : > { %v658_v62 = vpop.permute.xlu2 %657 }
 0x2a0   : > { %v660_v63 = vsel %vm584_vm8, %v658_v62, 0.0 }
 0x2a7   : > { %v582_v55 = vpop.permute.xlu1 %581  ;;  %v827_v15 = vpop.permute.xlu2 %826 }
 0x2a8   : > { %v585_v56 = vsel %vm584_vm8, %v582_v55, 0.0 }
 0x2a9   : > { %586 = vadd.xlane.f32.xlu0 %v585_v56 }
 0x2af   : > { %v589_v58 = vpop.permute.xlu1 %588 }
 0x2b0   : > { %v591_v59 = vsel %vm584_vm8, %v589_v58, 0.0 }
 0x2b1   : > { %617 = vrot.lane.b32.xlu2 %v1375_v57, %s1429_s18  ;;  %592 = vadd.xlane.f32.xlu1 %v591_v59 }
 0x2bd   : > { %623 = vrot.lane.b32.xlu0 %v1376_v60, %s1430_s24 }
 0x2c5   : > { %643 = vrot.lane.b32.xlu0 %v1575_v61, %s1430_s24 }
 0x2ca   : > { %628 = vrot.lane.b32.xlu1 %v1575_v61, %s1429_s18 }
 0x2d2   : > { %702 = vrot.lane.b32.xlu1 %v1575_v61, %s1431_s13 }
 0x2da   : > { %661 = vadd.xlane.f32.xlu2 %v660_v63  ;;  %639 = vrot.lane.b32.xlu1 %v1575_v61, %s1428_s15  ;;  %s439_s15 = scalar_lea.vmem %s1723_s12, %s1511_s23 }
 0x2ef   : > { %800 = vadd.xlane.f32.xlu0 %v799_v0 }
 0x2f7   : > { %655 = vadd.xlane.f32.xlu0 %v654_v1 }
 0x30b   : > { %683 = vrot.lane.b32.xlu0 %v1374_v51, %s1431_s13 }
 0x30c   : > { %v807_v18 = vpop.xlane.xlu2 %806 }
 0x314   : > { %v618_v25 = vpop.permute.xlu2 %617 }
 0x31c   : > { %v587_v8 = vpop.xlane.xlu0 %586 }
 0x324   : > { %v593_v10 = vpop.xlane.xlu1 %592 }
 0x325   : > { %v594_v12 = vadd.f32 %v593_v10, %v587_v8 }
 0x327   : > { %v602_v13 = vmul.f32 %v601_v9, %v594_v12 }
 0x329   : > { %v603_v14 = vadd.f32 1e-06, %v602_v13 }
 0x32b   : > { %1390 = vrsqrt.f32 %v603_v14  ;;  %vm610_vm11 = vweird.f32 %v603_v14 }
 0x32f   : > { %v624_v21 = vpop.permute.xlu0 %623 }
 0x331   : > { %v1391_v16 = vpop.eup %1390 }
 0x332   : > { %v605_v17 = vmul.f32 %v1391_v16, %v603_v14  ;;  %vm611_vm10 = vweird.f32 %v1391_v16 }
 0x333   : > { %vm612_vm12 = vmor %vm610_vm11, %vm611_vm10 }
 0x334   : > { %v606_v19 = vmul.f32 %v1391_v16, %v605_v17 }
 0x336   : > { %v607_v20 = vmul.f32 0.5, %v606_v19 }
 0x337   : > { %v644_v30 = vpop.permute.xlu0 %643 }
 0x338   : > { %v608_v22 = vsub.f32 1.5, %v607_v20 }
 0x33a   : > { %v609_v23 = vmul.f32 %v1391_v16, %v608_v22 }
 0x33c   : > { %v613_v24 = vsel %vm612_vm12, %v1391_v16, %v609_v23  ;;  %v629_v31 = vpop.permute.xlu1 %628 }
 0x33d   : > { %v614_v26 = vmul.f32 %v613_v24, %v1551_v48 }
 0x33f   : > { %v626_v27 = vmul.f32 %v624_v21, %v614_v26  ;;  %v620_v29 = vmul.f32 %v618_v25, %v614_v26 }
 0x341   : > { %v646_v32 = vmul.f32 %v644_v30, %v626_v27  ;;  %v632_v33 = vmul.f32 %v629_v31, %v626_v27  ;;  %v631_v34 = vmul.f32 %v629_v31, %v620_v29 }
 0x343   : > { %648 = vrot.lane.b32.xlu1 %v646_v32, %s1423_s26  ;;  %634 = vrot.lane.b32.xlu2 %v632_v33, %s1423_s26 }
 0x344   : > { %v703_v49 = vpop.permute.xlu1 %702 }
 0x34b   : > { %822 = vrot.lane.b32.xlu1 %v1377_v35, %s1433_s16  ;;  %688 = vrot.lane.b32.xlu2 %v1575_v61, %s1433_s16 }
 0x34c   : > { %v640_v60 = vpop.permute.xlu1 %639 }
 0x34d   : > { %v662_v40 = vpop.xlane.xlu2 %661  ;;  %v642_v8 = vmul.f32 %v640_v60, %v620_v29 }
 0x362   : > { %v801_v36 = vpop.xlane.xlu0 %800 }
 0x363   : > { %v808_v37 = vadd.f32 %v807_v18, %v801_v36 }
 0x365   : > { %v809_v38 = vmul.f32 %v808_v37, %v601_v9 }
 0x367   : > { %v810_v39 = vadd.f32 1e-06, %v809_v38 }
 0x369   : > { %1392 = vrsqrt.f32 %v810_v39  ;;  %vm817_vm14 = vweird.f32 %v810_v39 }
 0x36a   : > { %v656_v41 = vpop.xlane.xlu0 %655 }
 0x36b   : > { %v663_v42 = vadd.f32 %v662_v40, %v656_v41 }
 0x36d   : > { %v664_v43 = vmul.f32 %v663_v42, %v601_v9 }
 0x36f   : > { %v1393_v44 = vpop.eup %1392  ;;  %v665_v45 = vadd.f32 1e-06, %v664_v43 }
 0x370   : > { %v812_v46 = vmul.f32 %v1393_v44, %v810_v39  ;;  %vm818_vm13 = vweird.f32 %v1393_v44 }
 0x371   : > { %1394 = vrsqrt.f32 %v665_v45  ;;  %vm819_vm15 = vmor %vm817_vm14, %vm818_vm13  ;;  %vm672_vm2 = vweird.f32 %v665_v45 }
 0x372   : > { %v813_v47 = vmul.f32 %v1393_v44, %v812_v46 }
 0x374   : > { %v814_v50 = vmul.f32 0.5, %v813_v47 }
 0x376   : > { %v815_v51 = vsub.f32 1.5, %v814_v50 }
 0x377   : > { %v1395_v52 = vpop.eup %1394 }
 0x378   : > { %v816_v53 = vmul.f32 %v1393_v44, %v815_v51  ;;  %v667_v54 = vmul.f32 %v1395_v52, %v665_v45  ;;  %vm673_vm1 = vweird.f32 %v1395_v52 }
 0x379   : > { %vm674_vm3 = vmor %vm672_vm2, %vm673_vm1  ;;  %vm1128_vm1 = vcmask 785408  }
 0x37a   : > { %v668_v55 = vmul.f32 %v1395_v52, %v667_v54  ;;  %v820_v56 = vsel %vm819_vm15, %v1393_v44, %v816_v53 }
 0x37b   : > { %v821_v57 = vmul.f32 %v820_v56, %v1551_v48 }
 0x37c   : > { %v669_v58 = vmul.f32 0.5, %v668_v55 }
 0x37d   : > { %v829_v59 = vmul.f32 %v827_v15, %v821_v57  ;;  %v684_v3 = vpop.permute.xlu0 %683 }
 0x37e   : > { %v670_v62 = vsub.f32 1.5, %v669_v58 }
 0x37f   : > { %v831_v63 = vmul.f32 %v829_v59, %v703_v49  ;;  %v839_v0 = vmul.f32 %v829_v59, %v640_v60 }
 0x380   : > { %v671_v1 = vmul.f32 %v1395_v52, %v670_v62  ;;  %v653_v62 = vpack.c.bf16 %v1551_v48, %v1551_v48 }
 0x381   : > { %833 = vrot.lane.b32.xlu1 %v831_v63, %s1427_s30  ;;  %841 = vrot.lane.b32.xlu2 %v839_v0, %s1427_s30 }
 0x382   : > { %v675_v2 = vsel %vm674_vm3, %v1395_v52, %v671_v1 }
 0x383   : > { %v676_v4 = vmul.f32 %v675_v2, %v1551_v48 }
 0x385   : > { %v686_v5 = vmul.f32 %v684_v3, %v676_v4  ;;  %v680_v6 = vmul.f32 %v1377_v35, %v676_v4 }
 0x387   : > { %v705_v7 = vmul.f32 %v703_v49, %v686_v5  ;;  %v687_v39 = vmul.f32 %v680_v6, %v1575_v61 }
 0x389   : > { %698 = vrot.lane.b32.xlu1 %v1575_v61, %s1423_s26  ;;  %707 = vrot.lane.b32.xlu2 %v705_v7, %s1427_s30 }
 0x39d   : > { %v635_v13 = vpop.permute.xlu2 %634 }
 0x39e   : > { %v637_v14 = vsub.f32 %v631_v34, %v635_v13 }
 0x3a0   : > { %v638_v15 = vpack.c.bf16 %v637_v14, %v637_v14 }
 0x3a5   : > { %v689_v16 = vpop.permute.xlu2 %688 }
 0x3a6   : > { %v691_v17 = vmul.f32 %v689_v16, %v686_v5 }
 0x3b5   : > { %v649_v9 = vpop.permute.xlu1 %648 }
 0x3b6   : > { %v651_v10 = vadd.f32 %v649_v9, %v642_v8 }
 0x3b8   : > { %v652_v12 = vpack.c.bf16 %v651_v10, %v651_v10 }
 0x3ba   : > { %713 = vrot.lane.b32.xlu0 %v652_v12, %s1424_s27 }
 0x3bd   : > { %v823_v18 = vpop.permute.xlu1 %822 }
 0x3be   : > { %v825_v19 = vmul.f32 %v823_v18, %v821_v57 }
 0x3c0   : > { %v838_v20 = vmul.f32 %v825_v19, %v1575_v61  ;;  %v830_v24 = vmul.f32 %v825_v19, %v689_v16 }
 0x3c2   : > { %735 = vrot.lane.b32.xlu0 %v638_v15, %s1424_s27 }
 0x3ca   : > { %693 = vrot.lane.b32.xlu0 %v691_v17, %s1427_s30  ;;  %s431_s30 = scalar_lea.vmem %s1712_s1, %s1725_s22  ;;  %s1434_s22 = smov 80  }
 0x3cb   : > { %v1378_v51 = vld [vmem:[%s431_s30] ss:$0 sm:$0xff] }
 0x3db   : > { %v842_v21 = vpop.permute.xlu2 %841 }
 0x3dc   : > { %v844_v22 = vadd.f32 %v842_v21, %v838_v20  ;;  %v1339_v21 = vld [vmem:[%s1718_s7 + $0x8] sm:$0xff] }
 0x3de   : > { %v845_v23 = vpack.c.bf16 %v844_v22, %v844_v22  ;;  %v1338_v22 = vld [vmem:[%s1718_s7] sm:$0xff] }
 0x3e0   : > { %847 = vrot.lane.b32.xlu2 %v845_v23, %s1423_s26 }
 0x3e3   : > { %v708_v33 = vpop.permute.xlu2 %707 }
 0x3f3   : > { %v834_v25 = vpop.permute.xlu1 %833 }
 0x3f4   : > { %v836_v26 = vsub.f32 %v830_v24, %v834_v25 }
 0x3f6   : > { %v837_v27 = vpack.c.bf16 %v836_v26, %v836_v26 }
 0x3f8   : > { %866 = vrot.lane.b32.xlu1 %v837_v27, %s1423_s26 }
 0x3fb   : > { %v699_v29 = vpop.permute.xlu1 %698 }
 0x3fc   : > { %v701_v30 = vmul.f32 %v699_v29, %v680_v6 }
 0x3fe   : > { %v710_v34 = vadd.f32 %v708_v33, %v701_v30 }
 0x400   : > { %v711_v35 = vpack.c.bf16 %v710_v34, %v710_v34 }
 0x42c   : > { %v714_v31 = vpop.permute.xlu0 %713 }
 0x42d   : > { %v719_v32 = vsel %vm584_vm8, %v714_v31, 0 }
 0x42e   : > { %728 = vmatpush.bf16.xpose.msra.mxu2 %v719_v32  ;;  %859 = vmatpush.bf16.xpose.msrb.mxu1 %v719_v32 }
 0x434   : > { %v736_v36 = vpop.permute.xlu0 %735 }
 0x435   : > { %1274 = vmatmul.msk.bf16.vlgmr.msra.gmra.mxu2 %vm584_vm8, %v711_v35  ;;  %v741_v37 = vsel %vm584_vm8, %v736_v36, 0 }
 0x436   : > { %750 = vmatpush.bf16.xpose.msra.mxu3 %v741_v37  ;;  %878 = vmatpush.bf16.xpose.msrb.mxu2 %v741_v37 }
 0x43a   : > { %v848_v38 = vpop.permute.xlu2 %847 }
 0x43b   : > { %1277 = vmatmul.msk.bf16.vlgmr.msrb.gmra.mxu1 %vm584_vm8, %v848_v38 }
 0x43c   : > { %v694_v40 = vpop.permute.xlu0 %693 }
 0x43d   : > { %v696_v41 = vsub.f32 %v687_v39, %v694_v40 }
 0x43f   : > { %v697_v42 = vpack.c.bf16 %v696_v41, %v696_v41 }
 0x441   : > { %1275 = vmatmul.msk.bf16.vlgmr.msra.gmra.mxu3 %vm584_vm8, %v697_v42  ;;  %v1379_v42 = vld [vmem:[%s1720_s9 + $0x1] ss:$0 sm:$0xff] }
 0x46a   : > { %v867_v43 = vpop.permute.xlu1 %866 }
 0x46b   : > { %1278 = vmatmul.msk.bf16.vlgmr.msrb.gmra.mxu2 %vm584_vm8, %v867_v43 }
 0x4b8   : > { %v730_v44 = vpop.f32.mrf.mxu2  ;;  %v861_v45 = vpop.f32.mrf.mxu1 }
 0x4c0   : > { %v732_v46 = vpop.f32.mrf.mxu2  ;;  %v863_v47 = vpop.f32.mrf.mxu1 }
 0x4c4   : > { %v752_v49 = vpop.f32.mrf.mxu3 }
 0x4c5   : > { %v753_v50 = vadd.f32 %v752_v49, %v730_v44 }
 0x4c7   : > { %v756_v61 = vmul.f32 0.25, %v753_v50  ;;  %v1342_v50 = vld [vmem:[%s1721_s10 + $0x14] sm:$0xf] }
 0x4c9   : > { %v760_v52 = vadd.f32 %v1378_v51, %v756_v61  ;;  %v1299_v61 = vld [vmem:[%s1721_s10 + $0x10] sm:$0xf] }
 0x4cb   : > { %v761_v53 = vsel %vm584_vm8, %v760_v52, -inf }
 0x4cc   : > { %v754_v54 = vpop.f32.mrf.mxu3  ;;  %762 = vmax.xlane.f32.xlu2 %v761_v53 }
 0x4cd   : > { %v1340_v54 = vld [vmem:[%s1721_s10 + $0x4] sm:$0xf] }
 0x4ee   : > { %v880_v55 = vpop.f32.mrf.mxu2 }
 0x4ef   : > { %v881_v56 = vadd.f32 %v880_v55, %v861_v45  ;;  %v1293_v55 = vld [vmem:[%s1721_s10 + $0x8] sm:$0xf0] }
 0x4f1   : > { %v884_v57 = vmul.f32 0.25, %v881_v56  ;;  %v1291_v56 = vld [vmem:[%s1721_s10] sm:$0xf] }
 0x4f3   : > { %v885_v58 = vadd.f32 %v1378_v51, %v884_v57  ;;  %v1301_v51 = vld [vmem:[%s1721_s10 + $0x18] sm:$0xf0]  ;;  %v1296_v57 = vor.u32 %v1340_v54, %v1293_v55  ;;  %v1381_v55 = vld [vmem:[%s1720_s9 + $0x3] ss:$0 sm:$0xff] }
 0x4f5   : > { %v886_v59 = vsel %vm584_vm8, %v885_v58, -inf }
 0x4f6   : > { %v882_v60 = vpop.f32.mrf.mxu2  ;;  %887 = vmax.xlane.f32.xlu1 %v886_v59 }
 0x50f   : > { %774 = vrot.lane.b32.xlu1 %v653_v62, %s1434_s22 }
 0x53f   : > { %v763_v63 = vpop.xlane.xlu2 %762 }
 0x540   : > { %v764_v0 = vsub.f32 %v760_v52, %v763_v63  ;;  %v1343_v52 = vld [vmem:[%s1721_s10 + $0x14] sm:$0xf0] }
 0x541   : > { %v1300_v53 = vor.u32 %v1343_v52, %v1299_v61 }
 0x542   : > { %v765_v1 = vmul.f32 1.442695, %v764_v0 }
 0x543   : > { %1030 = vmatpush.bf16.msra.mxu1 %v1300_v53 }
 0x544   : > { %1396 = vpow2.f32 %v765_v1 }
 0x54a   : > { %v1397_v2 = vpop.eup %1396 }
 0x54b   : > { %v767_v3 = vsel %vm584_vm8, %v1397_v2, 0.0 }
 0x54c   : > { %768 = vadd.xlane.f32.xlu2 %v767_v3 }
 0x569   : > { %v888_v4 = vpop.xlane.xlu1 %887 }
 0x56a   : > { %v889_v5 = vsub.f32 %v885_v58, %v888_v4  ;;  %v1341_v58 = vld [vmem:[%s1721_s10 + $0x4] sm:$0xf0] }
 0x56b   : > { %v1292_v59 = vor.u32 %v1341_v58, %v1291_v56 }
 0x56c   : > { %v890_v6 = vmul.f32 1.442695, %v889_v5 }
 0x56d   : > { %1031 = vmatpush.bf16.msra.mxu1 %v1292_v59 }
 0x56e   : > { %1398 = vpow2.f32 %v890_v6  ;;  %v1380_v6 = vld [vmem:[%s1720_s9 + $0x2] ss:$0 sm:$0xff] }
 0x574   : > { %v1399_v7 = vpop.eup %1398 }
 0x575   : > { %v892_v8 = vsel %vm584_vm8, %v1399_v7, 0.0 }
 0x576   : > { %893 = vadd.xlane.f32.xlu0 %v892_v8 }
 0x581   : > { %v775_v48 = vpop.permute.xlu1 %774 }
 0x582   : > { %v781_v9 = vsel %vm779_vm4, %v775_v48, 0 }
 0x583   : > { %790 = vmatpush.bf16.msrb.mxu0 %v781_v9  ;;  %908 = vmatpush.bf16.msrb.mxu3 %v781_v9 }
 0x587   : > { %946 = vmatpush.bf16.msra.mxu0 %v1339_v21 }
 0x58b   : > { %947 = vmatpush.bf16.msra.mxu0 %v1338_v22  ;;  %v1345_v22 = vld [vmem:[%s1722_s11 + $0x8] sm:$0xff] }
 0x5bf   : > { %v769_v10 = vpop.xlane.xlu2 %768 }
 0x5c0   : > { %1400 = vrcp.f32 %v769_v10  ;;  %v1349_v10 = vld [vmem:[%s1722_s11 + $0x28] sm:$0xff] }
 0x5c1   : > { %1134 = vmatpush.bf16.msra.mxu3 %v1349_v10 }
 0x5c6   : > { %v1401_v12 = vpop.eup %1400 }
 0x5c7   : > { %v771_v13 = vmul.f32 %v1401_v12, %v1397_v2 }
 0x5c9   : > { %v772_v14 = vpack.c.bf16 %v771_v13, %v771_v13  ;;  %v1348_v13 = vld [vmem:[%s1722_s11 + $0x20] sm:$0xff] }
 0x5ca   : > { %1135 = vmatpush.bf16.msra.mxu3 %v1348_v13 }
 0x5cb   : > { %1276 = vmatmul.msk.bf16.vlgmr.msrb.gmra.mxu0 %vm584_vm8, %v772_v14  ;;  %v1347_v14 = vld [vmem:[%s1722_s11 + $0x18] sm:$0xff] }
 0x5ce   : > { %1136 = vmatpush.bf16.msra.mxu3 %v1347_v14 }
 0x5e9   : > { %v894_v15 = vpop.xlane.xlu0 %893 }
 0x5ea   : > { %1402 = vrcp.f32 %v894_v15 }
 0x5f0   : > { %v1403_v16 = vpop.eup %1402 }
 0x5f1   : > { %v896_v17 = vmul.f32 %v1403_v16, %v1399_v7 }
 0x5f3   : > { %v897_v18 = vpack.c.bf16 %v896_v17, %v896_v17 }
 0x5f5   : > { %1279 = vmatmul.msk.bf16.vlgmr.msrb.gmra.mxu3 %vm584_vm8, %v897_v18 }
 0x648   : > { %v792_v19 = vpop.f32.mrf.mxu0 }
 0x650   : > { %v794_v20 = vpop.f32.mrf.mxu0 }
 0x651   : > { %v1346_v20 = vld [vmem:[%s1722_s11 + $0x10] sm:$0xff] }
 0x652   : > { %1137 = vmatpush.bf16.msra.mxu3 %v1346_v20 }
 0x656   : > { %1138 = vmatpush.bf16.msra.mxu3 %v1345_v22 }
 0x678   : > { %v910_v23 = vpop.f32.mrf.mxu3 }
 0x679   : > { %915 = vrot.lane.b32.xlu0 %v910_v23, %s1431_s13 }
 0x680   : > { %v912_v24 = vpop.f32.mrf.mxu3 }
 0x681   : > { %v1344_v24 = vld [vmem:[%s1722_s11] sm:$0xff] }
 0x682   : > { %1139 = vmatpush.bf16.msra.mxu3 %v1344_v24 }
 0x6eb   : > { %v916_v25 = vpop.permute.xlu0 %915 }
 0x6ec   : > { %v919_v26 = vsel %vm918_vm5, %v792_v19, %v916_v25 }
 0x6ed   : > { %v920_v27 = vpack.c.bf16 %v919_v26, %v919_v26 }
 0x6ef   : > { %1288 = vmatmul.msk.bf16.vlgmr.msra.gmra.mxu0 %vm460_vm0, %v920_v27 }
 0x76c   : > { %v949_v29 = vpop.f32.mrf.mxu0 }
 0x76d   : > { %v953_v30 = vmul.f32 %v949_v29, %v949_v29 }
 0x76f   : > { %v954_v31 = vsel %vm460_vm0, %v953_v30, 0.0 }
 0x770   : > { %955 = vadd.xlane.f32.xlu2 %v954_v31 }
 0x774   : > { %v951_v32 = vpop.f32.mrf.mxu0 }
 0x7e3   : > { %v956_v33 = vpop.xlane.xlu2 %955 }
 0x7e4   : > { %v957_v34 = vmul.f32 %v956_v33, %v1524_v11 }
 0x7e6   : > { %v958_v35 = vadd.f32 1e-05, %v957_v34 }
 0x7e8   : > { %1404 = vrsqrt.f32 %v958_v35  ;;  %vm965_vm7 = vweird.f32 %v958_v35 }
 0x7ee   : > { %v1405_v36 = vpop.eup %1404 }
 0x7ef   : > { %v960_v37 = vmul.f32 %v1405_v36, %v958_v35  ;;  %vm966_vm6 = vweird.f32 %v1405_v36 }
 0x7f0   : > { %vm967_vm8 = vmor %vm965_vm7, %vm966_vm6 }
 0x7f1   : > { %v961_v38 = vmul.f32 %v1405_v36, %v960_v37 }
 0x7f3   : > { %v962_v39 = vmul.f32 0.5, %v961_v38 }
 0x7f5   : > { %v963_v40 = vsub.f32 1.5, %v962_v39 }
 0x7f7   : > { %v964_v41 = vmul.f32 %v1405_v36, %v963_v40 }
 0x7f9   : > { %v968_v43 = vsel %vm967_vm8, %v1405_v36, %v964_v41 }
 0x7fa   : > { %v969_v44 = vmul.f32 %v968_v43, %v949_v29 }
 0x7fc   : > { %v973_v45 = vmul.f32 %v1379_v42, %v969_v44 }
 0x7fe   : > { %v1640_v46 = vadd.f32 %v973_v45, %v1534_v28  ;;  %v1304_v28 = vor.u32 %v1342_v50, %v1301_v51 }
 0x800   : > { %v975_v47 = vmul.f32 %v1640_v46, %v1640_v46  ;;  %1043 = vmatpush.bf16.msra.mxu2 %v1304_v28 }
 0x802   : > { %v976_v49 = vsel %vm460_vm0, %v975_v47, 0.0 }
 0x803   : > { %977 = vadd.xlane.f32.xlu2 %v976_v49 }
 0x804   : > { %1044 = vmatpush.bf16.msra.mxu2 %v1296_v57 }
 0x876   : > { %v978_v60 = vpop.xlane.xlu2 %977 }
 0x877   : > { %v979_v62 = vmul.f32 %v978_v60, %v1524_v11 }
 0x879   : > { %v980_v63 = vadd.f32 1e-05, %v979_v62 }
 0x87b   : > { %1406 = vrsqrt.f32 %v980_v63  ;;  %vm987_vm10 = vweird.f32 %v980_v63 }
 0x881   : > { %v1407_v0 = vpop.eup %1406 }
 0x882   : > { %v982_v1 = vmul.f32 %v1407_v0, %v980_v63  ;;  %vm988_vm9 = vweird.f32 %v1407_v0 }
 0x883   : > { %vm989_vm11 = vmor %vm987_vm10, %vm988_vm9 }
 0x884   : > { %v983_v2 = vmul.f32 %v1407_v0, %v982_v1 }
 0x886   : > { %v984_v3 = vmul.f32 0.5, %v983_v2 }
 0x888   : > { %v985_v4 = vsub.f32 1.5, %v984_v3 }
 0x88a   : > { %v986_v5 = vmul.f32 %v1407_v0, %v985_v4 }
 0x88c   : > { %v990_v7 = vsel %vm989_vm11, %v1407_v0, %v986_v5 }
 0x88d   : > { %v991_v8 = vmul.f32 %v990_v7, %v1640_v46 }
 0x88f   : > { %v995_v48 = vmul.f32 %v1380_v6, %v991_v8 }
 0x891   : > { %v996_v9 = vpack.c.bf16 %v995_v48, %v995_v48 }
 0x893   : > { %1305 = vmatmul.msk.bf16.vlgmr.msra.gmra.mxu1 %vm460_vm0, %v996_v9  ;;  %1306 = vmatmul.msk.bf16.vlgmr.msra.gmra.mxu2 %vm460_vm0, %v996_v9 }
 0x910   : > { %v1033_v12 = vpop.f32.mrf.mxu1 }
 0x911   : > { %1072 = vrot.lane.b32.xlu1 %v1033_v12, %s1429_s18  ;;  %v1050_v18 = vsub.f32 0.0, %v1033_v12 }
 0x913   : > { %v1051_v19 = vmul.f32 1.442695, %v1050_v18 }
 0x915   : > { %1408 = vpow2.f32 %v1051_v19 }
 0x916   : > { %v1046_v15 = vpop.f32.mrf.mxu2 }
 0x917   : > { %1074 = vrot.lane.b32.xlu0 %v1046_v15, %s1429_s18 }
 0x918   : > { %v1035_v16 = vpop.f32.mrf.mxu1 }
 0x91b   : > { %v1409_v21 = vpop.eup %1408 }
 0x91c   : > { %v1053_v23 = vadd.f32 1.0, %v1409_v21 }
 0x91e   : > { %v1048_v17 = vpop.f32.mrf.mxu2  ;;  %1410 = vrcp.f32 %v1053_v23  ;;  %v1065_v31 = vand.u32 2147483648, %v1053_v23  ;;  %vm1059_vm13 = vweird.f32 %v1053_v23  ;;  %v1063_v32 = vand.u32 2147483647, %v1053_v23 }
 0x920   : > { %v1066_v34 = vor.u32 1.1754944e-38, %v1065_v31  ;;  %vm1064_vm15 = vcmp.eq.f32.partialorder %v1063_v32, 8.507059e+37 }
 0x924   : > { %v1411_v25 = vpop.eup %1410 }
 0x925   : > { %v1055_v26 = vmul.f32 %v1411_v25, %v1053_v23  ;;  %vm1060_vm12 = vweird.f32 %v1411_v25 }
 0x926   : > { %vm1061_vm14 = vmor %vm1059_vm13, %vm1060_vm12 }
 0x927   : > { %v1056_v27 = vsub.f32 1.0, %v1055_v26 }
 0x929   : > { %v1057_v29 = vmul.f32 %v1411_v25, %v1056_v27 }
 0x92b   : > { %v1058_v30 = vadd.f32 %v1411_v25, %v1057_v29 }
 0x92d   : > { %v1062_v33 = vsel %vm1061_vm14, %v1411_v25, %v1058_v30 }
 0x92e   : > { %v1067_v35 = vsel %vm1064_vm15, %v1066_v34, %v1062_v33 }
 0x92f   : > { %v1069_v36 = vmul.f32 %v1067_v35, %v1033_v12 }
 0x983   : > { %v1073_v37 = vpop.permute.xlu1 %1072 }
 0x989   : > { %v1075_v38 = vpop.permute.xlu0 %1074 }
 0x98a   : > { %v1076_v39 = vsel %vm460_vm0, %v1073_v37, %v1075_v38 }
 0x98b   : > { %v1078_v40 = vmul.f32 %v1076_v39, %v1069_v36 }
 0x98d   : > { %v1079_v41 = vpack.c.bf16 %v1078_v40, %v1078_v40 }
 0x98f   : > { %1331 = vmatmul.msk.bf16.vlgmr.msra.gmra.mxu3 %vm1128_vm1, %v1079_v41 }
 0xa12   : > { %v1141_v42 = vpop.f32.mrf.mxu3 }
 0xa13   : > { %v1145_v43 = vmul.f32 %v1141_v42, %v1141_v42 }
 0xa15   : > { %v1146_v44 = vsel %vm460_vm0, %v1145_v43, 0.0 }
 0xa16   : > { %1147 = vadd.xlane.f32.xlu2 %v1146_v44 }
 0xa1a   : > { %v1143_v45 = vpop.f32.mrf.mxu3 }
 0xa89   : > { %v1148_v47 = vpop.xlane.xlu2 %1147 }
 0xa8a   : > { %v1149_v49 = vmul.f32 %v1148_v47, %v1524_v11 }
 0xa8c   : > { %v1150_v50 = vadd.f32 1e-05, %v1149_v49 }
 0xa8e   : > { %1412 = vrsqrt.f32 %v1150_v50  ;;  %vm1157_vm3 = vweird.f32 %v1150_v50 }
 0xa94   : > { %v1413_v51 = vpop.eup %1412 }
 0xa95   : > { %v1152_v61 = vmul.f32 %v1413_v51, %v1150_v50  ;;  %vm1158_vm2 = vweird.f32 %v1413_v51 }
 0xa96   : > { %vm1159_vm4 = vmor %vm1157_vm3, %vm1158_vm2 }
 0xa97   : > { %v1153_v28 = vmul.f32 %v1413_v51, %v1152_v61 }
 0xa99   : > { %v1154_v52 = vmul.f32 0.5, %v1153_v28 }
 0xa9b   : > { %v1155_v53 = vsub.f32 1.5, %v1154_v52 }
 0xa9d   : > { %v1156_v54 = vmul.f32 %v1413_v51, %v1155_v53 }
 0xa9f   : > { %v1160_v56 = vsel %vm1159_vm4, %v1413_v51, %v1156_v54 }
 0xaa0   : > { %v1161_v57 = vmul.f32 %v1160_v56, %v1141_v42 }
 0xaa2   : > { %v1165_v58 = vmul.f32 %v1381_v55, %v1161_v57 }
 0xaa4   : > { %v1166_v11 = vadd.f32 %v1165_v58, %v1640_v46 }
 0xaa6   : > { %1167 = vst.msk [vmem:[%s439_s15] sm:$0xff] %vm460_vm0, %v1166_v11 }
 0xaa7 PF: > { %s22_s21 = sadd.s32 1, %s1420_s21  }
 0xaa8   : > { %p19_p4 = scmp.ge.s32.totalorder %s22_s21, 4  }
 0xaaa   :  { %21 = sbr.rel (!%p19_p4) target bundleno = 1 (0x1), region = 110 }

// kernel: initial_layer_forward.5
= control target key start
LH: loop header
LB: loop body
LE: loop exit
PB: predicated region body
PF: predicated region fallthrough
CT: control target
= control target key end

     0   :  { %s4429_s29 = smov 0   ;;  %s6367_s0 = inlined_call_operand.vmem [shape: f32[2,64,16], index: 0, kind: input, shape index: {}]   ;;  %s6368_s1 = inlined_call_operand.vmem [shape: f32[2,1,64], index: 1, kind: input, shape index: {}]   ;;  %s6369_s2 = inlined_call_operand.vmem [shape: f32[2,64,16], index: 2, kind: input, shape index: {}]   ;;  %s6370_s3 = inlined_call_operand.vmem [shape: f32[2,1,32], index: 3, kind: input, shape index: {}]   ;;  %s6371_s4 = inlined_call_operand.vmem [shape: bf16[16,32], index: 4, kind: input, shape index: {}]   ;;  %s6372_s5 = inlined_call_operand.vmem [shape: f32[1,32], index: 5, kind: input, shape index: {}]   ;;  %s6373_s6 = inlined_call_operand.vmem [shape: bf16[32,64], index: 6, kind: input, shape index: {}]   ;;  %s6374_s7 = inlined_call_operand.vmem [shape: bf16[32,32], index: 7, kind: input, shape index: {}]   ;;  %s6375_s8 = inlined_call_operand.vmem [shape: f32[4,1,8], index: 8, kind: input, shape index: {}]   ;;  %s6376_s9 = inlined_call_operand.vmem [shape: f32[4,1,32], index: 9, kind: input, shape index: {}]   ;;  %s6377_s10 = inlined_call_operand.vmem [shape: bf16[32,192], index: 10, kind: input, shape index: {}]   ;;  %s6378_s11 = inlined_call_operand.vmem [shape: bf16[96,32], index: 11, kind: input, shape index: {}]   ;;  %s6379_s12 = inlined_call_operand.vmem [shape: bf16[32,128], index: 12, kind: input, shape index: {}]   ;;  %s6380_s13 = inlined_call_operand.vmem [shape: f32[1,128], index: 13, kind: input, shape index: {}]   ;;  %s6381_s14 = inlined_call_operand.vmem [shape: f32[2,64,32], index: 14, kind: output, shape index: {}]  }
   0x1 LB: > { %s3886_s30 = sadd.s32 4294967295, %s4338_s29   ;;  %p3890_p0 = scmp.ge.s32.totalorder %s4338_s29, 1  ;;  %s4338_s29 = sphi %s4429_s29, %s24_s29  }
   0x2   : > { %p438_p1 = scmp.lt.s32.totalorder %s4338_s29, 3 }
   0x4   : > { %p439_p2 = pnand %p3890_p0, %p438_p1 }
   0x6   : > { %442 = sbr.rel (%p439_p2) target bundleno = 3639 (0xe37), region = 76 }
   0xb   : > { %v4025_v0 = vld [vmem:[%s6371_s4] sm:$0xff]  ;;  %p495_p3 = scmp.lt.s32.totalorder %s3886_s30, 1  ;;  %vm564_vm0 = vcmask 130048   ;;  %s4340_s27 = smov 40   ;;  %v4027_v33 = vld [vmem:[%s6379_s12 + $0x8] sm:$0xff]  ;;  %vm645_vm5 = vcmask 261120  }
   0xc   : > { %584 = vmatpush.bf16.msra.mxu0 %v4025_v0  ;;  %v4089_v10 = vld [vmem:[%s6375_s8 + $0x2] ss:$0 sm:$0xff]  ;;  %s4341_s16 = smov 32   ;;  %v4090_v13 = vld [vmem:[%s6375_s8 + $0x3] ss:$0 sm:$0xff]  ;;  %s4342_s21 = smov 24   ;;  %655 = vmatpush.bf16.msra.mxu1 %v4027_v33 }
   0xd   : > { %s6544_s30 = smov (!%p495_p3, %s3886_s30), 1  ;;  %1134 = vrot.lane.b32.xlu2 %v4090_v13, %s4340_s27  ;;  %s4343_s22 = smov 16   ;;  %v4091_v23 = vld [vmem:[%s6375_s8 + $0x1] ss:$0 sm:$0xff]  ;;  %v4092_v43 = vld [vmem:[%s6372_s5] ss:$0 sm:$0xff] }
   0xe   : > { %s4443_s17 = sshll.u32 %s6544_s30, 6  ;;  %s502_s20 = scalar_lea.vmem %s6368_s1, %s6544_s30  ;;  %v4026_v37 = vld [vmem:[%s6379_s12] sm:$0xff] }
   0xf   : > { %s4453_s23 = scalar_lea.vmem %s6367_s0, %s4443_s17  ;;  %s4459_s26 = scalar_lea.vmem %s6369_s2, %s4443_s17 }
  0x10   : > { %v517_v1 = vld [vmem:[%s4453_s23] sm:$0xff]  ;;  %v518_v2 = vld [vmem:[%s4453_s23 + $0x8] sm:$0xff]  ;;  %v533_v4 = vld [vmem:[%s4459_s26 + $0x38] sm:$0xff]  ;;  %s510_s28 = scalar_lea.vmem %s6370_s3, %s6544_s30  ;;  %656 = vmatpush.bf16.msra.mxu1 %v4026_v37  ;;  %s4347_s15 = smov 96  }
  0x11   : > { %v548_v3 = vpack.c.bf16 %v518_v2, %v517_v1  ;;  %1283 = vrot.lane.b32.xlu0 %v533_v4, %s4340_s27  ;;  %v532_v5 = vld [vmem:[%s4459_s26 + $0x30] sm:$0xff]  ;;  %v530_v7 = vld [vmem:[%s4459_s26 + $0x20] sm:$0xff]  ;;  %v520_v9 = vld [vmem:[%s4453_s23 + $0x18] sm:$0xff]  ;;  %s4348_s18 = smov 112   ;;  %s4349_s19 = smov 104  }
  0x12   : > { %1281 = vrot.lane.b32.xlu1 %v532_v5, %s4340_s27  ;;  %v4469_v6 = vld [vmem:[%s4459_s26 + $0x10] sm:$0xff]  ;;  %v4483_v12 = vld [vmem:[%s4459_s26 + $0x18] sm:$0xff]  ;;  %v531_v14 = vld [vmem:[%s4459_s26 + $0x28] sm:$0xff] }
  0x13   : > { %3907 = vmatmul.msk.bf16.vlgmr.msra.gmra.mxu0 %vm564_vm0, %v548_v3  ;;  %v519_v8 = vld [vmem:[%s4453_s23 + $0x10] sm:$0xff]  ;;  %v4493_v15 = vld [vmem:[%s4459_s26] sm:$0xff]  ;;  %v522_v17 = vld [vmem:[%s4453_s23 + $0x28] sm:$0xff] }
  0x14   : > { %v549_v11 = vpack.c.bf16 %v520_v9, %v519_v8  ;;  %v521_v16 = vld [vmem:[%s4453_s23 + $0x20] sm:$0xff]  ;;  %v4505_v19 = vld [vmem:[%s4459_s26 + $0x8] sm:$0xff]  ;;  %v523_v20 = vld [vmem:[%s4453_s23 + $0x30] sm:$0xff] }
  0x15   : > { %1279 = vrot.lane.b32.xlu2 %v531_v14, %s4340_s27  ;;  %v550_v18 = vpack.c.bf16 %v522_v17, %v521_v16  ;;  %v524_v21 = vld [vmem:[%s4453_s23 + $0x38] sm:$0xff]  ;;  %v606_v24 = vld [vmem:[%s510_s28] sm:$0x1]  ;;  %s4346_s28 = smov 88  }
  0x16   : > { %v551_v22 = vpack.c.bf16 %v524_v21, %v523_v20  ;;  %v607_v25 = vsub.f32 0.0, %v606_v24 }
  0x18   : > { %v608_v26 = vmul.f32 1.442695, %v607_v25 }
  0x19   : > { %1273 = vrot.lane.b32.xlu0 %v4469_v6, %s4340_s27 }
  0x1a   : > { %1277 = vrot.lane.b32.xlu1 %v530_v7, %s4340_s27  ;;  %4098 = vpow2.f32 %v608_v26 }
  0x1d   : > { %1271 = vrot.lane.b32.xlu2 %v4505_v19, %s4340_s27 }
  0x20   : > { %v4099_v27 = vpop.eup %4098 }
  0x21   : > { %1121 = vrot.lane.b32.xlu0 %v4089_v10, %s4341_s16  ;;  %v610_v28 = vadd.f32 1.0, %v4099_v27 }
  0x22   : > { %1275 = vrot.lane.b32.xlu1 %v4483_v12, %s4340_s27 }
  0x23   : > { %3908 = vmatmul.msk.bf16.gmra.mxu0 %vm564_vm0, %v549_v11  ;;  %4100 = vrcp.f32 %v610_v28  ;;  %v622_v34 = vand.u32 2147483648, %v610_v28  ;;  %vm616_vm1 = vweird.f32 %v610_v28  ;;  %v620_v36 = vand.u32 2147483647, %v610_v28 }
  0x25   : > { %1251 = vrot.lane.b32.xlu2 %v533_v4, %s4342_s21  ;;  %v623_v38 = vor.u32 1.1754944e-38, %v622_v34  ;;  %vm621_vm4 = vcmp.eq.f32.partialorder %v620_v36, 8.507059e+37 }
  0x29   : > { %1247 = vrot.lane.b32.xlu0 %v531_v14, %s4342_s21  ;;  %v4101_v29 = vpop.eup %4100 }
  0x2a   : > { %1269 = vrot.lane.b32.xlu1 %v4493_v15, %s4340_s27  ;;  %v612_v30 = vmul.f32 %v4101_v29, %v610_v28  ;;  %vm617_vm2 = vweird.f32 %v4101_v29  ;;  %s4345_s27 = smov 120  }
  0x2b   : > { %vm618_vm3 = vmor %vm616_vm1, %vm617_vm2 }
  0x2c   : > { %v613_v31 = vsub.f32 1.0, %v612_v30 }
  0x2d   : > { %1165 = vrot.lane.b32.xlu2 %v532_v5, %s4341_s16 }
  0x2e   : > { %v614_v32 = vmul.f32 %v4101_v29, %v613_v31 }
  0x30   : > { %v615_v35 = vadd.f32 %v4101_v29, %v614_v32  ;;  %v4344_v32 = vmov 32.0  }
  0x31   : > { %1243 = vrot.lane.b32.xlu0 %v4483_v12, %s4342_s21  ;;  %4102 = vrcp.f32 %v4344_v32 }
  0x32   : > { %1249 = vrot.lane.b32.xlu1 %v532_v5, %s4342_s21  ;;  %v619_v39 = vsel %vm618_vm3, %v4101_v29, %v615_v35 }
  0x33   : > { %3909 = vmatmul.msk.bf16.gmra.mxu0 %vm564_vm0, %v550_v18  ;;  %v624_v40 = vsel %vm621_vm4, %v623_v38, %v619_v39 }
  0x34   : > { %v626_v41 = vmul.f32 %v624_v40, %v606_v24 }
  0x35   : > { %1673 = vrot.lane.b32.xlu2 %v4493_v15, %s4343_s22 }
  0x36   : > { %v627_v42 = vpack.c.bf16 %v626_v41, %v626_v41 }
  0x37   : > { %v4103_v34 = vpop.eup %4102 }
  0x38   : > { %3919 = vmatmul.msk.bf16.vlgmr.msra.gmra.mxu1 %vm645_vm5, %v627_v42  ;;  %v695_v37 = vmul.f32 32.0, %v4103_v34  ;;  %vm699_vm6 = vweird.f32 %v4103_v34 }
  0x39   : > { %1237 = vrot.lane.b32.xlu0 %v4493_v15, %s4342_s21 }
  0x3a   : > { %1245 = vrot.lane.b32.xlu1 %v530_v7, %s4342_s21  ;;  %v696_v39 = vsub.f32 1.0, %v695_v37  ;;  %v632_v37 = vld [vmem:[%s6380_s13] sm:$0x1] }
  0x3c   : > { %v697_v41 = vmul.f32 %v4103_v34, %v696_v39 }
  0x3d   : > { %1163 = vrot.lane.b32.xlu2 %v531_v14, %s4341_s16 }
  0x41   : > { %1167 = vrot.lane.b32.xlu0 %v533_v4, %s4341_s16 }
  0x42   : > { %1241 = vrot.lane.b32.xlu1 %v4469_v6, %s4342_s21 }
  0x43   : > { %3910 = vmatmul.msk.bf16.gmra.mxu0 %vm564_vm0, %v551_v22 }
  0x45   : > { %1157 = vrot.lane.b32.xlu2 %v4469_v6, %s4341_s16 }
  0x49   : > { %1675 = vrot.lane.b32.xlu0 %v4505_v19, %s4343_s22 }
  0x4a   : > { %1239 = vrot.lane.b32.xlu1 %v4505_v19, %s4342_s21 }
  0x51   : > { %1161 = vrot.lane.b32.xlu0 %v530_v7, %s4341_s16 }
  0x52   : > { %1546 = vrot.lane.b32.xlu1 %v4091_v23, %s4343_s22 }
  0x5a   : > { %1159 = vrot.lane.b32.xlu1 %v4483_v12, %s4341_s16 }
  0x67   : > { %v4609_v25 = vpop.permute.xlu2 %1134 }
  0x6f   : > { %v4615_v28 = vpop.permute.xlu2 %1279 }
  0x77   : > { %v4621_v31 = vpop.permute.xlu2 %1271 }
  0x7f   : > { %v4627_v36 = vpop.permute.xlu2 %1251 }
  0x80   : > { %6443 = vst [vmem:[#allocation16_spill] sm:$0xff] %v4627_v36 }
  0x83   : > { %v4571_v61 = vpop.permute.xlu0 %1283 }
  0x84   : > { %v4578_v1 = vpop.permute.xlu1 %1281 }
  0x8b   : > { %v4582_v4 = vpop.permute.xlu0 %1273 }
  0x8c   : > { %v4587_v8 = vpop.permute.xlu1 %1277 }
  0x90   : > { %v586_v44 = vpop.f32.mrf.mxu0 }
  0x91   : > { %v4551_v45 = vadd.f32 %v4092_v43, %v586_v44  ;;  %v698_v44 = vadd.f32 %v4103_v34, %v697_v41 }
  0x93   : > { %6429 = vst [vmem:[#allocation2_spill] sm:$0xff] %v4551_v45  ;;  %v662_v46 = vmul.f32 %v4551_v45, %v4551_v45  ;;  %v4593_v13 = vpop.permute.xlu0 %1121 }
  0x94   : > { %v4598_v18 = vpop.permute.xlu1 %1275 }
  0x95   : > { %v670_v47 = vsel %vm645_vm5, %v662_v46, 0.0 }
  0x96   : > { %671 = vadd.xlane.f32.xlu0 %v670_v47 }
  0x98   : > { %v588_v48 = vpop.f32.mrf.mxu0 }
  0x99   : > { %v4556_v49 = vadd.f32 %v4092_v43, %v588_v48  ;;  %v4637_v48 = vsel %vm699_vm6, %v4103_v34, %v698_v44 }
  0x9a   : > { %6444 = vst [vmem:[#allocation17_spill] sm:$0xff] %v4637_v48 }
  0x9b   : > { %6430 = vst [vmem:[#allocation3_spill] sm:$0xff] %v4556_v49  ;;  %v663_v50 = vmul.f32 %v4556_v49, %v4556_v49  ;;  %v4603_v22 = vpop.permute.xlu0 %1247 }
  0x9c   : > { %6437 = vst [vmem:[#allocation10_spill] sm:$0xff] %v4603_v22  ;;  %v4605_v23 = vpop.permute.xlu1 %1269 }
  0x9d   : > { %v673_v51 = vsel %vm645_vm5, %v663_v50, 0.0  ;;  %v4029_v50 = vld [vmem:[%s6373_s6 + $0x8] sm:$0xff] }
  0x9e   : > { %674 = vadd.xlane.f32.xlu0 %v673_v51  ;;  %864 = vmatpush.bf16.msra.mxu2 %v4029_v50 }
  0xa0   : > { %v591_v52 = vpop.f32.mrf.mxu0 }
  0xa1   : > { %v4561_v53 = vadd.f32 %v4092_v43, %v591_v52 }
  0xa3   : > { %6431 = vst [vmem:[#allocation4_spill] sm:$0xff] %v4561_v53  ;;  %v664_v54 = vmul.f32 %v4561_v53, %v4561_v53  ;;  %v4607_v24 = vpop.permute.xlu0 %1243 }
  0xa4   : > { %6438 = vst [vmem:[#allocation11_spill] sm:$0xff] %v4607_v24  ;;  %v4611_v26 = vpop.permute.xlu1 %1249 }
  0xa5   : > { %v676_v55 = vsel %vm645_vm5, %v664_v54, 0.0  ;;  %6439 = vst [vmem:[#allocation12_spill] sm:$0xff] %v4611_v26 }
  0xa6   : > { %677 = vadd.xlane.f32.xlu1 %v676_v55  ;;  %v4028_v55 = vld [vmem:[%s6373_s6] sm:$0xff] }
  0xa7   : > { %865 = vmatpush.bf16.msra.mxu2 %v4028_v55 }
  0xa8   : > { %v593_v56 = vpop.f32.mrf.mxu0 }
  0xa9   : > { %v4566_v57 = vadd.f32 %v4092_v43, %v593_v56 }
  0xab   : > { %6432 = vst [vmem:[#allocation5_spill] sm:$0xff] %v4566_v57  ;;  %v665_v58 = vmul.f32 %v4566_v57, %v4566_v57  ;;  %v4613_v27 = vpop.permute.xlu0 %1237 }
  0xac   : > { %v4617_v29 = vpop.permute.xlu1 %1245 }
  0xad   : > { %v679_v59 = vsel %vm645_vm5, %v665_v58, 0.0  ;;  %6440 = vst [vmem:[#allocation13_spill] sm:$0xff] %v4617_v29 }
  0xae   : > { %680 = vadd.xlane.f32.xlu1 %v679_v59 }
  0xb0   : > { %v596_v60 = vpop.f32.mrf.mxu0 }
  0xb1   : > { %v4573_v62 = vadd.f32 %v4092_v43, %v596_v60 }
  0xb3   : > { %6433 = vst [vmem:[#allocation6_spill] sm:$0xff] %v4573_v62  ;;  %v666_v63 = vmul.f32 %v4573_v62, %v4573_v62  ;;  %v4619_v30 = vpop.permute.xlu0 %1167 }
  0xb4   : > { %6441 = vst [vmem:[#allocation14_spill] sm:$0xff] %v4619_v30  ;;  %v4623_v33 = vpop.permute.xlu1 %1241 }
  0xb5   : > { %v682_v0 = vsel %vm645_vm5, %v666_v63, 0.0  ;;  %6442 = vst [vmem:[#allocation15_spill] sm:$0xff] %v4623_v33  ;;  %v658_v40 = vpop.f32.mrf.mxu1 }
  0xb6   : > { %683 = vadd.xlane.f32.xlu2 %v682_v0  ;;  %v4659_v44 = vadd.f32 %v658_v40, %v632_v37 }
  0xb8   : > { %v598_v2 = vpop.f32.mrf.mxu0  ;;  %6447 = vst [vmem:[#allocation20_spill] sm:$0xff] %v4659_v44 }
  0xb9   : > { %v4580_v3 = vadd.f32 %v4092_v43, %v598_v2 }
  0xbb   : > { %6434 = vst [vmem:[#allocation7_spill] sm:$0xff] %v4580_v3  ;;  %v667_v5 = vmul.f32 %v4580_v3, %v4580_v3  ;;  %v4625_v35 = vpop.permute.xlu0 %1675 }
  0xbc   : > { %v4629_v38 = vpop.permute.xlu1 %1239 }
  0xbd   : > { %v685_v7 = vsel %vm645_vm5, %v667_v5, 0.0  ;;  %v660_v47 = vpop.f32.mrf.mxu1 }
  0xbe   : > { %686 = vadd.xlane.f32.xlu2 %v685_v7 }
  0xc0   : > { %v601_v9 = vpop.f32.mrf.mxu0 }
  0xc1   : > { %v4589_v10 = vadd.f32 %v4092_v43, %v601_v9 }
  0xc3   : > { %6435 = vst [vmem:[#allocation8_spill] sm:$0xff] %v4589_v10  ;;  %v668_v11 = vmul.f32 %v4589_v10, %v4589_v10  ;;  %v4631_v42 = vpop.permute.xlu0 %1161 }
  0xc4   : > { %v4635_v46 = vpop.permute.xlu1 %1546 }
  0xc5   : > { %v688_v14 = vsel %vm645_vm5, %v668_v11, 0.0 }
  0xc6   : > { %689 = vadd.xlane.f32.xlu0 %v688_v14 }
  0xc8   : > { %v603_v16 = vpop.f32.mrf.mxu0 }
  0xc9   : > { %v4596_v17 = vadd.f32 %v4092_v43, %v603_v16  ;;  %v4633_v43 = vpop.permute.xlu2 %1165 }
  0xcb   : > { %6436 = vst [vmem:[#allocation9_spill] sm:$0xff] %v4596_v17  ;;  %v669_v20 = vmul.f32 %v4596_v17, %v4596_v17 }
  0xcc   : > { %v4648_v58 = vpop.permute.xlu1 %1159 }
  0xcd   : > { %v691_v21 = vsel %vm645_vm5, %v669_v20, 0.0  ;;  %6445 = vst [vmem:[#allocation18_spill] sm:$0xff] %v4648_v58 }
  0xce   : > { %692 = vadd.xlane.f32.xlu1 %v691_v21 }
  0xd1   : > { %v4643_v54 = vpop.permute.xlu2 %1673 }
  0xd9   : > { %v4651_v5 = vpop.permute.xlu2 %1163 }
  0xe1   : > { %v4657_v41 = vpop.permute.xlu2 %1157 }
  0xe2   : > { %6446 = vst [vmem:[#allocation19_spill] sm:$0xff] %v4657_v41 }
 0x109   : > { %v672_v51 = vpop.xlane.xlu0 %671 }
 0x10a   : > { %v701_v52 = vmul.f32 %v4637_v48, %v672_v51 }
 0x10c   : > { %v709_v56 = vadd.f32 1e-05, %v701_v52 }
 0x10e   : > { %4104 = vrsqrt.f32 %v709_v56  ;;  %vm723_vm8 = vweird.f32 %v709_v56 }
 0x111   : > { %v675_v59 = vpop.xlane.xlu0 %674 }
 0x112   : > { %v702_v60 = vmul.f32 %v4637_v48, %v675_v59 }
 0x114   : > { %v4105_v63 = vpop.eup %4104  ;;  %v710_v0 = vadd.f32 1e-05, %v702_v60  ;;  %v816_v60 = vadd.f32 1.0, %v4659_v44 }
 0x115   : > { %v718_v2 = vmul.f32 %v4105_v63, %v709_v56  ;;  %vm724_vm7 = vweird.f32 %v4105_v63  ;;  %v4667_v56 = vld [vmem:[%s6376_s9] ss:$0 sm:$0xff] }
 0x116   : > { %4106 = vrsqrt.f32 %v710_v0  ;;  %vm725_vm9 = vmor %vm723_vm8, %vm724_vm7  ;;  %vm733_vm11 = vweird.f32 %v710_v0 }
 0x117   : > { %v719_v7 = vmul.f32 %v4105_v63, %v718_v2 }
 0x119   : > { %v720_v9 = vmul.f32 0.5, %v719_v7  ;;  %v678_v11 = vpop.xlane.xlu1 %677 }
 0x11a   : > { %v703_v14 = vmul.f32 %v4637_v48, %v678_v11 }
 0x11b   : > { %v721_v16 = vsub.f32 1.5, %v720_v9 }
 0x11c   : > { %v4107_v20 = vpop.eup %4106  ;;  %v711_v21 = vadd.f32 1e-05, %v703_v14  ;;  %v4669_v14 = vperm.slane %v816_v60, 0 }
 0x11d   : > { %v722_v32 = vmul.f32 %v4105_v63, %v721_v16  ;;  %v728_v34 = vmul.f32 %v4107_v20, %v710_v0  ;;  %vm734_vm10 = vweird.f32 %v4107_v20 }
 0x11e   : > { %4108 = vrsqrt.f32 %v711_v21  ;;  %vm735_vm12 = vmor %vm733_vm11, %vm734_vm10  ;;  %6448 = vst [vmem:[#allocation21_spill] sm:$0xff] %v4669_v14  ;;  %vm743_vm13 = vweird.f32 %v711_v21 }
 0x11f   : > { %v729_v39 = vmul.f32 %v4107_v20, %v728_v34  ;;  %v726_v47 = vsel %vm725_vm9, %v4105_v63, %v722_v32 }
 0x120   : > { %v797_v7 = vmul.f32 %v726_v47, %v4551_v45 }
 0x121   : > { %v730_v50 = vmul.f32 0.5, %v729_v39  ;;  %v681_v51 = vpop.xlane.xlu1 %680 }
 0x122   : > { %v704_v52 = vmul.f32 %v4637_v48, %v681_v51  ;;  %v808_v32 = vmul.f32 %v4667_v56, %v797_v7 }
 0x123   : > { %v731_v55 = vsub.f32 1.5, %v730_v50 }
 0x124   : > { %v4109_v59 = vpop.eup %4108  ;;  %v712_v2 = vadd.f32 1e-05, %v704_v52 }
 0x125   : > { %v732_v40 = vmul.f32 %v4107_v20, %v731_v55  ;;  %v738_v63 = vmul.f32 %v4109_v59, %v711_v21  ;;  %vm744_vm14 = vweird.f32 %v4109_v59 }
 0x126   : > { %4110 = vrsqrt.f32 %v712_v2  ;;  %vm745_vm15 = vmor %vm743_vm13, %vm744_vm14  ;;  %vm753_vm1 = vweird.f32 %v712_v2 }
 0x127   : > { %v736_v9 = vsel %vm735_vm12, %v4107_v20, %v732_v40  ;;  %v739_v11 = vmul.f32 %v4109_v59, %v738_v63  ;;  %v818_v20 = vmul.f32 %v4669_v14, %v808_v32 }
 0x128   : > { %v798_v16 = vmul.f32 %v736_v9, %v4556_v49 }
 0x129   : > { %v740_v34 = vmul.f32 0.5, %v739_v11  ;;  %v684_v37 = vpop.xlane.xlu2 %683 }
 0x12a   : > { %v705_v39 = vmul.f32 %v4637_v48, %v684_v37  ;;  %v809_v47 = vmul.f32 %v4667_v56, %v798_v16 }
 0x12b   : > { %v741_v50 = vsub.f32 1.5, %v740_v34 }
 0x12c   : > { %v4111_v0 = vpop.eup %4110  ;;  %v713_v51 = vadd.f32 1e-05, %v705_v39  ;;  %v819_v52 = vmul.f32 %v4669_v14, %v809_v47 }
 0x12d   : > { %v742_v55 = vmul.f32 %v4109_v59, %v741_v50  ;;  %v748_v60 = vmul.f32 %v4111_v0, %v712_v2  ;;  %vm754_vm2 = vweird.f32 %v4111_v0 }
 0x12e   : > { %4112 = vrsqrt.f32 %v713_v51  ;;  %v826_v7 = vpack.c.bf16 %v819_v52, %v818_v20  ;;  %vm755_vm3 = vmor %vm753_vm1, %vm754_vm2  ;;  %vm763_vm4 = vweird.f32 %v713_v51  ;;  %vm927_vm2 = vcmask 64512  }
 0x12f   : > { %v749_v40 = vmul.f32 %v4111_v0, %v748_v60  ;;  %v746_v63 = vsel %vm745_vm15, %v4109_v59, %v742_v55 }
 0x130   : > { %3928 = vmatmul.msk.bf16.vlgmr.msra.gmra.mxu2 %vm645_vm5, %v826_v7  ;;  %v799_v37 = vmul.f32 %v746_v63, %v4561_v53 }
 0x131   : > { %v750_v9 = vmul.f32 0.5, %v749_v40  ;;  %v687_v21 = vpop.xlane.xlu2 %686 }
 0x132   : > { %v706_v11 = vmul.f32 %v4637_v48, %v687_v21  ;;  %v810_v59 = vmul.f32 %v4667_v56, %v799_v37 }
 0x133   : > { %v751_v16 = vsub.f32 1.5, %v750_v9 }
 0x134   : > { %v4113_v34 = vpop.eup %4112  ;;  %v714_v32 = vadd.f32 1e-05, %v706_v11  ;;  %v820_v21 = vmul.f32 %v4669_v14, %v810_v59 }
 0x135   : > { %v752_v39 = vmul.f32 %v4111_v0, %v751_v16  ;;  %v758_v47 = vmul.f32 %v4113_v34, %v713_v51  ;;  %vm764_vm6 = vweird.f32 %v4113_v34 }
 0x136   : > { %4114 = vrsqrt.f32 %v714_v32  ;;  %vm765_vm7 = vmor %vm763_vm4, %vm764_vm6  ;;  %vm773_vm8 = vweird.f32 %v714_v32 }
 0x137   : > { %v756_v50 = vsel %vm755_vm3, %v4111_v0, %v752_v39  ;;  %v759_v20 = vmul.f32 %v4113_v34, %v758_v47 }
 0x138   : > { %v800_v52 = vmul.f32 %v756_v50, %v4566_v57 }
 0x139   : > { %v760_v2 = vmul.f32 0.5, %v759_v20  ;;  %v690_v55 = vpop.xlane.xlu0 %689 }
 0x13a   : > { %v707_v60 = vmul.f32 %v4637_v48, %v690_v55  ;;  %v811_v7 = vmul.f32 %v4667_v56, %v800_v52 }
 0x13b   : > { %v761_v40 = vsub.f32 1.5, %v760_v2 }
 0x13c   : > { %v4115_v9 = vpop.eup %4114  ;;  %v715_v63 = vadd.f32 1e-05, %v707_v60  ;;  %v821_v0 = vmul.f32 %v4669_v14, %v811_v7 }
 0x13d   : > { %v762_v11 = vmul.f32 %v4113_v34, %v761_v40  ;;  %v768_v16 = vmul.f32 %v4115_v9, %v714_v32  ;;  %vm774_vm9 = vweird.f32 %v4115_v9 }
 0x13e   : > { %4116 = vrsqrt.f32 %v715_v63  ;;  %v827_v37 = vpack.c.bf16 %v821_v0, %v820_v21  ;;  %vm775_vm10 = vmor %vm773_vm8, %vm774_vm9  ;;  %vm783_vm11 = vweird.f32 %v715_v63 }
 0x13f   : > { %v769_v39 = vmul.f32 %v4115_v9, %v768_v16  ;;  %v766_v47 = vsel %vm765_vm7, %v4113_v34, %v762_v11 }
 0x140   : > { %3929 = vmatmul.msk.bf16.gmra.mxu2 %vm645_vm5, %v827_v37  ;;  %v801_v55 = vmul.f32 %v766_v47, %v4573_v62 }
 0x141   : > { %v770_v50 = vmul.f32 0.5, %v769_v39  ;;  %v693_v51 = vpop.xlane.xlu1 %692 }
 0x142   : > { %v708_v20 = vmul.f32 %v4637_v48, %v693_v51  ;;  %v812_v34 = vmul.f32 %v4667_v56, %v801_v55 }
 0x143   : > { %v771_v52 = vsub.f32 1.5, %v770_v50 }
 0x144   : > { %v4117_v2 = vpop.eup %4116  ;;  %v716_v59 = vadd.f32 1e-05, %v708_v20  ;;  %v822_v39 = vmul.f32 %v4669_v14, %v812_v34 }
 0x145   : > { %v772_v60 = vmul.f32 %v4115_v9, %v771_v52  ;;  %v778_v7 = vmul.f32 %v4117_v2, %v715_v63  ;;  %vm784_vm12 = vweird.f32 %v4117_v2 }
 0x146   : > { %4118 = vrsqrt.f32 %v716_v59  ;;  %vm785_vm13 = vmor %vm783_vm11, %vm784_vm12  ;;  %vm793_vm14 = vweird.f32 %v716_v59 }
 0x147   : > { %v776_v40 = vsel %vm775_vm10, %v4115_v9, %v772_v60  ;;  %v779_v21 = vmul.f32 %v4117_v2, %v778_v7 }
 0x148   : > { %v802_v0 = vmul.f32 %v776_v40, %v4580_v3 }
 0x149   : > { %v780_v32 = vmul.f32 0.5, %v779_v21 }
 0x14a   : > { %v813_v11 = vmul.f32 %v4667_v56, %v802_v0 }
 0x14b   : > { %v781_v16 = vsub.f32 1.5, %v780_v32 }
 0x14c   : > { %v4119_v37 = vpop.eup %4118  ;;  %v823_v47 = vmul.f32 %v4669_v14, %v813_v11 }
 0x14d   : > { %v782_v50 = vmul.f32 %v4117_v2, %v781_v16  ;;  %v788_v51 = vmul.f32 %v4119_v37, %v716_v59  ;;  %vm794_vm15 = vweird.f32 %v4119_v37 }
 0x14e   : > { %v828_v9 = vpack.c.bf16 %v823_v47, %v822_v39  ;;  %vm795_vm1 = vmor %vm793_vm14, %vm794_vm15 }
 0x14f   : > { %v789_v20 = vmul.f32 %v4119_v37, %v788_v51  ;;  %v786_v52 = vsel %vm785_vm13, %v4117_v2, %v782_v50 }
 0x150   : > { %3930 = vmatmul.msk.bf16.gmra.mxu2 %vm645_vm5, %v828_v9  ;;  %v803_v63 = vmul.f32 %v786_v52, %v4589_v10 }
 0x151   : > { %v790_v55 = vmul.f32 0.5, %v789_v20 }
 0x152   : > { %v814_v0 = vmul.f32 %v4667_v56, %v803_v63 }
 0x153   : > { %v791_v60 = vsub.f32 1.5, %v790_v55 }
 0x154   : > { %v824_v32 = vmul.f32 %v4669_v14, %v814_v0 }
 0x155   : > { %v792_v7 = vmul.f32 %v4119_v37, %v791_v60 }
 0x157   : > { %v796_v40 = vsel %vm795_vm1, %v4119_v37, %v792_v7 }
 0x158   : > { %v804_v21 = vmul.f32 %v796_v40, %v4596_v17 }
 0x15a   : > { %v815_v34 = vmul.f32 %v4667_v56, %v804_v21 }
 0x15c   : > { %v825_v11 = vmul.f32 %v4669_v14, %v815_v34 }
 0x15e   : > { %v829_v2 = vpack.c.bf16 %v825_v11, %v824_v32 }
 0x160   : > { %3931 = vmatmul.msk.bf16.gmra.mxu2 %vm645_vm5, %v829_v2 }
 0x1b3   : > { %v4702_v59 = vpop.f32.mrf.mxu2 }
 0x1b4   : > { %v887_v16 = vmul.f32 %v4702_v59, %v4702_v59 }
 0x1b6   : > { %2048 = vrot.lane.b32.xlu0 %v887_v16, %s4345_s27  ;;  %952 = vrot.lane.b32.xlu2 %v887_v16, %s4346_s28  ;;  %v1349_v20 = vsel %vm927_vm2, %v887_v16, 0.0 }
 0x1b7   : > { %903 = vrot.lane.b32.xlu1 %v887_v16, %s4347_s15 }
 0x1bb   : > { %v4709_v56 = vpop.f32.mrf.mxu2 }
 0x1bc   : > { %v888_v37 = vmul.f32 %v4709_v56, %v4709_v56 }
 0x1be   : > { %1373 = vrot.lane.b32.xlu2 %v887_v16, %s4348_s18  ;;  %905 = vrot.lane.b32.xlu0 %v888_v37, %s4347_s15  ;;  %v1352_v52 = vsel %vm927_vm2, %v888_v37, 0.0 }
 0x1bf   : > { %954 = vrot.lane.b32.xlu1 %v888_v37, %s4346_s28 }
 0x1c3   : > { %v4716_v39 = vpop.f32.mrf.mxu2 }
 0x1c4   : > { %v889_v55 = vmul.f32 %v4716_v39, %v4716_v39 }
 0x1c6   : > { %2096 = vrot.lane.b32.xlu2 %v887_v16, %s4349_s19  ;;  %1375 = vrot.lane.b32.xlu0 %v888_v37, %s4348_s18  ;;  %v1355_v0 = vsel %vm927_vm2, %v889_v55, 0.0 }
 0x1c7   : > { %2050 = vrot.lane.b32.xlu1 %v888_v37, %s4345_s27 }
 0x1cb   : > { %v4721_v47 = vpop.f32.mrf.mxu2 }
 0x1cc   : > { %6449 = vst [vmem:[#allocation22_spill] sm:$0xff] %v4721_v47  ;;  %v890_v50 = vmul.f32 %v4721_v47, %v4721_v47 }
 0x1ce   : > { %2098 = vrot.lane.b32.xlu0 %v888_v37, %s4349_s19  ;;  %v1358_v34 = vsel %vm927_vm2, %v890_v50, 0.0 }
 0x1cf   : > { %909 = vrot.lane.b32.xlu1 %v890_v50, %s4347_s15 }
 0x1d3   : > { %v4728_v51 = vpop.f32.mrf.mxu2 }
 0x1d4   : > { %6450 = vst [vmem:[#allocation23_spill] sm:$0xff] %v4728_v51  ;;  %v891_v9 = vmul.f32 %v4728_v51, %v4728_v51 }
 0x1d6   : > { %v1361_v60 = vsel %vm927_vm2, %v891_v9, 0.0 }
 0x1d7   : > { %2054 = vrot.lane.b32.xlu1 %v890_v50, %s4345_s27 }
 0x1db   : > { %v4745_v63 = vpop.f32.mrf.mxu2 }
 0x1dc   : > { %6451 = vst [vmem:[#allocation24_spill] sm:$0xff] %v4745_v63  ;;  %v892_v7 = vmul.f32 %v4745_v63, %v4745_v63 }
 0x1de   : > { %v1364_v17 = vsel %vm927_vm2, %v892_v7, 0.0 }
 0x1df   : > { %960 = vrot.lane.b32.xlu1 %v891_v9, %s4346_s28 }
 0x1e3   : > { %v4750_v40 = vpop.f32.mrf.mxu2 }
 0x1e4   : > { %v4754_v21 = vmul.f32 %v4750_v40, %v4750_v40 }
 0x1e7   : > { %1381 = vrot.lane.b32.xlu1 %v891_v9, %s4348_s18 }
 0x1ef   : > { %1350 = vadd.xlane.f32.xlu2 %v1349_v20 }
 0x1f8   : > { %1353 = vadd.xlane.f32.xlu0 %v1352_v52 }
 0x207   : > { %907 = vrot.lane.b32.xlu2 %v889_v55, %s4347_s15 }
 0x20c   : > { %956 = vrot.lane.b32.xlu0 %v889_v55, %s4346_s28 }
 0x20f   : > { %1377 = vrot.lane.b32.xlu2 %v889_v55, %s4348_s18 }
 0x210   : > { %v953_v32 = vpop.permute.xlu2 %952 }
 0x211   : > { %1362 = vadd.xlane.f32.xlu1 %v1361_v60  ;;  %v976_v37 = vsel %vm927_vm2, %v953_v32, 0.0 }
 0x214   : > { %2052 = vrot.lane.b32.xlu0 %v889_v55, %s4345_s27 }
 0x217   : > { %2100 = vrot.lane.b32.xlu2 %v889_v55, %s4349_s19 }
 0x218   : > { %v1374_v11 = vpop.permute.xlu2 %1373 }
 0x21f   : > { %958 = vrot.lane.b32.xlu2 %v890_v50, %s4346_s28 }
 0x220   : > { %v2097_v16 = vpop.permute.xlu2 %2096 }
 0x229   : > { %v4764_v2 = vpop.permute.xlu1 %903 }
 0x22a   : > { %2058 = vrot.lane.b32.xlu1 %v892_v7, %s4345_s27 }
 0x231   : > { %v4769_v20 = vpop.permute.xlu1 %954 }
 0x232   : > { %964 = vrot.lane.b32.xlu1 %v4754_v21, %s4346_s28 }
 0x239   : > { %v2051_v55 = vpop.permute.xlu1 %2050 }
 0x23a   : > { %2108 = vrot.lane.b32.xlu1 %v4754_v21, %s4349_s19 }
 0x23e   : > { %1356 = vadd.xlane.f32.xlu0 %v1355_v0  ;;  %v2075_v0 = vsel %vm927_vm2, %v2051_v55, 0.0 }
 0x248   : > { %1359 = vadd.xlane.f32.xlu2 %v1358_v34 }
 0x252   : > { %1379 = vrot.lane.b32.xlu0 %v890_v50, %s4348_s18 }
 0x25a   : > { %2102 = vrot.lane.b32.xlu0 %v890_v50, %s4349_s19  ;;  %v1397_v50 = vsel %vm927_vm2, %v1374_v11, 0.0  ;;  %v4784_v11 = vpop.permute.xlu0 %2048 }
 0x260   : > { %2056 = vrot.lane.b32.xlu2 %v891_v9, %s4345_s27 }
 0x262   : > { %911 = vrot.lane.b32.xlu0 %v891_v9, %s4347_s15  ;;  %v4771_v52 = vpop.xlane.xlu2 %1350 }
 0x264   : > { %977 = vadd.xlane.f32.xlu1 %v976_v37 }
 0x268   : > { %913 = vrot.lane.b32.xlu2 %v892_v7, %s4347_s15 }
 0x26a   : > { %2104 = vrot.lane.b32.xlu0 %v891_v9, %s4349_s19  ;;  %v908_v60 = vpop.permute.xlu2 %907 }
 0x26b   : > { %v934_v34 = vsel %vm927_vm2, %v908_v60, 0.0 }
 0x26c   : > { %1398 = vadd.xlane.f32.xlu1 %v1397_v50  ;;  %v4788_v50 = vpop.f32.mrf.mxu2 }
 0x26d   : > { %6452 = vst [vmem:[#allocation25_spill] sm:$0xff] %v4788_v50  ;;  %v4793_v60 = vmul.f32 %v4788_v50, %v4788_v50 }
 0x270   : > { %1383 = vrot.lane.b32.xlu2 %v892_v7, %s4348_s18 }
 0x272   : > { %962 = vrot.lane.b32.xlu0 %v892_v7, %s4346_s28  ;;  %v1378_v32 = vpop.permute.xlu2 %1377 }
 0x273   : > { %v1403_v9 = vsel %vm927_vm2, %v1378_v32, 0.0 }
 0x274   : > { %2076 = vadd.xlane.f32.xlu1 %v2075_v0  ;;  %v906_v0 = vpop.permute.xlu0 %905 }
 0x275   : > { %v931_v45 = vsel %vm927_vm2, %v906_v0, 0.0 }
 0x278   : > { %2106 = vrot.lane.b32.xlu2 %v892_v7, %s4349_s19 }
 0x27a   : > { %v2101_v37 = vpop.permute.xlu2 %2100 }
 0x27b   : > { %v2126_v55 = vsel %vm927_vm2, %v2101_v37, 0.0  ;;  %v910_v37 = vpop.permute.xlu1 %909 }
 0x27c   : > { %935 = vadd.xlane.f32.xlu1 %v934_v34 }
 0x280   : > { %915 = vrot.lane.b32.xlu2 %v4754_v21, %s4347_s15 }
 0x282   : > { %v959_v34 = vpop.permute.xlu2 %958 }
 0x283   : > { %v985_v32 = vsel %vm927_vm2, %v959_v34, 0.0  ;;  %v2055_v10 = vpop.permute.xlu1 %2054 }
 0x284   : > { %1404 = vadd.xlane.f32.xlu1 %v1403_v9  ;;  %v1376_v9 = vpop.permute.xlu0 %1375 }
 0x288   : > { %2060 = vrot.lane.b32.xlu2 %v4754_v21, %s4345_s27 }
 0x28b   : > { %v4805_v62 = vpop.permute.xlu1 %960 }
 0x28c   : > { %2127 = vadd.xlane.f32.xlu1 %v2126_v55  ;;  %v2099_v55 = vpop.permute.xlu0 %2098 }
 0x290   : > { %966 = vrot.lane.b32.xlu2 %v4793_v60, %s4346_s28  ;;  %s4351_s28 = smov 8  }
 0x293   : > { %v1382_v57 = vpop.permute.xlu1 %1381 }
 0x294   : > { %986 = vadd.xlane.f32.xlu1 %v985_v32  ;;  %v4801_v3 = vpop.xlane.xlu0 %1353 }
 0x298   : > { %1387 = vrot.lane.b32.xlu2 %v4793_v60, %s4348_s18 }
 0x29b   : > { %v4818_v49 = vpop.xlane.xlu1 %1362 }
 0x29c   : > { %1365 = vadd.xlane.f32.xlu0 %v1364_v17  ;;  %v957_v53 = vpop.permute.xlu0 %956  ;;  %v2120_v17 = vsel %vm927_vm2, %v2097_v16, 0.0  ;;  %6453 = vst [vmem:[#allocation26_spill] sm:$0xff] %v4818_v49  ;;  %v1400_v16 = vsel %vm927_vm2, %v1376_v9, 0.0 }
 0x29d   : > { %v982_v41 = vsel %vm927_vm2, %v957_v53, 0.0 }
 0x2a3   : > { %v2059_v36 = vpop.permute.xlu1 %2058 }
 0x2a4   : > { %v2053_v32 = vpop.permute.xlu0 %2052 }
 0x2ab   : > { %v965_v58 = vpop.permute.xlu1 %964 }
 0x2b0   : > { %1385 = vrot.lane.b32.xlu0 %v4754_v21, %s4348_s18 }
 0x2b1   : > { %v4816_v14 = vpop.xlane.xlu0 %1356 }
 0x2b8   : > { %917 = vrot.lane.b32.xlu0 %v4793_v60, %s4347_s15 }
 0x2bb   : > { %v4809_v34 = vpop.xlane.xlu2 %1359 }
 0x2c0   : > { %2062 = vrot.lane.b32.xlu0 %v4793_v60, %s4345_s27 }
 0x2c1   : > { %2121 = vadd.xlane.f32.xlu2 %v2120_v17 }
 0x2c3   : > { %v4814_v7 = vpop.permute.xlu2 %2056 }
 0x2c4   : > { %v1380_v26 = vpop.permute.xlu0 %1379 }
 0x2c8   : > { %2110 = vrot.lane.b32.xlu0 %v4793_v60, %s4349_s19 }
 0x2c9   : > { %932 = vadd.xlane.f32.xlu2 %v931_v45  ;;  %v994_v45 = vsel %vm927_vm2, %v965_v58, 0.0 }
 0x2cb   : > { %v914_v44 = vpop.permute.xlu2 %913 }
 0x2cc   : > { %v943_v48 = vsel %vm927_vm2, %v914_v44, 0.0  ;;  %v2103_v29 = vpop.permute.xlu0 %2102  ;;  %v2081_v44 = vsel %vm927_vm2, %v2055_v10, 0.0  ;;  %v2072_v10 = vsel %vm927_vm2, %v4784_v11, 0.0 }
 0x2cd   : > { %944 = vadd.xlane.f32.xlu1 %v943_v48 }
 0x2d1   : > { %1401 = vadd.xlane.f32.xlu2 %v1400_v16  ;;  %v1409_v16 = vsel %vm927_vm2, %v1382_v57, 0.0  ;;  %v979_v57 = vsel %vm927_vm2, %v4769_v20, 0.0  ;;  %v1406_v20 = vsel %vm927_vm2, %v1380_v26, 0.0  ;;  %v988_v26 = vsel %vm927_vm2, %v4805_v62, 0.0 }
 0x2d3   : > { %v1384_v17 = vpop.permute.xlu2 %1383 }
 0x2d4   : > { %v1412_v22 = vsel %vm927_vm2, %v1384_v17, 0.0  ;;  %v912_v0 = vpop.permute.xlu0 %911 }
 0x2d5   : > { %1413 = vadd.xlane.f32.xlu1 %v1412_v22  ;;  %v940_v48 = vsel %vm927_vm2, %v912_v0, 0.0  ;;  %v928_v22 = vsel %vm927_vm2, %v4764_v2, 0.0  ;;  %v2123_v2 = vsel %vm927_vm2, %v2099_v55, 0.0 }
 0x2d9   : > { %983 = vadd.xlane.f32.xlu2 %v982_v41 }
 0x2db   : > { %v4838_v41 = vpop.permute.xlu2 %2106 }
 0x2dc   : > { %v2105_v9 = vpop.permute.xlu0 %2104 }
 0x2dd   : > { %995 = vadd.xlane.f32.xlu1 %v994_v45 }
 0x2e1   : > { %2082 = vadd.xlane.f32.xlu2 %v2081_v44  ;;  %v937_v44 = vsel %vm927_vm2, %v910_v37, 0.0 }
 0x2e3   : > { %v916_v17 = vpop.permute.xlu2 %915 }
 0x2e4   : > { %v963_v53 = vpop.permute.xlu0 %962 }
 0x2e5   : > { %v991_v58 = vsel %vm927_vm2, %v963_v53, 0.0 }
 0x2e9   : > { %941 = vadd.xlane.f32.xlu2 %v940_v48  ;;  %v1367_v48 = vsel %vm927_vm2, %v4754_v21, 0.0  ;;  %v2084_v21 = vsel %vm927_vm2, %v4814_v7, 0.0 }
 0x2eb   : > { %v4843_v45 = vpop.permute.xlu2 %2060 }
 0x2f1   : > { %1410 = vadd.xlane.f32.xlu2 %v1409_v16 }
 0x2f2   : > { %929 = vadd.xlane.f32.xlu0 %v928_v22 }
 0x2f3   : > { %v967_v0 = vpop.permute.xlu2 %966 }
 0x2f4   : > { %v997_v7 = vsel %vm927_vm2, %v967_v0, 0.0 }
 0x2f6   : > { %1677 = vrot.lane.b32.xlu1 %v4469_v6, %s4343_s22  ;;  %v2078_v6 = vsel %vm927_vm2, %v2053_v32, 0.0  ;;  %v2129_v32 = vsel %vm927_vm2, %v2103_v29, 0.0  ;;  %v946_v29 = vsel %vm927_vm2, %v916_v17, 0.0 }
 0x2f9   : > { %992 = vadd.xlane.f32.xlu2 %v991_v58  ;;  %v2087_v58 = vsel %vm927_vm2, %v2059_v36, 0.0 }
 0x2fa   : > { %2073 = vadd.xlane.f32.xlu0 %v2072_v10  ;;  %v4862_v10 = vpop.permute.xlu1 %2108 }
 0x2fb   : > { %v1388_v16 = vpop.permute.xlu2 %1387 }
 0x2fc   : > { %v1418_v22 = vsel %vm927_vm2, %v1388_v16, 0.0 }
 0x302   : > { %980 = vadd.xlane.f32.xlu0 %v979_v57 }
 0x30a   : > { %2124 = vadd.xlane.f32.xlu0 %v2123_v2  ;;  %v2132_v2 = vsel %vm927_vm2, %v2105_v9, 0.0 }
 0x30f   : > { %v4847_v11 = vpop.xlane.xlu0 %1365 }
 0x310   : > { %6454 = vst [vmem:[#allocation27_spill] sm:$0xff] %v4847_v11 }
 0x312   : > { %2079 = vadd.xlane.f32.xlu0 %v2078_v6  ;;  %v978_v6 = vpop.xlane.xlu1 %977 }
 0x31a   : > { %938 = vadd.xlane.f32.xlu0 %v937_v44  ;;  %v1399_v36 = vpop.xlane.xlu1 %1398  ;;  %v4350_v44 = vmov 16.0  }
 0x31b   : > { %4120 = vrcp.f32 %v4350_v44 }
 0x320   : > { %1368 = vadd.xlane.f32.xlu1 %v1367_v48 }
 0x322   : > { %1407 = vadd.xlane.f32.xlu0 %v1406_v20  ;;  %v4852_v55 = vpop.permute.xlu0 %1385  ;;  %v4121_v20 = vpop.eup %4120 }
 0x323   : > { %v4875_v16 = vpop.xlane.xlu1 %2076  ;;  %v1009_v9 = vmul.f32 16.0, %v4121_v20  ;;  %vm1013_vm3 = vweird.f32 %v4121_v20 }
 0x324   : > { %6455 = vst [vmem:[#allocation28_spill] sm:$0xff] %v4875_v16 }
 0x325   : > { %v1010_v0 = vsub.f32 1.0, %v1009_v9 }
 0x328   : > { %1419 = vadd.xlane.f32.xlu1 %v1418_v22 }
 0x32a   : > { %2130 = vadd.xlane.f32.xlu0 %v2129_v32  ;;  %v918_v37 = vpop.permute.xlu0 %917 }
 0x32b   : > { %v949_v53 = vsel %vm927_vm2, %v918_v37, 0.0  ;;  %v936_v37 = vpop.xlane.xlu1 %935 }
 0x32c   : > { %950 = vadd.xlane.f32.xlu2 %v949_v53 }
 0x330   : > { %2085 = vadd.xlane.f32.xlu1 %v2084_v21 }
 0x332   : > { %989 = vadd.xlane.f32.xlu0 %v988_v26  ;;  %v4873_v17 = vpop.permute.xlu0 %2062 }
 0x334   : > { %v4865_v57 = vpop.xlane.xlu2 %2121 }
 0x338   : > { %2088 = vadd.xlane.f32.xlu1 %v2087_v58 }
 0x33a   : > { %947 = vadd.xlane.f32.xlu0 %v946_v29  ;;  %v4879_v32 = vpop.permute.xlu0 %2110 }
 0x33c   : > { %v933_v62 = vpop.xlane.xlu2 %932 }
 0x340   : > { %2133 = vadd.xlane.f32.xlu1 %v2132_v2 }
 0x342   : > { %998 = vadd.xlane.f32.xlu0 %v997_v7  ;;  %v4888_v7 = vpop.xlane.xlu1 %1404 }
 0x344   : > { %1153 = vrot.lane.b32.xlu2 %v4493_v15, %s4341_s16  ;;  %v4871_v48 = vpop.xlane.xlu2 %1401  ;;  %v1011_v15 = vmul.f32 %v4121_v20, %v1010_v0 }
 0x346   : > { %v1012_v53 = vadd.f32 %v4121_v20, %v1011_v15  ;;  %v1421_v15 = vadd.f32 %v1399_v36, %v4771_v52 }
 0x348   : > { %v4885_v29 = vsel %vm1013_vm3, %v4121_v20, %v1012_v53 }
 0x34a   : > { %v4901_v53 = vpop.xlane.xlu1 %2127 }
 0x34b   : > { %6457 = vst [vmem:[#allocation30_spill] sm:$0xff] %v4901_v53 }
 0x34c   : > { %v984_v22 = vpop.xlane.xlu2 %983 }
 0x34d   : > { %v1002_v2 = vadd.f32 %v984_v22, %v936_v37  ;;  %v1429_v37 = vmul.f32 %v1421_v15, %v4885_v29 }
 0x34f   : > { %v1017_v9 = vmul.f32 %v4885_v29, %v1002_v2 }
 0x354   : > { %v4883_v21 = vpop.xlane.xlu2 %2082 }
 0x355   : > { %6456 = vst [vmem:[#allocation29_spill] sm:$0xff] %v4883_v21 }
 0x356   : > { %1679 = vrot.lane.b32.xlu0 %v4483_v12, %s4343_s22 }
 0x35c   : > { %v4898_v20 = vpop.xlane.xlu2 %941 }
 0x35e   : > { %1155 = vrot.lane.b32.xlu0 %v4505_v19, %s4341_s16  ;;  %v1370_v19 = vsel %vm927_vm2, %v4793_v60, 0.0 }
 0x365   : > { %v930_v26 = vpop.xlane.xlu0 %929 }
 0x366   : > { %v1000_v58 = vadd.f32 %v978_v6, %v930_v26  ;;  %v4896_v6 = vadd.f32 1e-06, %v1017_v9  ;;  %v4909_v9 = vpop.xlane.xlu2 %1410 }
 0x367   : > { %6458 = vst [vmem:[#allocation31_spill] sm:$0xff] %v4909_v9 }
 0x368   : > { %v1015_v12 = vmul.f32 %v4885_v29, %v1000_v58  ;;  %vm1057_vm12 = vweird.f32 %v4896_v6 }
 0x36a   : > { %v1023_v44 = vadd.f32 1e-06, %v1015_v12  ;;  %v4904_v12 = vadd.f32 1e-06, %v1429_v37 }
 0x36c   : > { %4122 = vrsqrt.f32 %v1023_v44  ;;  %vm1037_vm6 = vweird.f32 %v1023_v44  ;;  %vm1451_vm15 = vweird.f32 %v4904_v12 }
 0x36d   : > { %1371 = vadd.xlane.f32.xlu2 %v1370_v19  ;;  %v4893_v0 = vpop.xlane.xlu0 %2073  ;;  %4124 = vrsqrt.f32 %v4896_v6 }
 0x36e   : > { %4126 = vrsqrt.f32 %v4904_v12  ;;  %v993_v21 = vpop.xlane.xlu2 %992 }
 0x372   : > { %v4123_v22 = vpop.eup %4122 }
 0x373   : > { %v1032_v26 = vmul.f32 %v4123_v22, %v1023_v44  ;;  %v4907_v36 = vpop.eup %4124  ;;  %vm1038_vm4 = vweird.f32 %v4123_v22 }
 0x374   : > { %vm1039_vm7 = vmor %vm1037_vm6, %vm1038_vm4  ;;  %vm1058_vm10 = vweird.f32 %v4907_v36 }
 0x375   : > { %v1033_v58 = vmul.f32 %v4123_v22, %v1032_v26  ;;  %v981_v2 = vpop.xlane.xlu0 %980  ;;  %v1052_v26 = vmul.f32 %v4907_v36, %v4896_v6  ;;  %vm1059_vm13 = vmor %vm1057_vm12, %vm1058_vm10 }
 0x376   : > { %v1001_v60 = vadd.f32 %v981_v2, %v933_v62  ;;  %v987_v62 = vpop.xlane.xlu1 %986 }
 0x377   : > { %v1034_v19 = vmul.f32 0.5, %v1033_v58 }
 0x378   : > { %v1016_v52 = vmul.f32 %v4885_v29, %v1001_v60  ;;  %v1053_v60 = vmul.f32 %v4907_v36, %v1052_v26 }
 0x379   : > { %v1035_v11 = vsub.f32 1.5, %v1034_v19 }
 0x37a   : > { %v1024_v15 = vadd.f32 1e-06, %v1016_v52  ;;  %v1054_v9 = vmul.f32 0.5, %v1053_v60 }
 0x37b   : > { %v1036_v53 = vmul.f32 %v4123_v22, %v1035_v11  ;;  %v4127_v11 = vpop.eup %4126 }
 0x37c   : > { %4128 = vrsqrt.f32 %v1024_v15  ;;  %v1446_v33 = vmul.f32 %v4127_v11, %v4904_v12  ;;  %v1055_v60 = vsub.f32 1.5, %v1054_v9  ;;  %vm1047_vm9 = vweird.f32 %v1024_v15  ;;  %v4319_v12 = vld [vmem:[%s6375_s8 + $0x1] ss:$0 sm:$0xff] }
 0x37d   : > { %v4914_v37 = vpop.xlane.xlu0 %2124  ;;  %v1040_v58 = vsel %vm1039_vm7, %v4123_v22, %v1036_v53  ;;  %vm1452_vm14 = vweird.f32 %v4127_v11 }
 0x37e   : > { %6459 = vst [vmem:[#allocation32_spill] sm:$0xff] %v4914_v37  ;;  %v4917_v2 = vmul.f32 %v1040_v58, %v4702_v59  ;;  %v945_v22 = vpop.xlane.xlu1 %944  ;;  %v4929_v58 = vld [vmem:[%s4459_s26 + $0x28] sm:$0xff]  ;;  %vm1453_vm1 = vmor %vm1451_vm15, %vm1452_vm14 }
 0x37f   : > { %6461 = vst [vmem:[#allocation34_spill] sm:$0xff] %v4929_v58  ;;  %v1005_v49 = vadd.f32 %v993_v21, %v945_v22 }
 0x380   : > { %v4922_v19 = vmul.f32 %v4609_v25, %v4917_v2 }
 0x382   : > { %6460 = vst [vmem:[#allocation33_spill] sm:$0xff] %v4922_v19  ;;  %v4129_v44 = vpop.eup %4128  ;;  %v1293_v52 = vmul.f32 %v4605_v23, %v4922_v19  ;;  %v1415_v23 = vsel %vm927_vm2, %v4852_v55, 0.0  ;;  %v1447_v19 = vmul.f32 %v4127_v11, %v1446_v33  ;;  %v1056_v55 = vmul.f32 %v4907_v36, %v1055_v60  ;;  %v4946_v33 = vld [vmem:[%s4459_s26] sm:$0xff] }
 0x383   : > { %v1042_v24 = vmul.f32 %v4129_v44, %v1024_v15  ;;  %vm1048_vm8 = vweird.f32 %v4129_v44  ;;  %6464 = vst [vmem:[#allocation37_spill] sm:$0xff] %v4946_v33 }
 0x384   : > { %1309 = vrot.lane.b32.xlu1 %v1293_v52, %s4345_s27  ;;  %v1448_v30 = vmul.f32 0.5, %v1447_v19  ;;  %vm1049_vm11 = vmor %vm1047_vm9, %vm1048_vm8 }
 0x385   : > { %v1043_v53 = vmul.f32 %v4129_v44, %v1042_v24  ;;  %1683 = vrot.lane.b32.xlu2 %v4929_v58, %s4343_s22  ;;  %v4933_v26 = vpop.xlane.xlu0 %2079  ;;  %v1020_v24 = vmul.f32 %v4885_v29, %v1005_v49  ;;  %v4940_v58 = vld [vmem:[%s4459_s26 + $0x20] sm:$0xff] }
 0x386   : > { %6462 = vst [vmem:[#allocation35_spill] sm:$0xff] %v4933_v26  ;;  %v1449_v19 = vsub.f32 1.5, %v1448_v30 }
 0x387   : > { %v1044_v37 = vmul.f32 0.5, %v1043_v53  ;;  %6463 = vst [vmem:[#allocation36_spill] sm:$0xff] %v4940_v58  ;;  %v1028_v9 = vadd.f32 1e-06, %v1020_v24 }
 0x388   : > { %1416 = vadd.xlane.f32.xlu0 %v1415_v23  ;;  %v1060_v23 = vsel %vm1059_vm13, %v4907_v36, %v1056_v55 }
 0x389   : > { %v1045_v52 = vsub.f32 1.5, %v1044_v37  ;;  %4130 = vrsqrt.f32 %v1028_v9  ;;  %v4963_v6 = vmul.f32 %v1060_v23, %v4716_v39  ;;  %vm1087_vm8 = vweird.f32 %v1028_v9 }
 0x38b   : > { %v1046_v16 = vmul.f32 %v4129_v44, %v1045_v52  ;;  %v4971_v36 = vmul.f32 %v4609_v25, %v4963_v6 }
 0x38c   : > { %1681 = vrot.lane.b32.xlu1 %v4940_v58, %s4343_s22 }
 0x38d   : > { %1641 = vrot.lane.b32.xlu2 %v4946_v33, %s4345_s27  ;;  %v939_v21 = vpop.xlane.xlu0 %938  ;;  %v1050_v49 = vsel %vm1049_vm11, %v4129_v44, %v1046_v16 }
 0x38e   : > { %v1003_v15 = vadd.f32 %v987_v62, %v939_v21  ;;  %v4952_v37 = vmul.f32 %v1050_v49, %v4709_v56  ;;  %v1450_v62 = vmul.f32 %v4127_v11, %v1449_v19  ;;  %v1295_v21 = vmul.f32 %v4582_v4, %v4971_v36 }
 0x38f   : > { %v4131_v44 = vpop.eup %4130 }
 0x390   : > { %v1018_v22 = vmul.f32 %v4885_v29, %v1003_v15  ;;  %v4957_v53 = vmul.f32 %v4609_v25, %v4952_v37  ;;  %v1454_v52 = vsel %vm1453_vm1, %v4127_v11, %v1450_v62  ;;  %v1082_v24 = vmul.f32 %v4131_v44, %v1028_v9 }
 0x391   : > { %v4976_v49 = vmul.f32 %v1454_v52, %v4702_v59  ;;  %vm1088_vm7 = vweird.f32 %v4131_v44 }
 0x392   : > { %v1026_v60 = vadd.f32 1e-06, %v1018_v22  ;;  %v1294_v16 = vmul.f32 %v4621_v31, %v4957_v53  ;;  %v1083_v11 = vmul.f32 %v4131_v44, %v1082_v24  ;;  %vm1089_vm9 = vmor %vm1087_vm8, %vm1088_vm7 }
 0x393   : > { %6465 = vst [vmem:[#allocation38_spill] sm:$0xff] %v4976_v49  ;;  %v4987_v23 = vmul.f32 %v4635_v46, %v4976_v49 }
 0x394   : > { %4132 = vrsqrt.f32 %v1026_v60  ;;  %v1084_v62 = vmul.f32 0.5, %v1083_v11  ;;  %vm1067_vm4 = vweird.f32 %v1026_v60 }
 0x395   : > { %1311 = vrot.lane.b32.xlu2 %v1294_v16, %s4345_s27  ;;  %v4966_v30 = vpop.xlane.xlu0 %1407  ;;  %6466 = vst [vmem:[#allocation39_spill] sm:$0xff] %v4987_v23  ;;  %v4989_v16 = vpop.xlane.xlu1 %1413  ;;  %v1697_v52 = vmul.f32 %v4643_v54, %v4987_v23 }
 0x39a   : > { %v4133_v31 = vpop.eup %4132 }
 0x39b   : > { %v1062_v55 = vmul.f32 %v4133_v31, %v1026_v60  ;;  %vm1068_vm3 = vweird.f32 %v4133_v31 }
 0x39c   : > { %2267 = vrot.lane.b32.xlu0 %v4319_v12, %s4342_s21  ;;  %vm1069_vm6 = vmor %vm1067_vm4, %vm1068_vm3  ;;  %s4353_s21 = smov 64  }
 0x39d   : > { %v1063_v15 = vmul.f32 %v4133_v31, %v1062_v55  ;;  %1313 = vrot.lane.b32.xlu2 %v1295_v21, %s4345_s27  ;;  %v4983_v19 = vpop.xlane.xlu0 %2130 }
 0x39f   : > { %v1064_v22 = vmul.f32 0.5, %v1063_v15  ;;  %v951_v9 = vpop.xlane.xlu2 %950 }
 0x3a1   : > { %v1065_v4 = vsub.f32 1.5, %v1064_v22  ;;  %v1085_v22 = vsub.f32 1.5, %v1084_v62 }
 0x3a3   : > { %v1066_v55 = vmul.f32 %v4133_v31, %v1065_v4 }
 0x3a5   : > { %1713 = vrot.lane.b32.xlu2 %v1697_v52, %s4348_s18  ;;  %v990_v21 = vpop.xlane.xlu0 %989  ;;  %v1070_v24 = vsel %vm1069_vm6, %v4133_v31, %v1066_v55  ;;  %v1086_v52 = vmul.f32 %v4131_v44, %v1085_v22  ;;  %v1422_v31 = vadd.f32 %v4871_v48, %v4801_v3 }
 0x3a6   : > { %v1004_v12 = vadd.f32 %v990_v21, %v4898_v20  ;;  %v4996_v15 = vmul.f32 %v1070_v24, %v4721_v47  ;;  %v996_v20 = vpop.xlane.xlu1 %995 }
 0x3a7   : > { %v1090_v21 = vsel %vm1089_vm9, %v4131_v44, %v1086_v52 }
 0x3a8   : > { %v1019_v49 = vmul.f32 %v4885_v29, %v1004_v12  ;;  %v5001_v60 = vmul.f32 %v4609_v25, %v4996_v15  ;;  %v5011_v22 = vmul.f32 %v1090_v21, %v4745_v63 }
 0x3aa   : > { %v1027_v11 = vadd.f32 1e-06, %v1019_v49  ;;  %v1296_v4 = vmul.f32 %v4598_v18, %v5001_v60  ;;  %v1430_v49 = vmul.f32 %v1422_v31, %v4885_v29 }
 0x3ac   : > { %4134 = vrsqrt.f32 %v1027_v11  ;;  %1315 = vrot.lane.b32.xlu1 %v1296_v4, %s4345_s27  ;;  %v5013_v48 = vadd.f32 1e-06, %v1430_v49  ;;  %v5016_v4 = vld [vmem:[%s4459_s26 + $0x8] sm:$0xff]  ;;  %vm1077_vm11 = vweird.f32 %v1027_v11 }
 0x3ad   : > { %v948_v62 = vpop.xlane.xlu0 %947 }
 0x3ae   : > { %v1006_v55 = vadd.f32 %v996_v20, %v948_v62  ;;  %v1142_v20 = vmul.f32 %v4609_v25, %v5011_v22  ;;  %vm1461_vm7 = vweird.f32 %v5013_v48 }
 0x3b0   : > { %v1021_v24 = vmul.f32 %v4885_v29, %v1006_v55  ;;  %v1298_v23 = vmul.f32 %v4615_v28, %v1142_v20 }
 0x3b2   : > { %v4135_v18 = vpop.eup %4134  ;;  %v1029_v12 = vadd.f32 1e-06, %v1021_v24 }
 0x3b3   : > { %v1072_v3 = vmul.f32 %v4135_v18, %v1027_v11  ;;  %vm1078_vm10 = vweird.f32 %v4135_v18 }
 0x3b4   : > { %4136 = vrsqrt.f32 %v1029_v12  ;;  %1643 = vrot.lane.b32.xlu1 %v5016_v4, %s4345_s27  ;;  %vm1079_vm12 = vmor %vm1077_vm11, %vm1078_vm10  ;;  %vm1097_vm14 = vweird.f32 %v1029_v12 }
 0x3b5   : > { %v1073_v44 = vmul.f32 %v4135_v18, %v1072_v3  ;;  %v999_v52 = vpop.xlane.xlu0 %998  ;;  %4138 = vrsqrt.f32 %v5013_v48 }
 0x3b6   : > { %v1007_v31 = vadd.f32 %v999_v52, %v951_v9  ;;  %v5026_v52 = vpop.permute.xlu1 %1677 }
 0x3b7   : > { %v1074_v62 = vmul.f32 0.5, %v1073_v44 }
 0x3b8   : > { %v1022_v55 = vmul.f32 %v4885_v29, %v1007_v31 }
 0x3b9   : > { %v1075_v21 = vsub.f32 1.5, %v1074_v62 }
 0x3ba   : > { %v4137_v49 = vpop.eup %4136  ;;  %v1030_v24 = vadd.f32 1e-06, %v1022_v55 }
 0x3bb   : > { %v1092_v58 = vmul.f32 %v4137_v49, %v1029_v12  ;;  %v1076_v63 = vmul.f32 %v4135_v18, %v1075_v21  ;;  %v4139_v44 = vpop.eup %4138  ;;  %vm1098_vm13 = vweird.f32 %v4137_v49 }
 0x3bc   : > { %4140 = vrsqrt.f32 %v1030_v24  ;;  %1319 = vrot.lane.b32.xlu1 %v1298_v23, %s4345_s27  ;;  %v1456_v28 = vmul.f32 %v4139_v44, %v5013_v48  ;;  %vm1099_vm15 = vmor %vm1097_vm14, %vm1098_vm13  ;;  %vm1107_vm3 = vweird.f32 %v1030_v24  ;;  %vm1462_vm6 = vweird.f32 %v4139_v44 }
 0x3bd   : > { %v1093_v3 = vmul.f32 %v4137_v49, %v1092_v58  ;;  %v1080_v9 = vsel %vm1079_vm12, %v4135_v18, %v1076_v63  ;;  %vm1463_vm8 = vmor %vm1461_vm7, %vm1462_vm6 }
 0x3be   : > { %v5029_v31 = vmul.f32 %v1080_v9, %v4728_v51  ;;  %v1457_v18 = vmul.f32 %v4139_v44, %v1456_v28  ;;  %v2135_v9 = vsel %vm927_vm2, %v4838_v41, 0.0  ;;  %v5040_v26 = vpop.xlane.xlu1 %1368 }
 0x3bf   : > { %v1094_v62 = vmul.f32 0.5, %v1093_v3 }
 0x3c0   : > { %v1141_v55 = vmul.f32 %v4609_v25, %v5029_v31 }
 0x3c1   : > { %v1095_v11 = vsub.f32 1.5, %v1094_v62 }
 0x3c2   : > { %v4141_v21 = vpop.eup %4140  ;;  %v1297_v33 = vmul.f32 %v4587_v8, %v1141_v55  ;;  %v1189_v23 = vmul.f32 %v4631_v42, %v1141_v55  ;;  %v1458_v55 = vmul.f32 0.5, %v1457_v18  ;;  %v5061_v18 = vpop.permute.xlu2 %1153 }
 0x3c3   : > { %v1102_v63 = vmul.f32 %v4141_v21, %v1030_v24  ;;  %v1096_v58 = vmul.f32 %v4137_v49, %v1095_v11  ;;  %vm1108_vm1 = vweird.f32 %v4141_v21  ;;  %v1190_v11 = vmul.f32 %v4651_v5, %v1142_v20 }
 0x3c4   : > { %1317 = vrot.lane.b32.xlu2 %v1297_v33, %s4345_s27  ;;  %1209 = vrot.lane.b32.xlu1 %v1189_v23, %s4345_s27  ;;  %vm1109_vm4 = vmor %vm1107_vm3, %vm1108_vm1  ;;  %v1459_v41 = vsub.f32 1.5, %v1458_v55 }
 0x3c5   : > { %v1103_v3 = vmul.f32 %v4141_v21, %v1102_v63  ;;  %v1100_v62 = vsel %vm1099_vm15, %v4137_v49, %v1096_v58 }
 0x3c6   : > { %2136 = vadd.xlane.f32.xlu0 %v2135_v9  ;;  %v5044_v33 = vmul.f32 %v1100_v62, %v4750_v40  ;;  %v5052_v63 = vpop.xlane.xlu1 %1419  ;;  %v1460_v58 = vmul.f32 %v4139_v44, %v1459_v41 }
 0x3c7   : > { %v1104_v8 = vmul.f32 0.5, %v1103_v3 }
 0x3c8   : > { %v1143_v23 = vmul.f32 %v4609_v25, %v5044_v33 }
 0x3c9   : > { %v1105_v51 = vsub.f32 1.5, %v1104_v8 }
 0x3ca   : > { %v1299_v3 = vmul.f32 %v4578_v1, %v1143_v23 }
 0x3cb   : > { %v1106_v12 = vmul.f32 %v4141_v21, %v1105_v51  ;;  %v1191_v51 = vmul.f32 %v4633_v43, %v1143_v23 }
 0x3cc   : > { %1211 = vrot.lane.b32.xlu2 %v1190_v11, %s4345_s27  ;;  %v5089_v11 = vmul.f32 %v4593_v13, %v4917_v2  ;;  %v1424_v2 = vadd.f32 %v4966_v30, %v4809_v34  ;;  %v2144_v34 = vadd.f32 %v4865_v57, %v4893_v0 }
 0x3cd   : > { %v1110_v28 = vsel %vm1109_vm4, %v4141_v21, %v1106_v12  ;;  %v1464_v21 = vsel %vm1463_vm8, %v4139_v44, %v1460_v58  ;;  %v5093_v12 = vmul.f32 %v4593_v13, %v4952_v37  ;;  %v2093_v37 = vsel %vm927_vm2, %v4873_v17, 0.0 }
 0x3ce   : > { %v5050_v49 = vmul.f32 %v1110_v28, %v4788_v50  ;;  %v5067_v9 = vpop.xlane.xlu1 %2085  ;;  %6470 = vst [vmem:[#allocation43_spill] sm:$0xff] %v5089_v11  ;;  %v1261_v28 = vmul.f32 %v4613_v27, %v5089_v11  ;;  %v2138_v17 = vsel %vm927_vm2, %v4862_v10, 0.0  ;;  %v2152_v30 = vmul.f32 %v2144_v34, %v4885_v29  ;;  %v5161_v11 = vld [vmem:[%s4459_s26 + $0x38] sm:$0xff] }
 0x3cf   : > { %6471 = vst [vmem:[#allocation44_spill] sm:$0xff] %v5093_v12  ;;  %v1262_v23 = vmul.f32 %v4629_v38, %v5093_v12 }
 0x3d0   : > { %v1144_v20 = vmul.f32 %v4609_v25, %v5050_v49  ;;  %v5065_v25 = vmul.f32 %v1464_v21, %v4709_v56  ;;  %v1423_v21 = vadd.f32 %v4888_v7, %v4816_v14  ;;  %v2141_v14 = vsel %vm927_vm2, %v4879_v32, 0.0 }
 0x3d2   : > { %v1300_v24 = vmul.f32 %v4571_v61, %v1144_v20  ;;  %6467 = vst [vmem:[#allocation40_spill] sm:$0xff] %v5065_v25  ;;  %v5072_v61 = vmul.f32 %v4635_v46, %v5065_v25 }
 0x3d4   : > { %1213 = vrot.lane.b32.xlu2 %v1191_v51, %s4345_s27  ;;  %1323 = vrot.lane.b32.xlu1 %v1300_v24, %s4345_s27  ;;  %6468 = vst [vmem:[#allocation41_spill] sm:$0xff] %v5072_v61  ;;  %v1698_v44 = vmul.f32 %v4625_v35, %v5072_v61  ;;  %v1431_v61 = vmul.f32 %v1423_v21, %v4885_v29 }
 0x3d6   : > { %v5079_v8 = vpop.xlane.xlu1 %2088 }
 0x3da   : > { %1321 = vrot.lane.b32.xlu0 %v1299_v3, %s4345_s27 }
 0x3de   : > { %v5083_v62 = vpop.xlane.xlu1 %2133 }
 0x3e0   : > { %v5074_v48 = vpop.xlane.xlu2 %1371 }
 0x3e2   : > { %1715 = vrot.lane.b32.xlu0 %v1698_v44, %s4348_s18  ;;  %v2090_v44 = vsel %vm927_vm2, %v4843_v45, 0.0 }
 0x3e8   : > { %v5081_v1 = vpop.permute.xlu2 %1683 }
 0x3f0   : > { %v5085_v55 = vpop.permute.xlu2 %1641 }
 0x3f1   : > { %6469 = vst [vmem:[#allocation42_spill] sm:$0xff] %v5085_v55  ;;  %v5145_v55 = vld [vmem:[%s4459_s26 + $0x30] sm:$0xff] }
 0x3f6   : > { %v1310_v41 = vpop.permute.xlu1 %1309 }
 0x3f7   : > { %v1333_v51 = vadd.f32 %v1310_v41, %v1261_v28  ;;  %v1432_v41 = vmul.f32 %v1424_v2, %v4885_v29  ;;  %v1439_v28 = vadd.f32 1e-06, %v1431_v61  ;;  %v6473_v2 = vld [vmem:[#allocation28_spill] sm:$0xff] }
 0x3f8   : > { %v1312_v58 = vpop.permute.xlu2 %1311 }
 0x3f9   : > { %v1334_v24 = vadd.f32 %v1312_v58, %v1262_v23  ;;  %v1440_v23 = vadd.f32 1e-06, %v1432_v41  ;;  %4142 = vrsqrt.f32 %v1439_v28  ;;  %vm1471_vm11 = vweird.f32 %v1439_v28 }
 0x3fb   : > { %v1341_v3 = vpack.c.bf16 %v1334_v24, %v1333_v51  ;;  %4144 = vrsqrt.f32 %v1440_v23  ;;  %v5116_v51 = vadd.f32 1e-06, %v2152_v30  ;;  %v6472_v24 = vld [vmem:[#allocation14_spill] sm:$0xff]  ;;  %vm1481_vm13 = vweird.f32 %v1440_v23 }
 0x3fc   : > { %v1192_v32 = vmul.f32 %v6472_v24, %v1144_v20  ;;  %v5128_v20 = vmul.f32 %v4593_v13, %v4963_v6  ;;  %v6477_v30 = vld [vmem:[#allocation26_spill] sm:$0xff] }
 0x3fd   : > { %2094 = vadd.xlane.f32.xlu2 %v2093_v37  ;;  %v6474_v37 = vld [vmem:[#allocation32_spill] sm:$0xff]  ;;  %4146 = vrsqrt.f32 %v5116_v51  ;;  %vm2174_vm1 = vweird.f32 %v5116_v51 }
 0x3fe   : > { %2091 = vadd.xlane.f32.xlu1 %v2090_v44  ;;  %v2145_v44 = vadd.f32 %v6474_v37, %v6473_v2  ;;  %v5122_v10 = vpop.permute.xlu1 %1681  ;;  %6475 = vst [vmem:[#allocation14_spill] sm:$0xff] %v5128_v20 }
 0x3ff   : > { %v4143_v45 = vpop.eup %4142  ;;  %6481 = vst [vmem:[#allocation32_spill] sm:$0xff] %v5161_v11 }
 0x400   : > { %v1466_v58 = vmul.f32 %v4143_v45, %v1439_v28  ;;  %v2153_v0 = vmul.f32 %v2145_v44, %v4885_v29  ;;  %v5140_v44 = vpop.permute.xlu0 %1679  ;;  %vm1472_vm9 = vweird.f32 %v4143_v45 }
 0x401   : > { %v4145_v7 = vpop.eup %4144  ;;  %vm1473_vm12 = vmor %vm1471_vm11, %vm1472_vm9 }
 0x402   : > { %v1476_v61 = vmul.f32 %v4145_v7, %v1440_v23  ;;  %v1467_v21 = vmul.f32 %v4143_v45, %v1466_v58  ;;  %v6478_v58 = vld [vmem:[#allocation31_spill] sm:$0xff]  ;;  %v5136_v2 = vadd.f32 1e-06, %v2153_v0  ;;  %vm1482_vm10 = vweird.f32 %v4145_v7 }
 0x403   : > { %v5138_v37 = vpop.eup %4146  ;;  %vm1483_vm14 = vmor %vm1481_vm13, %vm1482_vm10 }
 0x404   : > { %v1477_v41 = vmul.f32 %v4145_v7, %v1476_v61  ;;  %v1468_v57 = vmul.f32 0.5, %v1467_v21  ;;  %v1425_v61 = vadd.f32 %v6478_v58, %v6477_v30  ;;  %v2169_v12 = vmul.f32 %v5138_v37, %v5116_v51 }
 0x405   : > { %4148 = vrsqrt.f32 %v5136_v2  ;;  %vm2175_vm15 = vweird.f32 %v5138_v37  ;;  %vm2184_vm6 = vweird.f32 %v5136_v2 }
 0x406   : > { %2142 = vadd.xlane.f32.xlu1 %v2141_v14  ;;  %v1314_v14 = vpop.permute.xlu2 %1313  ;;  %v1478_v34 = vmul.f32 0.5, %v1477_v41  ;;  %v6479_v41 = vld [vmem:[#allocation15_spill] sm:$0xff]  ;;  %v1433_v0 = vmul.f32 %v1425_v61, %v4885_v29  ;;  %vm5236_vm3 = vmor %vm2174_vm1, %vm2175_vm15 }
 0x407   : > { %v1263_v6 = vmul.f32 %v6479_v41, %v5128_v20  ;;  %v2170_v20 = vmul.f32 %v5138_v37, %v2169_v12 }
 0x408   : > { %v1479_v21 = vsub.f32 1.5, %v1478_v34 }
 0x409   : > { %v5152_v58 = vadd.f32 %v1314_v14, %v1263_v6  ;;  %v2171_v12 = vmul.f32 0.5, %v2170_v20 }
 0x40a   : > { %v1480_v61 = vmul.f32 %v4145_v7, %v1479_v21  ;;  %v6484_v21 = vld [vmem:[#allocation19_spill] sm:$0xff] }
 0x40b   : > { %v1187_v28 = vmul.f32 %v6484_v21, %v4971_v36  ;;  %v5177_v14 = vpop.eup %4148  ;;  %v6491_v21 = vld [vmem:[#allocation13_spill] sm:$0xff] }
 0x40c   : > { %2139 = vadd.xlane.f32.xlu0 %v2138_v17  ;;  %v5132_v17 = vmul.f32 %v4593_v13, %v4996_v15  ;;  %v6480_v15 = vld [vmem:[#allocation11_spill] sm:$0xff]  ;;  %v2179_v36 = vmul.f32 %v5177_v14, %v5136_v2  ;;  %vm2185_vm4 = vweird.f32 %v5177_v14 }
 0x40d   : > { %vm2186_vm7 = vmor %vm2184_vm6, %vm2185_vm4 }
 0x40e   : > { %6476 = vst [vmem:[#allocation28_spill] sm:$0xff] %v5132_v17  ;;  %v1264_v30 = vmul.f32 %v6480_v15, %v5132_v17  ;;  %v5167_v6 = vpop.permute.xlu2 %1713  ;;  %v1484_v17 = vsel %vm1483_vm14, %v4145_v7, %v1480_v61  ;;  %v5192_v7 = vld [vmem:[%s4459_s26 + $0x10] sm:$0xff] }
 0x40f   : > { %6482 = vst [vmem:[#allocation26_spill] sm:$0xff] %v5167_v6 }
 0x415   : > { %1215 = vrot.lane.b32.xlu2 %v1192_v32, %s4345_s27  ;;  %v1469_v32 = vsub.f32 1.5, %v1468_v57 }
 0x417   : > { %v1470_v34 = vmul.f32 %v4143_v45, %v1469_v32  ;;  %v6483_v32 = vld [vmem:[#allocation18_spill] sm:$0xff] }
 0x41d   : > { %1685 = vrot.lane.b32.xlu2 %v5145_v55, %s4343_s22 }
 0x41e   : > { %v1316_v57 = vpop.permute.xlu1 %1315  ;;  %v1318_v61 = vpop.permute.xlu2 %1317 }
 0x41f   : > { %v5154_v25 = vadd.f32 %v1316_v57, %v1264_v30  ;;  %1753 = vrot.lane.b32.xlu1 %v1341_v3, %s4347_s15  ;;  %v5169_v3 = vadd.f32 1e-06, %v1433_v0  ;;  %v1188_v30 = vmul.f32 %v6483_v32, %v5001_v60  ;;  %v1474_v57 = vsel %vm1473_vm12, %v4143_v45, %v1470_v34  ;;  %v5185_v60 = vpop.permute.xlu0 %1155 }
 0x420   : > { %1687 = vrot.lane.b32.xlu0 %v5161_v11, %s4343_s22  ;;  %v5183_v23 = vmul.f32 %v1474_v57, %v4716_v39  ;;  %v5189_v45 = vmul.f32 %v1484_v17, %v4721_v47  ;;  %v1128_v0 = vmul.f32 %v4593_v13, %v5029_v31  ;;  %v1129_v34 = vmul.f32 %v4593_v13, %v5011_v22  ;;  %v5219_v11 = vld [vmem:[%s4459_s26 + $0x18] sm:$0xff] }
 0x421   : > { %4150 = vrsqrt.f32 %v5169_v3  ;;  %v2172_v17 = vsub.f32 1.5, %v2171_v12  ;;  %v2180_v22 = vmul.f32 %v5177_v14, %v2179_v36  ;;  %v6492_v12 = vld [vmem:[#allocation10_spill] sm:$0xff]  ;;  %vm1491_vm9 = vweird.f32 %v5169_v3 }
 0x422   : > { %6486 = vst [vmem:[#allocation15_spill] sm:$0xff] %v5183_v23  ;;  %v5204_v20 = vmul.f32 %v4635_v46, %v5183_v23  ;;  %v1265_v32 = vmul.f32 %v6491_v21, %v1128_v0  ;;  %v1182_v51 = vmul.f32 %v4651_v5, %v1129_v34 }
 0x423   : > { %6487 = vst [vmem:[#allocation45_spill] sm:$0xff] %v5189_v45 }
 0x424   : > { %6488 = vst [vmem:[#allocation46_spill] sm:$0xff] %v5204_v20  ;;  %v1699_v31 = vmul.f32 %v5026_v52, %v5204_v20  ;;  %v1337_v50 = vadd.f32 %v1318_v61, %v1265_v32  ;;  %v2173_v20 = vmul.f32 %v5138_v37, %v2172_v17 }
 0x425   : > { %1207 = vrot.lane.b32.xlu2 %v1188_v30, %s4345_s27  ;;  %v6489_v30 = vld [vmem:[#allocation29_spill] sm:$0xff] }
 0x426   : > { %v5179_v6 = vpop.permute.xlu1 %1643  ;;  %v2147_v57 = vadd.f32 %v4983_v19, %v6489_v30  ;;  %v1266_v19 = vmul.f32 %v6492_v12, %v1129_v34  ;;  %v2181_v12 = vmul.f32 0.5, %v2180_v22  ;;  %v2177_v17 = vsel %vm5236_vm3, %v5138_v37, %v2173_v20 }
 0x427   : > { %6485 = vst [vmem:[#allocation31_spill] sm:$0xff] %v5179_v6  ;;  %1205 = vrot.lane.b32.xlu1 %v1187_v28, %s4345_s27  ;;  %v5210_v28 = vmul.f32 %v4635_v46, %v5189_v45  ;;  %v5212_v6 = vpop.eup %4150  ;;  %v5226_v45 = vpop.xlane.xlu0 %1416 }
 0x428   : > { %1645 = vrot.lane.b32.xlu0 %v5192_v7, %s4345_s27  ;;  %v1486_v36 = vmul.f32 %v5212_v6, %v5169_v3  ;;  %v2155_v21 = vmul.f32 %v2147_v57, %v4885_v29  ;;  %v2182_v22 = vsub.f32 1.5, %v2181_v12  ;;  %v6496_v12 = vld [vmem:[#allocation27_spill] sm:$0xff]  ;;  %vm1492_vm8 = vweird.f32 %v5212_v6 }
 0x429   : > { %6490 = vst [vmem:[#allocation29_spill] sm:$0xff] %v5210_v28  ;;  %v1700_v30 = vmul.f32 %v5140_v44, %v5210_v28  ;;  %v1426_v32 = vadd.f32 %v4989_v16, %v6496_v12  ;;  %vm1493_vm10 = vmor %vm1491_vm9, %vm1492_vm8  ;;  %v6498_v3 = vld [vmem:[#allocation23_spill] sm:$0xff]  ;;  %v6502_v12 = vld [vmem:[#allocation30_spill] sm:$0xff] }
 0x42a   : > { %v5246_v57 = vadd.f32 1e-06, %v2155_v21 }
 0x42b   : > { %v1434_v16 = vmul.f32 %v1426_v32, %v4885_v29 }
 0x42c   : > { %4152 = vrsqrt.f32 %v5246_v57  ;;  %vm2204_vm12 = vweird.f32 %v5246_v57 }
 0x42d   : > { %1647 = vrot.lane.b32.xlu2 %v5219_v11, %s4345_s27 }
 0x42e   : > { %v1320_v23 = vpop.permute.xlu1 %1319 }
 0x42f   : > { %v1338_v15 = vadd.f32 %v1320_v23, %v1266_v19  ;;  %1717 = vrot.lane.b32.xlu1 %v1699_v31, %s4348_s18  ;;  %v6495_v23 = vld [vmem:[#allocation33_spill] sm:$0xff]  ;;  %v1487_v31 = vmul.f32 %v5212_v6, %v1486_v36  ;;  %v1212_v19 = vpop.permute.xlu2 %1211  ;;  %v5258_v37 = vpop.permute.xlu0 %2267 }
 0x430   : > { %1719 = vrot.lane.b32.xlu0 %v1700_v30, %s4348_s18  ;;  %v1185_v61 = vmul.f32 %v5061_v18, %v6495_v23  ;;  %v5256_v30 = vld [vmem:[%s6375_s8] ss:$0 sm:$0xff]  ;;  %v1230_v21 = vsub.f32 %v1182_v51, %v1212_v19 }
 0x431   : > { %v1343_v28 = vpack.c.bf16 %v1338_v15, %v1337_v50  ;;  %v1186_v50 = vmul.f32 %v5185_v60, %v4957_v53  ;;  %v1181_v15 = vmul.f32 %v4631_v42, %v1128_v0  ;;  %v5265_v42 = vmul.f32 %v2177_v17, %v4702_v59 }
 0x432   : > { %v1488_v5 = vmul.f32 0.5, %v1487_v31  ;;  %v2183_v53 = vmul.f32 %v5177_v14, %v2182_v22  ;;  %v6497_v31 = vpack.c.bf16 %v5154_v25, %v5152_v58  ;;  %v4153_v17 = vpop.eup %4152  ;;  %v1442_v22 = vadd.f32 1e-06, %v1434_v16 }
 0x433   : > { %v2270_v34 = vmul.f32 %v5258_v37, %v5265_v42  ;;  %vm2205_vm11 = vweird.f32 %v4153_v17 }
 0x434   : > { %v1489_v23 = vsub.f32 1.5, %v1488_v5  ;;  %4154 = vrsqrt.f32 %v1442_v22  ;;  %vm2206_vm13 = vmor %vm2204_vm12, %vm2205_vm11  ;;  %vm1501_vm15 = vweird.f32 %v1442_v22 }
 0x435   : > { %1201 = vrot.lane.b32.xlu2 %v1185_v61, %s4345_s27  ;;  %v2187_v61 = vsel %vm2186_vm7, %v5177_v14, %v2183_v53  ;;  %v2286_v19 = vmul.f32 %v2270_v34, %v4643_v54  ;;  %v2199_v14 = vmul.f32 %v4153_v17, %v5246_v57 }
 0x436   : > { %v1210_v36 = vpop.permute.xlu1 %1209  ;;  %v5286_v2 = vmul.f32 %v2187_v61, %v4709_v56  ;;  %v1490_v25 = vmul.f32 %v5212_v6, %v1489_v23 }
 0x437   : > { %v1229_v20 = vsub.f32 %v1181_v15, %v1210_v36  ;;  %1203 = vrot.lane.b32.xlu1 %v1186_v50, %s4345_s27  ;;  %v2200_v50 = vmul.f32 %v4153_v17, %v2199_v14  ;;  %v2346_v15 = vmul.f32 %v2270_v34, %v4613_v27  ;;  %v6501_v34 = vld [vmem:[#allocation35_spill] sm:$0xff]  ;;  %v1427_v14 = vadd.f32 %v5226_v45, %v5040_v26 }
 0x438   : > { %2256 = vrot.lane.b32.xlu0 %v5256_v30, %s4351_s28  ;;  %v2271_v58 = vmul.f32 %v5258_v37, %v5286_v2  ;;  %v1494_v51 = vsel %vm1493_vm10, %v5212_v6, %v1490_v25  ;;  %v2146_v32 = vadd.f32 %v6502_v12, %v6501_v34 }
 0x439   : > { %v5269_v0 = vpack.c.bf16 %v1230_v21, %v1229_v20  ;;  %v2137_v54 = vpop.xlane.xlu0 %2136  ;;  %v5301_v21 = vmul.f32 %v4593_v13, %v5044_v33  ;;  %v5305_v20 = vmul.f32 %v4593_v13, %v5050_v49  ;;  %v5309_v5 = vmul.f32 %v1494_v51, %v6498_v3  ;;  %v6500_v33 = vld [vmem:[#allocation12_spill] sm:$0xff] }
 0x43a   : > { %v2347_v36 = vmul.f32 %v2271_v58, %v4629_v38  ;;  %v2201_v6 = vmul.f32 0.5, %v2200_v50  ;;  %v6499_v38 = vld [vmem:[#allocation16_spill] sm:$0xff]  ;;  %v4155_v16 = vpop.eup %4154  ;;  %v6503_v50 = vld [vmem:[#allocation34_spill] sm:$0xff]  ;;  %v2154_v51 = vmul.f32 %v2146_v32, %v4885_v29 }
 0x43b   : > { %v1267_v53 = vmul.f32 %v6500_v33, %v5301_v21  ;;  %v5318_v13 = vmul.f32 %v4635_v46, %v5309_v5  ;;  %vm1502_vm14 = vweird.f32 %v4155_v16 }
 0x43c   : > { %v2202_v23 = vsub.f32 1.5, %v2201_v6  ;;  %v1435_v6 = vmul.f32 %v1427_v14, %v4885_v29  ;;  %vm1503_vm1 = vmor %vm1501_vm15, %vm1502_vm14 }
 0x43d   : > { %1755 = vrot.lane.b32.xlu2 %v6497_v31, %s4347_s15 }
 0x43f   : > { %1567 = vrot.lane.b32.xlu1 %v5016_v4, %s4351_s28 }
 0x440   : > { %2302 = vrot.lane.b32.xlu0 %v2286_v19, %s4348_s18  ;;  %v1701_v19 = vmul.f32 %v5122_v10, %v5318_v13 }
 0x445   : > { %1757 = vrot.lane.b32.xlu2 %v1343_v28, %s4347_s15  ;;  %v1268_v28 = vmul.f32 %v6499_v38, %v5305_v20 }
 0x446   : > { %v1324_v27 = vpop.permute.xlu1 %1323 }
 0x447   : > { %2362 = vrot.lane.b32.xlu1 %v2346_v15, %s4348_s18  ;;  %v1340_v61 = vadd.f32 %v1324_v27, %v1268_v28  ;;  %v2203_v15 = vmul.f32 %v4153_v17, %v2202_v23  ;;  %v2162_v27 = vadd.f32 1e-06, %v2154_v51  ;;  %v1443_v28 = vadd.f32 1e-06, %v1435_v6 }
 0x448   : > { %2364 = vrot.lane.b32.xlu0 %v2347_v36, %s4348_s18  ;;  %v1496_v36 = vmul.f32 %v4155_v16, %v1442_v22  ;;  %v6506_v22 = vld [vmem:[#allocation36_spill] sm:$0xff] }
 0x449   : > { %v2207_v26 = vsel %vm2206_vm13, %v4153_v17, %v2203_v15  ;;  %4156 = vrsqrt.f32 %v2162_v27  ;;  %v2149_v17 = vadd.f32 %v2137_v54, %v5079_v8  ;;  %v1214_v15 = vpop.permute.xlu2 %1213  ;;  %vm2194_vm4 = vweird.f32 %v2162_v27 }
 0x44a   : > { %v1497_v45 = vmul.f32 %v4155_v16, %v1496_v36  ;;  %4158 = vrsqrt.f32 %v1443_v28  ;;  %vm1511_vm8 = vweird.f32 %v1443_v28 }
 0x44b   : > { %v2157_v14 = vmul.f32 %v2149_v17, %v4885_v29 }
 0x44c   : > { %v1322_v49 = vpop.permute.xlu0 %1321  ;;  %v1498_v34 = vmul.f32 0.5, %v1497_v45 }
 0x44d   : > { %v1339_v31 = vadd.f32 %v1322_v49, %v1267_v53  ;;  %v5336_v53 = vmul.f32 %v2207_v26, %v4721_v47  ;;  %v6504_v49 = vld [vmem:[#allocation37_spill] sm:$0xff] }
 0x44e   : > { %v1499_v12 = vsub.f32 1.5, %v1498_v34 }
 0x44f   : > { %v1344_v25 = vpack.c.bf16 %v1340_v61, %v1339_v31  ;;  %1651 = vrot.lane.b32.xlu1 %v6503_v50, %s4345_s27  ;;  %v5342_v57 = vmul.f32 %v5258_v37, %v5336_v53  ;;  %v4157_v23 = vpop.eup %4156  ;;  %v2287_v61 = vmul.f32 %v2271_v58, %v4625_v35  ;;  %v5354_v50 = vadd.f32 1e-06, %v2157_v14 }
 0x450   : > { %1721 = vrot.lane.b32.xlu0 %v1701_v19, %s4348_s18  ;;  %v4159_v31 = vpop.eup %4158  ;;  %v1428_v19 = vadd.f32 %v5052_v63, %v5074_v48  ;;  %v1500_v8 = vmul.f32 %v4155_v16, %v1499_v12  ;;  %v6505_v48 = vld [vmem:[#allocation24_spill] sm:$0xff]  ;;  %v2148_v12 = vadd.f32 %v5083_v62, %v5067_v9  ;;  %vm2195_vm3 = vweird.f32 %v4157_v23 }
 0x451   : > { %1759 = vrot.lane.b32.xlu2 %v1344_v25, %s4347_s15  ;;  %v2289_v32 = vmul.f32 %v5342_v57, %v5140_v44  ;;  %v2189_v25 = vmul.f32 %v4157_v23, %v2162_v27  ;;  %v1506_v54 = vmul.f32 %v4159_v31, %v1443_v28  ;;  %4160 = vrsqrt.f32 %v5354_v50  ;;  %vm2196_vm7 = vmor %vm2194_vm4, %vm2195_vm3 }
 0x452   : > { %v1436_v44 = vmul.f32 %v1428_v19, %v4885_v29  ;;  %v1504_v58 = vsel %vm1503_vm1, %v4155_v16, %v1500_v8  ;;  %vm1512_vm6 = vweird.f32 %v4159_v31  ;;  %v1183_v62 = vmul.f32 %v4633_v43, %v5301_v21 }
 0x453   : > { %v2190_v35 = vmul.f32 %v4157_v23, %v2189_v25  ;;  %v1507_v51 = vmul.f32 %v4159_v31, %v1506_v54  ;;  %v5361_v36 = vmul.f32 %v1504_v58, %v6505_v48  ;;  %v2156_v25 = vmul.f32 %v2148_v12, %v4885_v29  ;;  %vm1513_vm9 = vmor %vm1511_vm8, %vm1512_vm6 }
 0x454   : > { %v5358_v63 = vadd.f32 1e-06, %v1436_v44  ;;  %v1184_v44 = vmul.f32 %v6472_v24, %v5305_v20  ;;  %vm2224_vm11 = vweird.f32 %v5354_v50 }
 0x455   : > { %v2191_v6 = vmul.f32 0.5, %v2190_v35  ;;  %v1508_v26 = vmul.f32 0.5, %v1507_v51  ;;  %v5369_v16 = vmul.f32 %v4635_v46, %v5361_v36  ;;  %v5390_v58 = vadd.f32 1e-06, %v2156_v25 }
 0x456   : > { %4162 = vrsqrt.f32 %v5358_v63  ;;  %v1231_v51 = vsub.f32 %v1183_v62, %v1214_v15  ;;  %vm1521_vm14 = vweird.f32 %v5358_v63 }
 0x457   : > { %v2192_v45 = vsub.f32 1.5, %v2191_v6  ;;  %v1509_v34 = vsub.f32 1.5, %v1508_v26  ;;  %4164 = vrsqrt.f32 %v5390_v58  ;;  %vm2214_vm3 = vweird.f32 %v5390_v58 }
 0x458   : > { %1569 = vrot.lane.b32.xlu0 %v5192_v7, %s4351_s28 }
 0x459   : > { %1565 = vrot.lane.b32.xlu2 %v6504_v49, %s4351_s28  ;;  %v1702_v49 = vmul.f32 %v5081_v1, %v5369_v16  ;;  %v1510_v14 = vmul.f32 %v4159_v31, %v1509_v34 }
 0x45b   : > { %v1514_v35 = vsel %vm1513_vm9, %v4159_v31, %v1510_v14  ;;  %v5417_v14 = vpop.permute.xlu0 %1715 }
 0x45c   : > { %v5399_v21 = vmul.f32 %v1514_v35, %v4750_v40 }
 0x45e   : > { %v5407_v15 = vmul.f32 %v4635_v46, %v5399_v21 }
 0x460   : > { %2308 = vrot.lane.b32.xlu0 %v2289_v32, %s4348_s18  ;;  %v2193_v32 = vmul.f32 %v4157_v23, %v2192_v45 }
 0x461   : > { %2304 = vrot.lane.b32.xlu2 %v2287_v61, %s4348_s18 }
 0x462   : > { %v2197_v8 = vsel %vm2196_vm7, %v4157_v23, %v2193_v32 }
 0x463   : > { %v5395_v28 = vmul.f32 %v2197_v8, %v4716_v39 }
 0x465   : > { %v2272_v24 = vmul.f32 %v5258_v37, %v5395_v28 }
 0x467   : > { %v2288_v8 = vmul.f32 %v2272_v24, %v5026_v52 }
 0x468   : > { %1822 = vrot.lane.b32.xlu0 %v5269_v0, %s4347_s15  ;;  %v5371_v0 = vpop.eup %4160 }
 0x469   : > { %1649 = vrot.lane.b32.xlu2 %v6506_v22, %s4345_s27  ;;  %v2219_v61 = vmul.f32 %v5371_v0, %v5354_v50  ;;  %v5380_v19 = vpop.eup %4162  ;;  %vm2225_vm10 = vweird.f32 %v5371_v0 }
 0x46a   : > { %v1516_v54 = vmul.f32 %v5380_v19, %v5358_v63  ;;  %v4165_v25 = vpop.eup %4164  ;;  %vm2226_vm12 = vmor %vm2224_vm11, %vm2225_vm10  ;;  %vm1522_vm13 = vweird.f32 %v5380_v19 }
 0x46b   : > { %v2220_v9 = vmul.f32 %v5371_v0, %v2219_v61  ;;  %vm1523_vm15 = vmor %vm1521_vm14, %vm1522_vm13  ;;  %vm2215_vm1 = vweird.f32 %v4165_v25 }
 0x46c   : > { %v1517_v23 = vmul.f32 %v5380_v19, %v1516_v54  ;;  %v2209_v54 = vmul.f32 %v4165_v25, %v5390_v58  ;;  %vm2216_vm4 = vmor %vm2214_vm3, %vm2215_vm1  ;;  %v5471_v58 = vld [vmem:[%s4459_s26 + $0x28] sm:$0xff] }
 0x46d   : > { %v2221_v26 = vmul.f32 0.5, %v2220_v9 }
 0x46e   : > { %v1518_v20 = vmul.f32 0.5, %v1517_v23  ;;  %v2210_v50 = vmul.f32 %v4165_v25, %v2209_v54 }
 0x46f   : > { %v2222_v31 = vsub.f32 1.5, %v2221_v26 }
 0x470   : > { %v2095_v17 = vpop.xlane.xlu2 %2094  ;;  %v1519_v32 = vsub.f32 1.5, %v1518_v20 }
 0x471   : > { %1723 = vrot.lane.b32.xlu2 %v1702_v49, %s4348_s18  ;;  %v2092_v45 = vpop.xlane.xlu1 %2091  ;;  %v2348_v49 = vmul.f32 %v2272_v24, %v6479_v41  ;;  %v2223_v61 = vmul.f32 %v5371_v0, %v2222_v31 }
 0x472   : > { %v1520_v62 = vmul.f32 %v5380_v19, %v1519_v32  ;;  %v6509_v32 = vld [vmem:[#allocation32_spill] sm:$0xff] }
 0x473   : > { %v2227_v9 = vsel %vm2226_vm12, %v5371_v0, %v2223_v61  ;;  %v6507_v0 = vld [vmem:[#allocation11_spill] sm:$0xff]  ;;  %vm1898_vm12 = vcmask 523264  }
 0x474   : > { %v5431_v52 = vmul.f32 %v2227_v9, %v6505_v48  ;;  %v6512_v9 = vld [vmem:[#allocation14_spill] sm:$0xff] }
 0x476   : > { %v2275_v26 = vmul.f32 %v5258_v37, %v5431_v52 }
 0x478   : > { %v1216_v27 = vpop.permute.xlu2 %1215 }
 0x479   : > { %v1232_v6 = vsub.f32 %v1184_v44, %v1216_v27  ;;  %1571 = vrot.lane.b32.xlu2 %v5219_v11, %s4351_s28  ;;  %v2143_v41 = vpop.xlane.xlu1 %2142 }
 0x47a   : > { %v2151_v44 = vadd.f32 %v2143_v41, %v2095_v17  ;;  %v6508_v17 = vld [vmem:[#allocation25_spill] sm:$0xff] }
 0x47b   : > { %v1236_v43 = vpack.c.bf16 %v1232_v6, %v1231_v51  ;;  %v1524_v51 = vsel %vm1523_vm15, %v5380_v19, %v1520_v62  ;;  %v2349_v6 = vmul.f32 %v5342_v57, %v6507_v0  ;;  %v2291_v57 = vmul.f32 %v2275_v26, %v5081_v1  ;;  %v6510_v1 = vld [vmem:[#allocation28_spill] sm:$0xff]  ;;  %v6513_v62 = vld [vmem:[#allocation19_spill] sm:$0xff] }
 0x47c   : > { %v2159_v63 = vmul.f32 %v2151_v44, %v4885_v29  ;;  %v5441_v23 = vmul.f32 %v1524_v51, %v6508_v17  ;;  %v1179_v44 = vmul.f32 %v6513_v62, %v6512_v9  ;;  %v6515_v62 = vld [vmem:[#allocation43_spill] sm:$0xff] }
 0x47d   : > { %1824 = vrot.lane.b32.xlu1 %v1236_v43, %s4347_s15  ;;  %v2211_v43 = vmul.f32 0.5, %v2210_v50 }
 0x47e   : > { %v2167_v24 = vadd.f32 1e-06, %v2159_v63 }
 0x47f   : > { %v2140_v35 = vpop.xlane.xlu0 %2139  ;;  %v2212_v31 = vsub.f32 1.5, %v2211_v43 }
 0x480   : > { %v5410_v34 = vpop.permute.xlu2 %1685  ;;  %4166 = vrsqrt.f32 %v2167_v24  ;;  %vm2244_vm7 = vweird.f32 %v2167_v24 }
 0x481   : > { %v1703_v12 = vmul.f32 %v5410_v34, %v5407_v15  ;;  %2366 = vrot.lane.b32.xlu2 %v2348_v49, %s4348_s18  ;;  %v2213_v61 = vmul.f32 %v4165_v25, %v2212_v31 }
 0x483   : > { %1725 = vrot.lane.b32.xlu0 %v1703_v12, %s4348_s18  ;;  %v2217_v0 = vsel %vm2216_vm4, %v4165_v25, %v2213_v61 }
 0x484   : > { %v5476_v31 = vmul.f32 %v2217_v0, %v6498_v3 }
 0x485   : > { %2306 = vrot.lane.b32.xlu1 %v2288_v8, %s4348_s18  ;;  %v6511_v8 = vld [vmem:[#allocation18_spill] sm:$0xff] }
 0x486   : > { %v1180_v41 = vmul.f32 %v6511_v8, %v6510_v1  ;;  %v4167_v51 = vpop.eup %4166  ;;  %v2274_v25 = vmul.f32 %v5258_v37, %v5476_v31  ;;  %v6514_v1 = vld [vmem:[#allocation13_spill] sm:$0xff] }
 0x487   : > { %vm2245_vm6 = vweird.f32 %v4167_v51 }
 0x488   : > { %v1208_v27 = vpop.permute.xlu2 %1207  ;;  %v2350_v8 = vmul.f32 %v2274_v25, %v6514_v1  ;;  %vm2246_vm8 = vmor %vm2244_vm7, %vm2245_vm6 }
 0x489   : > { %1653 = vrot.lane.b32.xlu2 %v5145_v55, %s4345_s27 }
 0x48b   : > { %1573 = vrot.lane.b32.xlu0 %v6506_v22, %s4351_s28  ;;  %v5451_v22 = vmul.f32 %v4635_v46, %v5441_v23  ;;  %v2150_v46 = vadd.f32 %v2140_v35, %v2092_v45  ;;  %v2239_v35 = vmul.f32 %v4167_v51, %v2167_v24 }
 0x48d   : > { %2368 = vrot.lane.b32.xlu1 %v2349_v6, %s4348_s18  ;;  %v1228_v6 = vsub.f32 %v1180_v41, %v1208_v27  ;;  %v2290_v41 = vmul.f32 %v2274_v25, %v5122_v10 }
 0x490   : > { %v5445_v20 = vpop.permute.xlu2 %1647 }
 0x491   : > { %v5447_v19 = vpop.permute.xlu1 %1753 }
 0x492   : > { %v5454_v49 = vpop.permute.xlu0 %1687 }
 0x493   : > { %v1704_v12 = vmul.f32 %v5454_v49, %v5451_v22  ;;  %2312 = vrot.lane.b32.xlu0 %v2291_v57, %s4348_s18  ;;  %v2158_v57 = vmul.f32 %v2150_v46, %v4885_v29  ;;  %v2240_v29 = vmul.f32 %v4167_v51, %v2239_v35 }
 0x495   : > { %1655 = vrot.lane.b32.xlu1 %v6509_v32, %s4345_s27  ;;  %1727 = vrot.lane.b32.xlu2 %v1704_v12, %s4348_s18  ;;  %v5479_v12 = vadd.f32 1e-06, %v2158_v57  ;;  %v2241_v9 = vmul.f32 0.5, %v2240_v29  ;;  %v6517_v29 = vld [vmem:[#allocation10_spill] sm:$0xff] }
 0x497   : > { %4168 = vrsqrt.f32 %v5479_v12  ;;  %v2242_v57 = vsub.f32 1.5, %v2241_v9  ;;  %vm2234_vm10 = vweird.f32 %v5479_v12 }
 0x498   : > { %v1202_v54 = vpop.permute.xlu2 %1201 }
 0x499   : > { %v1206_v50 = vpop.permute.xlu1 %1205 }
 0x49a   : > { %v1227_v63 = vsub.f32 %v1179_v44, %v1206_v50  ;;  %v5467_v43 = vpop.permute.xlu0 %1645  ;;  %v1177_v44 = vmul.f32 %v5061_v18, %v6515_v62  ;;  %v6516_v50 = vld [vmem:[#allocation44_spill] sm:$0xff] }
 0x49b   : > { %v1178_v0 = vmul.f32 %v5185_v60, %v6516_v50 }
 0x49c   : > { %v1234_v45 = vpack.c.bf16 %v1228_v6, %v1227_v63  ;;  %v1225_v35 = vsub.f32 %v1177_v44, %v1202_v54 }
 0x49d   : > { %1575 = vrot.lane.b32.xlu2 %v5471_v58, %s4351_s28  ;;  %v4169_v63 = vpop.eup %4168 }
 0x49e   : > { %1820 = vrot.lane.b32.xlu1 %v1234_v45, %s4347_s15  ;;  %v2229_v10 = vmul.f32 %v4169_v63, %v5479_v12  ;;  %vm2235_vm9 = vweird.f32 %v4169_v63 }
 0x49f   : > { %vm2236_vm11 = vmor %vm2234_vm10, %vm2235_vm9 }
 0x4a0   : > { %v5483_v27 = vpop.permute.xlu2 %1755  ;;  %v2230_v18 = vmul.f32 %v4169_v63, %v2229_v10 }
 0x4a1   : > { %v5485_v61 = vpop.permute.xlu1 %1717 }
 0x4a2   : > { %v5487_v46 = vpop.permute.xlu0 %1719 }
 0x4a5   : > { %2370 = vrot.lane.b32.xlu2 %v2350_v8, %s4348_s18  ;;  %v2351_v8 = vmul.f32 %v2275_v26, %v6517_v29  ;;  %v2231_v26 = vmul.f32 0.5, %v2230_v18 }
 0x4a6   : > { %2310 = vrot.lane.b32.xlu1 %v2290_v41, %s4348_s18  ;;  %v2243_v41 = vmul.f32 %v4167_v51, %v2242_v57 }
 0x4a8   : > { %v1758_v6 = vpop.permute.xlu2 %1757  ;;  %v2247_v54 = vsel %vm2246_vm8, %v4167_v51, %v2243_v41  ;;  %v2232_v51 = vsub.f32 1.5, %v2231_v26 }
 0x4a9   : > { %v1204_v45 = vpop.permute.xlu1 %1203  ;;  %v5508_v44 = vmul.f32 %v2247_v54, %v6508_v17 }
 0x4aa   : > { %v1226_v47 = vsub.f32 %v1178_v0, %v1204_v45  ;;  %v5498_v1 = vpop.permute.xlu0 %2256  ;;  %v5521_v45 = vld [vmem:[%s4459_s26] sm:$0xff]  ;;  %v2233_v41 = vmul.f32 %v4169_v63, %v2232_v51  ;;  %v1777_v51 = vsel %vm927_vm2, %v5483_v27, 0 }
 0x4ab   : > { %v2259_v50 = vmul.f32 %v5498_v1, %v5265_v42  ;;  %v2260_v24 = vmul.f32 %v5498_v1, %v5286_v2  ;;  %v2277_v0 = vmul.f32 %v5258_v37, %v5508_v44 }
 0x4ac   : > { %v1233_v25 = vpack.c.bf16 %v1226_v47, %v1225_v35 }
 0x4ad   : > { %v2338_v35 = vmul.f32 %v5521_v45, %v2259_v50  ;;  %v2339_v42 = vmul.f32 %v5016_v4, %v2260_v24  ;;  %v2293_v18 = vmul.f32 %v2277_v0, %v5454_v49  ;;  %v2237_v4 = vsel %vm2236_vm11, %v4169_v63, %v2233_v41 }
 0x4ae   : > { %2372 = vrot.lane.b32.xlu1 %v2351_v8, %s4348_s18  ;;  %1818 = vrot.lane.b32.xlu0 %v1233_v25, %s4347_s15  ;;  %v1780_v25 = vsel %vm927_vm2, %v1758_v6, 0  ;;  %v5535_v49 = vmul.f32 %v2237_v4, %v4750_v40 }
 0x4b0   : > { %v1760_v60 = vpop.permute.xlu2 %1759  ;;  %v2276_v63 = vmul.f32 %v5258_v37, %v5535_v49 }
 0x4b1   : > { %v5504_v9 = vpop.permute.xlu1 %1567  ;;  %v1783_v62 = vsel %vm927_vm2, %v1760_v60, 0 }
 0x4b2   : > { %1789 = vmatpush.bf16.xpose.msra.mxu3 %v1783_v62  ;;  %2426 = vmatpush.bf16.xpose.msrb.mxu2 %v1783_v62  ;;  %v2303_v47 = vpop.permute.xlu0 %2302  ;;  %v2279_v6 = vmul.f32 %v2260_v24, %v5504_v9 }
 0x4b6   : > { %1577 = vrot.lane.b32.xlu0 %v5145_v55, %s4351_s28 }
 0x4b8   : > { %v5518_v57 = vpop.permute.xlu2 %1565 }
 0x4b9   : > { %v2363_v10 = vpop.permute.xlu1 %2362  ;;  %v2278_v60 = vmul.f32 %v2259_v50, %v5518_v57  ;;  %v6518_v50 = vld [vmem:[#allocation40_spill] sm:$0xff] }
 0x4ba   : > { %v2386_v29 = vadd.f32 %v2363_v10, %v2338_v35  ;;  %1790 = vmatpush.bf16.xpose.msra.mxu3 %v1780_v25  ;;  %2427 = vmatpush.bf16.xpose.msrb.mxu2 %v1780_v25  ;;  %v2365_v2 = vpop.permute.xlu0 %2364  ;;  %v5540_v24 = vmul.f32 %v5256_v30, %v6518_v50  ;;  %v6520_v10 = vld [vmem:[#allocation31_spill] sm:$0xff] }
 0x4bb   : > { %v2387_v8 = vadd.f32 %v2365_v2, %v2339_v42  ;;  %v2326_v26 = vsub.f32 %v2278_v60, %v2303_v47  ;;  %v6519_v47 = vld [vmem:[#allocation38_spill] sm:$0xff]  ;;  %v1774_v42 = vsel %vm927_vm2, %v5447_v19, 0  ;;  %v2353_v19 = vmul.f32 %v2277_v0, %v6499_v38 }
 0x4bc   : > { %v5548_v27 = vmul.f32 %v5256_v30, %v6519_v47  ;;  %v1666_v25 = vmul.f32 %v6520_v10, %v5540_v24  ;;  %v5586_v10 = vmul.f32 %v5256_v30, %v5361_v36  ;;  %v2262_v36 = vmul.f32 %v5498_v1, %v5336_v53 }
 0x4bd   : > { %v2394_v54 = vpack.c.bf16 %v2387_v8, %v2386_v29  ;;  %v6521_v29 = vld [vmem:[#allocation42_spill] sm:$0xff]  ;;  %v2292_v8 = vmul.f32 %v2276_v63, %v5410_v34 }
 0x4be   : > { %2316 = vrot.lane.b32.xlu0 %v2293_v18, %s4348_s18  ;;  %v1665_v2 = vmul.f32 %v6521_v29, %v5548_v27  ;;  %v1738_v37 = vadd.f32 %v5417_v14, %v1666_v25  ;;  %v6522_v18 = vld [vmem:[#allocation26_spill] sm:$0xff]  ;;  %v6523_v14 = vld [vmem:[#allocation45_spill] sm:$0xff] }
 0x4bf   : > { %2402 = vrot.lane.b32.xlu2 %v2394_v54, %s4345_s27  ;;  %v2352_v54 = vmul.f32 %v2276_v63, %v6500_v33  ;;  %v5567_v34 = vmul.f32 %v5256_v30, %v6523_v14 }
 0x4c0   : > { %v2305_v62 = vpop.permute.xlu2 %2304  ;;  %v1737_v60 = vadd.f32 %v6522_v18, %v1665_v2 }
 0x4c1   : > { %v2327_v35 = vsub.f32 %v2279_v6, %v2305_v62  ;;  %v6524_v62 = vld [vmem:[#allocation15_spill] sm:$0xff]  ;;  %v1668_v33 = vmul.f32 %v5445_v20, %v5567_v34  ;;  %v1652_v47 = vpop.permute.xlu1 %1651  ;;  %v5590_v20 = vmul.f32 %v5256_v30, %v5309_v5 }
 0x4c2   : > { %1791 = vmatpush.bf16.xpose.msra.mxu3 %v1777_v51  ;;  %2428 = vmatpush.bf16.xpose.msrb.mxu2 %v1777_v51  ;;  %v1745_v6 = vpack.c.bf16 %v1738_v37, %v1737_v60 }
 0x4c3   : > { %v2334_v12 = vpack.c.bf16 %v2327_v35, %v2326_v26  ;;  %v5571_v26 = vmul.f32 %v5256_v30, %v6524_v62  ;;  %v1722_v35 = vpop.permute.xlu0 %1721  ;;  %v1740_v0 = vadd.f32 %v5487_v46, %v1668_v33  ;;  %v2341_v33 = vmul.f32 %v5219_v11, %v2262_v36 }
 0x4c5   : > { %2455 = vrot.lane.b32.xlu1 %v2334_v12, %s4345_s27  ;;  %v1667_v51 = vmul.f32 %v5467_v43, %v5571_v26  ;;  %v1670_v43 = vmul.f32 %v1652_v47, %v5586_v10 }
 0x4c7   : > { %1579 = vrot.lane.b32.xlu2 %v6509_v32, %s4351_s28  ;;  %v1739_v38 = vadd.f32 %v5485_v61, %v1667_v51 }
 0x4c8   : > { %v1650_v41 = vpop.permute.xlu2 %1649 }
 0x4c9   : > { %v1746_v12 = vpack.c.bf16 %v1740_v0, %v1739_v38  ;;  %v1669_v61 = vmul.f32 %v1650_v41, %v5590_v20  ;;  %v2261_v41 = vmul.f32 %v5498_v1, %v5395_v28  ;;  %v6525_v0 = vld [vmem:[#allocation39_spill] sm:$0xff] }
 0x4ca   : > { %1792 = vmatpush.bf16.xpose.msra.mxu3 %v1774_v42  ;;  %2429 = vmatpush.bf16.xpose.msrb.mxu2 %v1774_v42 }
 0x4cb   : > { %v5581_v63 = vpop.permute.xlu0 %1569  ;;  %v1741_v29 = vadd.f32 %v1722_v35, %v1669_v61  ;;  %v2340_v35 = vmul.f32 %v5192_v7, %v2261_v41  ;;  %v5612_v61 = vmul.f32 %v5256_v30, %v5399_v21  ;;  %v5616_v7 = vmul.f32 %v5256_v30, %v5441_v23 }
 0x4cc   : > { %v2264_v30 = vmul.f32 %v5498_v1, %v5431_v52  ;;  %v2263_v23 = vmul.f32 %v5498_v1, %v5476_v31 }
 0x4cd   : > { %2314 = vrot.lane.b32.xlu1 %v2292_v8, %s4348_s18 }
 0x4ce   : > { %v2343_v52 = vmul.f32 %v5471_v58, %v2264_v30 }
 0x4cf   : > { %2374 = vrot.lane.b32.xlu2 %v2352_v54, %s4348_s18  ;;  %v2280_v54 = vmul.f32 %v2261_v41, %v5581_v63 }
 0x4d0   : > { %v1724_v4 = vpop.permute.xlu2 %1723 }
 0x4d1   : > { %3932 = vmatmul.msk.bf16.vlgmr.msra.gmra.mxu3 %vm927_vm2, %v1745_v6  ;;  %v1742_v25 = vadd.f32 %v1724_v4, %v1670_v43 }
 0x4d3   : > { %v2309_v42 = vpop.permute.xlu0 %2308  ;;  %v1747_v2 = vpack.c.bf16 %v1742_v25, %v1741_v29 }
 0x4d5   : > { %2376 = vrot.lane.b32.xlu1 %v2353_v19, %s4348_s18 }
 0x4d8   : > { %v5579_v50 = vpop.permute.xlu2 %1571 }
 0x4d9   : > { %v2281_v18 = vmul.f32 %v2262_v36, %v5579_v50 }
 0x4db   : > { %v1823_v60 = vpop.permute.xlu0 %1822  ;;  %v2329_v4 = vsub.f32 %v2281_v18, %v2309_v42 }
 0x4dc   : > { %v1845_v14 = vsel %vm927_vm2, %v1823_v60, 0 }
 0x4e0   : > { %v2367_v46 = vpop.permute.xlu2 %2366 }
 0x4e1   : > { %3933 = vmatmul.msk.bf16.gmra.mxu3 %vm927_vm2, %v1746_v12  ;;  %v2388_v51 = vadd.f32 %v2367_v46, %v2340_v35  ;;  %v1589_v12 = vmul.f32 %v5518_v57, %v6525_v0  ;;  %v6526_v0 = vld [vmem:[#allocation41_spill] sm:$0xff] }
 0x4e8   : > { %v1654_v5 = vpop.permute.xlu2 %1653 }
 0x4e9   : > { %v1671_v42 = vmul.f32 %v1654_v5, %v5612_v61 }
 0x4ef   : > { %v1825_v37 = vpop.permute.xlu1 %1824 }
 0x4f0   : > { %v1848_v8 = vsel %vm927_vm2, %v1825_v37, 0  ;;  %v1728_v53 = vpop.permute.xlu2 %1727 }
 0x4f1   : > { %3934 = vmatmul.msk.bf16.gmra.mxu3 %vm927_vm2, %v1747_v2  ;;  %1854 = vmatpush.bf16.xpose.msrb.mxu0 %v1848_v8 }
 0x4f2   : > { %4042 = vmatpush.bf16.xpose.msrb.mxu1 %v1848_v8  ;;  %2479 = vmatpush.bf16.xpose.msrb.mxu3 %v1848_v8 }
 0x4f5   : > { %v1726_v47 = vpop.permute.xlu0 %1725 }
 0x4f6   : > { %v1743_v29 = vadd.f32 %v1726_v47, %v1671_v42  ;;  %v6527_v47 = vld [vmem:[#allocation46_spill] sm:$0xff] }
 0x4f7   : > { %v2307_v6 = vpop.permute.xlu1 %2306 }
 0x4f8   : > { %v2328_v19 = vsub.f32 %v2280_v54, %v2307_v6  ;;  %v1576_v25 = vpop.permute.xlu2 %1575 }
 0x4f9   : > { %1855 = vmatpush.bf16.xpose.msrb.mxu0 %v1845_v14  ;;  %v2283_v41 = vmul.f32 %v2264_v30, %v1576_v25 }
 0x4fa   : > { %v2335_v62 = vpack.c.bf16 %v2329_v4, %v2328_v19  ;;  %4043 = vmatpush.bf16.xpose.msrb.mxu1 %v1845_v14  ;;  %2480 = vmatpush.bf16.xpose.msrb.mxu3 %v1845_v14 }
 0x4fc   : > { %2457 = vrot.lane.b32.xlu2 %v2335_v62, %s4345_s27  ;;  %v5629_v62 = vld [vmem:[%s4459_s26 + $0x20] sm:$0xff] }
 0x4fd   : > { %v1574_v37 = vpop.permute.xlu0 %1573 }
 0x4fe   : > { %v2282_v60 = vmul.f32 %v2263_v23, %v1574_v37 }
 0x4ff   : > { %v2369_v28 = vpop.permute.xlu1 %2368 }
 0x500   : > { %v2389_v38 = vadd.f32 %v2369_v28, %v2341_v33  ;;  %v2371_v18 = vpop.permute.xlu2 %2370 }
 0x502   : > { %v2395_v43 = vpack.c.bf16 %v2389_v38, %v2388_v51 }
 0x504   : > { %2404 = vrot.lane.b32.xlu0 %v2395_v43, %s4345_s27  ;;  %1605 = vrot.lane.b32.xlu2 %v1589_v12, %s4348_s18  ;;  %v1590_v12 = vmul.f32 %v5504_v9, %v6526_v0  ;;  %v1591_v43 = vmul.f32 %v5581_v63, %v6527_v47  ;;  %v2265_v9 = vmul.f32 %v5498_v1, %v5535_v49 }
 0x505   : > { %v2313_v5 = vpop.permute.xlu0 %2312 }
 0x506   : > { %v2331_v6 = vsub.f32 %v2283_v41, %v2313_v5 }
 0x507   : > { %v1656_v46 = vpop.permute.xlu1 %1655 }
 0x508   : > { %v1672_v57 = vmul.f32 %v1656_v46, %v5616_v7 }
 0x50a   : > { %v1744_v2 = vadd.f32 %v1728_v53, %v1672_v57  ;;  %v2342_v53 = vmul.f32 %v5629_v62, %v2263_v23  ;;  %v1594_v57 = vmul.f32 %v1576_v25, %v5369_v16  ;;  %v2344_v16 = vmul.f32 %v5145_v55, %v2265_v9 }
 0x50c   : > { %v1748_v8 = vpack.c.bf16 %v1744_v2, %v1743_v29  ;;  %v2390_v33 = vadd.f32 %v2371_v18, %v2342_v53  ;;  %v2266_v2 = vmul.f32 %v5498_v1, %v5508_v44  ;;  %v1593_v1 = vmul.f32 %v1574_v37, %v5318_v13 }
 0x50e   : > { %3935 = vmatmul.msk.bf16.gmra.mxu3 %vm927_vm2, %v1748_v8  ;;  %v2345_v25 = vmul.f32 %v6509_v32, %v2266_v2 }
 0x510   : > { %v1821_v36 = vpop.permute.xlu1 %1820 }
 0x511   : > { %v1842_v21 = vsel %vm927_vm2, %v1821_v36, 0 }
 0x512   : > { %1856 = vmatpush.bf16.xpose.msrb.mxu0 %v1842_v21  ;;  %4044 = vmatpush.bf16.xpose.msrb.mxu1 %v1842_v21 }
 0x513   : > { %2481 = vmatpush.bf16.xpose.msrb.mxu3 %v1842_v21 }
 0x518   : > { %v2311_v54 = vpop.permute.xlu1 %2310 }
 0x519   : > { %v2330_v19 = vsub.f32 %v2282_v60, %v2311_v54  ;;  %v2403_v4 = vpop.permute.xlu2 %2402  ;;  %v6528_v54 = vld [vmem:[#allocation29_spill] sm:$0xff] }
 0x51a   : > { %3944 = vmatmul.msk.bf16.vlgmr.msrb.gmra.mxu2 %vm927_vm2, %v2403_v4 }
 0x51b   : > { %v2336_v14 = vpack.c.bf16 %v2331_v6, %v2330_v19  ;;  %v1592_v6 = vmul.f32 %v5579_v50, %v6528_v54 }
 0x51d   : > { %2459 = vrot.lane.b32.xlu0 %v2336_v14, %s4345_s27  ;;  %v1557_v14 = vmul.f32 %v5521_v45, %v5548_v27 }
 0x520   : > { %v2373_v35 = vpop.permute.xlu1 %2372  ;;  %v1819_v31 = vpop.permute.xlu0 %1818 }
 0x521   : > { %v2391_v28 = vadd.f32 %v2373_v35, %v2343_v52  ;;  %v1839_v51 = vsel %vm927_vm2, %v1819_v31, 0  ;;  %v1580_v29 = vpop.permute.xlu2 %1579 }
 0x522   : > { %1857 = vmatpush.bf16.xpose.msrb.mxu0 %v1839_v51  ;;  %4045 = vmatpush.bf16.xpose.msrb.mxu1 %v1839_v51  ;;  %v2285_v36 = vmul.f32 %v2266_v2, %v1580_v29  ;;  %v1596_v19 = vmul.f32 %v1580_v29, %v5451_v22 }
 0x523   : > { %v2396_v38 = vpack.c.bf16 %v2391_v28, %v2390_v33  ;;  %2482 = vmatpush.bf16.xpose.msrb.mxu3 %v1839_v51 }
 0x525   : > { %2406 = vrot.lane.b32.xlu1 %v2396_v38, %s4345_s27 }
 0x528   : > { %v1578_v46 = vpop.permute.xlu0 %1577 }
 0x529   : > { %v2284_v63 = vmul.f32 %v2265_v9, %v1578_v46  ;;  %v2375_v5 = vpop.permute.xlu2 %2374  ;;  %v1595_v13 = vmul.f32 %v1578_v46, %v5407_v15  ;;  %v4328_v15 = vld [vmem:[%s4459_s26 + $0x8] sm:$0xff] }
 0x52a   : > { %v2392_v41 = vadd.f32 %v2375_v5, %v2344_v16  ;;  %v1558_v52 = vmul.f32 %v4328_v15, %v5540_v24 }
 0x52d   : > { %1607 = vrot.lane.b32.xlu1 %v1590_v12, %s4348_s18  ;;  %v4329_v12 = vld [vmem:[%s4459_s26 + $0x10] sm:$0xff] }
 0x52e   : > { %v1559_v47 = vmul.f32 %v4329_v12, %v5571_v26  ;;  %v1561_v26 = vmul.f32 %v5629_v62, %v5590_v20 }
 0x530   : > { %v2317_v8 = vpop.permute.xlu0 %2316 }
 0x531   : > { %v2333_v21 = vsub.f32 %v2285_v36, %v2317_v8  ;;  %v1562_v8 = vmul.f32 %v5471_v58, %v5586_v10  ;;  %v4331_v58 = vld [vmem:[%s4459_s26 + $0x38] sm:$0xff] }
 0x532   : > { %v1564_v10 = vmul.f32 %v4331_v58, %v5616_v7 }
 0x535   : > { %1609 = vrot.lane.b32.xlu1 %v1591_v43, %s4348_s18  ;;  %v1560_v43 = vmul.f32 %v5219_v11, %v5567_v34 }
 0x537   : > { %v2456_v42 = vpop.permute.xlu1 %2455 }
 0x538   : > { %3948 = vmatmul.msk.bf16.vlgmr.msrb.gmra.mxu3 %vm927_vm2, %v2456_v42 }
 0x53d   : > { %1615 = vrot.lane.b32.xlu1 %v1594_v57, %s4348_s18 }
 0x53f   : > { %v2315_v18 = vpop.permute.xlu1 %2314 }
 0x540   : > { %v2332_v30 = vsub.f32 %v2284_v63, %v2315_v18 }
 0x542   : > { %v2337_v23 = vpack.c.bf16 %v2333_v21, %v2332_v30 }
 0x544   : > { %2461 = vrot.lane.b32.xlu2 %v2337_v23, %s4345_s27  ;;  %v4330_v23 = vld [vmem:[%s4459_s26 + $0x30] sm:$0xff]  ;;  %s4352_s26 = smov 80  }
 0x545   : > { %v1563_v5 = vmul.f32 %v4330_v23, %v5612_v61  ;;  %v5708_v61 = vld [vmem:[%s502_s20] ss:$0 sm:$0xff] }
 0x547   : > { %v2377_v44 = vpop.permute.xlu1 %2376 }
 0x548   : > { %v2393_v60 = vadd.f32 %v2377_v44, %v2345_v25 }
 0x54a   : > { %v2397_v49 = vpack.c.bf16 %v2393_v60, %v2392_v41 }
 0x54c   : > { %2408 = vrot.lane.b32.xlu0 %v2397_v49, %s4345_s27  ;;  %1613 = vrot.lane.b32.xlu2 %v1593_v1, %s4348_s18 }
 0x554   : > { %1611 = vrot.lane.b32.xlu0 %v1592_v6, %s4348_s18  ;;  %1619 = vrot.lane.b32.xlu2 %v1596_v19, %s4348_s18  ;;  %v5665_v4 = vpop.f32.mrf.mxu3 }
 0x556   : > { %v2458_v55 = vpop.permute.xlu2 %2457 }
 0x557   : > { %3949 = vmatmul.msk.bf16.gmra.mxu3 %vm927_vm2, %v2458_v55 }
 0x55c   : > { %1617 = vrot.lane.b32.xlu0 %v1595_v13, %s4348_s18  ;;  %v5673_v51 = vpop.f32.mrf.mxu3  ;;  %v1347_v13 = vpack.c.bf16 %v6505_v48, %v6498_v3 }
 0x55e   : > { %v1606_v50 = vpop.permute.xlu2 %1605 }
 0x55f   : > { %v1629_v31 = vsub.f32 %v1557_v14, %v1606_v50 }
 0x564   : > { %v5675_v38 = vpop.f32.mrf.mxu3 }
 0x56c   : > { %v5677_v0 = vpop.f32.mrf.mxu3 }
 0x574   : > { %v5680_v27 = vpop.f32.mrf.mxu3 }
 0x576   : > { %v2405_v32 = vpop.permute.xlu0 %2404 }
 0x577   : > { %3945 = vmatmul.msk.bf16.gmra.mxu2 %vm927_vm2, %v2405_v32 }
 0x57c   : > { %v5687_v2 = vpop.f32.mrf.mxu3 }
 0x58f   : > { %v2460_v37 = vpop.permute.xlu0 %2459 }
 0x590   : > { %3950 = vmatmul.msk.bf16.gmra.mxu3 %vm927_vm2, %v2460_v37 }
 0x591   : > { %v5693_v11 = vpop.f32.mrf.mxu3 }
 0x597   : > { %v2407_v22 = vpop.permute.xlu1 %2406 }
 0x598   : > { %3946 = vmatmul.msk.bf16.gmra.mxu2 %vm927_vm2, %v2407_v22 }
 0x599   : > { %v5696_v21 = vpop.f32.mrf.mxu3 }
 0x59d   : > { %v2431_v62 = vpop.f32.mrf.mxu2 }
 0x59e   : > { %v2462_v53 = vpop.permute.xlu2 %2461 }
 0x59f   : > { %v1608_v35 = vpop.permute.xlu1 %1607 }
 0x5a0   : > { %v1630_v33 = vsub.f32 %v1558_v52, %v1608_v35  ;;  %3951 = vmatmul.msk.bf16.gmra.mxu3 %vm927_vm2, %v2462_v53 }
 0x5a2   : > { %v1637_v28 = vpack.c.bf16 %v1630_v33, %v1629_v31 }
 0x5a4   : > { %3936 = vmatmul.msk.bf16.vlgmr.msrb.gmra.mxu0 %vm927_vm2, %v1637_v28 }
 0x5a5   : > { %v2433_v60 = vpop.f32.mrf.mxu2 }
 0x5a6   : > { %v1614_v36 = vpop.permute.xlu2 %1613 }
 0x5a7   : > { %v1610_v24 = vpop.permute.xlu1 %1609  ;;  %v1633_v34 = vsub.f32 %v1561_v26, %v1614_v36 }
 0x5a8   : > { %v1631_v42 = vsub.f32 %v1559_v47, %v1610_v24 }
 0x5ae   : > { %v1620_v16 = vpop.permute.xlu2 %1619 }
 0x5af   : > { %v1616_v9 = vpop.permute.xlu1 %1615  ;;  %v1636_v20 = vsub.f32 %v1564_v10, %v1620_v16 }
 0x5b0   : > { %v1634_v63 = vsub.f32 %v1562_v8, %v1616_v9 }
 0x5b2   : > { %v1639_v18 = vpack.c.bf16 %v1634_v63, %v1633_v34 }
 0x5bb   : > { %v2484_v44 = vpop.f32.mrf.mxu3 }
 0x5bc   : > { %v2485_v14 = vadd.f32 %v2484_v44, %v2431_v62 }
 0x5be   : > { %v2409_v45 = vpop.permute.xlu0 %2408  ;;  %v2504_v52 = vmul.f32 0.25, %v2485_v14 }
 0x5bf   : > { %3947 = vmatmul.msk.bf16.gmra.mxu2 %vm927_vm2, %v2409_v45 }
 0x5c0   : > { %v5726_v28 = vadd.f32 %v5708_v61, %v2504_v52 }
 0x5c3   : > { %v2486_v1 = vpop.f32.mrf.mxu3 }
 0x5c6   : > { %v1612_v46 = vpop.permute.xlu0 %1611 }
 0x5c7   : > { %v1632_v57 = vsub.f32 %v1560_v43, %v1612_v46  ;;  %v2520_v46 = vsel %vm1898_vm12, %v5726_v28, -inf }
 0x5c9   : > { %v1638_v29 = vpack.c.bf16 %v1632_v57, %v1631_v42 }
 0x5cb   : > { %3937 = vmatmul.msk.bf16.vlgmr.msrb.gmra.mxu1 %vm927_vm2, %v1638_v29 }
 0x5ce   : > { %v1618_v30 = vpop.permute.xlu0 %1617 }
 0x5cf   : > { %v1635_v25 = vsub.f32 %v1563_v5, %v1618_v30 }
 0x5d1   : > { %v1640_v41 = vpack.c.bf16 %v1636_v20, %v1635_v25 }
 0x5da   : > { %v2489_v49 = vpop.f32.mrf.mxu3 }
 0x5db   : > { %3938 = vmatmul.msk.bf16.gmra.mxu1 %vm927_vm2, %v1639_v18 }
 0x5e2   : > { %v2491_v22 = vpop.f32.mrf.mxu3 }
 0x5eb   : > { %3939 = vmatmul.msk.bf16.gmra.mxu1 %vm927_vm2, %v1640_v41 }
 0x5fa   : > { %v2436_v54 = vpop.f32.mrf.mxu2 }
 0x5fb   : > { %v2490_v6 = vadd.f32 %v2489_v49, %v2436_v54 }
 0x5fd   : > { %v2506_v19 = vmul.f32 0.25, %v2490_v6 }
 0x5ff   : > { %v5711_v7 = vadd.f32 %v5708_v61, %v2506_v19 }
 0x601   : > { %v2526_v55 = vsel %vm1898_vm12, %v5711_v7, -inf }
 0x602   : > { %2527 = vmax.xlane.f32.xlu2 %v2526_v55  ;;  %v2438_v32 = vpop.f32.mrf.mxu2 }
 0x603   : > { %v2492_v45 = vadd.f32 %v2491_v22, %v2438_v32 }
 0x605   : > { %v2507_v43 = vmul.f32 0.25, %v2492_v45 }
 0x607   : > { %v5739_v29 = vadd.f32 %v5708_v61, %v2507_v43 }
 0x609   : > { %v2529_v34 = vsel %vm1898_vm12, %v5739_v29, -inf }
 0x613   : > { %v2494_v48 = vpop.f32.mrf.mxu3 }
 0x61a   : > { %1999 = vrot.lane.b32.xlu2 %v1347_v13, %s4352_s26 }
 0x61b   : > { %v2441_v31 = vpop.f32.mrf.mxu2  ;;  %v2496_v8 = vpop.f32.mrf.mxu3 }
 0x61c   : > { %v2495_v9 = vadd.f32 %v2494_v48, %v2441_v31 }
 0x61e   : > { %v2508_v26 = vmul.f32 0.25, %v2495_v9 }
 0x620   : > { %v5746_v30 = vadd.f32 %v5708_v61, %v2508_v26 }
 0x621   : > { %v1859_v37 = vpop.f32.mrf.mxu0 }
 0x622   : > { %v1860_v50 = vadd.f32 %v1859_v37, %v5665_v4  ;;  %v2487_v4 = vadd.f32 %v2486_v1, %v2433_v60  ;;  %v2532_v16 = vsel %vm1898_vm12, %v5746_v30, -inf }
 0x623   : > { %v2499_v5 = vpop.f32.mrf.mxu3 }
 0x624   : > { %v1879_v53 = vmul.f32 0.25, %v1860_v50  ;;  %v2505_v47 = vmul.f32 0.25, %v2487_v4 }
 0x626   : > { %v5720_v15 = vadd.f32 %v5708_v61, %v1879_v53  ;;  %v5736_v57 = vadd.f32 %v5708_v61, %v2505_v47 }
 0x628   : > { %v1899_v35 = vsel %vm1898_vm12, %v5720_v15, -inf  ;;  %v2523_v63 = vsel %vm1898_vm12, %v5736_v57, -inf }
 0x629   : > { %v1861_v33 = vpop.f32.mrf.mxu0  ;;  %1900 = vmax.xlane.f32.xlu1 %v1899_v35 }
 0x62a   : > { %v1862_v3 = vadd.f32 %v1861_v33, %v5673_v51  ;;  %v2443_v51 = vpop.f32.mrf.mxu2 }
 0x62b   : > { %v2497_v36 = vadd.f32 %v2496_v8, %v2443_v51  ;;  %v2501_v1 = vpop.f32.mrf.mxu3 }
 0x62c   : > { %v1880_v24 = vmul.f32 0.25, %v1862_v3 }
 0x62d   : > { %v2509_v18 = vmul.f32 0.25, %v2497_v36 }
 0x62e   : > { %v5729_v12 = vadd.f32 %v5708_v61, %v1880_v24 }
 0x62f   : > { %v5749_v23 = vadd.f32 %v5708_v61, %v2509_v18 }
 0x630   : > { %v1902_v42 = vsel %vm1898_vm12, %v5729_v12, -inf }
 0x631   : > { %2521 = vmax.xlane.f32.xlu1 %v2520_v46  ;;  %1903 = vmax.xlane.f32.xlu0 %v1902_v42  ;;  %v2535_v10 = vsel %vm1898_vm12, %v5749_v23, -inf }
 0x639   : > { %2524 = vmax.xlane.f32.xlu0 %v2523_v63  ;;  %2530 = vmax.xlane.f32.xlu1 %v2529_v34 }
 0x641   : > { %2533 = vmax.xlane.f32.xlu0 %v2532_v16 }
 0x642   : > { %v2446_v58 = vpop.f32.mrf.mxu2 }
 0x643   : > { %v2500_v25 = vadd.f32 %v2499_v5, %v2446_v58  ;;  %2536 = vmax.xlane.f32.xlu2 %v2535_v10 }
 0x645   : > { %v2510_v20 = vmul.f32 0.25, %v2500_v25 }
 0x647   : > { %v5756_v62 = vadd.f32 %v5708_v61, %v2510_v20 }
 0x648   : > { %v1864_v44 = vpop.f32.mrf.mxu1 }
 0x649   : > { %v1865_v41 = vadd.f32 %v1864_v44, %v5675_v38  ;;  %v2538_v60 = vsel %vm1898_vm12, %v5756_v62, -inf  ;;  %v1348_v38 = vpack.c.bf16 %v6508_v17, %v4750_v40 }
 0x64a   : > { %v2448_v49 = vpop.f32.mrf.mxu2 }
 0x64b   : > { %v1881_v54 = vmul.f32 0.25, %v1865_v41  ;;  %v2502_v6 = vadd.f32 %v2501_v1, %v2448_v49  ;;  %2539 = vmax.xlane.f32.xlu2 %v2538_v60  ;;  %v1345_v1 = vpack.c.bf16 %v4709_v56, %v4702_v59  ;;  %v6529_v56 = vld [vmem:[#allocation22_spill] sm:$0xff] }
 0x64d   : > { %v5762_v19 = vadd.f32 %v5708_v61, %v1881_v54  ;;  %v2511_v55 = vmul.f32 0.25, %v2502_v6 }
 0x64f   : > { %v1905_v13 = vsel %vm1898_vm12, %v5762_v19, -inf  ;;  %v5767_v32 = vadd.f32 %v5708_v61, %v2511_v55 }
 0x650   : > { %1906 = vmax.xlane.f32.xlu1 %v1905_v13  ;;  %v1866_v50 = vpop.f32.mrf.mxu1  ;;  %v1346_v13 = vpack.c.bf16 %v6529_v56, %v4716_v39 }
 0x651   : > { %v2541_v37 = vsel %vm1898_vm12, %v5767_v32, -inf  ;;  %v1867_v22 = vadd.f32 %v1866_v50, %v5677_v0 }
 0x653   : > { %v1882_v53 = vmul.f32 0.25, %v1867_v22 }
 0x655   : > { %2001 = vrot.lane.b32.xlu0 %v1348_v38, %s4352_s26  ;;  %v5776_v52 = vadd.f32 %v5708_v61, %v1882_v53 }
 0x657   : > { %v1908_v40 = vsel %vm1898_vm12, %v5776_v52, -inf }
 0x658   : > { %2542 = vmax.xlane.f32.xlu1 %v2541_v37  ;;  %v1869_v14 = vpop.f32.mrf.mxu1 }
 0x659   : > { %v1870_v35 = vadd.f32 %v1869_v14, %v5680_v27 }
 0x65b   : > { %v1883_v31 = vmul.f32 0.25, %v1870_v35 }
 0x65d   : > { %v5782_v33 = vadd.f32 %v5708_v61, %v1883_v31 }
 0x65f   : > { %v1911_v0 = vsel %vm1898_vm12, %v5782_v33, -inf }
 0x660   : > { %v1871_v17 = vpop.f32.mrf.mxu1 }
 0x661   : > { %v1872_v3 = vadd.f32 %v1871_v17, %v5687_v2 }
 0x663   : > { %v1884_v48 = vmul.f32 0.25, %v1872_v3 }
 0x665   : > { %v5788_v4 = vadd.f32 %v5708_v61, %v1884_v48 }
 0x667   : > { %v1914_v27 = vsel %vm1898_vm12, %v5788_v4, -inf }
 0x668   : > { %v1874_v22 = vpop.f32.mrf.mxu1 }
 0x669   : > { %v1875_v53 = vadd.f32 %v1874_v22, %v5693_v11 }
 0x675   : > { %v2528_v24 = vpop.xlane.xlu2 %2527 }
 0x676   : > { %v2546_v37 = vsub.f32 %v5711_v7, %v2528_v24 }
 0x678   : > { %v2556_v50 = vmul.f32 1.442695, %v2546_v37 }
 0x67d   : > { %v2000_v9 = vpop.permute.xlu2 %1999 }
 0x67f   : > { %1909 = vmax.xlane.f32.xlu0 %v1908_v40  ;;  %v1885_v40 = vmul.f32 0.25, %v1875_v53 }
 0x681   : > { %v5840_v48 = vadd.f32 %v5708_v61, %v1885_v40 }
 0x687   : > { %1912 = vmax.xlane.f32.xlu0 %v1911_v0 }
 0x68f   : > { %1915 = vmax.xlane.f32.xlu0 %v1914_v27 }
 0x69c   : > { %v1901_v45 = vpop.xlane.xlu1 %1900 }
 0x69d   : > { %v1923_v20 = vsub.f32 %v5720_v15, %v1901_v45 }
 0x69f   : > { %v1931_v44 = vmul.f32 1.442695, %v1923_v20 }
 0x6a4   : > { %v2522_v47 = vpop.xlane.xlu1 %2521  ;;  %v5792_v43 = vpop.xlane.xlu0 %1903 }
 0x6a5   : > { %v2544_v46 = vsub.f32 %v5726_v28, %v2522_v47  ;;  %v1924_v31 = vsub.f32 %v5729_v12, %v5792_v43  ;;  %v1917_v12 = vsel %vm1898_vm12, %v5840_v48, -inf }
 0x6a7   : > { %v2552_v2 = vmul.f32 1.442695, %v2544_v46  ;;  %v1933_v7 = vmul.f32 1.442695, %v1924_v31 }
 0x6a9   : > { %4170 = vpow2.f32 %v2552_v2 }
 0x6ac   : > { %v2525_v42 = vpop.xlane.xlu0 %2524  ;;  %v2531_v58 = vpop.xlane.xlu1 %2530 }
 0x6ad   : > { %v2545_v51 = vsub.f32 %v5736_v57, %v2525_v42  ;;  %v2547_v14 = vsub.f32 %v5739_v29, %v2531_v58  ;;  %v1876_v29 = vpop.f32.mrf.mxu1 }
 0x6ae   : > { %v1877_v11 = vadd.f32 %v1876_v29, %v5696_v21 }
 0x6af   : > { %v5796_v8 = vpop.eup %4170  ;;  %v2554_v36 = vmul.f32 1.442695, %v2545_v51  ;;  %v2558_v39 = vmul.f32 1.442695, %v2547_v14 }
 0x6b0   : > { %v2568_v26 = vsel %vm1898_vm12, %v5796_v8, 0.0  ;;  %v1886_v46 = vmul.f32 0.25, %v1877_v11 }
 0x6b1   : > { %2569 = vadd.xlane.f32.xlu2 %v2568_v26  ;;  %4172 = vpow2.f32 %v2554_v36 }
 0x6b4   : > { %v2534_v63 = vpop.xlane.xlu0 %2533 }
 0x6b5   : > { %v2548_v34 = vsub.f32 %v5746_v30, %v2534_v63 }
 0x6b6   : > { %v2537_v18 = vpop.xlane.xlu2 %2536 }
 0x6b7   : > { %v2560_v5 = vmul.f32 1.442695, %v2548_v34  ;;  %v2549_v28 = vsub.f32 %v5749_v23, %v2537_v18  ;;  %v5802_v16 = vpop.eup %4172 }
 0x6b8   : > { %v2571_v57 = vsel %vm1898_vm12, %v5802_v16, 0.0 }
 0x6b9   : > { %4174 = vpow2.f32 %v2560_v5  ;;  %2572 = vadd.xlane.f32.xlu1 %v2571_v57  ;;  %v2562_v10 = vmul.f32 1.442695, %v2549_v28 }
 0x6bb   : > { %4176 = vpow2.f32 %v2562_v10 }
 0x6bc   : > { %4178 = vpow2.f32 %v1931_v44 }
 0x6be   : > { %v2540_v0 = vpop.xlane.xlu2 %2539 }
 0x6bf   : > { %v5806_v25 = vpop.eup %4174  ;;  %v2550_v47 = vsub.f32 %v5756_v62, %v2540_v0 }
 0x6c0   : > { %v2580_v30 = vsel %vm1898_vm12, %v5806_v25, 0.0 }
 0x6c1   : > { %2581 = vadd.xlane.f32.xlu0 %v2580_v30  ;;  %v5811_v41 = vpop.eup %4176 }
 0x6c2   : > { %v2583_v49 = vsel %vm1898_vm12, %v5811_v41, 0.0  ;;  %v5819_v6 = vpop.eup %4178 }
 0x6c3   : > { %v1907_v23 = vpop.xlane.xlu1 %1906  ;;  %v1947_v59 = vsel %vm1898_vm12, %v5819_v6, 0.0 }
 0x6c4   : > { %v1925_v27 = vsub.f32 %v5762_v19, %v1907_v23  ;;  %v2564_v19 = vmul.f32 1.442695, %v2550_v47 }
 0x6c6   : > { %v1935_v2 = vmul.f32 1.442695, %v1925_v27 }
 0x6c7   : > { %v2002_v60 = vpop.permute.xlu0 %2001 }
 0x6c8   : > { %2023 = vmatpush.bf16.msra.mxu0 %v2002_v60  ;;  %2628 = vmatpush.bf16.msra.mxu1 %v2002_v60 }
 0x6c9   : > { %1995 = vrot.lane.b32.xlu2 %v1345_v1, %s4352_s26  ;;  %2584 = vadd.xlane.f32.xlu0 %v2583_v49 }
 0x6cb   : > { %v2543_v15 = vpop.xlane.xlu1 %2542 }
 0x6cc   : > { %v2551_v54 = vsub.f32 %v5767_v32, %v2543_v15  ;;  %2024 = vmatpush.bf16.msra.mxu0 %v2000_v9  ;;  %2629 = vmatpush.bf16.msra.mxu1 %v2000_v9  ;;  %v5855_v9 = vadd.f32 %v5708_v61, %v1886_v46 }
 0x6ce   : > { %v2566_v55 = vmul.f32 1.442695, %v2551_v54  ;;  %v1920_v63 = vsel %vm1898_vm12, %v5855_v9, -inf }
 0x6d0   : > { %4180 = vpow2.f32 %v2566_v55 }
 0x6d1   : > { %1948 = vadd.xlane.f32.xlu0 %v1947_v59  ;;  %4182 = vpow2.f32 %v2556_v50 }
 0x6d2   : > { %1997 = vrot.lane.b32.xlu1 %v1346_v13, %s4352_s26  ;;  %4184 = vpow2.f32 %v2558_v39 }
 0x6d3   : > { %4186 = vpow2.f32 %v1933_v7 }
 0x6d6   : > { %v5826_v38 = vpop.eup %4180 }
 0x6d7   : > { %v2589_v32 = vsel %vm1898_vm12, %v5826_v38, 0.0  ;;  %v5833_v35 = vpop.eup %4182 }
 0x6d8   : > { %v2574_v17 = vsel %vm1898_vm12, %v5833_v35, 0.0  ;;  %v5844_v45 = vpop.eup %4184 }
 0x6d9   : > { %2590 = vadd.xlane.f32.xlu0 %v2589_v32  ;;  %v2577_v21 = vsel %vm1898_vm12, %v5844_v45, 0.0  ;;  %v5852_v51 = vpop.eup %4186 }
 0x6da   : > { %v1950_v62 = vsel %vm1898_vm12, %v5852_v51, 0.0 }
 0x6f2   : > { %2575 = vadd.xlane.f32.xlu2 %v2574_v17  ;;  %v1910_v3 = vpop.xlane.xlu0 %1909 }
 0x6f3   : > { %v1926_v36 = vsub.f32 %v5776_v52, %v1910_v3 }
 0x6f5   : > { %v1937_v28 = vmul.f32 1.442695, %v1926_v36 }
 0x6fa   : > { %1918 = vmax.xlane.f32.xlu2 %v1917_v12  ;;  %v1913_v24 = vpop.xlane.xlu0 %1912 }
 0x6fb   : > { %v1927_v43 = vsub.f32 %v5782_v33, %v1913_v24 }
 0x6fc   : > { %2578 = vadd.xlane.f32.xlu1 %v2577_v21 }
 0x6fd   : > { %v1939_v42 = vmul.f32 1.442695, %v1927_v43 }
 0x6ff   : > { %4188 = vpow2.f32 %v1939_v42 }
 0x700   : > { %4190 = vpow2.f32 %v1935_v2 }
 0x701   : > { %4192 = vpow2.f32 %v2564_v19 }
 0x702   : > { %1951 = vadd.xlane.f32.xlu2 %v1950_v62  ;;  %v1916_v33 = vpop.xlane.xlu0 %1915 }
 0x703   : > { %v1928_v26 = vsub.f32 %v5788_v4, %v1916_v33 }
 0x704   : > { %1921 = vmax.xlane.f32.xlu1 %v1920_v63 }
 0x705   : > { %v5863_v34 = vpop.eup %4188  ;;  %v1941_v18 = vmul.f32 1.442695, %v1928_v26 }
 0x706   : > { %v5865_v61 = vpop.eup %4190  ;;  %v1959_v5 = vsel %vm1898_vm12, %v5863_v34, 0.0 }
 0x707   : > { %1960 = vadd.xlane.f32.xlu0 %v1959_v5  ;;  %4194 = vpow2.f32 %v1941_v18  ;;  %v5869_v57 = vpop.eup %4192  ;;  %v1953_v52 = vsel %vm1898_vm12, %v5865_v61, 0.0 }
 0x708   : > { %4196 = vpow2.f32 %v1937_v28  ;;  %v2586_v4 = vsel %vm1898_vm12, %v5869_v57, 0.0 }
 0x70a   : > { %1954 = vadd.xlane.f32.xlu2 %v1953_v52 }
 0x70c   : > { %2587 = vadd.xlane.f32.xlu1 %v2586_v4 }
 0x70d   : > { %v5875_v58 = vpop.eup %4194 }
 0x70e   : > { %v5877_v10 = vpop.eup %4196  ;;  %v1962_v20 = vsel %vm1898_vm12, %v5875_v58, 0.0 }
 0x70f   : > { %v1956_v30 = vsel %vm1898_vm12, %v5877_v10, 0.0 }
 0x712   : > { %1963 = vadd.xlane.f32.xlu2 %v1962_v20 }
 0x714   : > { %1957 = vadd.xlane.f32.xlu1 %v1956_v30 }
 0x724   : > { %v2570_v23 = vpop.xlane.xlu2 %2569 }
 0x72c   : > { %v2573_v44 = vpop.xlane.xlu1 %2572  ;;  %v1996_v55 = vpop.permute.xlu2 %1995 }
 0x72d   : > { %4198 = vrcp.f32 %v2573_v44 }
 0x72e   : > { %4200 = vrcp.f32 %v2570_v23 }
 0x733   : > { %v4199_v60 = vpop.eup %4198 }
 0x734   : > { %v4201_v49 = vpop.eup %4200  ;;  %v2601_v15 = vmul.f32 %v4199_v60, %v5802_v16  ;;  %v2582_v56 = vpop.xlane.xlu0 %2581 }
 0x735   : > { %v2600_v54 = vmul.f32 %v4201_v49, %v5796_v8 }
 0x737   : > { %v2608_v59 = vpack.c.bf16 %v2601_v15, %v2600_v54 }
 0x73c   : > { %v2585_v32 = vpop.xlane.xlu0 %2584 }
 0x744   : > { %v1998_v1 = vpop.permute.xlu1 %1997  ;;  %v1949_v53 = vpop.xlane.xlu0 %1948 }
 0x745   : > { %2025 = vmatpush.bf16.msra.mxu0 %v1998_v1  ;;  %2630 = vmatpush.bf16.msra.mxu1 %v1998_v1 }
 0x749   : > { %2026 = vmatpush.bf16.msra.mxu0 %v1996_v55  ;;  %2631 = vmatpush.bf16.msra.mxu1 %v1996_v55 }
 0x74c   : > { %3952 = vmatmul.msk.bf16.vlgmr.msra.gmra.mxu1 %vm1898_vm12, %v2608_v59 }
 0x765   : > { %v2576_v13 = vpop.xlane.xlu2 %2575 }
 0x766   : > { %4202 = vrcp.f32 %v2576_v13 }
 0x76c   : > { %v4203_v8 = vpop.eup %4202 }
 0x76d   : > { %v1919_v37 = vpop.xlane.xlu2 %1918  ;;  %v2602_v17 = vmul.f32 %v4203_v8, %v5833_v35 }
 0x76e   : > { %v1929_v50 = vsub.f32 %v5840_v48, %v1919_v37 }
 0x76f   : > { %v2579_v14 = vpop.xlane.xlu1 %2578 }
 0x770   : > { %v1943_v22 = vmul.f32 1.442695, %v1929_v50  ;;  %4204 = vrcp.f32 %v2579_v14 }
 0x772   : > { %4206 = vpow2.f32 %v1943_v22  ;;  %v4030_v22 = vld [vmem:[%s6374_s7] sm:$0xff] }
 0x773   : > { %4208 = vrcp.f32 %v1949_v53 }
 0x775   : > { %v1952_v16 = vpop.xlane.xlu2 %1951 }
 0x776   : > { %4210 = vrcp.f32 %v1952_v16  ;;  %v4205_v39 = vpop.eup %4204 }
 0x777   : > { %v1922_v40 = vpop.xlane.xlu1 %1921  ;;  %v2603_v3 = vmul.f32 %v4205_v39, %v5844_v45  ;;  %4212 = vrcp.f32 %v2585_v32 }
 0x778   : > { %v5887_v31 = vpop.eup %4206  ;;  %v1930_v7 = vsub.f32 %v5855_v9, %v1922_v40  ;;  %v2591_v9 = vpop.xlane.xlu0 %2590 }
 0x779   : > { %v1965_v48 = vsel %vm1898_vm12, %v5887_v31, 0.0  ;;  %v4209_v29 = vpop.eup %4208  ;;  %v2609_v11 = vpack.c.bf16 %v2603_v3, %v2602_v17 }
 0x77a   : > { %1966 = vadd.xlane.f32.xlu1 %v1965_v48  ;;  %v1945_v0 = vmul.f32 1.442695, %v1930_v7  ;;  %v1979_v12 = vmul.f32 %v4209_v29, %v5819_v6 }
 0x77b   : > { %3953 = vmatmul.msk.bf16.gmra.mxu1 %vm1898_vm12, %v2609_v11 }
 0x77c   : > { %v4211_v27 = vpop.eup %4210  ;;  %4214 = vpow2.f32 %v1945_v0 }
 0x77d   : > { %v1980_v24 = vmul.f32 %v4211_v27, %v5852_v51  ;;  %4216 = vrcp.f32 %v2582_v56  ;;  %v4213_v47 = vpop.eup %4212  ;;  %v1955_v46 = vpop.xlane.xlu2 %1954 }
 0x77e   : > { %v2605_v42 = vmul.f32 %v4213_v47, %v5811_v41  ;;  %4218 = vrcp.f32 %v1955_v46 }
 0x77f   : > { %v1987_v35 = vpack.c.bf16 %v1980_v24, %v1979_v12  ;;  %v2588_v45 = vpop.xlane.xlu1 %2587 }
 0x780   : > { %v1961_v5 = vpop.xlane.xlu0 %1960 }
 0x781   : > { %3940 = vmatmul.msk.bf16.vlgmr.msra.gmra.mxu0 %vm1898_vm12, %v1987_v35 }
 0x782   : > { %v4215_v43 = vpop.eup %4214 }
 0x783   : > { %v1968_v2 = vsel %vm1898_vm12, %v4215_v43, 0.0  ;;  %v4217_v21 = vpop.eup %4216 }
 0x784   : > { %1969 = vadd.xlane.f32.xlu0 %v1968_v2  ;;  %v2604_v6 = vmul.f32 %v4217_v21, %v5806_v25  ;;  %v4219_v62 = vpop.eup %4218 }
 0x785   : > { %v1981_v36 = vmul.f32 %v4219_v62, %v5865_v61  ;;  %v1964_v63 = vpop.xlane.xlu2 %1963 }
 0x786   : > { %v2610_v51 = vpack.c.bf16 %v2605_v42, %v2604_v6 }
 0x787   : > { %v1958_v19 = vpop.xlane.xlu1 %1957 }
 0x788   : > { %4220 = vrcp.f32 %v1958_v19 }
 0x789   : > { %4222 = vrcp.f32 %v2588_v45 }
 0x78a   : > { %4224 = vrcp.f32 %v2591_v9 }
 0x78b   : > { %3954 = vmatmul.msk.bf16.gmra.mxu1 %vm1898_vm12, %v2610_v51  ;;  %4226 = vrcp.f32 %v1964_v63 }
 0x78c   : > { %4228 = vrcp.f32 %v1961_v5 }
 0x78e   : > { %v4221_v33 = vpop.eup %4220 }
 0x78f   : > { %v1982_v26 = vmul.f32 %v4221_v33, %v5877_v10  ;;  %v4223_v41 = vpop.eup %4222 }
 0x790   : > { %v4225_v25 = vpop.eup %4224  ;;  %v2606_v28 = vmul.f32 %v4223_v41, %v5869_v57 }
 0x791   : > { %v1988_v18 = vpack.c.bf16 %v1982_v26, %v1981_v36  ;;  %v2607_v52 = vmul.f32 %v4225_v25, %v5826_v38  ;;  %v4227_v20 = vpop.eup %4226  ;;  %v4031_v38 = vld [vmem:[%s6374_s7 + $0x8] sm:$0xff] }
 0x792   : > { %v4229_v61 = vpop.eup %4228  ;;  %v1984_v10 = vmul.f32 %v4227_v20, %v5875_v58  ;;  %2731 = vmatpush.bf16.msrb.mxu0 %v4031_v38 }
 0x793   : > { %3941 = vmatmul.msk.bf16.gmra.mxu0 %vm1898_vm12, %v1988_v18  ;;  %v2611_v4 = vpack.c.bf16 %v2607_v52, %v2606_v28  ;;  %v1983_v30 = vmul.f32 %v4229_v61, %v5863_v34 }
 0x795   : > { %v1989_v44 = vpack.c.bf16 %v1984_v10, %v1983_v30 }
 0x796   : > { %2732 = vmatpush.bf16.msrb.mxu0 %v4030_v22 }
 0x79b   : > { %3955 = vmatmul.msk.bf16.gmra.mxu1 %vm1898_vm12, %v2611_v4 }
 0x7a3   : > { %3942 = vmatmul.msk.bf16.gmra.mxu0 %vm1898_vm12, %v1989_v44 }
 0x7c9   : > { %v2633_v23 = vpop.f32.mrf.mxu1 }
 0x7d1   : > { %v2635_v60 = vpop.f32.mrf.mxu1 }
 0x7d2   : > { %v4068_v1 = vpack.i.bf16 %v2635_v60, %v2633_v23 }
 0x7d4   : > { %4069 = vrot.lane.b32.xlu2 %v4068_v1, %s4343_s22 }
 0x7ed   : > { %v1967_v57 = vpop.xlane.xlu1 %1966 }
 0x7ee   : > { %4230 = vrcp.f32 %v1967_v57 }
 0x7f4   : > { %v4231_v15 = vpop.eup %4230 }
 0x7f5   : > { %v1985_v54 = vmul.f32 %v4231_v15, %v5887_v31 }
 0x7f7   : > { %v1970_v49 = vpop.xlane.xlu0 %1969 }
 0x7f8   : > { %4232 = vrcp.f32 %v1970_v49  ;;  %v2638_v58 = vpop.f32.mrf.mxu1 }
 0x7fe   : > { %v4233_v34 = vpop.eup %4232  ;;  %v2028_v16 = vpop.f32.mrf.mxu0 }
 0x7ff   : > { %v1986_v55 = vmul.f32 %v4233_v34, %v4215_v43 }
 0x800   : > { %v2640_v59 = vpop.f32.mrf.mxu1 }
 0x801   : > { %v4073_v56 = vpack.i.bf16 %v2640_v59, %v2638_v58  ;;  %v1990_v13 = vpack.c.bf16 %v1986_v55, %v1985_v54 }
 0x803   : > { %4074 = vrot.lane.b32.xlu1 %v4073_v56, %s4343_s22  ;;  %3943 = vmatmul.msk.bf16.gmra.mxu0 %vm1898_vm12, %v1990_v13 }
 0x806   : > { %v2030_v17 = vpop.f32.mrf.mxu0 }
 0x808   : > { %v2643_v32 = vpop.f32.mrf.mxu1 }
 0x810   : > { %v2645_v37 = vpop.f32.mrf.mxu1  ;;  %v2033_v29 = vpop.f32.mrf.mxu0 }
 0x811   : > { %v4078_v50 = vpack.i.bf16 %v2645_v37, %v2643_v32  ;;  %v6530_v32 = vld [vmem:[#allocation17_spill] sm:$0xff] }
 0x813   : > { %4079 = vrot.lane.b32.xlu0 %v4078_v50, %s4343_s22 }
 0x818   : > { %v2648_v14 = vpop.f32.mrf.mxu1  ;;  %v2035_v11 = vpop.f32.mrf.mxu0 }
 0x820   : > { %v2650_v53 = vpop.f32.mrf.mxu1  ;;  %v2038_v24 = vpop.f32.mrf.mxu0 }
 0x821   : > { %v4083_v8 = vpack.i.bf16 %v2650_v53, %v2648_v14 }
 0x823   : > { %4084 = vrot.lane.b32.xlu2 %v4083_v8, %s4343_s22  ;;  %s515_s22 = scalar_lea.vmem %s6381_s14, %s4443_s17 }
 0x828   : > { %v2040_v43 = vpop.f32.mrf.mxu0 }
 0x82e   : > { %v4070_v39 = vpop.permute.xlu2 %4069 }
 0x82f   : > { %v4072_v31 = vunpack.i.h.bf16 %v4070_v39  ;;  %v4071_v40 = vunpack.i.l.bf16 %v4070_v39 }
 0x831   : > { %v2685_v3 = vsel %vm564_vm0, %v2028_v16, %v4071_v40  ;;  %v2686_v7 = vsel %vm564_vm0, %v2030_v17, %v4072_v31 }
 0x832   : > { %v2693_v48 = vpack.c.bf16 %v2686_v7, %v2685_v3 }
 0x834   : > { %3964 = vmatmul.msk.bf16.vlgmr.msrb.gmra.mxu0 %vm645_vm5, %v2693_v48  ;;  %v5972_v48 = vld [vmem:[%s6376_s9 + $0x1] ss:$0 sm:$0xff] }
 0x875   : > { %v4075_v0 = vpop.permute.xlu1 %4074 }
 0x876   : > { %v4077_v27 = vunpack.i.h.bf16 %v4075_v0  ;;  %v4076_v12 = vunpack.i.l.bf16 %v4075_v0 }
 0x878   : > { %v2687_v35 = vsel %vm564_vm0, %v2033_v29, %v4076_v12  ;;  %v2688_v45 = vsel %vm564_vm0, %v2035_v11, %v4077_v27 }
 0x879   : > { %v2694_v47 = vpack.c.bf16 %v2688_v45, %v2687_v35 }
 0x87b   : > { %3965 = vmatmul.msk.bf16.gmra.mxu0 %vm645_vm5, %v2694_v47 }
 0x87d   : > { %v4085_v9 = vpop.permute.xlu2 %4084 }
 0x87e   : > { %v4087_v33 = vunpack.i.h.bf16 %v4085_v9  ;;  %v4086_v36 = vunpack.i.l.bf16 %v4085_v9 }
 0x880   : > { %v2043_v6 = vpop.f32.mrf.mxu0 }
 0x881   : > { %v2691_v63 = vsel %vm564_vm0, %v2043_v6, %v4086_v36 }
 0x885   : > { %v4080_v46 = vpop.permute.xlu0 %4079 }
 0x886   : > { %v4082_v2 = vunpack.i.h.bf16 %v4080_v46  ;;  %v4081_v21 = vunpack.i.l.bf16 %v4080_v46 }
 0x888   : > { %v2689_v42 = vsel %vm564_vm0, %v2038_v24, %v4081_v21  ;;  %v2690_v19 = vsel %vm564_vm0, %v2040_v43, %v4082_v2  ;;  %v2045_v62 = vpop.f32.mrf.mxu0 }
 0x889   : > { %v2695_v51 = vpack.c.bf16 %v2690_v19, %v2689_v42  ;;  %v2692_v26 = vsel %vm564_vm0, %v2045_v62, %v4087_v33 }
 0x88a   : > { %v2696_v18 = vpack.c.bf16 %v2692_v26, %v2691_v63 }
 0x88b   : > { %3966 = vmatmul.msk.bf16.gmra.mxu0 %vm645_vm5, %v2695_v51 }
 0x89b   : > { %3967 = vmatmul.msk.bf16.gmra.mxu0 %vm645_vm5, %v2696_v18 }
 0x8b1   : > { %v2734_v41 = vpop.f32.mrf.mxu0 }
 0x8b2   : > { %v2754_v5 = vmul.f32 %v2734_v41, %v2734_v41 }
 0x8b4   : > { %v2762_v25 = vsel %vm645_vm5, %v2754_v5, 0.0 }
 0x8b5   : > { %2763 = vadd.xlane.f32.xlu0 %v2762_v25 }
 0x8b9   : > { %v2736_v28 = vpop.f32.mrf.mxu0 }
 0x8ba   : > { %v2755_v52 = vmul.f32 %v2736_v28, %v2736_v28 }
 0x8bc   : > { %v2765_v4 = vsel %vm645_vm5, %v2755_v52, 0.0 }
 0x8bd   : > { %2766 = vadd.xlane.f32.xlu1 %v2765_v4 }
 0x8f8   : > { %v5937_v20 = vpop.f32.mrf.mxu0 }
 0x8f9   : > { %v2756_v61 = vmul.f32 %v5937_v20, %v5937_v20 }
 0x8fb   : > { %v2768_v10 = vsel %vm645_vm5, %v2756_v61, 0.0 }
 0x8fc   : > { %2769 = vadd.xlane.f32.xlu2 %v2768_v10 }
 0x900   : > { %v5942_v30 = vpop.f32.mrf.mxu0 }
 0x901   : > { %v2757_v44 = vmul.f32 %v5942_v30, %v5942_v30 }
 0x903   : > { %v2771_v23 = vsel %vm645_vm5, %v2757_v44, 0.0 }
 0x904   : > { %2772 = vadd.xlane.f32.xlu0 %v2771_v23 }
 0x908   : > { %v5947_v60 = vpop.f32.mrf.mxu0 }
 0x909   : > { %v2758_v1 = vmul.f32 %v5947_v60, %v5947_v60 }
 0x90b   : > { %v2774_v57 = vsel %vm645_vm5, %v2758_v1, 0.0 }
 0x90c   : > { %2775 = vadd.xlane.f32.xlu1 %v2774_v57 }
 0x910   : > { %v5952_v38 = vpop.f32.mrf.mxu0 }
 0x911   : > { %v2759_v49 = vmul.f32 %v5952_v38, %v5952_v38 }
 0x913   : > { %v2777_v58 = vsel %vm645_vm5, %v2759_v49, 0.0 }
 0x914   : > { %2778 = vadd.xlane.f32.xlu2 %v2777_v58 }
 0x918   : > { %v5957_v15 = vpop.f32.mrf.mxu0 }
 0x919   : > { %v2760_v34 = vmul.f32 %v5957_v15, %v5957_v15 }
 0x91b   : > { %v2780_v54 = vsel %vm645_vm5, %v2760_v34, 0.0 }
 0x91c   : > { %2781 = vadd.xlane.f32.xlu0 %v2780_v54 }
 0x920   : > { %v5962_v55 = vpop.f32.mrf.mxu0 }
 0x921   : > { %v2761_v59 = vmul.f32 %v5962_v55, %v5962_v55 }
 0x923   : > { %v2783_v56 = vsel %vm645_vm5, %v2761_v59, 0.0 }
 0x924   : > { %2784 = vadd.xlane.f32.xlu1 %v2783_v56 }
 0x928   : > { %v2764_v13 = vpop.xlane.xlu0 %2763 }
 0x929   : > { %v2786_v37 = vmul.f32 %v2764_v13, %v6530_v32 }
 0x92b   : > { %v2794_v50 = vadd.f32 1e-05, %v2786_v37 }
 0x92d   : > { %4234 = vrsqrt.f32 %v2794_v50  ;;  %vm2808_vm2 = vweird.f32 %v2794_v50 }
 0x930   : > { %v2767_v22 = vpop.xlane.xlu1 %2766 }
 0x931   : > { %v2787_v14 = vmul.f32 %v2767_v22, %v6530_v32 }
 0x933   : > { %v4235_v53 = vpop.eup %4234  ;;  %v2795_v8 = vadd.f32 1e-05, %v2787_v14 }
 0x934   : > { %v2803_v16 = vmul.f32 %v4235_v53, %v2794_v50  ;;  %vm2809_vm0 = vweird.f32 %v4235_v53 }
 0x935   : > { %4236 = vrsqrt.f32 %v2795_v8  ;;  %vm2810_vm13 = vmor %vm2808_vm2, %vm2809_vm0  ;;  %vm2818_vm15 = vweird.f32 %v2795_v8 }
 0x936   : > { %v2804_v39 = vmul.f32 %v4235_v53, %v2803_v16 }
 0x938   : > { %v2805_v31 = vmul.f32 0.5, %v2804_v39 }
 0x93a   : > { %v2806_v40 = vsub.f32 1.5, %v2805_v31 }
 0x93b   : > { %v4237_v17 = vpop.eup %4236 }
 0x93c   : > { %v2807_v3 = vmul.f32 %v4235_v53, %v2806_v40  ;;  %v2813_v7 = vmul.f32 %v4237_v17, %v2795_v8  ;;  %vm2819_vm14 = vweird.f32 %v4237_v17  ;;  %v6531_v8 = vld [vmem:[#allocation20_spill] sm:$0xff] }
 0x93d   : > { %vm2820_vm1 = vmor %vm2818_vm15, %vm2819_vm14 }
 0x93e   : > { %v2811_v29 = vsel %vm2810_vm13, %v4235_v53, %v2807_v3  ;;  %v2814_v11 = vmul.f32 %v4237_v17, %v2813_v7 }
 0x93f   : > { %v2882_v0 = vmul.f32 %v2811_v29, %v2734_v41 }
 0x940   : > { %v2815_v27 = vmul.f32 0.5, %v2814_v11 }
 0x941   : > { %v2893_v12 = vmul.f32 %v5972_v48, %v2882_v0 }
 0x942   : > { %v2816_v24 = vsub.f32 1.5, %v2815_v27 }
 0x943   : > { %2911 = vrot.lane.b32.xlu2 %v2893_v12, %s4341_s16 }
 0x944   : > { %v2817_v35 = vmul.f32 %v4237_v17, %v2816_v24 }
 0x946   : > { %v2821_v45 = vsel %vm2820_vm1, %v4237_v17, %v2817_v35 }
 0x947   : > { %v2883_v47 = vmul.f32 %v2821_v45, %v2736_v28 }
 0x949   : > { %v2894_v43 = vmul.f32 %v5972_v48, %v2883_v47 }
 0x94b   : > { %2913 = vrot.lane.b32.xlu0 %v2894_v43, %s4341_s16 }
 0x96f   : > { %v2770_v46 = vpop.xlane.xlu2 %2769 }
 0x970   : > { %v2788_v2 = vmul.f32 %v2770_v46, %v6530_v32 }
 0x972   : > { %v2796_v21 = vadd.f32 1e-05, %v2788_v2 }
 0x974   : > { %4238 = vrsqrt.f32 %v2796_v21  ;;  %vm2828_vm4 = vweird.f32 %v2796_v21 }
 0x977   : > { %v2773_v42 = vpop.xlane.xlu0 %2772 }
 0x978   : > { %v2789_v19 = vmul.f32 %v2773_v42, %v6530_v32 }
 0x97a   : > { %v4239_v6 = vpop.eup %4238  ;;  %v2797_v51 = vadd.f32 1e-05, %v2789_v19 }
 0x97b   : > { %v2823_v9 = vmul.f32 %v4239_v6, %v2796_v21  ;;  %vm2829_vm3 = vweird.f32 %v4239_v6 }
 0x97c   : > { %4240 = vrsqrt.f32 %v2797_v51  ;;  %vm2830_vm6 = vmor %vm2828_vm4, %vm2829_vm3  ;;  %vm2838_vm8 = vweird.f32 %v2797_v51 }
 0x97d   : > { %v2824_v62 = vmul.f32 %v4239_v6, %v2823_v9 }
 0x97f   : > { %v2825_v33 = vmul.f32 0.5, %v2824_v62  ;;  %v2776_v36 = vpop.xlane.xlu1 %2775 }
 0x980   : > { %v2790_v26 = vmul.f32 %v2776_v36, %v6530_v32 }
 0x981   : > { %v2826_v63 = vsub.f32 1.5, %v2825_v33 }
 0x982   : > { %v4241_v18 = vpop.eup %4240  ;;  %v2798_v41 = vadd.f32 1e-05, %v2790_v26 }
 0x983   : > { %v2827_v5 = vmul.f32 %v4239_v6, %v2826_v63  ;;  %v2833_v25 = vmul.f32 %v4241_v18, %v2797_v51  ;;  %vm2839_vm7 = vweird.f32 %v4241_v18 }
 0x984   : > { %4242 = vrsqrt.f32 %v2798_v41  ;;  %vm2840_vm9 = vmor %vm2838_vm8, %vm2839_vm7  ;;  %vm2848_vm11 = vweird.f32 %v2798_v41 }
 0x985   : > { %v2831_v28 = vsel %vm2830_vm6, %v4239_v6, %v2827_v5  ;;  %v2834_v52 = vmul.f32 %v4241_v18, %v2833_v25 }
 0x986   : > { %v2884_v4 = vmul.f32 %v2831_v28, %v5937_v20 }
 0x987   : > { %v2835_v61 = vmul.f32 0.5, %v2834_v52  ;;  %v2779_v10 = vpop.xlane.xlu2 %2778 }
 0x988   : > { %v2791_v44 = vmul.f32 %v2779_v10, %v6530_v32  ;;  %v2895_v23 = vmul.f32 %v5972_v48, %v2884_v4 }
 0x989   : > { %v2836_v1 = vsub.f32 1.5, %v2835_v61 }
 0x98a   : > { %v4243_v57 = vpop.eup %4242  ;;  %v2799_v49 = vadd.f32 1e-05, %v2791_v44  ;;  %2915 = vrot.lane.b32.xlu1 %v2895_v23, %s4341_s16  ;;  %v6532_v23 = vld [vmem:[#allocation2_spill] sm:$0xff] }
 0x98b   : > { %v2837_v58 = vmul.f32 %v4241_v18, %v2836_v1  ;;  %v2843_v34 = vmul.f32 %v4243_v57, %v2798_v41  ;;  %vm2849_vm10 = vweird.f32 %v4243_v57 }
 0x98c   : > { %4244 = vrsqrt.f32 %v2799_v49  ;;  %vm2850_vm12 = vmor %vm2848_vm11, %vm2849_vm10  ;;  %vm2858_vm2 = vweird.f32 %v2799_v49 }
 0x98d   : > { %v2841_v54 = vsel %vm2840_vm9, %v4241_v18, %v2837_v58  ;;  %v2844_v59 = vmul.f32 %v4243_v57, %v2843_v34  ;;  %4246 = vtanh.f32 %v6531_v8 }
 0x98e   : > { %v2885_v20 = vmul.f32 %v2841_v54, %v5942_v30 }
 0x98f   : > { %v2845_v56 = vmul.f32 0.5, %v2844_v59  ;;  %v2782_v13 = vpop.xlane.xlu0 %2781 }
 0x990   : > { %v2792_v37 = vmul.f32 %v2782_v13, %v6530_v32  ;;  %v2896_v50 = vmul.f32 %v5972_v48, %v2885_v20 }
 0x991   : > { %v2846_v22 = vsub.f32 1.5, %v2845_v56 }
 0x992   : > { %v4245_v14 = vpop.eup %4244  ;;  %v2800_v53 = vadd.f32 1e-05, %v2792_v37  ;;  %2917 = vrot.lane.b32.xlu2 %v2896_v50, %s4341_s16  ;;  %v6533_v37 = vld [vmem:[#allocation3_spill] sm:$0xff] }
 0x993   : > { %v2847_v16 = vmul.f32 %v4243_v57, %v2846_v22  ;;  %v2853_v39 = vmul.f32 %v4245_v14, %v2799_v49  ;;  %v4247_v11 = vpop.eup %4246  ;;  %vm2859_vm0 = vweird.f32 %v4245_v14 }
 0x994   : > { %4248 = vrsqrt.f32 %v2800_v53  ;;  %v5994_v45 = vperm.slane %v4247_v11, 0  ;;  %vm2860_vm13 = vmor %vm2858_vm2, %vm2859_vm0  ;;  %vm2868_vm15 = vweird.f32 %v2800_v53 }
 0x995   : > { %v2851_v30 = vsel %vm2850_vm12, %v4243_v57, %v2847_v16  ;;  %v2854_v31 = vmul.f32 %v4245_v14, %v2853_v39  ;;  %v6535_v16 = vld [vmem:[#allocation5_spill] sm:$0xff] }
 0x996   : > { %v2886_v40 = vmul.f32 %v2851_v30, %v5947_v60 }
 0x997   : > { %v2855_v17 = vmul.f32 0.5, %v2854_v31  ;;  %v2785_v3 = vpop.xlane.xlu1 %2784 }
 0x998   : > { %v2793_v7 = vmul.f32 %v2785_v3, %v6530_v32  ;;  %v2897_v29 = vmul.f32 %v5972_v48, %v2886_v40 }
 0x999   : > { %v2856_v0 = vsub.f32 1.5, %v2855_v17  ;;  %v6536_v17 = vld [vmem:[#allocation6_spill] sm:$0xff] }
 0x99a   : > { %v4249_v27 = vpop.eup %4248  ;;  %v2801_v12 = vadd.f32 1e-05, %v2793_v7  ;;  %2919 = vrot.lane.b32.xlu0 %v2897_v29, %s4341_s16 }
 0x99b   : > { %v2857_v24 = vmul.f32 %v4245_v14, %v2856_v0  ;;  %v2863_v35 = vmul.f32 %v4249_v27, %v2800_v53  ;;  %vm2869_vm14 = vweird.f32 %v4249_v27  ;;  %v6534_v53 = vld [vmem:[#allocation21_spill] sm:$0xff]  ;;  %v6537_v0 = vld [vmem:[#allocation4_spill] sm:$0xff] }
 0x99c   : > { %4250 = vrsqrt.f32 %v2801_v12  ;;  %vm2870_vm1 = vmor %vm2868_vm15, %vm2869_vm14  ;;  %vm2878_vm4 = vweird.f32 %v2801_v12 }
 0x99d   : > { %v2861_v60 = vsel %vm2860_vm13, %v4245_v14, %v2857_v24  ;;  %v2864_v47 = vmul.f32 %v4249_v27, %v2863_v35  ;;  %v2912_v43 = vpop.permute.xlu2 %2911 }
 0x99e   : > { %v2935_v46 = vmul.f32 %v2912_v43, %v5994_v45  ;;  %v2887_v2 = vmul.f32 %v2861_v60, %v5952_v38  ;;  %v6538_v60 = vld [vmem:[#allocation7_spill] sm:$0xff] }
 0x99f   : > { %v2865_v21 = vmul.f32 0.5, %v2864_v47 }
 0x9a0   : > { %2951 = vrot.lane.b32.xlu2 %v2935_v46, %s4347_s15  ;;  %v2898_v42 = vmul.f32 %v5972_v48, %v2887_v2 }
 0x9a1   : > { %v2866_v19 = vsub.f32 1.5, %v2865_v21  ;;  %v6539_v21 = vld [vmem:[#allocation8_spill] sm:$0xff] }
 0x9a2   : > { %v4251_v6 = vpop.eup %4250  ;;  %2921 = vrot.lane.b32.xlu1 %v2898_v42, %s4341_s16 }
 0x9a3   : > { %v2867_v51 = vmul.f32 %v4249_v27, %v2866_v19  ;;  %v2873_v9 = vmul.f32 %v4251_v6, %v2801_v12  ;;  %vm2879_vm3 = vweird.f32 %v4251_v6 }
 0x9a4   : > { %vm2880_vm6 = vmor %vm2878_vm4, %vm2879_vm3 }
 0x9a5   : > { %v2871_v62 = vsel %vm2870_vm1, %v4249_v27, %v2867_v51  ;;  %v2874_v33 = vmul.f32 %v4251_v6, %v2873_v9 }
 0x9a6   : > { %v2888_v36 = vmul.f32 %v2871_v62, %v5957_v15 }
 0x9a7   : > { %v2875_v26 = vmul.f32 0.5, %v2874_v33  ;;  %v6540_v33 = vld [vmem:[#allocation9_spill] sm:$0xff] }
 0x9a8   : > { %v2899_v38 = vmul.f32 %v5972_v48, %v2888_v36 }
 0x9a9   : > { %v2876_v63 = vsub.f32 1.5, %v2875_v26 }
 0x9aa   : > { %2923 = vrot.lane.b32.xlu1 %v2899_v38, %s4341_s16 }
 0x9ab   : > { %v2877_v18 = vmul.f32 %v4251_v6, %v2876_v63 }
 0x9ad   : > { %v2881_v41 = vsel %vm2880_vm6, %v4251_v6, %v2877_v18  ;;  %v3978_v18 = vld [vmem:[%s6377_s10 + $0x10] sm:$0xf] }
 0x9ae   : > { %v2889_v5 = vmul.f32 %v2881_v41, %v5962_v55  ;;  %v4035_v41 = vld [vmem:[%s6377_s10 + $0x14] sm:$0xf0] }
 0x9b0   : > { %v2900_v25 = vmul.f32 %v5972_v48, %v2889_v5  ;;  %v4034_v5 = vld [vmem:[%s6377_s10 + $0x14] sm:$0xf] }
 0x9b2   : > { %2925 = vrot.lane.b32.xlu2 %v2900_v25, %s4341_s16  ;;  %v3979_v25 = vor.u32 %v4035_v41, %v3978_v18 }
 0x9b4   : > { %3188 = vmatpush.bf16.msra.mxu2 %v3979_v25 }
 0x9bd   : > { %v2914_v28 = vpop.permute.xlu0 %2913 }
 0x9be   : > { %v2936_v15 = vmul.f32 %v2914_v28, %v5994_v45  ;;  %v3980_v28 = vld [vmem:[%s6377_s10 + $0x18] sm:$0xf0] }
 0x9c0   : > { %2953 = vrot.lane.b32.xlu0 %v2936_v15, %s4347_s15  ;;  %v3983_v15 = vor.u32 %v4034_v5, %v3980_v28 }
 0x9c2   : > { %3217 = vmatpush.bf16.msra.mxu3 %v3983_v15 }
 0x9ec   : > { %v2918_v52 = vpop.permute.xlu2 %2917 }
 0x9ed   : > { %v2938_v4 = vmul.f32 %v2918_v52, %v5994_v45  ;;  %v3970_v52 = vld [vmem:[%s6377_s10] sm:$0xf] }
 0x9ef   : > { %2957 = vrot.lane.b32.xlu1 %v2938_v4, %s4347_s15  ;;  %v4033_v4 = vld [vmem:[%s6377_s10 + $0x4] sm:$0xf0] }
 0x9fa   : > { %v2952_v44 = vpop.permute.xlu2 %2951 }
 0x9fb   : > { %v6016_v1 = vadd.f32 %v2952_v44, %v6532_v23 }
 0x9fc   : > { %v2916_v61 = vpop.permute.xlu1 %2915 }
 0x9fd   : > { %v2937_v10 = vmul.f32 %v2916_v61, %v5994_v45  ;;  %v2983_v49 = vmul.f32 %v6016_v1, %v6016_v1  ;;  %v4032_v61 = vld [vmem:[%s6377_s10 + $0x4] sm:$0xf] }
 0x9ff   : > { %2955 = vrot.lane.b32.xlu0 %v2937_v10, %s4347_s15  ;;  %v2991_v34 = vsel %vm645_vm5, %v2983_v49, 0.0  ;;  %v3971_v10 = vor.u32 %v4033_v4, %v3970_v52 }
 0xa01   : > { %3189 = vmatpush.bf16.msra.mxu2 %v3971_v10 }
 0xa0c   : > { %v2920_v55 = vpop.permute.xlu0 %2919  ;;  %v2926_v20 = vpop.permute.xlu2 %2925 }
 0xa0d   : > { %v2939_v48 = vmul.f32 %v2920_v55, %v5994_v45  ;;  %v2942_v56 = vmul.f32 %v2926_v20, %v5994_v45  ;;  %v3972_v55 = vld [vmem:[%s6377_s10 + $0x8] sm:$0xf0] }
 0xa0f   : > { %2959 = vrot.lane.b32.xlu2 %v2939_v48, %s4347_s15  ;;  %v3975_v48 = vor.u32 %v4032_v61, %v3972_v55 }
 0xa11   : > { %3218 = vmatpush.bf16.msra.mxu3 %v3975_v48 }
 0xa14   : > { %v2922_v57 = vpop.permute.xlu1 %2921 }
 0xa15   : > { %v2940_v58 = vmul.f32 %v2922_v57, %v5994_v45 }
 0xa17   : > { %2961 = vrot.lane.b32.xlu0 %v2940_v58, %s4347_s15 }
 0xa19   : > { %2992 = vadd.xlane.f32.xlu1 %v2991_v34 }
 0xa1c   : > { %v2924_v54 = vpop.permute.xlu1 %2923 }
 0xa1d   : > { %v2941_v59 = vmul.f32 %v2924_v54, %v5994_v45 }
 0xa1f   : > { %2963 = vrot.lane.b32.xlu0 %v2941_v59, %s4347_s15 }
 0xa27   : > { %2965 = vrot.lane.b32.xlu0 %v2942_v56, %s4347_s15 }
 0xa32   : > { %v2954_v13 = vpop.permute.xlu0 %2953 }
 0xa33   : > { %v6028_v50 = vadd.f32 %v2954_v13, %v6533_v37 }
 0xa35   : > { %v2984_v22 = vmul.f32 %v6028_v50, %v6028_v50 }
 0xa37   : > { %v2994_v14 = vsel %vm645_vm5, %v2984_v22, 0.0 }
 0xa38   : > { %2995 = vadd.xlane.f32.xlu2 %v2994_v14 }
 0xa50   : > { %3131 = vrot.lane.b32.xlu2 %v6534_v53, %s4353_s21 }
 0xa61   : > { %v2958_v8 = vpop.permute.xlu1 %2957 }
 0xa62   : > { %v6035_v39 = vadd.f32 %v2958_v8, %v6535_v16  ;;  %v6099_v16 = vld [vmem:[%s6376_s9 + $0x2] ss:$0 sm:$0xff] }
 0xa64   : > { %v2986_v30 = vmul.f32 %v6035_v39, %v6035_v39 }
 0xa66   : > { %v3000_v31 = vsel %vm645_vm5, %v2986_v30, 0.0 }
 0xa67   : > { %3001 = vadd.xlane.f32.xlu1 %v3000_v31 }
 0xa69   : > { %v2960_v40 = vpop.permute.xlu2 %2959 }
 0xa6a   : > { %v6041_v3 = vadd.f32 %v2960_v40, %v6536_v17 }
 0xa6c   : > { %v2987_v7 = vmul.f32 %v6041_v3, %v6041_v3 }
 0xa6e   : > { %v3003_v29 = vsel %vm645_vm5, %v2987_v7, 0.0 }
 0xa6f   : > { %3004 = vadd.xlane.f32.xlu1 %v3003_v29 }
 0xa71   : > { %v2956_v11 = vpop.permute.xlu0 %2955 }
 0xa72   : > { %v6047_v27 = vadd.f32 %v2956_v11, %v6537_v0 }
 0xa74   : > { %v2985_v12 = vmul.f32 %v6047_v27, %v6047_v27 }
 0xa76   : > { %v2997_v24 = vsel %vm645_vm5, %v2985_v12, 0.0 }
 0xa77   : > { %2998 = vadd.xlane.f32.xlu0 %v2997_v24 }
 0xa89   : > { %v2962_v35 = vpop.permute.xlu0 %2961 }
 0xa8a   : > { %v6053_v47 = vadd.f32 %v2962_v35, %v6538_v60 }
 0xa8c   : > { %v2988_v43 = vmul.f32 %v6053_v47, %v6053_v47  ;;  %v2993_v6 = vpop.xlane.xlu1 %2992 }
 0xa8d   : > { %v3015_v9 = vmul.f32 %v2993_v6, %v6530_v32 }
 0xa8e   : > { %v3006_v46 = vsel %vm645_vm5, %v2988_v43, 0.0 }
 0xa8f   : > { %3007 = vadd.xlane.f32.xlu1 %v3006_v46  ;;  %v3023_v26 = vadd.f32 1e-05, %v3015_v9 }
 0xa91   : > { %v2964_v2 = vpop.permute.xlu0 %2963  ;;  %4252 = vrsqrt.f32 %v3023_v26  ;;  %vm3037_vm8 = vweird.f32 %v3023_v26 }
 0xa92   : > { %v6059_v42 = vadd.f32 %v2964_v2, %v6539_v21 }
 0xa94   : > { %v2989_v19 = vmul.f32 %v6059_v42, %v6059_v42 }
 0xa96   : > { %v3009_v51 = vsel %vm645_vm5, %v2989_v19, 0.0 }
 0xa97   : > { %3010 = vadd.xlane.f32.xlu0 %v3009_v51  ;;  %v4253_v44 = vpop.eup %4252 }
 0xa98   : > { %v3032_v23 = vmul.f32 %v4253_v44, %v3023_v26  ;;  %vm3038_vm7 = vweird.f32 %v4253_v44 }
 0xa99   : > { %v2966_v62 = vpop.permute.xlu0 %2965  ;;  %vm3039_vm9 = vmor %vm3037_vm8, %vm3038_vm7 }
 0xa9a   : > { %v6066_v36 = vadd.f32 %v2966_v62, %v6540_v33  ;;  %v3033_v58 = vmul.f32 %v4253_v44, %v3032_v23 }
 0xa9c   : > { %v2990_v38 = vmul.f32 %v6066_v36, %v6066_v36  ;;  %v3034_v54 = vmul.f32 0.5, %v3033_v58 }
 0xa9e   : > { %v3012_v63 = vsel %vm645_vm5, %v2990_v38, 0.0  ;;  %v3035_v59 = vsub.f32 1.5, %v3034_v54 }
 0xa9f   : > { %3013 = vadd.xlane.f32.xlu1 %v3012_v63 }
 0xaa0   : > { %v3036_v13 = vmul.f32 %v4253_v44, %v3035_v59 }
 0xaa2   : > { %v3040_v14 = vsel %vm3039_vm9, %v4253_v44, %v3036_v13 }
 0xaa3   : > { %v3111_v30 = vmul.f32 %v3040_v14, %v6016_v1 }
 0xaa5   : > { %v3122_v7 = vmul.f32 %v6099_v16, %v3111_v30 }
 0xaab   : > { %v2996_v57 = vpop.xlane.xlu2 %2995 }
 0xaac   : > { %v3016_v49 = vmul.f32 %v2996_v57, %v6530_v32 }
 0xaae   : > { %v3024_v34 = vadd.f32 1e-05, %v3016_v49 }
 0xab0   : > { %4254 = vrsqrt.f32 %v3024_v34  ;;  %vm3047_vm11 = vweird.f32 %v3024_v34 }
 0xab3   : > { %v6103_v17 = vpop.permute.xlu2 %3131 }
 0xab4   : > { %v3134_v11 = vmul.f32 %v6103_v17, %v3122_v7 }
 0xab6   : > { %v4255_v20 = vpop.eup %4254 }
 0xab7   : > { %v3042_v56 = vmul.f32 %v4255_v20, %v3024_v34  ;;  %vm3048_vm10 = vweird.f32 %v4255_v20 }
 0xab8   : > { %vm3049_vm12 = vmor %vm3047_vm11, %vm3048_vm10 }
 0xab9   : > { %v3043_v37 = vmul.f32 %v4255_v20, %v3042_v56 }
 0xabb   : > { %v3044_v22 = vmul.f32 0.5, %v3043_v37 }
 0xabd   : > { %v3045_v53 = vsub.f32 1.5, %v3044_v22 }
 0xabf   : > { %v3046_v8 = vmul.f32 %v4255_v20, %v3045_v53 }
 0xac1   : > { %v3050_v31 = vsel %vm3049_vm12, %v4255_v20, %v3046_v8 }
 0xac2   : > { %v3112_v40 = vmul.f32 %v3050_v31, %v6028_v50 }
 0xac4   : > { %v3123_v29 = vmul.f32 %v6099_v16, %v3112_v40 }
 0xac6   : > { %v3135_v0 = vmul.f32 %v6103_v17, %v3123_v29 }
 0xac8   : > { %v3142_v12 = vpack.c.bf16 %v3135_v0, %v3134_v11 }
 0xaca   : > { %3984 = vmatmul.msk.bf16.vlgmr.msra.gmra.mxu2 %vm645_vm5, %v3142_v12  ;;  %3988 = vmatmul.msk.bf16.vlgmr.msra.gmra.mxu3 %vm645_vm5, %v3142_v12 }
 0xada   : > { %v3002_v24 = vpop.xlane.xlu1 %3001 }
 0xadb   : > { %v3018_v35 = vmul.f32 %v3002_v24, %v6530_v32 }
 0xadd   : > { %v3026_v60 = vadd.f32 1e-05, %v3018_v35 }
 0xadf   : > { %4256 = vrsqrt.f32 %v3026_v60  ;;  %vm3067_vm2 = vweird.f32 %v3026_v60 }
 0xae2   : > { %v3005_v21 = vpop.xlane.xlu1 %3004 }
 0xae3   : > { %v3019_v51 = vmul.f32 %v3005_v21, %v6530_v32 }
 0xae5   : > { %v4257_v43 = vpop.eup %4256  ;;  %v3027_v33 = vadd.f32 1e-05, %v3019_v51 }
 0xae6   : > { %v3062_v46 = vmul.f32 %v4257_v43, %v3026_v60  ;;  %vm3068_vm0 = vweird.f32 %v4257_v43 }
 0xae7   : > { %vm3069_vm13 = vmor %vm3067_vm2, %vm3068_vm0  ;;  %vm3077_vm4 = vweird.f32 %v3027_v33 }
 0xae8   : > { %v3063_v2 = vmul.f32 %v4257_v43, %v3062_v46 }
 0xaea   : > { %v2999_v19 = vpop.xlane.xlu0 %2998  ;;  %v3064_v62 = vmul.f32 0.5, %v3063_v2 }
 0xaeb   : > { %v3017_v6 = vmul.f32 %v2999_v19, %v6530_v32 }
 0xaec   : > { %v3065_v26 = vsub.f32 1.5, %v3064_v62 }
 0xaed   : > { %v3025_v9 = vadd.f32 1e-05, %v3017_v6 }
 0xaee   : > { %v3066_v63 = vmul.f32 %v4257_v43, %v3065_v26 }
 0xaef   : > { %4258 = vrsqrt.f32 %v3025_v9  ;;  %vm3057_vm15 = vweird.f32 %v3025_v9 }
 0xaf0   : > { %4260 = vrsqrt.f32 %v3027_v33  ;;  %v3070_v5 = vsel %vm3069_vm13, %v4257_v43, %v3066_v63 }
 0xaf1   : > { %v3114_v52 = vmul.f32 %v3070_v5, %v6035_v39 }
 0xaf3   : > { %v3125_v44 = vmul.f32 %v6099_v16, %v3114_v52 }
 0xaf5   : > { %v4259_v38 = vpop.eup %4258  ;;  %v3137_v54 = vmul.f32 %v6103_v17, %v3125_v44 }
 0xaf6   : > { %v3052_v18 = vmul.f32 %v4259_v38, %v3025_v9  ;;  %v4261_v28 = vpop.eup %4260  ;;  %vm3058_vm14 = vweird.f32 %v4259_v38 }
 0xaf7   : > { %v3072_v4 = vmul.f32 %v4261_v28, %v3027_v33  ;;  %vm3059_vm1 = vmor %vm3057_vm15, %vm3058_vm14  ;;  %vm3078_vm3 = vweird.f32 %v4261_v28 }
 0xaf8   : > { %v3053_v41 = vmul.f32 %v4259_v38, %v3052_v18  ;;  %vm3079_vm6 = vmor %vm3077_vm4, %vm3078_vm3 }
 0xaf9   : > { %v3073_v48 = vmul.f32 %v4261_v28, %v3072_v4 }
 0xafa   : > { %v3054_v25 = vmul.f32 0.5, %v3053_v41 }
 0xafb   : > { %v3074_v59 = vmul.f32 0.5, %v3073_v48 }
 0xafc   : > { %v3055_v15 = vsub.f32 1.5, %v3054_v25 }
 0xafd   : > { %v3075_v56 = vsub.f32 1.5, %v3074_v59 }
 0xafe   : > { %v3056_v61 = vmul.f32 %v4259_v38, %v3055_v15 }
 0xaff   : > { %v3076_v53 = vmul.f32 %v4261_v28, %v3075_v56  ;;  %v4041_v56 = vld [vmem:[%s6378_s11 + $0x28] sm:$0xff] }
 0xb00   : > { %v3060_v10 = vsel %vm3059_vm1, %v4259_v38, %v3056_v61  ;;  %3539 = vmatpush.bf16.msrb.mxu1 %v4041_v56 }
 0xb01   : > { %v3113_v55 = vmul.f32 %v3060_v10, %v6047_v27  ;;  %v3080_v31 = vsel %vm3079_vm6, %v4261_v28, %v3076_v53 }
 0xb02   : > { %v3008_v23 = vpop.xlane.xlu1 %3007  ;;  %v3115_v12 = vmul.f32 %v3080_v31, %v6041_v3 }
 0xb03   : > { %v3020_v57 = vmul.f32 %v3008_v23, %v6530_v32  ;;  %v3124_v49 = vmul.f32 %v6099_v16, %v3113_v55 }
 0xb04   : > { %v3126_v21 = vmul.f32 %v6099_v16, %v3115_v12 }
 0xb05   : > { %v3028_v58 = vadd.f32 1e-05, %v3020_v57  ;;  %v3136_v34 = vmul.f32 %v6103_v17, %v3124_v49 }
 0xb06   : > { %v3138_v62 = vmul.f32 %v6103_v17, %v3126_v21 }
 0xb07   : > { %4262 = vrsqrt.f32 %v3028_v58  ;;  %v3143_v20 = vpack.c.bf16 %v3137_v54, %v3136_v34  ;;  %vm3087_vm8 = vweird.f32 %v3028_v58 }
 0xb09   : > { %3985 = vmatmul.msk.bf16.gmra.mxu2 %vm645_vm5, %v3143_v20  ;;  %3989 = vmatmul.msk.bf16.gmra.mxu3 %vm645_vm5, %v3143_v20 }
 0xb0a   : > { %v3011_v13 = vpop.xlane.xlu0 %3010 }
 0xb0b   : > { %v3021_v37 = vmul.f32 %v3011_v13, %v6530_v32 }
 0xb0d   : > { %v4263_v22 = vpop.eup %4262  ;;  %v3029_v14 = vadd.f32 1e-05, %v3021_v37 }
 0xb0e   : > { %v3082_v8 = vmul.f32 %v4263_v22, %v3028_v58  ;;  %vm3088_vm7 = vweird.f32 %v4263_v22 }
 0xb0f   : > { %4264 = vrsqrt.f32 %v3029_v14  ;;  %vm3089_vm9 = vmor %vm3087_vm8, %vm3088_vm7  ;;  %vm3097_vm11 = vweird.f32 %v3029_v14 }
 0xb10   : > { %v3083_v30 = vmul.f32 %v4263_v22, %v3082_v8 }
 0xb12   : > { %v3084_v40 = vmul.f32 0.5, %v3083_v30  ;;  %v3014_v7 = vpop.xlane.xlu1 %3013  ;;  %v4038_v30 = vld [vmem:[%s6378_s11 + $0x10] sm:$0xff] }
 0xb13   : > { %v3022_v29 = vmul.f32 %v3014_v7, %v6530_v32 }
 0xb14   : > { %v3085_v11 = vsub.f32 1.5, %v3084_v40 }
 0xb15   : > { %v4265_v0 = vpop.eup %4264  ;;  %v3030_v24 = vadd.f32 1e-05, %v3022_v29 }
 0xb16   : > { %v3086_v35 = vmul.f32 %v4263_v22, %v3085_v11  ;;  %v3092_v60 = vmul.f32 %v4265_v0, %v3029_v14  ;;  %vm3098_vm10 = vweird.f32 %v4265_v0  ;;  %v4039_v14 = vld [vmem:[%s6378_s11 + $0x18] sm:$0xff]  ;;  %v4037_v11 = vld [vmem:[%s6378_s11 + $0x8] sm:$0xff] }
 0xb17   : > { %4266 = vrsqrt.f32 %v3030_v24  ;;  %vm3099_vm12 = vmor %vm3097_vm11, %vm3098_vm10  ;;  %vm3107_vm2 = vweird.f32 %v3030_v24 }
 0xb18   : > { %v3090_v43 = vsel %vm3089_vm9, %v4263_v22, %v3086_v35  ;;  %v3093_v46 = vmul.f32 %v4265_v0, %v3092_v60  ;;  %v4040_v22 = vld [vmem:[%s6378_s11 + $0x20] sm:$0xff]  ;;  %vm3524_vm9 = vcmask 785408  }
 0xb19   : > { %v3116_v2 = vmul.f32 %v3090_v43, %v6053_v47  ;;  %3540 = vmatpush.bf16.msrb.mxu1 %v4040_v22 }
 0xb1a   : > { %v3094_v19 = vmul.f32 0.5, %v3093_v46 }
 0xb1b   : > { %v3127_v6 = vmul.f32 %v6099_v16, %v3116_v2 }
 0xb1c   : > { %v3095_v51 = vsub.f32 1.5, %v3094_v19 }
 0xb1d   : > { %v4267_v9 = vpop.eup %4266  ;;  %v3139_v33 = vmul.f32 %v6103_v17, %v3127_v6  ;;  %3541 = vmatpush.bf16.msrb.mxu1 %v4039_v14 }
 0xb1e   : > { %v3096_v26 = vmul.f32 %v4265_v0, %v3095_v51  ;;  %v3102_v38 = vmul.f32 %v4267_v9, %v3030_v24  ;;  %vm3108_vm0 = vweird.f32 %v4267_v9 }
 0xb1f   : > { %v3144_v63 = vpack.c.bf16 %v3139_v33, %v3138_v62  ;;  %vm3109_vm13 = vmor %vm3107_vm2, %vm3108_vm0 }
 0xb20   : > { %v3103_v18 = vmul.f32 %v4267_v9, %v3102_v38  ;;  %v3100_v41 = vsel %vm3099_vm12, %v4265_v0, %v3096_v26  ;;  %v4036_v0 = vld [vmem:[%s6378_s11] sm:$0xff] }
 0xb21   : > { %3986 = vmatmul.msk.bf16.gmra.mxu2 %vm645_vm5, %v3144_v63  ;;  %3990 = vmatmul.msk.bf16.gmra.mxu3 %vm645_vm5, %v3144_v63  ;;  %v3117_v28 = vmul.f32 %v3100_v41, %v6059_v42 }
 0xb22   : > { %v3104_v5 = vmul.f32 0.5, %v3103_v18  ;;  %3542 = vmatpush.bf16.msrb.mxu1 %v4038_v30 }
 0xb23   : > { %v3128_v61 = vmul.f32 %v6099_v16, %v3117_v28 }
 0xb24   : > { %v3105_v25 = vsub.f32 1.5, %v3104_v5 }
 0xb25   : > { %v3140_v55 = vmul.f32 %v6103_v17, %v3128_v61 }
 0xb26   : > { %v3106_v15 = vmul.f32 %v4267_v9, %v3105_v25  ;;  %3543 = vmatpush.bf16.msrb.mxu1 %v4037_v11 }
 0xb28   : > { %v3110_v52 = vsel %vm3109_vm13, %v4267_v9, %v3106_v15 }
 0xb29   : > { %v3118_v4 = vmul.f32 %v3110_v52, %v6066_v36 }
 0xb2a   : > { %3544 = vmatpush.bf16.msrb.mxu1 %v4036_v0 }
 0xb2b   : > { %v3129_v10 = vmul.f32 %v6099_v16, %v3118_v4 }
 0xb2d   : > { %v3141_v44 = vmul.f32 %v6103_v17, %v3129_v10 }
 0xb2f   : > { %v3145_v48 = vpack.c.bf16 %v3141_v44, %v3140_v55 }
 0xb31   : > { %3987 = vmatmul.msk.bf16.gmra.mxu2 %vm645_vm5, %v3145_v48  ;;  %3991 = vmatmul.msk.bf16.gmra.mxu3 %vm645_vm5, %v3145_v48 }
 0xb4d   : > { %v6141_v23 = vpop.f32.mrf.mxu2  ;;  %v3220_v57 = vpop.f32.mrf.mxu3 }
 0xb4e   : > { %3418 = vrot.lane.b32.xlu0 %v3220_v57, %s4341_s16  ;;  %3416 = vrot.lane.b32.xlu2 %v6141_v23, %s4341_s16  ;;  %v3240_v34 = vsub.f32 0.0, %v6141_v23 }
 0xb50   : > { %v3248_v13 = vmul.f32 1.442695, %v3240_v34 }
 0xb52   : > { %4268 = vpow2.f32 %v3248_v13 }
 0xb55   : > { %v6146_v49 = vpop.f32.mrf.mxu2  ;;  %v3222_v16 = vpop.f32.mrf.mxu3 }
 0xb56   : > { %3422 = vrot.lane.b32.xlu2 %v3222_v16, %s4341_s16  ;;  %3420 = vrot.lane.b32.xlu1 %v6146_v49, %s4341_s16  ;;  %v3241_v20 = vsub.f32 0.0, %v6146_v49 }
 0xb58   : > { %v3250_v37 = vmul.f32 1.442695, %v3241_v20  ;;  %v4269_v53 = vpop.eup %4268 }
 0xb59   : > { %v3264_v7 = vadd.f32 1.0, %v4269_v53 }
 0xb5a   : > { %4270 = vpow2.f32 %v3250_v37 }
 0xb5b   : > { %4272 = vrcp.f32 %v3264_v7  ;;  %vm3277_vm1 = vweird.f32 %v3264_v7  ;;  %v3283_v18 = vand.u32 2147483648, %v3264_v7  ;;  %v3281_v5 = vand.u32 2147483647, %v3264_v7 }
 0xb5d   : > { %v3284_v52 = vor.u32 1.1754944e-38, %v3283_v18  ;;  %vm3282_vm7 = vcmp.eq.f32.partialorder %v3281_v5, 8.507059e+37 }
 0xb60   : > { %v4271_v8 = vpop.eup %4270 }
 0xb61   : > { %v3265_v29 = vadd.f32 1.0, %v4271_v8  ;;  %v4273_v35 = vpop.eup %4272 }
 0xb62   : > { %v3273_v43 = vmul.f32 %v4273_v35, %v3264_v7  ;;  %vm3278_vm14 = vweird.f32 %v4273_v35 }
 0xb63   : > { %4274 = vrcp.f32 %v3265_v29  ;;  %v3298_v41 = vand.u32 2147483648, %v3265_v29  ;;  %vm3279_vm3 = vmor %vm3277_vm1, %vm3278_vm14  ;;  %vm3292_vm4 = vweird.f32 %v3265_v29  ;;  %v3296_v25 = vand.u32 2147483647, %v3265_v29 }
 0xb64   : > { %v3274_v19 = vsub.f32 1.0, %v3273_v43 }
 0xb65   : > { %v3299_v4 = vor.u32 1.1754944e-38, %v3298_v41  ;;  %vm3297_vm8 = vcmp.eq.f32.partialorder %v3296_v25, 8.507059e+37 }
 0xb66   : > { %v3275_v51 = vmul.f32 %v4273_v35, %v3274_v19 }
 0xb68   : > { %v3276_v38 = vadd.f32 %v4273_v35, %v3275_v51 }
 0xb69   : > { %v4275_v60 = vpop.eup %4274 }
 0xb6a   : > { %v3288_v46 = vmul.f32 %v4275_v60, %v3265_v29  ;;  %vm3293_vm15 = vweird.f32 %v4275_v60  ;;  %v3280_v28 = vsel %vm3279_vm3, %v4273_v35, %v3276_v38 }
 0xb6b   : > { %vm3294_vm6 = vmor %vm3292_vm4, %vm3293_vm15  ;;  %v3285_v10 = vsel %vm3282_vm7, %v3284_v52, %v3280_v28 }
 0xb6c   : > { %v3289_v6 = vsub.f32 1.0, %v3288_v46  ;;  %v3392_v16 = vmul.f32 %v3285_v10, %v6141_v23 }
 0xb6e   : > { %v3290_v9 = vmul.f32 %v4275_v60, %v3289_v6 }
 0xb70   : > { %v3291_v63 = vadd.f32 %v4275_v60, %v3290_v9 }
 0xb72   : > { %v3295_v15 = vsel %vm3294_vm6, %v4275_v60, %v3291_v63 }
 0xb73   : > { %v3300_v55 = vsel %vm3297_vm8, %v3299_v4, %v3295_v15 }
 0xb8c   : > { %v6151_v17 = vpop.f32.mrf.mxu2  ;;  %v3225_v58 = vpop.f32.mrf.mxu3 }
 0xb8d   : > { %3426 = vrot.lane.b32.xlu0 %v3225_v58, %s4341_s16  ;;  %3424 = vrot.lane.b32.xlu2 %v6151_v17, %s4341_s16  ;;  %v3393_v58 = vmul.f32 %v3300_v55, %v6146_v49  ;;  %v3242_v13 = vsub.f32 0.0, %v6151_v17 }
 0xb8f   : > { %v3252_v22 = vmul.f32 1.442695, %v3242_v13 }
 0xb91   : > { %4276 = vpow2.f32 %v3252_v22 }
 0xb94   : > { %v6157_v54 = vpop.f32.mrf.mxu2  ;;  %v3227_v59 = vpop.f32.mrf.mxu3 }
 0xb95   : > { %3430 = vrot.lane.b32.xlu0 %v3227_v59, %s4341_s16  ;;  %3428 = vrot.lane.b32.xlu2 %v6157_v54, %s4341_s16  ;;  %v3243_v37 = vsub.f32 0.0, %v6157_v54 }
 0xb97   : > { %v3254_v14 = vmul.f32 1.442695, %v3243_v37  ;;  %v4277_v53 = vpop.eup %4276 }
 0xb98   : > { %v3266_v8 = vadd.f32 1.0, %v4277_v53 }
 0xb99   : > { %4278 = vpow2.f32 %v3254_v14 }
 0xb9a   : > { %4280 = vrcp.f32 %v3266_v8  ;;  %vm3307_vm11 = vweird.f32 %v3266_v8  ;;  %v3311_v41 = vand.u32 2147483647, %v3266_v8  ;;  %v3313_v5 = vand.u32 2147483648, %v3266_v8 }
 0xb9c   : > { %vm3312_vm14 = vcmp.eq.f32.partialorder %v3311_v41, 8.507059e+37 }
 0xb9f   : > { %v4279_v23 = vpop.eup %4278 }
 0xba0   : > { %v3267_v49 = vadd.f32 1.0, %v4279_v23  ;;  %v4281_v7 = vpop.eup %4280 }
 0xba1   : > { %vm3308_vm10 = vweird.f32 %v4281_v7 }
 0xba2   : > { %4282 = vrcp.f32 %v3267_v49  ;;  %v3328_v25 = vand.u32 2147483648, %v3267_v49  ;;  %vm6216_vm0 = vmor %vm3307_vm11, %vm3308_vm10  ;;  %vm3322_vm2 = vweird.f32 %v3267_v49  ;;  %v3326_v52 = vand.u32 2147483647, %v3267_v49 }
 0xba4   : > { %v6175_v31 = vpop.f32.mrf.mxu2  ;;  %v3230_v40 = vpop.f32.mrf.mxu3  ;;  %vm3327_vm15 = vcmp.eq.f32.partialorder %v3326_v52, 8.507059e+37 }
 0xba5   : > { %3434 = vrot.lane.b32.xlu1 %v3230_v40, %s4341_s16  ;;  %3432 = vrot.lane.b32.xlu2 %v6175_v31, %s4341_s16  ;;  %v3244_v30 = vsub.f32 0.0, %v6175_v31 }
 0xba7   : > { %v3256_v11 = vmul.f32 1.442695, %v3244_v30 }
 0xba8   : > { %v3417_v26 = vpop.permute.xlu2 %3416  ;;  %v4283_v29 = vpop.eup %4282 }
 0xba9   : > { %v3318_v35 = vmul.f32 %v4283_v29, %v3267_v49  ;;  %4284 = vpow2.f32 %v3256_v11  ;;  %vm3323_vm12 = vweird.f32 %v4283_v29 }
 0xbaa   : > { %vm3324_vm13 = vmor %vm3322_vm2, %vm3323_vm12 }
 0xbab   : > { %v3319_v43 = vsub.f32 1.0, %v3318_v35 }
 0xbac   : > { %v6186_v12 = vpop.f32.mrf.mxu2  ;;  %v3232_v24 = vpop.f32.mrf.mxu3 }
 0xbad   : > { %3438 = vrot.lane.b32.xlu2 %v3232_v24, %s4341_s16  ;;  %3436 = vrot.lane.b32.xlu0 %v6186_v12, %s4341_s16  ;;  %v3245_v40 = vsub.f32 0.0, %v6186_v12  ;;  %v3303_v24 = vmul.f32 %v4281_v7, %v3266_v8  ;;  %v3320_v6 = vmul.f32 %v4283_v29, %v3319_v43 }
 0xbaf   : > { %v3258_v0 = vmul.f32 1.442695, %v3245_v40  ;;  %v3304_v60 = vsub.f32 1.0, %v3303_v24  ;;  %v4285_v46 = vpop.eup %4284  ;;  %v3321_v63 = vadd.f32 %v4283_v29, %v3320_v6 }
 0xbb0   : > { %v3423_v44 = vpop.permute.xlu2 %3422  ;;  %v6211_v9 = vadd.f32 1.0, %v4285_v46 }
 0xbb1   : > { %4286 = vpow2.f32 %v3258_v0  ;;  %v3305_v19 = vmul.f32 %v4281_v7, %v3304_v60  ;;  %v3325_v55 = vsel %vm3324_vm13, %v4283_v29, %v3321_v63 }
 0xbb2   : > { %4288 = vrcp.f32 %v6211_v9  ;;  %vm3337_vm4 = vweird.f32 %v6211_v9  ;;  %v3341_v6 = vand.u32 2147483647, %v6211_v9 }
 0xbb3   : > { %v3306_v38 = vadd.f32 %v4281_v7, %v3305_v19 }
 0xbb4   : > { %v6191_v2 = vpop.f32.mrf.mxu2  ;;  %v3235_v21 = vpop.f32.mrf.mxu3  ;;  %vm3342_vm10 = vcmp.eq.f32.partialorder %v3341_v6, 8.507059e+37 }
 0xbb5   : > { %3442 = vrot.lane.b32.xlu0 %v3235_v21, %s4341_s16  ;;  %3440 = vrot.lane.b32.xlu1 %v6191_v2, %s4341_s16  ;;  %v3246_v51 = vsub.f32 0.0, %v6191_v2  ;;  %v3310_v10 = vsel %vm6216_vm0, %v4281_v7, %v3306_v38 }
 0xbb7   : > { %v4287_v21 = vpop.eup %4286  ;;  %v3260_v28 = vmul.f32 1.442695, %v3246_v51 }
 0xbbc   : > { %v6196_v62 = vpop.f32.mrf.mxu2  ;;  %v3237_v33 = vpop.f32.mrf.mxu3 }
 0xbbd   : > { %3446 = vrot.lane.b32.xlu1 %v3237_v33, %s4341_s16  ;;  %3444 = vrot.lane.b32.xlu2 %v6196_v62, %s4341_s16  ;;  %v3247_v33 = vsub.f32 0.0, %v6196_v62 }
 0xbbf   : > { %v3262_v4 = vmul.f32 1.442695, %v3247_v33 }
 0xbc0   : > { %v3419_v61 = vpop.permute.xlu0 %3418 }
 0xbc1   : > { %v3448_v48 = vsel %vm645_vm5, %v3417_v26, %v3419_v61  ;;  %v6214_v26 = vadd.f32 1.0, %v4287_v21  ;;  %v3343_v21 = vand.u32 2147483648, %v6211_v9 }
 0xbc2   : > { %v3464_v59 = vmul.f32 %v3448_v48, %v3392_v16  ;;  %v3329_v48 = vor.u32 1.1754944e-38, %v3328_v25 }
 0xbc3   : > { %4290 = vrcp.f32 %v6214_v26  ;;  %v3358_v19 = vand.u32 2147483648, %v6214_v26  ;;  %vm3352_vm7 = vweird.f32 %v6214_v26  ;;  %v3356_v51 = vand.u32 2147483647, %v6214_v26 }
 0xbc4   : > { %4292 = vpow2.f32 %v3260_v28  ;;  %v3330_v16 = vsel %vm3327_vm15, %v3329_v48, %v3325_v55  ;;  %v3344_v41 = vor.u32 1.1754944e-38, %v3343_v21 }
 0xbc5   : > { %4294 = vpow2.f32 %v3262_v4  ;;  %vm3357_vm11 = vcmp.eq.f32.partialorder %v3356_v51, 8.507059e+37 }
 0xbc8   : > { %v3421_v57 = vpop.permute.xlu1 %3420 }
 0xbc9   : > { %v3449_v34 = vsel %vm645_vm5, %v3421_v57, %v3423_v44  ;;  %v3314_v44 = vor.u32 1.1754944e-38, %v3313_v5  ;;  %v3359_v5 = vor.u32 1.1754944e-38, %v3358_v19 }
 0xbca   : > { %v3465_v20 = vmul.f32 %v3449_v34, %v3393_v58  ;;  %v4289_v58 = vpop.eup %4288 }
 0xbcb   : > { %v3315_v57 = vsel %vm3312_vm14, %v3314_v44, %v3310_v10  ;;  %v4291_v34 = vpop.eup %4290  ;;  %v3333_v23 = vmul.f32 %v4289_v58, %v6211_v9  ;;  %vm3338_vm1 = vweird.f32 %v4289_v58 }
 0xbcc   : > { %v3472_v56 = vpack.c.bf16 %v3465_v20, %v3464_v59  ;;  %v3394_v20 = vmul.f32 %v3315_v57, %v6151_v17  ;;  %v4293_v22 = vpop.eup %4292  ;;  %v3348_v8 = vmul.f32 %v4291_v34, %v6214_v26  ;;  %vm3353_vm3 = vweird.f32 %v4291_v34  ;;  %vm3339_vm6 = vmor %vm3337_vm4, %vm3338_vm1 }
 0xbcd   : > { %v4295_v53 = vpop.eup %4294  ;;  %v6230_v40 = vadd.f32 1.0, %v4293_v22  ;;  %v3334_v17 = vsub.f32 1.0, %v3333_v23  ;;  %vm3354_vm8 = vmor %vm3352_vm7, %vm3353_vm3 }
 0xbce   : > { %4016 = vmatmul.msk.bf16.vlgmr.msrb.gmra.mxu1 %vm3524_vm9, %v3472_v56  ;;  %v3395_v56 = vmul.f32 %v3330_v16, %v6157_v54  ;;  %v6232_v29 = vadd.f32 1.0, %v4295_v53  ;;  %v3349_v11 = vsub.f32 1.0, %v3348_v8 }
 0xbcf   : > { %4296 = vrcp.f32 %v6230_v40  ;;  %v3335_v54 = vmul.f32 %v4289_v58, %v3334_v17  ;;  %vm3367_vm2 = vweird.f32 %v6230_v40 }
 0xbd0   : > { %4298 = vrcp.f32 %v6232_v29  ;;  %v3350_v0 = vmul.f32 %v4291_v34, %v3349_v11  ;;  %vm3382_vm14 = vweird.f32 %v6232_v29 }
 0xbd1   : > { %v3336_v35 = vadd.f32 %v4289_v58, %v3335_v54 }
 0xbd2   : > { %v3351_v60 = vadd.f32 %v4291_v34, %v3350_v0 }
 0xbd3   : > { %v3340_v33 = vsel %vm3339_vm6, %v4289_v58, %v3336_v35 }
 0xbd4   : > { %v3355_v38 = vsel %vm3354_vm8, %v4291_v34, %v3351_v60  ;;  %v3345_v28 = vsel %vm3342_vm10, %v3344_v41, %v3340_v33 }
 0xbd5   : > { %v4297_v24 = vpop.eup %4296  ;;  %v3360_v15 = vsel %vm3357_vm11, %v3359_v5, %v3355_v38  ;;  %v3396_v26 = vmul.f32 %v3345_v28, %v6175_v31  ;;  %v3373_v31 = vand.u32 2147483648, %v6230_v40 }
 0xbd6   : > { %v4299_v46 = vpop.eup %4298  ;;  %v3363_v63 = vmul.f32 %v4297_v24, %v6230_v40  ;;  %vm3368_vm12 = vweird.f32 %v4297_v24 }
 0xbd7   : > { %vm3383_vm0 = vweird.f32 %v4299_v46  ;;  %vm3369_vm13 = vmor %vm3367_vm2, %vm3368_vm12  ;;  %v3374_v53 = vor.u32 1.1754944e-38, %v3373_v31 }
 0xbd8   : > { %v3364_v52 = vsub.f32 1.0, %v3363_v63  ;;  %vm3384_vm15 = vmor %vm3382_vm14, %vm3383_vm0 }
 0xbda   : > { %v3365_v48 = vmul.f32 %v4297_v24, %v3364_v52 }
 0xbe7   : > { %v3425_v18 = vpop.permute.xlu2 %3424 }
 0xbef   : > { %v3429_v13 = vpop.permute.xlu2 %3428 }
 0xbff   : > { %v3427_v61 = vpop.permute.xlu0 %3426  ;;  %v3433_v43 = vpop.permute.xlu2 %3432 }
 0xc00   : > { %v3450_v59 = vsel %vm645_vm5, %v3425_v18, %v3427_v61  ;;  %v3378_v18 = vmul.f32 %v4299_v46, %v6232_v29  ;;  %v3397_v61 = vmul.f32 %v3360_v15, %v6186_v12  ;;  %v3388_v12 = vand.u32 2147483648, %v6232_v29 }
 0xc01   : > { %v3466_v49 = vmul.f32 %v3450_v59, %v3394_v20  ;;  %v3366_v59 = vadd.f32 %v4297_v24, %v3365_v48 }
 0xc02   : > { %v3379_v9 = vsub.f32 1.0, %v3378_v18  ;;  %v3389_v23 = vor.u32 1.1754944e-38, %v3388_v12 }
 0xc03   : > { %v3370_v22 = vsel %vm3369_vm13, %v4297_v24, %v3366_v59 }
 0xc04   : > { %v3380_v57 = vmul.f32 %v4299_v46, %v3379_v9 }
 0xc06   : > { %v3381_v20 = vadd.f32 %v4299_v46, %v3380_v57 }
 0xc07   : > { %v3431_v37 = vpop.permute.xlu0 %3430  ;;  %v3439_v10 = vpop.permute.xlu2 %3438 }
 0xc08   : > { %v3451_v14 = vsel %vm645_vm5, %v3429_v13, %v3431_v37  ;;  %v3386_v13 = vand.u32 2147483647, %v6232_v29 }
 0xc09   : > { %v3467_v30 = vmul.f32 %v3451_v14, %v3395_v56  ;;  %v3371_v56 = vand.u32 2147483647, %v6230_v40  ;;  %v3385_v14 = vsel %vm3384_vm15, %v4299_v46, %v3381_v20 }
 0xc0a   : > { %vm3387_vm3 = vcmp.eq.f32.partialorder %v3386_v13, 8.507059e+37 }
 0xc0b   : > { %v3473_v7 = vpack.c.bf16 %v3467_v30, %v3466_v49  ;;  %vm3372_vm1 = vcmp.eq.f32.partialorder %v3371_v56, 8.507059e+37  ;;  %v3390_v30 = vsel %vm3387_vm3, %v3389_v23, %v3385_v14 }
 0xc0c   : > { %v3375_v49 = vsel %vm3372_vm1, %v3374_v53, %v3370_v22  ;;  %v3399_v40 = vmul.f32 %v3390_v30, %v6196_v62  ;;  %v6298_v22 = vld [vmem:[%s6376_s9 + $0x3] ss:$0 sm:$0xff] }
 0xc0d   : > { %4017 = vmatmul.msk.bf16.gmra.mxu1 %vm3524_vm9, %v3473_v7  ;;  %v3398_v17 = vmul.f32 %v3375_v49, %v6191_v2 }
 0xc17   : > { %v3435_v25 = vpop.permute.xlu1 %3434  ;;  %v3445_v11 = vpop.permute.xlu2 %3444 }
 0xc18   : > { %v3452_v4 = vsel %vm645_vm5, %v3433_v43, %v3435_v25 }
 0xc19   : > { %v3468_v16 = vmul.f32 %v3452_v4, %v3396_v26 }
 0xc1f   : > { %v3437_v55 = vpop.permute.xlu0 %3436 }
 0xc20   : > { %v3453_v44 = vsel %vm645_vm5, %v3437_v55, %v3439_v10 }
 0xc21   : > { %v3469_v58 = vmul.f32 %v3453_v44, %v3397_v61 }
 0xc23   : > { %v3474_v34 = vpack.c.bf16 %v3469_v58, %v3468_v16 }
 0xc25   : > { %4018 = vmatmul.msk.bf16.gmra.mxu1 %vm3524_vm9, %v3474_v34 }
 0xc27   : > { %v3441_v37 = vpop.permute.xlu1 %3440  ;;  %v3443_v8 = vpop.permute.xlu0 %3442 }
 0xc28   : > { %v3454_v7 = vsel %vm645_vm5, %v3441_v37, %v3443_v8 }
 0xc29   : > { %v3470_v0 = vmul.f32 %v3454_v7, %v3398_v17 }
 0xc2f   : > { %v3447_v54 = vpop.permute.xlu1 %3446 }
 0xc30   : > { %v3455_v29 = vsel %vm645_vm5, %v3445_v11, %v3447_v54 }
 0xc31   : > { %v3471_v24 = vmul.f32 %v3455_v29, %v3399_v40 }
 0xc33   : > { %v3475_v35 = vpack.c.bf16 %v3471_v24, %v3470_v0 }
 0xc35   : > { %4019 = vmatmul.msk.bf16.gmra.mxu1 %vm3524_vm9, %v3475_v35 }
 0xc4b   : > { %v3546_v60 = vpop.f32.mrf.mxu1 }
 0xc4c   : > { %v3566_v43 = vmul.f32 %v3546_v60, %v3546_v60 }
 0xc4e   : > { %v3574_v46 = vsel %vm645_vm5, %v3566_v43, 0.0 }
 0xc4f   : > { %3575 = vadd.xlane.f32.xlu0 %v3574_v46 }
 0xc53   : > { %v3548_v21 = vpop.f32.mrf.mxu1 }
 0xc54   : > { %v3567_v19 = vmul.f32 %v3548_v21, %v3548_v21 }
 0xc56   : > { %v3577_v2 = vsel %vm645_vm5, %v3567_v19, 0.0 }
 0xc57   : > { %3578 = vadd.xlane.f32.xlu2 %v3577_v2 }
 0xc8a   : > { %v6263_v62 = vpop.f32.mrf.mxu1 }
 0xc8b   : > { %v3568_v6 = vmul.f32 %v6263_v62, %v6263_v62 }
 0xc8d   : > { %v3580_v51 = vsel %vm645_vm5, %v3568_v6, 0.0 }
 0xc8e   : > { %3581 = vadd.xlane.f32.xlu1 %v3580_v51 }
 0xc92   : > { %v6268_v33 = vpop.f32.mrf.mxu1 }
 0xc93   : > { %v3569_v38 = vmul.f32 %v6268_v33, %v6268_v33 }
 0xc95   : > { %v3583_v63 = vsel %vm645_vm5, %v3569_v38, 0.0 }
 0xc96   : > { %3584 = vadd.xlane.f32.xlu0 %v3583_v63 }
 0xca2   : > { %v6273_v18 = vpop.f32.mrf.mxu1 }
 0xca3   : > { %v3570_v41 = vmul.f32 %v6273_v18, %v6273_v18 }
 0xca5   : > { %v3586_v5 = vsel %vm645_vm5, %v3570_v41, 0.0 }
 0xca6   : > { %3587 = vadd.xlane.f32.xlu2 %v3586_v5 }
 0xcaa   : > { %v6278_v25 = vpop.f32.mrf.mxu1 }
 0xcab   : > { %v3571_v28 = vmul.f32 %v6278_v25, %v6278_v25 }
 0xcad   : > { %v3589_v15 = vsel %vm645_vm5, %v3571_v28, 0.0 }
 0xcae   : > { %3590 = vadd.xlane.f32.xlu1 %v3589_v15 }
 0xcb2   : > { %v6283_v52 = vpop.f32.mrf.mxu1 }
 0xcb3   : > { %v3572_v9 = vmul.f32 %v6283_v52, %v6283_v52 }
 0xcb5   : > { %v3592_v4 = vsel %vm645_vm5, %v3572_v9, 0.0 }
 0xcb6   : > { %3593 = vadd.xlane.f32.xlu0 %v3592_v4 }
 0xcba   : > { %v6288_v26 = vpop.f32.mrf.mxu1 }
 0xcbb   : > { %v3573_v61 = vmul.f32 %v6288_v26, %v6288_v26 }
 0xcbd   : > { %v3595_v10 = vsel %vm645_vm5, %v3573_v61, 0.0 }
 0xcbe   : > { %3596 = vadd.xlane.f32.xlu2 %v3595_v10 }
 0xcc2   : > { %v3576_v55 = vpop.xlane.xlu0 %3575 }
 0xcc3   : > { %v3598_v44 = vmul.f32 %v3576_v55, %v6530_v32 }
 0xcc5   : > { %v3606_v48 = vadd.f32 1e-05, %v3598_v44 }
 0xcc7   : > { %4300 = vrsqrt.f32 %v3606_v48  ;;  %vm3620_vm4 = vweird.f32 %v3606_v48 }
 0xcca   : > { %v3579_v57 = vpop.xlane.xlu2 %3578 }
 0xccb   : > { %v3599_v16 = vmul.f32 %v3579_v57, %v6530_v32 }
 0xccd   : > { %v4301_v58 = vpop.eup %4300  ;;  %v3607_v34 = vadd.f32 1e-05, %v3599_v16 }
 0xcce   : > { %v3615_v59 = vmul.f32 %v4301_v58, %v3606_v48  ;;  %vm3621_vm9 = vweird.f32 %v4301_v58 }
 0xccf   : > { %4302 = vrsqrt.f32 %v3607_v34  ;;  %vm3622_vm6 = vmor %vm3620_vm4, %vm3621_vm9  ;;  %vm3630_vm8 = vweird.f32 %v3607_v34 }
 0xcd0   : > { %v3616_v20 = vmul.f32 %v4301_v58, %v3615_v59 }
 0xcd2   : > { %v3617_v31 = vmul.f32 0.5, %v3616_v20 }
 0xcd4   : > { %v3618_v12 = vsub.f32 1.5, %v3617_v31 }
 0xcd5   : > { %v4303_v56 = vpop.eup %4302 }
 0xcd6   : > { %v3619_v13 = vmul.f32 %v4301_v58, %v3618_v12  ;;  %v3625_v37 = vmul.f32 %v4303_v56, %v3607_v34  ;;  %vm3631_vm7 = vweird.f32 %v4303_v56 }
 0xcd7   : > { %vm3632_vm10 = vmor %vm3630_vm8, %vm3631_vm7 }
 0xcd8   : > { %v3623_v14 = vsel %vm3622_vm6, %v4301_v58, %v3619_v13  ;;  %v3626_v53 = vmul.f32 %v4303_v56, %v3625_v37 }
 0xcd9   : > { %v3694_v23 = vmul.f32 %v3623_v14, %v3546_v60 }
 0xcda   : > { %v3627_v8 = vmul.f32 0.5, %v3626_v53 }
 0xcdb   : > { %v3705_v49 = vmul.f32 %v6298_v22, %v3694_v23 }
 0xcdc   : > { %v3628_v30 = vsub.f32 1.5, %v3627_v8 }
 0xcdd   : > { %3721 = vrot.lane.b32.xlu1 %v3705_v49, %s4347_s15 }
 0xcde   : > { %v3629_v7 = vmul.f32 %v4303_v56, %v3628_v30 }
 0xce0   : > { %v3633_v17 = vsel %vm3632_vm10, %v4303_v56, %v3629_v7 }
 0xce1   : > { %v3695_v40 = vmul.f32 %v3633_v17, %v3548_v21 }
 0xce3   : > { %v3706_v11 = vmul.f32 %v6298_v22, %v3695_v40 }
 0xce5   : > { %3723 = vrot.lane.b32.xlu0 %v3706_v11, %s4347_s15 }
 0xd01   : > { %v3582_v54 = vpop.xlane.xlu1 %3581 }
 0xd02   : > { %v3600_v29 = vmul.f32 %v3582_v54, %v6530_v32 }
 0xd04   : > { %v3608_v0 = vadd.f32 1e-05, %v3600_v29 }
 0xd06   : > { %4304 = vrsqrt.f32 %v3608_v0  ;;  %vm3640_vm12 = vweird.f32 %v3608_v0 }
 0xd09   : > { %v3585_v24 = vpop.xlane.xlu0 %3584 }
 0xd0a   : > { %v3601_v35 = vmul.f32 %v3585_v24, %v6530_v32 }
 0xd0c   : > { %v4305_v60 = vpop.eup %4304  ;;  %v3609_v43 = vadd.f32 1e-05, %v3601_v35 }
 0xd0d   : > { %v3635_v46 = vmul.f32 %v4305_v60, %v3608_v0  ;;  %vm3641_vm11 = vweird.f32 %v4305_v60 }
 0xd0e   : > { %4306 = vrsqrt.f32 %v3609_v43  ;;  %vm3642_vm0 = vmor %vm3640_vm12, %vm3641_vm11  ;;  %vm3650_vm13 = vweird.f32 %v3609_v43 }
 0xd0f   : > { %v3636_v19 = vmul.f32 %v4305_v60, %v3635_v46 }
 0xd11   : > { %v3637_v2 = vmul.f32 0.5, %v3636_v19 }
 0xd13   : > { %v3638_v6 = vsub.f32 1.5, %v3637_v2 }
 0xd14   : > { %v4307_v21 = vpop.eup %4306 }
 0xd15   : > { %v3639_v51 = vmul.f32 %v4305_v60, %v3638_v6  ;;  %v3645_v38 = vmul.f32 %v4307_v21, %v3609_v43  ;;  %vm3651_vm2 = vweird.f32 %v4307_v21 }
 0xd16   : > { %vm3652_vm14 = vmor %vm3650_vm13, %vm3651_vm2 }
 0xd17   : > { %v3643_v63 = vsel %vm3642_vm0, %v4305_v60, %v3639_v51  ;;  %v3646_v41 = vmul.f32 %v4307_v21, %v3645_v38 }
 0xd18   : > { %v3696_v5 = vmul.f32 %v3643_v63, %v6263_v62 }
 0xd19   : > { %v3647_v28 = vmul.f32 0.5, %v3646_v41  ;;  %v3588_v15 = vpop.xlane.xlu2 %3587 }
 0xd1a   : > { %v3602_v9 = vmul.f32 %v3588_v15, %v6530_v32  ;;  %v3707_v4 = vmul.f32 %v6298_v22, %v3696_v5 }
 0xd1b   : > { %v3648_v61 = vsub.f32 1.5, %v3647_v28 }
 0xd1c   : > { %v3610_v10 = vadd.f32 1e-05, %v3602_v9  ;;  %3725 = vrot.lane.b32.xlu2 %v3707_v4, %s4347_s15 }
 0xd1d   : > { %v3649_v55 = vmul.f32 %v4307_v21, %v3648_v61 }
 0xd1e   : > { %4308 = vrsqrt.f32 %v3610_v10  ;;  %vm3660_vm1 = vweird.f32 %v3610_v10 }
 0xd1f   : > { %v3653_v44 = vsel %vm3652_vm14, %v4307_v21, %v3649_v55 }
 0xd20   : > { %v3697_v48 = vmul.f32 %v3653_v44, %v6268_v33 }
 0xd21   : > { %v3591_v57 = vpop.xlane.xlu1 %3590 }
 0xd22   : > { %v3603_v62 = vmul.f32 %v3591_v57, %v6530_v32  ;;  %v3708_v16 = vmul.f32 %v6298_v22, %v3697_v48 }
 0xd24   : > { %v4309_v58 = vpop.eup %4308  ;;  %v3611_v34 = vadd.f32 1e-05, %v3603_v62  ;;  %3727 = vrot.lane.b32.xlu0 %v3708_v16, %s4347_s15 }
 0xd25   : > { %v3655_v59 = vmul.f32 %v4309_v58, %v3610_v10  ;;  %vm3661_vm15 = vweird.f32 %v4309_v58 }
 0xd26   : > { %4310 = vrsqrt.f32 %v3611_v34  ;;  %vm3662_vm3 = vmor %vm3660_vm1, %vm3661_vm15  ;;  %vm3670_vm4 = vweird.f32 %v3611_v34 }
 0xd27   : > { %v3656_v20 = vmul.f32 %v4309_v58, %v3655_v59 }
 0xd29   : > { %v3657_v31 = vmul.f32 0.5, %v3656_v20  ;;  %v3594_v12 = vpop.xlane.xlu0 %3593 }
 0xd2a   : > { %v3604_v56 = vmul.f32 %v3594_v12, %v6530_v32 }
 0xd2b   : > { %v3658_v13 = vsub.f32 1.5, %v3657_v31 }
 0xd2c   : > { %v4311_v37 = vpop.eup %4310  ;;  %v3612_v33 = vadd.f32 1e-05, %v3604_v56 }
 0xd2d   : > { %v3659_v14 = vmul.f32 %v4309_v58, %v3658_v13  ;;  %v3665_v53 = vmul.f32 %v4311_v37, %v3611_v34  ;;  %vm3671_vm9 = vweird.f32 %v4311_v37 }
 0xd2e   : > { %4312 = vrsqrt.f32 %v3612_v33  ;;  %vm3672_vm6 = vmor %vm3670_vm4, %vm3671_vm9  ;;  %vm3680_vm8 = vweird.f32 %v3612_v33 }
 0xd2f   : > { %v3663_v23 = vsel %vm3662_vm3, %v4309_v58, %v3659_v14  ;;  %v3666_v8 = vmul.f32 %v4311_v37, %v3665_v53 }
 0xd30   : > { %v3698_v49 = vmul.f32 %v3663_v23, %v6273_v18 }
 0xd31   : > { %v3667_v30 = vmul.f32 0.5, %v3666_v8  ;;  %v3597_v7 = vpop.xlane.xlu2 %3596 }
 0xd32   : > { %v3605_v17 = vmul.f32 %v3597_v7, %v6530_v32  ;;  %v3709_v40 = vmul.f32 %v6298_v22, %v3698_v49 }
 0xd33   : > { %v3668_v11 = vsub.f32 1.5, %v3667_v30 }
 0xd34   : > { %v4313_v54 = vpop.eup %4312  ;;  %v3613_v29 = vadd.f32 1e-05, %v3605_v17  ;;  %3729 = vrot.lane.b32.xlu1 %v3709_v40, %s4347_s15 }
 0xd35   : > { %v3669_v0 = vmul.f32 %v4311_v37, %v3668_v11  ;;  %v3675_v24 = vmul.f32 %v4313_v54, %v3612_v33  ;;  %vm3681_vm7 = vweird.f32 %v4313_v54 }
 0xd36   : > { %4314 = vrsqrt.f32 %v3613_v29  ;;  %vm3682_vm10 = vmor %vm3680_vm8, %vm3681_vm7  ;;  %vm3690_vm12 = vweird.f32 %v3613_v29 }
 0xd37   : > { %v3673_v35 = vsel %vm3672_vm6, %v4311_v37, %v3669_v0  ;;  %v3676_v60 = vmul.f32 %v4313_v54, %v3675_v24 }
 0xd38   : > { %v3699_v18 = vmul.f32 %v3673_v35, %v6278_v25 }
 0xd39   : > { %v3677_v43 = vmul.f32 0.5, %v3676_v60 }
 0xd3a   : > { %v3710_v32 = vmul.f32 %v6298_v22, %v3699_v18 }
 0xd3b   : > { %v3678_v46 = vsub.f32 1.5, %v3677_v43 }
 0xd3c   : > { %v4315_v19 = vpop.eup %4314  ;;  %3731 = vrot.lane.b32.xlu2 %v3710_v32, %s4347_s15 }
 0xd3d   : > { %v3679_v2 = vmul.f32 %v4313_v54, %v3678_v46  ;;  %v3685_v6 = vmul.f32 %v4315_v19, %v3613_v29  ;;  %vm3691_vm11 = vweird.f32 %v4315_v19 }
 0xd3e   : > { %vm3692_vm0 = vmor %vm3690_vm12, %vm3691_vm11 }
 0xd3f   : > { %v3683_v21 = vsel %vm3682_vm10, %v4313_v54, %v3679_v2  ;;  %v3686_v51 = vmul.f32 %v4315_v19, %v3685_v6 }
 0xd40   : > { %v3700_v38 = vmul.f32 %v3683_v21, %v6283_v52 }
 0xd41   : > { %v3687_v63 = vmul.f32 0.5, %v3686_v51 }
 0xd42   : > { %v3711_v41 = vmul.f32 %v6298_v22, %v3700_v38 }
 0xd43   : > { %v3688_v25 = vsub.f32 1.5, %v3687_v63 }
 0xd44   : > { %3733 = vrot.lane.b32.xlu0 %v3711_v41, %s4347_s15 }
 0xd45   : > { %v3689_v5 = vmul.f32 %v4315_v19, %v3688_v25 }
 0xd47   : > { %v3693_v28 = vsel %vm3692_vm0, %v4315_v19, %v3689_v5 }
 0xd48   : > { %v3701_v15 = vmul.f32 %v3693_v28, %v6288_v26 }
 0xd4a   : > { %v3712_v9 = vmul.f32 %v6298_v22, %v3701_v15 }
 0xd4c   : > { %3735 = vrot.lane.b32.xlu1 %v3712_v9, %s4347_s15 }
 0xd4f   : > { %v3722_v4 = vpop.permute.xlu1 %3721 }
 0xd50   : > { %v3745_v52 = vmul.f32 %v3722_v4, %v5994_v45 }
 0xd52   : > { %3761 = vrot.lane.b32.xlu2 %v3745_v52, %s4341_s16 }
 0xd57   : > { %v3724_v61 = vpop.permute.xlu0 %3723 }
 0xd58   : > { %v3746_v10 = vmul.f32 %v3724_v61, %v5994_v45 }
 0xd5a   : > { %3763 = vrot.lane.b32.xlu0 %v3746_v10, %s4341_s16 }
 0xd76   : > { %v3726_v55 = vpop.permute.xlu2 %3725 }
 0xd77   : > { %v3747_v44 = vmul.f32 %v3726_v55, %v5994_v45 }
 0xd79   : > { %3765 = vrot.lane.b32.xlu1 %v3747_v44, %s4341_s16 }
 0xd96   : > { %v3728_v26 = vpop.permute.xlu0 %3727  ;;  %v3732_v22 = vpop.permute.xlu2 %3731 }
 0xd97   : > { %v3748_v48 = vmul.f32 %v3728_v26, %v5994_v45  ;;  %v3750_v57 = vmul.f32 %v3732_v22, %v5994_v45 }
 0xd99   : > { %3771 = vrot.lane.b32.xlu1 %v3750_v57, %s4341_s16  ;;  %3767 = vrot.lane.b32.xlu2 %v3748_v48, %s4341_s16 }
 0xda6   : > { %v3730_v62 = vpop.permute.xlu1 %3729 }
 0xda7   : > { %v3749_v16 = vmul.f32 %v3730_v62, %v5994_v45 }
 0xda9   : > { %3769 = vrot.lane.b32.xlu0 %v3749_v16, %s4341_s16 }
 0xdac   : > { %v3762_v58 = vpop.permute.xlu2 %3761 }
 0xdad   : > { %v3785_v34 = vadd.f32 %v3762_v58, %v6016_v1 }
 0xdaf   : > { %3793 = vst.msk [vmem:[%s515_s22] sm:$0xff] %vm645_vm5, %v3785_v34 }
 0xdb6   : > { %v3734_v59 = vpop.permute.xlu0 %3733 }
 0xdb7   : > { %v3751_v20 = vmul.f32 %v3734_v59, %v5994_v45 }
 0xdb9   : > { %3773 = vrot.lane.b32.xlu2 %v3751_v20, %s4341_s16 }
 0xdbe   : > { %v3736_v31 = vpop.permute.xlu1 %3735 }
 0xdbf   : > { %v3752_v12 = vmul.f32 %v3736_v31, %v5994_v45 }
 0xdc1   : > { %3775 = vrot.lane.b32.xlu0 %v3752_v12, %s4341_s16 }
 0xdcc   : > { %v3764_v56 = vpop.permute.xlu0 %3763 }
 0xdcd   : > { %v3786_v13 = vadd.f32 %v3764_v56, %v6028_v50 }
 0xdcf   : > { %3794 = vst.msk [vmem:[%s515_s22 + $0x8] sm:$0xff] %vm645_vm5, %v3786_v13 }
 0xdeb   : > { %v3766_v37 = vpop.permute.xlu1 %3765 }
 0xdec   : > { %v3787_v1 = vadd.f32 %v3766_v37, %v6047_v27 }
 0xdee   : > { %3795 = vst.msk [vmem:[%s515_s22 + $0x10] sm:$0xff] %vm645_vm5, %v3787_v1 }
 0xdf3   : > { %v3768_v33 = vpop.permute.xlu2 %3767 }
 0xdf4   : > { %v3788_v14 = vadd.f32 %v3768_v33, %v6035_v39 }
 0xdf6   : > { %3796 = vst.msk [vmem:[%s515_s22 + $0x18] sm:$0xff] %vm645_vm5, %v3788_v14 }
 0xe0b   : > { %v3772_v53 = vpop.permute.xlu1 %3771 }
 0xe0c   : > { %v3790_v45 = vadd.f32 %v3772_v53, %v6053_v47 }
 0xe0e   : > { %3798 = vst.msk [vmem:[%s515_s22 + $0x28] sm:$0xff] %vm645_vm5, %v3790_v45 }
 0xe13   : > { %v3774_v23 = vpop.permute.xlu2 %3773 }
 0xe14   : > { %v3791_v50 = vadd.f32 %v3774_v23, %v6059_v42 }
 0xe16   : > { %3799 = vst.msk [vmem:[%s515_s22 + $0x30] sm:$0xff] %vm645_vm5, %v3791_v50 }
 0xe1b   : > { %v3770_v8 = vpop.permute.xlu0 %3769 }
 0xe1c   : > { %v3789_v27 = vadd.f32 %v3770_v8, %v6041_v3 }
 0xe1e   : > { %3797 = vst.msk [vmem:[%s515_s22 + $0x20] sm:$0xff] %vm645_vm5, %v3789_v27 }
 0xe33   : > { %v3776_v49 = vpop.permute.xlu0 %3775 }
 0xe34   : > { %v3792_v39 = vadd.f32 %v3776_v49, %v6066_v36 }
 0xe36   : > { %3800 = vst.msk [vmem:[%s515_s22 + $0x38] sm:$0xff] %vm645_vm5, %v3792_v39 }
 0xe37 PF: > { %s24_s29 = sadd.s32 1, %s4338_s29  }
 0xe38   : > { %p21_p4 = scmp.ge.s32.totalorder %s24_s29, 4  }
 0xe3a   :  { %23 = sbr.rel (!%p21_p4) target bundleno = 1 (0x1), region = 121 }

</bundles_post_ra>
